<compile_context>
chip_gen: v6e
topology: v6e:2x2x1
jax: 0.10.0
libtpu: 0.0.40
codegen_flags: <defaults>
</compile_context>

<pallas_src>
import jax
import jax.numpy as jnp
from jax.experimental import pallas as pl
from jax.experimental.pallas import tpu as pltpu


def _linear_kernel(x_ref, w_ref, b_ref, o_ref):
    # x_ref: (M, K) bf16 (constant block -> resident), w_ref: (K, TN) bf16 tile,
    # b_ref: (1, TN) f32 tile, o_ref: (M, TN) f32 tile.
    acc = jnp.dot(x_ref[...], w_ref[...], preferred_element_type=jnp.float32)
    o_ref[...] = (acc + b_ref[...]).astype(o_ref.dtype)


def linear_pallas(x, w, b, *, tn=2048):
    """x: (..., K) float32, w: (K, N), b: (N,) f32 -> (..., N) f32.

    Weight is streamed in bf16 (cast here if needed); x is multiplied in bf16
    with f32 accumulation, matching the bf16-operand / f32-accumulate recipe.
    """
    orig_shape = x.shape
    K = orig_shape[-1]
    N = w.shape[1]
    M = 1
    for d in orig_shape[:-1]:
        M *= d

    # Cast once in the wrapper: halves the activation stream, no per-step cast.
    x2 = x.reshape(M, K).astype(jnp.bfloat16)
    # Guarantee the bf16 weight stream (review concern: silent f32 weights).
    w_bf = w if w.dtype == jnp.bfloat16 else w.astype(jnp.bfloat16)
    b2 = b.reshape(1, N).astype(jnp.float32)

    assert N % tn == 0, "output dim must be divisible by the N tile"

    cost = pl.CostEstimate(
        flops=2 * M * K * N,
        bytes_accessed=(
            K * N * 2          # bf16 weight stream (dominant)
            + M * K * 2        # bf16 activations
            + M * N * 4        # f32 output writeback
            + N * 4            # f32 bias
        ),
        transcendentals=0,
    )

    out = pl.pallas_call(
        _linear_kernel,
        out_shape=jax.ShapeDtypeStruct((M, N), jnp.float32),
        grid_spec=pltpu.PrefetchScalarGridSpec(
            num_scalar_prefetch=0,
            grid=(N // tn,),
            in_specs=[
                # Full activations, constant block index -> stays resident.
                pl.BlockSpec((M, K), lambda j: (0, 0)),
                # Weight column tile, default double-buffering.
                pl.BlockSpec((K, tn), lambda j: (0, j)),
                # Bias tile.
                pl.BlockSpec((1, tn), lambda j: (0, j)),
            ],
            out_specs=pl.BlockSpec((M, tn), lambda j: (0, j)),
        ),
        compiler_params=pltpu.CompilerParams(
            dimension_semantics=("parallel",),
        ),
        cost_estimate=cost,
    )(x2, w_bf, b2)

    return out.reshape(*orig_shape[:-1], N)


class MPallas:
    """Equivalent of the PyTorch module M (Linear(1024, 4096, bias=True))."""

    def __init__(self, key, in_features=1024, out_features=4096):
        kw, kb = jax.random.split(key)
        # Deterministic init mimicking nn.Linear's uniform(-1/sqrt(fan_in), 1/sqrt(fan_in)).
        bound = 1.0 / (in_features ** 0.5)
        # PyTorch stores weight as (out, in); kernel uses (in, out) convention.
        # Weight kept in bf16: the kernel is weight-bandwidth-bound, so
        # halving the 16 MiB f32 stream is the dominant optimization.
        self.weight = jax.random.uniform(
            kw, (in_features, out_features), jnp.float32, minval=-bound, maxval=bound
        ).astype(jnp.bfloat16)
        self.bias = jax.random.uniform(
            kb, (out_features,), jnp.float32, minval=-bound, maxval=bound
        )

    def __call__(self, x413):
        return linear_pallas(x413, self.weight, self.bias)


if __name__ == "__main__":
    key = jax.random.PRNGKey(0)
    k_in, k_mod = jax.random.split(key)

    # Input shape matches the module: [1, 7, 7, 1024]
    x413 = jax.random.normal(k_in, (1, 7, 7, 1024), dtype=jnp.float32)

    m = MPallas(k_mod)
    x414 = m(x413)
    x414 = jax.block_until_ready(x414)

    # Reference matching the kernel's numerics (bf16 operands, f32 accumulate).
    x_bf = x413.astype(jnp.bfloat16).astype(jnp.float32)
    w_f32 = m.weight.astype(jnp.float32)
    ref = x_bf @ w_f32 + m.bias

    assert x414.shape == (1, 7, 7, 4096), x414.shape
    assert jnp.allclose(x414, ref, atol=5e-3, rtol=5e-3), float(
        jnp.max(jnp.abs(x414 - ref))
    )

    print("KERNEL_OK")
</pallas_src>

<mosaic_0001>
module attributes {stable_mosaic.version = 11 : i64} {
  func.func @_linear_kernel(%arg0: i32, %arg1: memref<49x1024xbf16, #tpu.memory_space<vmem>>, %arg2: memref<1024x2048xbf16, #tpu.memory_space<vmem>>, %arg3: memref<1x2048xf32, #tpu.memory_space<vmem>>, %arg4: memref<49x2048xf32, #tpu.memory_space<vmem>>) attributes {dimension_semantics = [#tpu.dimension_semantics<parallel>], iteration_bounds = array<i64: 2>, scalar_prefetch = 0 : i64, scratch_operands = 0 : i64, tpu.core_type = #tpu.core_type<tc>, window_params = [{pipeline_mode = #tpu.pipeline_mode<synchronous>, transform_indices = @transform_0, window_bounds = array<i64: 49, 1024>}, {transform_indices = @transform_1, window_bounds = array<i64: 1024, 2048>}, {transform_indices = @transform_2, window_bounds = array<i64: 1, 2048>}, {transform_indices = @transform_3, window_bounds = array<i64: 49, 2048>}]} {
    %c0 = arith.constant 0 : index
    %c0_0 = arith.constant 0 : index
    %0 = vector.load %arg1[%c0, %c0_0] : memref<49x1024xbf16, #tpu.memory_space<vmem>>, vector<49x1024xbf16>
    %c0_1 = arith.constant 0 : index
    %c0_2 = arith.constant 0 : index
    %1 = vector.load %arg2[%c0_1, %c0_2] : memref<1024x2048xbf16, #tpu.memory_space<vmem>>, vector<1024x2048xbf16>
    %cst = arith.constant dense<0.000000e+00> : vector<49x2048xf32>
    %2 = tpu.matmul %0, %1, %cst {dimension_numbers = #tpu.dot_dimension_numbers<[1], [0], [0], [1], [0, 0, 1, 1], [], []>} : vector<49x1024xbf16>, vector<1024x2048xbf16>, vector<49x2048xf32> -> vector<49x2048xf32>
    %c0_3 = arith.constant 0 : index
    %c0_4 = arith.constant 0 : index
    %3 = vector.load %arg3[%c0_3, %c0_4] : memref<1x2048xf32, #tpu.memory_space<vmem>>, vector<1x2048xf32>
    %4 = vector.broadcast %3 : vector<1x2048xf32> to vector<49x2048xf32>
    %5 = arith.addf %2, %4 : vector<49x2048xf32>
    %c0_5 = arith.constant 0 : index
    %c0_6 = arith.constant 0 : index
    %6 = vector.load %arg4[%c0_5, %c0_6] : memref<49x2048xf32, #tpu.memory_space<vmem>>, vector<49x2048xf32>
    tpu.vector_store %arg4[%c0_5, %c0_6], %5 {strides = array<i32>} : memref<49x2048xf32, #tpu.memory_space<vmem>>, vector<49x2048xf32>,
    return
  }
  func.func @transform_0(%arg0: i32) -> (i32, i32) {
    %c0_i32 = arith.constant 0 : i32
    %c0_i32_0 = arith.constant 0 : i32
    %c0_i32_1 = arith.constant 0 : i32
    return %c0_i32, %c0_i32_0 : i32, i32
  }
  func.func @transform_1(%arg0: i32) -> (i32, i32) {
    %c0_i32 = arith.constant 0 : i32
    %c0_i32_0 = arith.constant 0 : i32
    return %c0_i32, %arg0 : i32, i32
  }
  func.func @transform_2(%arg0: i32) -> (i32, i32) {
    %c0_i32 = arith.constant 0 : i32
    %c0_i32_0 = arith.constant 0 : i32
    return %c0_i32, %arg0 : i32, i32
  }
  func.func @transform_3(%arg0: i32) -> (i32, i32) {
    %c0_i32 = arith.constant 0 : i32
    %c0_i32_0 = arith.constant 0 : i32
    return %c0_i32, %arg0 : i32, i32
  }
}

</mosaic_0001>

<bundles_post_ra>
// kernel: tpu_custom_call.1
= control target key start
LH: loop header
LB: loop body
LE: loop exit
PB: predicated region body
PF: predicated region fallthrough
CT: control target
= control target key end

     0   :  { %8 = vsyncpa [#allocation3], 0  ;;  %s13471_s0 = inlined_call_operand.hbm [shape: bf16[49,1024], index: 0, kind: input, shape index: {}]   ;;  %s13472_s1 = inlined_call_operand.hbm [shape: bf16[1024,4096], index: 1, kind: input, shape index: {}]   ;;  %s13473_s2 = inlined_call_operand.hbm [shape: f32[1,4096], index: 2, kind: input, shape index: {}]   ;;  %s13474_s3 = inlined_call_operand.hbm [shape: f32[49,4096], index: 3, kind: output, shape index: {}]  }
   0x1   :  { %9 = vsyncpa [#allocation6], 0 }
   0x2   :  { %11 = vsyncpa [#allocation6 + $0x1], 0 }
   0x3   :  { %12 = vsyncpa [#allocation4], 0 }
   0x4   :  { %14 = vsyncpa [#allocation4 + $0x1], 0  ;;  %s10493_s12 = smov 0   ;;  %s10495_s13 = smov 0  }
   0x5   :  { %s10497_s14 = smov 0   ;;  %s10499_s15 = smov 0  }
   0x6 LB: > { %s10514_s16 = sadd.s32 1, %s10459_s15   ;;  %s48_s17 = sadd.s32 1, %s10455_s14  ;;  %s10459_s15 = sphi %s10499_s15, %s13706_s15   ;;  %s10455_s14 = sphi %s10497_s14, %s13705_s14   ;;  %s10451_s13 = sphi %s10495_s13, %s13704_s13   ;;  %s10447_s12 = sphi %s10493_s12, %s13703_s12  }
   0x7   : > { %s45_s18 = ssub.s32 %s10459_s15, %s10514_s16  ;;  %p55_p0 = scmp.ne.s32.totalorder %s10455_s14, %s10451_s13 }
   0x8   : > { %p46_p1 = scmp.eq.s32.totalorder %s45_s18, 0  ;;  %p56_p2 = scmp.eq.s32.totalorder %s10459_s15, 0 }
   0x9   : > { %p10253_p4 = scmp.lt.s32.totalorder %s10459_s15, 2  ;;  %s150_s20 = sand.u32 1, %s10459_s15  }
   0xa   : > { %s10525_s19 = scalar_select %p46_p1, %s10455_s14, %s48_s17  }
   0xb   : > { %p57_p5 = por %p56_p2, %p55_p0  ;;  %s152_s21 = sand.u32 1, %s10455_s14  }
   0xc   : > { %s9153_s22 = sshll.u32 %s152_s21, 13  ;;  %s10223_s23 = sshll.u32 %s10459_s15, 10 }
   0xd   : > { %s10538_s26 = scalar_lea.hbm %s13472_s1, %s10223_s23  ;;  %s154_s27 = scalar_lea.vmem [#allocation5], %s9153_s22 }
   0xe   : > { %s161_s28 = sshll.u32 %s154_s27, 4  ;;  %p10540_p6 = pnand %p10253_p4, %p57_p5  ;;  %s10544_s28 = int_to_ptr.vmem [resolvable:$true] %s161_s28 }
   0xf   : > { %s10546_s30 = scalar_lea.sflag [#allocation6], %s150_s20  ;;  %s10309_s4 = scalar_lea.hbm %s10538_s26, 131072 }
  0x10   : > { %p10310_p7 = scmp.ne.s32.totalorder %s10538_s26, %s10309_s4  ;;  %p13476_p8 = pneg %p10540_p6 }
  0x11   : > { %s10314_s7 = scalar_lea.hbm %s13472_s1, 262144  ;;  %p10315_p11 = scmp.lt.s32.totalorder %s10538_s26, %s13472_s1 }
  0x12   : > { %p10312_p9 = pnand %p13476_p8, %p10310_p7  ;;  %p10316_p12 = scmp.lt.s32.totalorder %s10314_s7, %s10309_s4 }
  0x14   : > { %p10313_p10 = pneg %p10312_p9  ;;  %p10317_p13 = por %p10316_p12, %p10315_p11 }
  0x16   : > { %p10318_p1 = pnand %p10317_p13, %p10313_p10 }
  0x18   : > { %10321 = shalt.err (!%p10318_p1)
}
  0x19   : > { %s10322_s10 = scalar_lea.vmem %s10544_s28, 131072  ;;  %s10461_s11 = smov [#allocation5]  }
  0x1a   : > { %p10323_p2 = scmp.ne.s32.totalorder %s10544_s28, %s10322_s10  ;;  %s10327_s17 = sshll.u32 %s10461_s11, 4  ;;  %s10328_s17 = int_to_ptr.vmem [resolvable:$false] %s10327_s17 }
  0x1b   : > { %s10329_s18 = scalar_lea.vmem %s10328_s17, 262144  ;;  %p10330_p7 = scmp.lt.s32.totalorder %s10544_s28, %s10328_s17 }
  0x1c   : > { %p10325_p4 = pnand %p10323_p2, %p13476_p8  ;;  %p10331_p9 = scmp.lt.s32.totalorder %s10329_s18, %s10322_s10 }
  0x1e   : > { %p10326_p5 = pneg %p10325_p4  ;;  %p10332_p3 = por %p10331_p9, %p10330_p7 }
  0x20   : > { %p10333_p11 = pnand %p10332_p3, %p10326_p5 }
  0x22   : > { %10336 = shalt.err (!%p10333_p11)
}
  0x23   : > { %s10462_s20 = smov 2048   ;;  %s10463_s22 = smov 1024  }
  0x24   : > { %s10464_s23 = smov 64   ;;  %s10574_s24 = sadd.s32 4294967295, %s10459_s15  }
  0x25   : > { %10244 = dma.hbm_to_vmem [thread:$0]  (!%p10540_p6), %s10538_s26, 131072, %s10544_s28, %s10546_s30, %s10462_s20, %s10463_s22, %s10464_s23  }
  0x26   : > { %s9149_s25 = sadd.s32 4294967294, %s10459_s15   ;;  %p61_p3 = scmp.ne.s32.totalorder %s10451_s13, %s10447_s12 }
  0x27   : > { %p13475_p10 = scmp.eq.s32.totalorder %s10574_s24, 0  ;;  %p111_p12 = scmp.eq.s32.totalorder %s10574_s24, 1 }
  0x28   : > { %p117_p13 = scmp.eq.s32.totalorder %s9149_s25, 1  ;;  %p9150_p1 = scmp.ge.s32.totalorder %s10459_s15, 1 }
  0x29   : > { %p10584_p2 = por %p13475_p10, %p61_p3  ;;  %p10591_p4 = por %p111_p12, %p55_p0 }
  0x2a   : > { %p10595_p5 = por %p117_p13, %p61_p3  ;;  %p124_p7 = scmp.lt.s32.totalorder %s10459_s15, 3 }
  0x2b   : > { %s13529_s27 = scalar_select %p10584_p2, 1, 0 }
  0x2c   : > { %s13530_s26 = scalar_select %p10591_p4, 1, 0 }
  0x2d   : > { %s13531_s28 = scalar_select %p10595_p5, 1, 0 }
  0x2e   : > { %p10600_p9 = pnand %p9150_p1, %p124_p7  ;;  %s10465_s5 = smov [#allocation2]  }
  0x2f   : > { %s136_s6 = sshll.u32 %s10465_s5, 4  ;;  %s9156_s7 = sshll.u32 %s152_s21, 4  ;;  %s137_s6 = int_to_ptr.vmem [resolvable:$true] %s136_s6 }
  0x30   : > { %p10237_p11 = pneg %p10600_p9  ;;  %s10224_s8 = sshll.u32 %s10459_s15, 8 }
  0x31   : > { %s10618_s17 = scalar_lea.hbm %s13473_s2, %s10224_s8  ;;  %s175_s18 = scalar_lea.vmem [#allocation7], %s9156_s7 }
  0x32   : > { %p10611_p0 = pnand %p10237_p11, %p13475_p10  ;;  %s183_s20 = sshll.u32 %s175_s18, 4  ;;  %s10620_s20 = int_to_ptr.vmem [resolvable:$true] %s183_s20 }
  0x33   : > { %s10348_s22 = scalar_lea.vmem %s137_s6, 3584  ;;  %p10356_p7 = scmp.lt.s32.totalorder %s137_s6, %s137_s6 }
  0x34   : > { %p10339_p3 = pneg %p10611_p0  ;;  %p10349_p12 = scmp.ne.s32.totalorder %s137_s6, %s10348_s22 }
  0x35   : > { %p10357_p11 = scmp.lt.s32.totalorder %s10348_s22, %s10348_s22 }
  0x36   : > { %p10351_p13 = pnand %p10349_p12, %p10339_p3 }
  0x37   : > { %p10358_p10 = por %p10357_p11, %p10356_p7 }
  0x38   : > { %p10352_p1 = pneg %p10351_p13 }
  0x3a   : > { %p10359_p8 = pnand %p10358_p10, %p10352_p1 }
  0x3c   : > { %10362 = shalt.err (!%p10359_p8)
}
  0x3d   : > { %s10466_s21 = smov 512   ;;  %s10467_s23 = smov 32  }
  0x3e   : > { %10240 = dma.hbm_to_vmem [thread:$0]  (!%p10611_p0), %s13471_s0, 3584, %s137_s6, [#allocation3], %s10466_s21, %s10466_s21, %s10467_s23  }
  0x3f   : > { %s10363_s7 = scalar_lea.hbm %s10618_s17, 256  ;;  %p13534_p12 = pneg %p10540_p6 }
  0x40   : > { %p10364_p3 = scmp.ne.s32.totalorder %s10618_s17, %s10363_s7  ;;  %s10368_s11 = scalar_lea.hbm %s13473_s2, 512 }
  0x41   : > { %p10369_p8 = scmp.lt.s32.totalorder %s10618_s17, %s13473_s2  ;;  %p10370_p10 = scmp.lt.s32.totalorder %s10368_s11, %s10363_s7 }
  0x42   : > { %p10366_p13 = pnand %p10364_p3, %p13534_p12 }
  0x43   : > { %p10371_p1 = por %p10370_p10, %p10369_p8 }
  0x44   : > { %p10367_p7 = pneg %p10366_p13 }
  0x46   : > { %p10372_p11 = pnand %p10371_p1, %p10367_p7 }
  0x48   : > { %10375 = shalt.err (!%p10372_p11)
}
  0x49   : > { %s10376_s6 = scalar_lea.vmem %s10620_s20, 256  ;;  %p13535_p3 = pmov %p13534_p12 }
  0x4a   : > { %p10377_p0 = scmp.ne.s32.totalorder %s10620_s20, %s10376_s6  ;;  %s10468_s9 = smov [#allocation7]  }
  0x4b   : > { %s10381_s21 = sshll.u32 %s10468_s9, 4  ;;  %s10382_s21 = int_to_ptr.vmem [resolvable:$false] %s10381_s21 }
  0x4c   : > { %p10379_p12 = pnand %p10377_p0, %p13535_p3  ;;  %s10383_s23 = scalar_lea.vmem %s10382_s21, 512 }
  0x4d   : > { %p10384_p5 = scmp.lt.s32.totalorder %s10620_s20, %s10382_s21  ;;  %p10385_p4 = scmp.lt.s32.totalorder %s10383_s23, %s10376_s6 }
  0x4e   : > { %p10380_p13 = pneg %p10379_p12 }
  0x4f   : > { %p10386_p2 = por %p10385_p4, %p10384_p5 }
  0x51   : > { %p10387_p8 = pnand %p10386_p2, %p10380_p13 }
  0x53   : > { %10390 = shalt.err (!%p10387_p8)
}
  0x54   : > { %10247 = dma.hbm_to_vmem [thread:$0]  (!%p10540_p6), %s10618_s17, 256, %s10620_s20, %s10546_s30  }
  0x55   : > { %192 = sbr.rel (%p10600_p9) target bundleno = 1372 (0x55c), region = 32 }
  0x5a   : > { %p13536_p7 = scmp.eq.s32.totalorder %s10574_s24, 0 }
  0x5c   : > { %10434 = dma.done.wait (%p13536_p7), [#allocation3], 3584   ;;  %p13537_p10 = pmov %p13536_p7 }
  0x5d   : > { %s198_s25 = sand.u32 1, %s10574_s24   ;;  %s10660_s5 = sand.u32 1, %s10451_s13  }
  0x5e   : > { %10436 = vsyncadd (%p13537_p10), [#allocation3], 4294963712  ;;  %s9161_s29 = sshll.u32 %s10660_s5, 13  ;;  %s199_s7 = scalar_lea.sflag [#allocation6], %s198_s25 }
  0x5f   : > { %s10663_s8 = scalar_lea.vmem [#allocation5], %s9161_s29  ;;  %p13538_p6 = scmp.ne.s32.totalorder %s13529_s27, 0 }
  0x61   : > { %10438 = dma.done.wait (%p13538_p6), %s199_s7, 131328  }
  0x62   : > { %10440 = vsyncadd (%p13538_p6), %s199_s7, 4294835968  ;;  %v382_v0 = vld [vmem:[%s10663_s8 + $0x380] sm:$0xff]  ;;  %v10707_v59 = vld [vmem:[#allocation2 + $0x8] sm:$0xff]  ;;  %s9162_s30 = sshll.u32 %s10660_s5, 4  ;;  %s10226_s4 = smul.u32 896, %s10660_s5 }
  0x63   : > { %v390_v1 = vld [vmem:[%s10663_s8 + $0x3c0] sm:$0xff]  ;;  %v10709_v60 = vld [vmem:[#allocation2 + $0x28] sm:$0xff]  ;;  %s11209_s27 = scalar_lea.vmem [#allocation7], %s9162_s30  ;;  %s10225_s20 = sshll.u32 %s10574_s24, 11 }
  0x64   : > { %v638_v2 = vld [vmem:[%s10663_s8 + $0xb80] sm:$0xff]  ;;  %v9308_v3 = vcombine.high %v382_v0, %v390_v1  ;;  %v9307_v5 = vcombine.low %v382_v0, %v390_v1  ;;  %v10715_v63 = vcombine.high %v10707_v59, %v10709_v60  ;;  %s11282_s17 = scalar_lea.vmem [#allocation8], %s10226_s4  ;;  %s13424_s22 = scalar_lea.hbm %s13474_s3, %s10225_s20 }
  0x65   : > { %v646_v4 = vld [vmem:[%s10663_s8 + $0xbc0] sm:$0xff]  ;;  %s9044_s10 = sshll.u32 %s11282_s17, 4  ;;  %s9031_s24 = scalar_lea.sflag [#allocation4], %s10660_s5  ;;  %s13426_s10 = int_to_ptr.vmem [resolvable:$true] %s9044_s10 }
  0x66   : > { %v366_v6 = vld [vmem:[%s10663_s8 + $0x300] sm:$0xff]  ;;  %v9564_v8 = vcombine.high %v638_v2, %v646_v4  ;;  %v9563_v9 = vcombine.low %v638_v2, %v646_v4  ;;  %6646 = vmatprep.subr.bf16.mxu0 %v9308_v3  ;;  %13540 = vst [vmem:[#allocation13_spill] sm:$0xff] %v10715_v63  ;;  %6749 = vmatprep.mubr.bf16.mxu1 %v10715_v63  ;;  %s10391_s6 = scalar_lea.vmem %s13426_s10, 14336  ;;  %p13700_p4 = scmp.ne.s32.totalorder %s13530_s26, 0 }
  0x67   : > { %v374_v7 = vld [vmem:[%s10663_s8 + $0x340] sm:$0xff]  ;;  %6647 = vmatpush1.bf16.msra.mxu0 %v9307_v5  ;;  %p10392_p2 = scmp.ne.s32.totalorder %s13426_s10, %s10391_s6  ;;  %s10469_s9 = smov [#allocation8]  }
  0x68   : > { %v9292_v10 = vcombine.high %v366_v6, %v374_v7  ;;  %v622_v11 = vld [vmem:[%s10663_s8 + $0xb00] sm:$0xff]  ;;  %6717 = vmatprep.subr.bf16.mxu1 %v9564_v8  ;;  %v9291_v18 = vcombine.low %v366_v6, %v374_v7  ;;  %s10395_s21 = sshll.u32 %s10469_s9, 4  ;;  %s10396_s21 = int_to_ptr.vmem [resolvable:$false] %s10395_s21 }
  0x69   : > { %v630_v12 = vld [vmem:[%s10663_s8 + $0xb40] sm:$0xff]  ;;  %6718 = vmatpush1.bf16.msra.mxu1 %v9563_v9  ;;  %p10393_p5 = pnand %p10392_p2, %p13700_p4  ;;  %s10397_s23 = scalar_lea.vmem %s10396_s21, 28672 }
  0x6a   : > { %v350_v13 = vld [vmem:[%s10663_s8 + $0x280] sm:$0xff]  ;;  %v9548_v14 = vcombine.high %v622_v11, %v630_v12  ;;  %6648 = vmatprep.subr.bf16.mxu0 %v9292_v10  ;;  %v9547_v19 = vcombine.low %v622_v11, %v630_v12  ;;  %p10398_p1 = scmp.lt.s32.totalorder %s13426_s10, %s10396_s21  ;;  %p10399_p11 = scmp.lt.s32.totalorder %s10397_s23, %s10391_s6 }
  0x6b   : > { %v358_v15 = vld [vmem:[%s10663_s8 + $0x2c0] sm:$0xff]  ;;  %6649 = vmatpush1.bf16.msra.mxu0 %v9291_v18  ;;  %p10394_p9 = pneg %p10393_p5 }
  0x6c   : > { %v606_v16 = vld [vmem:[%s10663_s8 + $0xa80] sm:$0xff]  ;;  %v9276_v20 = vcombine.high %v350_v13, %v358_v15  ;;  %6719 = vmatprep.subr.bf16.mxu1 %v9548_v14  ;;  %v9275_v26 = vcombine.low %v350_v13, %v358_v15  ;;  %p10400_p0 = por %p10399_p11, %p10398_p1 }
  0x6d   : > { %v614_v17 = vld [vmem:[%s10663_s8 + $0xac0] sm:$0xff]  ;;  %6720 = vmatpush1.bf16.msra.mxu1 %v9547_v19 }
  0x6e   : > { %v9532_v21 = vcombine.high %v606_v16, %v614_v17  ;;  %v334_v22 = vld [vmem:[%s10663_s8 + $0x200] sm:$0xff]  ;;  %6650 = vmatprep.subr.bf16.mxu0 %v9276_v20  ;;  %v9531_v27 = vcombine.low %v606_v16, %v614_v17  ;;  %p10401_p3 = pnand %p10400_p0, %p10394_p9 }
  0x6f   : > { %v342_v23 = vld [vmem:[%s10663_s8 + $0x240] sm:$0xff]  ;;  %6651 = vmatpush1.bf16.msra.mxu0 %v9275_v26 }
  0x70   : > { %v590_v24 = vld [vmem:[%s10663_s8 + $0xa00] sm:$0xff]  ;;  %v9260_v28 = vcombine.high %v334_v22, %v342_v23  ;;  %6721 = vmatprep.subr.bf16.mxu1 %v9532_v21  ;;  %v9259_v34 = vcombine.low %v334_v22, %v342_v23 }
  0x71   : > { %v598_v25 = vld [vmem:[%s10663_s8 + $0xa40] sm:$0xff]  ;;  %6722 = vmatpush1.bf16.msra.mxu1 %v9531_v27 }
  0x72   : > { %v9516_v29 = vcombine.high %v590_v24, %v598_v25  ;;  %v318_v30 = vld [vmem:[%s10663_s8 + $0x180] sm:$0xff]  ;;  %6652 = vmatprep.subr.bf16.mxu0 %v9260_v28  ;;  %v9515_v35 = vcombine.low %v590_v24, %v598_v25 }
  0x73   : > { %v326_v31 = vld [vmem:[%s10663_s8 + $0x1c0] sm:$0xff]  ;;  %6653 = vmatpush1.bf16.msra.mxu0 %v9259_v34 }
  0x74   : > { %v574_v32 = vld [vmem:[%s10663_s8 + $0x980] sm:$0xff]  ;;  %v9244_v36 = vcombine.high %v318_v30, %v326_v31  ;;  %6723 = vmatprep.subr.bf16.mxu1 %v9516_v29  ;;  %v9243_v42 = vcombine.low %v318_v30, %v326_v31 }
  0x75   : > { %v582_v33 = vld [vmem:[%s10663_s8 + $0x9c0] sm:$0xff]  ;;  %6724 = vmatpush1.bf16.msra.mxu1 %v9515_v35 }
  0x76   : > { %v9500_v37 = vcombine.high %v574_v32, %v582_v33  ;;  %v302_v38 = vld [vmem:[%s10663_s8 + $0x100] sm:$0xff]  ;;  %6654 = vmatprep.subr.bf16.mxu0 %v9244_v36  ;;  %v9499_v43 = vcombine.low %v574_v32, %v582_v33 }
  0x77   : > { %v310_v39 = vld [vmem:[%s10663_s8 + $0x140] sm:$0xff]  ;;  %6655 = vmatpush1.bf16.msra.mxu0 %v9243_v42 }
  0x78   : > { %v558_v40 = vld [vmem:[%s10663_s8 + $0x900] sm:$0xff]  ;;  %v9228_v44 = vcombine.high %v302_v38, %v310_v39  ;;  %6725 = vmatprep.subr.bf16.mxu1 %v9500_v37  ;;  %v9227_v50 = vcombine.low %v302_v38, %v310_v39 }
  0x79   : > { %v566_v41 = vld [vmem:[%s10663_s8 + $0x940] sm:$0xff]  ;;  %6726 = vmatpush1.bf16.msra.mxu1 %v9499_v43 }
  0x7a   : > { %v9484_v45 = vcombine.high %v558_v40, %v566_v41  ;;  %v286_v46 = vld [vmem:[%s10663_s8 + $0x80] sm:$0xff]  ;;  %6656 = vmatprep.subr.bf16.mxu0 %v9228_v44  ;;  %v9483_v51 = vcombine.low %v558_v40, %v566_v41 }
  0x7b   : > { %v294_v47 = vld [vmem:[%s10663_s8 + $0xc0] sm:$0xff]  ;;  %6657 = vmatpush1.bf16.msra.mxu0 %v9227_v50 }
  0x7c   : > { %v542_v48 = vld [vmem:[%s10663_s8 + $0x880] sm:$0xff]  ;;  %v9212_v52 = vcombine.high %v286_v46, %v294_v47  ;;  %6727 = vmatprep.subr.bf16.mxu1 %v9484_v45  ;;  %v9211_v0 = vcombine.low %v286_v46, %v294_v47 }
  0x7d   : > { %v550_v49 = vld [vmem:[%s10663_s8 + $0x8c0] sm:$0xff]  ;;  %6728 = vmatpush1.bf16.msra.mxu1 %v9483_v51 }
  0x7e   : > { %v270_v53 = vld [vmem:[%s10663_s8] sm:$0xff]  ;;  %v9468_v56 = vcombine.high %v542_v48, %v550_v49  ;;  %6658 = vmatprep.subr.bf16.mxu0 %v9212_v52  ;;  %v9467_v1 = vcombine.low %v542_v48, %v550_v49 }
  0x7f   : > { %v10698_v54 = vld [vmem:[#allocation2] sm:$0xff]  ;;  %6659 = vmatpush1.bf16.msra.mxu0 %v9211_v0 }
  0x80   : > { %v10700_v55 = vld [vmem:[#allocation2 + $0x20] sm:$0xff]  ;;  %6729 = vmatprep.subr.bf16.mxu1 %v9468_v56 }
  0x81   : > { %v278_v57 = vld [vmem:[%s10663_s8 + $0x40] sm:$0xff]  ;;  %v10705_v58 = vcombine.high %v10698_v54, %v10700_v55  ;;  %6730 = vmatpush1.bf16.msra.mxu1 %v9467_v1 }
  0x82   : > { %v526_v61 = vld [vmem:[%s10663_s8 + $0x800] sm:$0xff]  ;;  %v9196_v2 = vcombine.high %v270_v53, %v278_v57  ;;  %v9195_v8 = vcombine.low %v270_v53, %v278_v57 }
  0x83   : > { %13539 = vst [vmem:[#allocation12_spill] sm:$0xff] %v10705_v58  ;;  %v534_v62 = vld [vmem:[%s10663_s8 + $0x840] sm:$0xff]  ;;  %6678 = vmatprep.mubr.bf16.mxu0 %v10705_v58 }
  0x84   : > { %v9452_v3 = vcombine.high %v526_v61, %v534_v62  ;;  %v510_v4 = vld [vmem:[%s10663_s8 + $0x780] sm:$0xff]  ;;  %6660 = vmatprep.subr.bf16.mxu0 %v9196_v2  ;;  %v9451_v9 = vcombine.low %v526_v61, %v534_v62 }
  0x85   : > { %v518_v5 = vld [vmem:[%s10663_s8 + $0x7c0] sm:$0xff]  ;;  %6661 = vmatpush1.bf16.msra.mxu0 %v9195_v8 }
  0x86   : > { %v766_v6 = vld [vmem:[%s10663_s8 + $0xf80] sm:$0xff]  ;;  %v9436_v10 = vcombine.high %v510_v4, %v518_v5  ;;  %6731 = vmatprep.subr.bf16.mxu1 %v9452_v3  ;;  %v9435_v16 = vcombine.low %v510_v4, %v518_v5 }
  0x87   : > { %v774_v7 = vld [vmem:[%s10663_s8 + $0xfc0] sm:$0xff]  ;;  %6732 = vmatpush1.bf16.msra.mxu1 %v9451_v9 }
  0x88   : > { %v9692_v11 = vcombine.high %v766_v6, %v774_v7  ;;  %v494_v12 = vld [vmem:[%s10663_s8 + $0x700] sm:$0xff]  ;;  %6662 = vmatprep.subr.bf16.mxu0 %v9436_v10  ;;  %v9691_v17 = vcombine.low %v766_v6, %v774_v7 }
  0x89   : > { %v502_v13 = vld [vmem:[%s10663_s8 + $0x740] sm:$0xff]  ;;  %6663 = vmatpush2.bf16.msra.mxu0 %v9435_v16 }
  0x8a   : > { %v750_v14 = vld [vmem:[%s10663_s8 + $0xf00] sm:$0xff]  ;;  %v9420_v18 = vcombine.high %v494_v12, %v502_v13  ;;  %6733 = vmatprep.subr.bf16.mxu1 %v9692_v11  ;;  %v9419_v24 = vcombine.low %v494_v12, %v502_v13 }
  0x8b   : > { %v758_v15 = vld [vmem:[%s10663_s8 + $0xf40] sm:$0xff]  ;;  %6734 = vmatpush2.bf16.msra.mxu1 %v9691_v17 }
  0x8c   : > { %v9676_v19 = vcombine.high %v750_v14, %v758_v15  ;;  %v478_v20 = vld [vmem:[%s10663_s8 + $0x680] sm:$0xff]  ;;  %6664 = vmatprep.subr.bf16.mxu0 %v9420_v18  ;;  %v9675_v25 = vcombine.low %v750_v14, %v758_v15 }
  0x8d   : > { %v486_v21 = vld [vmem:[%s10663_s8 + $0x6c0] sm:$0xff]  ;;  %6665 = vmatpush2.bf16.msra.mxu0 %v9419_v24 }
  0x8e   : > { %v734_v22 = vld [vmem:[%s10663_s8 + $0xe80] sm:$0xff]  ;;  %v9404_v26 = vcombine.high %v478_v20, %v486_v21  ;;  %6735 = vmatprep.subr.bf16.mxu1 %v9676_v19  ;;  %v9403_v32 = vcombine.low %v478_v20, %v486_v21  ;;  %v10760_v21 = vcombine.low %v10698_v54, %v10700_v55 }
  0x8f   : > { %v742_v23 = vld [vmem:[%s10663_s8 + $0xec0] sm:$0xff]  ;;  %6736 = vmatpush2.bf16.msra.mxu1 %v9675_v25  ;;  %v10765_v25 = vcombine.low %v10707_v59, %v10709_v60 }
  0x90   : > { %v9660_v27 = vcombine.high %v734_v22, %v742_v23  ;;  %v462_v28 = vld [vmem:[%s10663_s8 + $0x600] sm:$0xff]  ;;  %6666 = vmatprep.subr.bf16.mxu0 %v9404_v26  ;;  %v9659_v33 = vcombine.low %v734_v22, %v742_v23 }
  0x91   : > { %v470_v29 = vld [vmem:[%s10663_s8 + $0x640] sm:$0xff]  ;;  %6667 = vmatpush2.bf16.msra.mxu0 %v9403_v32 }
  0x92   : > { %v718_v30 = vld [vmem:[%s10663_s8 + $0xe00] sm:$0xff]  ;;  %v9388_v34 = vcombine.high %v462_v28, %v470_v29  ;;  %6737 = vmatprep.subr.bf16.mxu1 %v9660_v27  ;;  %v9387_v40 = vcombine.low %v462_v28, %v470_v29  ;;  %v251_v27 = vld [vmem:[#allocation2 + $0x48] sm:$0xff] }
  0x93   : > { %v726_v31 = vld [vmem:[%s10663_s8 + $0xe40] sm:$0xff]  ;;  %6738 = vmatpush2.bf16.msra.mxu1 %v9659_v33  ;;  %v255_v28 = vld [vmem:[#allocation2 + $0x68] sm:$0xff] }
  0x94   : > { %v9644_v35 = vcombine.high %v718_v30, %v726_v31  ;;  %v446_v36 = vld [vmem:[%s10663_s8 + $0x580] sm:$0xff]  ;;  %6668 = vmatprep.subr.bf16.mxu0 %v9388_v34  ;;  %v9643_v41 = vcombine.low %v718_v30, %v726_v31  ;;  %v10774_v33 = vcombine.high %v251_v27, %v255_v28 }
  0x95   : > { %v454_v37 = vld [vmem:[%s10663_s8 + $0x5c0] sm:$0xff]  ;;  %6669 = vmatpush2.bf16.msra.mxu0 %v9387_v40 }
  0x96   : > { %v702_v38 = vld [vmem:[%s10663_s8 + $0xd80] sm:$0xff]  ;;  %v9372_v42 = vcombine.high %v446_v36, %v454_v37  ;;  %6739 = vmatprep.subr.bf16.mxu1 %v9644_v35  ;;  %v9371_v48 = vcombine.low %v446_v36, %v454_v37 }
  0x97   : > { %v710_v39 = vld [vmem:[%s10663_s8 + $0xdc0] sm:$0xff]  ;;  %6740 = vmatpush2.bf16.msra.mxu1 %v9643_v41 }
  0x98   : > { %v9628_v43 = vcombine.high %v702_v38, %v710_v39  ;;  %v430_v44 = vld [vmem:[%s10663_s8 + $0x500] sm:$0xff]  ;;  %6670 = vmatprep.subr.bf16.mxu0 %v9372_v42  ;;  %v9627_v49 = vcombine.low %v702_v38, %v710_v39 }
  0x99   : > { %v438_v45 = vld [vmem:[%s10663_s8 + $0x540] sm:$0xff]  ;;  %6671 = vmatpush2.bf16.msra.mxu0 %v9371_v48  ;;  %v263_v48 = vld [vmem:[#allocation2 + $0xa8] sm:$0xff] }
  0x9a   : > { %v686_v46 = vld [vmem:[%s10663_s8 + $0xd00] sm:$0xff]  ;;  %v9356_v50 = vcombine.high %v430_v44, %v438_v45  ;;  %6741 = vmatprep.subr.bf16.mxu1 %v9628_v43  ;;  %v9355_v61 = vcombine.low %v430_v44, %v438_v45 }
  0x9b   : > { %v694_v47 = vld [vmem:[%s10663_s8 + $0xd40] sm:$0xff]  ;;  %6742 = vmatpush2.bf16.msra.mxu1 %v9627_v49 }
  0x9c   : > { %v9612_v51 = vcombine.high %v686_v46, %v694_v47  ;;  %v414_v52 = vld [vmem:[%s10663_s8 + $0x480] sm:$0xff]  ;;  %6672 = vmatprep.subr.bf16.mxu0 %v9356_v50  ;;  %v9611_v62 = vcombine.low %v686_v46, %v694_v47  ;;  %v10785_v46 = vcombine.low %v251_v27, %v255_v28  ;;  %v259_v47 = vld [vmem:[#allocation2 + $0x88] sm:$0xff] }
  0x9d   : > { %v422_v53 = vld [vmem:[%s10663_s8 + $0x4c0] sm:$0xff]  ;;  %6673 = vmatpush2.bf16.msra.mxu0 %v9355_v61 }
  0x9e   : > { %v670_v56 = vld [vmem:[%s10663_s8 + $0xc80] sm:$0xff]  ;;  %v9340_v0 = vcombine.high %v414_v52, %v422_v53  ;;  %6743 = vmatprep.subr.bf16.mxu1 %v9612_v51  ;;  %v9339_v6 = vcombine.low %v414_v52, %v422_v53 }
  0x9f   : > { %v678_v57 = vld [vmem:[%s10663_s8 + $0xcc0] sm:$0xff]  ;;  %6744 = vmatpush2.bf16.msra.mxu1 %v9611_v62  ;;  %v10794_v62 = vcombine.high %v259_v47, %v263_v48 }
  0xa0   : > { %v9596_v1 = vcombine.high %v670_v56, %v678_v57  ;;  %v398_v2 = vld [vmem:[%s10663_s8 + $0x400] sm:$0xff]  ;;  %6674 = vmatprep.subr.bf16.mxu0 %v9340_v0  ;;  %v9595_v7 = vcombine.low %v670_v56, %v678_v57 }
  0xa1   : > { %v406_v3 = vld [vmem:[%s10663_s8 + $0x440] sm:$0xff]  ;;  %6675 = vmatpush2.bf16.msra.mxu0 %v9339_v6 }
  0xa2   : > { %v654_v4 = vld [vmem:[%s10663_s8 + $0xc00] sm:$0xff]  ;;  %v9324_v8 = vcombine.high %v398_v2, %v406_v3  ;;  %6745 = vmatprep.subr.bf16.mxu1 %v9596_v1  ;;  %v9323_v14 = vcombine.low %v398_v2, %v406_v3 }
  0xa3   : > { %v662_v5 = vld [vmem:[%s10663_s8 + $0xc40] sm:$0xff]  ;;  %6746 = vmatpush2.bf16.msra.mxu1 %v9595_v7 }
  0xa4   : > { %v9580_v9 = vcombine.high %v654_v4, %v662_v5  ;;  %v894_v10 = vld [vmem:[%s10663_s8 + $0x1380] sm:$0xff]  ;;  %6676 = vmatprep.subr.bf16.mxu0 %v9324_v8  ;;  %v9579_v15 = vcombine.low %v654_v4, %v662_v5 }
  0xa5   : > { %v902_v11 = vld [vmem:[%s10663_s8 + $0x13c0] sm:$0xff]  ;;  %6677 = vmatpush2.bf16.msra.mxu0 %v9323_v14 }
  0xa6   : > { %v1150_v12 = vld [vmem:[%s10663_s8 + $0x1b80] sm:$0xff]  ;;  %v9820_v16 = vcombine.high %v894_v10, %v902_v11  ;;  %6747 = vmatprep.subr.bf16.mxu1 %v9580_v9  ;;  %v9819_v26 = vcombine.low %v894_v10, %v902_v11  ;;  %v10805_v11 = vcombine.low %v259_v47, %v263_v48 }
  0xa7   : > { %v1158_v13 = vld [vmem:[%s10663_s8 + $0x1bc0] sm:$0xff]  ;;  %6748 = vmatpush2.bf16.msra.mxu1 %v9579_v15 }
  0xa8   : > { %v10076_v17 = vcombine.high %v1150_v12, %v1158_v13  ;;  %v878_v18 = vld [vmem:[%s10663_s8 + $0x1300] sm:$0xff]  ;;  %6788 = vmatprep.subr.bf16.mxu0 %v9820_v16  ;;  %v10075_v29 = vcombine.low %v1150_v12, %v1158_v13  ;;  %6679 = vmatmul.mubr.bf16.vlgmr.msra.gmra.mxu0 %v10760_v21  ;;  %v267_v12 = vld [vmem:[#allocation2 + $0xc8] sm:$0x11] }
  0xa9   : > { %v886_v19 = vld [vmem:[%s10663_s8 + $0x1340] sm:$0xff]  ;;  %6789 = vmatpush1.bf16.msra.mxu0 %v9819_v26 }
  0xaa   : > { %v1134_v20 = vld [vmem:[%s10663_s8 + $0x1b00] sm:$0xff]  ;;  %v9804_v30 = vcombine.high %v878_v18, %v886_v19  ;;  %6859 = vmatprep.subr.bf16.mxu1 %v10076_v17  ;;  %6750 = vmatmul.mubr.bf16.vlgmr.msra.gmra.mxu1 %v10765_v25  ;;  %v9803_v34 = vcombine.low %v878_v18, %v886_v19 }
  0xab   : > { %v1142_v22 = vld [vmem:[%s10663_s8 + $0x1b40] sm:$0xff]  ;;  %6860 = vmatpush1.bf16.msra.mxu1 %v10075_v29  ;;  %6759 = vmatprep.mubr.bf16.mxu1 %v10774_v33 }
  0xac   : > { %v250_v23 = vld [vmem:[#allocation2 + $0x40] sm:$0xff]  ;;  %v10060_v54 = vcombine.high %v1134_v20, %v1142_v22  ;;  %6790 = vmatprep.subr.bf16.mxu0 %v9804_v30  ;;  %v10059_v35 = vcombine.low %v1134_v20, %v1142_v22  ;;  %v10814_v22 = vcombine.high %v267_v12, %v267_v12 }
  0xad   : > { %v254_v24 = vld [vmem:[#allocation2 + $0x60] sm:$0xff]  ;;  %6791 = vmatpush1.bf16.msra.mxu0 %v9803_v34  ;;  %v10829_v34 = vcombine.low %v267_v12, %v267_v12 }
  0xae   : > { %v862_v55 = vld [vmem:[%s10663_s8 + $0x1280] sm:$0xff]  ;;  %v10769_v32 = vcombine.high %v250_v23, %v254_v24  ;;  %6861 = vmatprep.subr.bf16.mxu1 %v10060_v54  ;;  %v10782_v42 = vcombine.low %v250_v23, %v254_v24 }
  0xaf   : > { %v870_v31 = vld [vmem:[%s10663_s8 + $0x12c0] sm:$0xff]  ;;  %6862 = vmatpush1.bf16.msra.mxu1 %v10059_v35  ;;  %13542 = vst [vmem:[#allocation15_spill] sm:$0xff] %v10829_v34  ;;  %v10831_v35 = vld [vmem:[#allocation2 + $0x18] sm:$0xff] }
  0xb0   : > { %v1118_v59 = vld [vmem:[%s10663_s8 + $0x1a80] sm:$0xff]  ;;  %v9788_v36 = vcombine.high %v862_v55, %v870_v31  ;;  %6688 = vmatprep.mubr.bf16.mxu0 %v10769_v32  ;;  %v9787_v45 = vcombine.low %v862_v55, %v870_v31  ;;  %v10825_v31 = vld [vmem:[#allocation2 + $0x10] sm:$0xff] }
  0xb1   : > { %v1126_v60 = vld [vmem:[%s10663_s8 + $0x1ac0] sm:$0xff]  ;;  %6689 = vmatmul.mubr.bf16.gmra.mxu0 %v10782_v42 }
  0xb2   : > { %v10044_v37 = vcombine.high %v1118_v59, %v1126_v60  ;;  %v846_v38 = vld [vmem:[%s10663_s8 + $0x1200] sm:$0xff]  ;;  %6792 = vmatprep.subr.bf16.mxu0 %v9788_v36  ;;  %v10043_v49 = vcombine.low %v1118_v59, %v1126_v60  ;;  %6760 = vmatmul.mubr.bf16.gmra.mxu1 %v10785_v46  ;;  %v10827_v59 = vld [vmem:[#allocation2 + $0x30] sm:$0xff]  ;;  %v10833_v36 = vld [vmem:[#allocation2 + $0x38] sm:$0xff] }
  0xb3   : > { %v854_v39 = vld [vmem:[%s10663_s8 + $0x1240] sm:$0xff]  ;;  %6793 = vmatpush1.bf16.msra.mxu0 %v9787_v45  ;;  %6769 = vmatprep.mubr.bf16.mxu1 %v10794_v62  ;;  %v10846_v47 = vcombine.high %v10831_v35, %v10833_v36 }
  0xb4   : > { %v1102_v40 = vld [vmem:[%s10663_s8 + $0x1a00] sm:$0xff]  ;;  %v9772_v50 = vcombine.high %v846_v38, %v854_v39  ;;  %6863 = vmatprep.subr.bf16.mxu1 %v10044_v37  ;;  %v9771_v0 = vcombine.low %v846_v38, %v854_v39 }
  0xb5   : > { %v1110_v41 = vld [vmem:[%s10663_s8 + $0x1a40] sm:$0xff]  ;;  %6864 = vmatpush1.bf16.msra.mxu1 %v10043_v49  ;;  %13544 = vst [vmem:[#allocation17_spill] sm:$0xff] %v10846_v47 }
  0xb6   : > { %v258_v43 = vld [vmem:[#allocation2 + $0x80] sm:$0xff]  ;;  %v10028_v51 = vcombine.high %v1102_v40, %v1110_v41  ;;  %6794 = vmatprep.subr.bf16.mxu0 %v9772_v50  ;;  %v10027_v1 = vcombine.low %v1102_v40, %v1110_v41 }
  0xb7   : > { %v262_v44 = vld [vmem:[#allocation2 + $0xa0] sm:$0xff]  ;;  %6795 = vmatpush1.bf16.msra.mxu0 %v9771_v0 }
  0xb8   : > { %v830_v52 = vld [vmem:[%s10663_s8 + $0x1180] sm:$0xff]  ;;  %v10789_v56 = vcombine.high %v258_v43, %v262_v44  ;;  %6865 = vmatprep.subr.bf16.mxu1 %v10028_v51  ;;  %v10802_v8 = vcombine.low %v258_v43, %v262_v44  ;;  %v10839_v43 = vcombine.high %v10825_v31, %v10827_v59 }
  0xb9   : > { %v838_v53 = vld [vmem:[%s10663_s8 + $0x11c0] sm:$0xff]  ;;  %6866 = vmatpush1.bf16.msra.mxu1 %v10027_v1 }
  0xba   : > { %v1086_v57 = vld [vmem:[%s10663_s8 + $0x1980] sm:$0xff]  ;;  %v9756_v2 = vcombine.high %v830_v52, %v838_v53  ;;  %6698 = vmatprep.mubr.bf16.mxu0 %v10789_v56  ;;  %v9755_v10 = vcombine.low %v830_v52, %v838_v53  ;;  %6770 = vmatmul.mubr.bf16.gmra.mxu1 %v10805_v11  ;;  %13543 = vst [vmem:[#allocation16_spill] sm:$0xff] %v10839_v43 }
  0xbb   : > { %v1094_v61 = vld [vmem:[%s10663_s8 + $0x19c0] sm:$0xff]  ;;  %6699 = vmatmul.mubr.bf16.gmra.mxu0 %v10802_v8  ;;  %6779 = vmatprep.mubr.bf16.mxu1 %v10814_v22 }
  0xbc   : > { %v10012_v3 = vcombine.high %v1086_v57, %v1094_v61  ;;  %v814_v4 = vld [vmem:[%s10663_s8 + $0x1100] sm:$0xff]  ;;  %6796 = vmatprep.subr.bf16.mxu0 %v9756_v2  ;;  %v10011_v13 = vcombine.low %v1086_v57, %v1094_v61 }
  0xbd   : > { %v822_v5 = vld [vmem:[%s10663_s8 + $0x1140] sm:$0xff]  ;;  %6797 = vmatpush1.bf16.msra.mxu0 %v9755_v10 }
  0xbe   : > { %v1070_v6 = vld [vmem:[%s10663_s8 + $0x1900] sm:$0xff]  ;;  %v9740_v14 = vcombine.high %v814_v4, %v822_v5  ;;  %6867 = vmatprep.subr.bf16.mxu1 %v10012_v3  ;;  %v9739_v23 = vcombine.low %v814_v4, %v822_v5 }
  0xbf   : > { %v1078_v7 = vld [vmem:[%s10663_s8 + $0x1940] sm:$0xff]  ;;  %6868 = vmatpush1.bf16.msra.mxu1 %v10011_v13 }
  0xc0   : > { %v266_v9 = vld [vmem:[#allocation2 + $0xc0] sm:$0x11]  ;;  %v9996_v15 = vcombine.high %v1070_v6, %v1078_v7  ;;  %6798 = vmatprep.subr.bf16.mxu0 %v9740_v14  ;;  %v9995_v24 = vcombine.low %v1070_v6, %v1078_v7 }
  0xc1   : > { %v798_v16 = vld [vmem:[%s10663_s8 + $0x1080] sm:$0xff]  ;;  %v10809_v18 = vcombine.high %v266_v9, %v266_v9  ;;  %v10822_v55 = vcombine.low %v266_v9, %v266_v9  ;;  %6799 = vmatpush1.bf16.msra.mxu0 %v9739_v23 }
  0xc2   : > { %v806_v17 = vld [vmem:[%s10663_s8 + $0x10c0] sm:$0xff]  ;;  %6869 = vmatprep.subr.bf16.mxu1 %v9996_v15  ;;  %6780 = vmatmul.mubr.bf16.gmra.mxu1 %v10829_v34 }
  0xc3   : > { %v1054_v19 = vld [vmem:[%s10663_s8 + $0x1880] sm:$0xff]  ;;  %v9724_v26 = vcombine.high %v798_v16, %v806_v17  ;;  %6708 = vmatprep.mubr.bf16.mxu0 %v10809_v18  ;;  %13541 = vst [vmem:[#allocation14_spill] sm:$0xff] %v10822_v55  ;;  %v9723_v60 = vcombine.low %v798_v16, %v806_v17  ;;  %6870 = vmatpush1.bf16.msra.mxu1 %v9995_v24 }
  0xc4   : > { %v1062_v20 = vld [vmem:[%s10663_s8 + $0x18c0] sm:$0xff]  ;;  %6709 = vmatmul.mubr.bf16.gmra.mxu0 %v10822_v55  ;;  %6891 = vmatprep.mubr.bf16.mxu1 %v10846_v47 }
  0xc5   : > { %v9980_v27 = vcombine.high %v1054_v19, %v1062_v20  ;;  %v782_v28 = vld [vmem:[%s10663_s8 + $0x1000] sm:$0xff]  ;;  %6800 = vmatprep.subr.bf16.mxu0 %v9724_v26  ;;  %v9979_v37 = vcombine.low %v1054_v19, %v1062_v20  ;;  %6820 = vmatprep.mubr.bf16.mxu0 %v10839_v43 }
  0xc6   : > { %v790_v29 = vld [vmem:[%s10663_s8 + $0x1040] sm:$0xff]  ;;  %6801 = vmatpush1.bf16.msra.mxu0 %v9723_v60 }
  0xc7   : > { %v1038_v30 = vld [vmem:[%s10663_s8 + $0x1800] sm:$0xff]  ;;  %v9708_v38 = vcombine.high %v782_v28, %v790_v29  ;;  %6871 = vmatprep.subr.bf16.mxu1 %v9980_v27  ;;  %v9707_v48 = vcombine.low %v782_v28, %v790_v29 }
  0xc8   : > { %v1046_v54 = vld [vmem:[%s10663_s8 + $0x1840] sm:$0xff]  ;;  %6872 = vmatpush1.bf16.msra.mxu1 %v9979_v37 }
  0xc9   : > { %v9964_v39 = vcombine.high %v1038_v30, %v1046_v54  ;;  %v1022_v40 = vld [vmem:[%s10663_s8 + $0x1780] sm:$0xff]  ;;  %6802 = vmatprep.subr.bf16.mxu0 %v9708_v38  ;;  %v9963_v49 = vcombine.low %v1038_v30, %v1046_v54 }
  0xca   : > { %v1030_v41 = vld [vmem:[%s10663_s8 + $0x17c0] sm:$0xff]  ;;  %6803 = vmatpush1.bf16.msra.mxu0 %v9707_v48 }
  0xcb   : > { %v1278_v44 = vld [vmem:[%s10663_s8 + $0x1f80] sm:$0xff]  ;;  %v9948_v50 = vcombine.high %v1022_v40, %v1030_v41  ;;  %6873 = vmatprep.subr.bf16.mxu1 %v9964_v39  ;;  %v9947_v0 = vcombine.low %v1022_v40, %v1030_v41 }
  0xcc   : > { %v1286_v45 = vld [vmem:[%s10663_s8 + $0x1fc0] sm:$0xff]  ;;  %6874 = vmatpush1.bf16.msra.mxu1 %v9963_v49 }
  0xcd   : > { %v10204_v51 = vcombine.high %v1278_v44, %v1286_v45  ;;  %v1006_v52 = vld [vmem:[%s10663_s8 + $0x1700] sm:$0xff]  ;;  %6804 = vmatprep.subr.bf16.mxu0 %v9948_v50  ;;  %v10203_v1 = vcombine.low %v1278_v44, %v1286_v45 }
  0xce   : > { %v1014_v53 = vld [vmem:[%s10663_s8 + $0x1740] sm:$0xff]  ;;  %6805 = vmatpush2.bf16.msra.mxu0 %v9947_v0 }
  0xcf   : > { %v1262_v57 = vld [vmem:[%s10663_s8 + $0x1f00] sm:$0xff]  ;;  %v9932_v2 = vcombine.high %v1006_v52, %v1014_v53  ;;  %6875 = vmatprep.subr.bf16.mxu1 %v10204_v51  ;;  %v9931_v9 = vcombine.low %v1006_v52, %v1014_v53 }
  0xd0   : > { %v1270_v61 = vld [vmem:[%s10663_s8 + $0x1f40] sm:$0xff]  ;;  %6876 = vmatpush2.bf16.msra.mxu1 %v10203_v1 }
  0xd1   : > { %v10188_v3 = vcombine.high %v1262_v57, %v1270_v61  ;;  %v990_v4 = vld [vmem:[%s10663_s8 + $0x1680] sm:$0xff]  ;;  %6806 = vmatprep.subr.bf16.mxu0 %v9932_v2  ;;  %v10187_v10 = vcombine.low %v1262_v57, %v1270_v61 }
  0xd2   : > { %v998_v5 = vld [vmem:[%s10663_s8 + $0x16c0] sm:$0xff]  ;;  %6807 = vmatpush2.bf16.msra.mxu0 %v9931_v9 }
  0xd3   : > { %v1246_v6 = vld [vmem:[%s10663_s8 + $0x1e80] sm:$0xff]  ;;  %v9916_v12 = vcombine.high %v990_v4, %v998_v5  ;;  %6877 = vmatprep.subr.bf16.mxu1 %v10188_v3  ;;  %v9915_v19 = vcombine.low %v990_v4, %v998_v5 }
  0xd4   : > { %v1254_v7 = vld [vmem:[%s10663_s8 + $0x1ec0] sm:$0xff]  ;;  %6878 = vmatpush2.bf16.msra.mxu1 %v10187_v10 }
  0xd5   : > { %v10172_v13 = vcombine.high %v1246_v6, %v1254_v7  ;;  %v974_v14 = vld [vmem:[%s10663_s8 + $0x1600] sm:$0xff]  ;;  %6808 = vmatprep.subr.bf16.mxu0 %v9916_v12  ;;  %v10171_v20 = vcombine.low %v1246_v6, %v1254_v7  ;;  %v383_v12 = vld [vmem:[%s10663_s8 + $0x388] sm:$0xff] }
  0xd6   : > { %v982_v15 = vld [vmem:[%s10663_s8 + $0x1640] sm:$0xff]  ;;  %6809 = vmatpush2.bf16.msra.mxu0 %v9915_v19 }
  0xd7   : > { %v1230_v16 = vld [vmem:[%s10663_s8 + $0x1e00] sm:$0xff]  ;;  %v9900_v23 = vcombine.high %v974_v14, %v982_v15  ;;  %6879 = vmatprep.subr.bf16.mxu1 %v10172_v13  ;;  %v9899_v30 = vcombine.low %v974_v14, %v982_v15  ;;  %v391_v13 = vld [vmem:[%s10663_s8 + $0x3c8] sm:$0xff] }
  0xd8   : > { %v1238_v17 = vld [vmem:[%s10663_s8 + $0x1e40] sm:$0xff]  ;;  %6880 = vmatpush2.bf16.msra.mxu1 %v10171_v20  ;;  %v639_v14 = vld [vmem:[%s10663_s8 + $0xb88] sm:$0xff]  ;;  %v9310_v19 = vcombine.high %v383_v12, %v391_v13 }
  0xd9   : > { %v10156_v24 = vcombine.high %v1230_v16, %v1238_v17  ;;  %v958_v26 = vld [vmem:[%s10663_s8 + $0x1580] sm:$0xff]  ;;  %6810 = vmatprep.subr.bf16.mxu0 %v9900_v23  ;;  %v10155_v54 = vcombine.low %v1230_v16, %v1238_v17  ;;  %v647_v15 = vld [vmem:[%s10663_s8 + $0xbc8] sm:$0xff] }
  0xda   : > { %v966_v27 = vld [vmem:[%s10663_s8 + $0x15c0] sm:$0xff]  ;;  %6811 = vmatpush2.bf16.msra.mxu0 %v9899_v30  ;;  %v9566_v20 = vcombine.high %v639_v14, %v647_v15  ;;  %v367_v23 = vld [vmem:[%s10663_s8 + $0x308] sm:$0xff]  ;;  %v256_v30 = vld [vmem:[#allocation2 + $0x70] sm:$0xff] }
  0xdb   : > { %v1214_v28 = vld [vmem:[%s10663_s8 + $0x1d80] sm:$0xff]  ;;  %v9884_v60 = vcombine.high %v958_v26, %v966_v27  ;;  %6881 = vmatprep.subr.bf16.mxu1 %v10156_v24  ;;  %v9883_v44 = vcombine.low %v958_v26, %v966_v27  ;;  %v375_v24 = vld [vmem:[%s10663_s8 + $0x348] sm:$0xff]  ;;  %v10888_v27 = vcombine.low %v10825_v31, %v10827_v59 }
  0xdc   : > { %v1222_v29 = vld [vmem:[%s10663_s8 + $0x1dc0] sm:$0xff]  ;;  %6882 = vmatpush2.bf16.msra.mxu1 %v10155_v54  ;;  %v623_v26 = vld [vmem:[%s10663_s8 + $0xb08] sm:$0xff]  ;;  %v10893_v54 = vcombine.low %v10831_v35, %v10833_v36  ;;  %v9294_v31 = vcombine.high %v367_v23, %v375_v24 }
  0xdd   : > { %v10140_v37 = vcombine.high %v1214_v28, %v1222_v29  ;;  %v942_v38 = vld [vmem:[%s10663_s8 + $0x1500] sm:$0xff]  ;;  %6812 = vmatprep.subr.bf16.mxu0 %v9884_v60  ;;  %v10139_v45 = vcombine.low %v1214_v28, %v1222_v29  ;;  %13545 = vst [vmem:[#allocation18_spill] sm:$0xff] %v10888_v27  ;;  %v631_v28 = vld [vmem:[%s10663_s8 + $0xb48] sm:$0xff]  ;;  %v252_v29 = vld [vmem:[#allocation2 + $0x50] sm:$0xff]  ;;  %v9309_v60 = vcombine.low %v383_v12, %v391_v13 }
  0xde   : > { %v950_v39 = vld [vmem:[%s10663_s8 + $0x1540] sm:$0xff]  ;;  %6813 = vmatpush2.bf16.msra.mxu0 %v9883_v44  ;;  %13546 = vst [vmem:[#allocation19_spill] sm:$0xff] %v10893_v54  ;;  %v9550_v59 = vcombine.high %v623_v26, %v631_v28  ;;  %v359_v44 = vld [vmem:[%s10663_s8 + $0x2c8] sm:$0xff] }
  0xdf   : > { %v1198_v40 = vld [vmem:[%s10663_s8 + $0x1d00] sm:$0xff]  ;;  %v9868_v48 = vcombine.high %v942_v38, %v950_v39  ;;  %6883 = vmatprep.subr.bf16.mxu1 %v10140_v37  ;;  %v9867_v57 = vcombine.low %v942_v38, %v950_v39  ;;  %v253_v37 = vld [vmem:[#allocation2 + $0x58] sm:$0xff]  ;;  %v9565_v39 = vcombine.low %v639_v14, %v647_v15  ;;  %v607_v35 = vld [vmem:[%s10663_s8 + $0xa88] sm:$0xff] }
  0xe0   : > { %v1206_v41 = vld [vmem:[%s10663_s8 + $0x1d40] sm:$0xff]  ;;  %6884 = vmatpush2.bf16.msra.mxu1 %v10139_v45  ;;  %v257_v38 = vld [vmem:[#allocation2 + $0x78] sm:$0xff]  ;;  %v615_v36 = vld [vmem:[%s10663_s8 + $0xac8] sm:$0xff] }
  0xe1   : > { %v10124_v49 = vcombine.high %v1198_v40, %v1206_v41  ;;  %v926_v50 = vld [vmem:[%s10663_s8 + $0x1480] sm:$0xff]  ;;  %6814 = vmatprep.subr.bf16.mxu0 %v9868_v48  ;;  %v10123_v61 = vcombine.low %v1198_v40, %v1206_v41  ;;  %v10895_v40 = vcombine.high %v252_v29, %v256_v30  ;;  %v351_v41 = vld [vmem:[%s10663_s8 + $0x288] sm:$0xff]  ;;  %v10902_v45 = vcombine.high %v253_v37, %v257_v38 }
  0xe2   : > { %v934_v51 = vld [vmem:[%s10663_s8 + $0x14c0] sm:$0xff]  ;;  %6815 = vmatpush2.bf16.msra.mxu0 %v9867_v57  ;;  %v9293_v48 = vcombine.low %v367_v23, %v375_v24  ;;  %v591_v57 = vld [vmem:[%s10663_s8 + $0xa08] sm:$0xff] }
  0xe3   : > { %v1182_v52 = vld [vmem:[%s10663_s8 + $0x1c80] sm:$0xff]  ;;  %v9852_v0 = vcombine.high %v926_v50, %v934_v51  ;;  %6885 = vmatprep.subr.bf16.mxu1 %v10124_v49  ;;  %v9851_v6 = vcombine.low %v926_v50, %v934_v51  ;;  %13547 = vst [vmem:[#allocation20_spill] sm:$0xff] %v10895_v40  ;;  %13548 = vst [vmem:[#allocation21_spill] sm:$0xff] %v10902_v45  ;;  %v9549_v49 = vcombine.low %v623_v26, %v631_v28  ;;  %v319_v13 = vld [vmem:[%s10663_s8 + $0x188] sm:$0xff] }
  0xe4   : > { %v1190_v53 = vld [vmem:[%s10663_s8 + $0x1cc0] sm:$0xff]  ;;  %6886 = vmatpush2.bf16.msra.mxu1 %v10123_v61  ;;  %v9278_v50 = vcombine.high %v351_v41, %v359_v44  ;;  %v9534_v51 = vcombine.high %v607_v35, %v615_v36  ;;  %v10909_v61 = vcombine.low %v252_v29, %v256_v30  ;;  %v327_v14 = vld [vmem:[%s10663_s8 + $0x1c8] sm:$0xff] }
  0xe5   : > { %v10108_v1 = vcombine.high %v1182_v52, %v1190_v53  ;;  %v910_v2 = vld [vmem:[%s10663_s8 + $0x1400] sm:$0xff]  ;;  %6816 = vmatprep.subr.bf16.mxu0 %v9852_v0  ;;  %v10107_v7 = vcombine.low %v1182_v52, %v1190_v53  ;;  %v335_v52 = vld [vmem:[%s10663_s8 + $0x208] sm:$0xff]  ;;  %v9246_v23 = vcombine.high %v319_v13, %v327_v14 }
  0xe6   : > { %v918_v3 = vld [vmem:[%s10663_s8 + $0x1440] sm:$0xff]  ;;  %6817 = vmatpush2.bf16.msra.mxu0 %v9851_v6  ;;  %v343_v53 = vld [vmem:[%s10663_s8 + $0x248] sm:$0xff]  ;;  %13549 = vst [vmem:[#allocation22_spill] sm:$0xff] %v10909_v61  ;;  %v265_v6 = vld [vmem:[#allocation2 + $0xb8] sm:$0xff] }
  0xe7   : > { %v1166_v4 = vld [vmem:[%s10663_s8 + $0x1c00] sm:$0xff]  ;;  %v9836_v9 = vcombine.high %v910_v2, %v918_v3  ;;  %6887 = vmatprep.subr.bf16.mxu1 %v10108_v1  ;;  %v9835_v16 = vcombine.low %v910_v2, %v918_v3  ;;  %v599_v0 = vld [vmem:[%s10663_s8 + $0xa48] sm:$0xff]  ;;  %v260_v1 = vld [vmem:[#allocation2 + $0x90] sm:$0xff]  ;;  %v9277_v3 = vcombine.low %v351_v41, %v359_v44 }
  0xe8   : > { %v1174_v5 = vld [vmem:[%s10663_s8 + $0x1c40] sm:$0xff]  ;;  %6888 = vmatpush2.bf16.msra.mxu1 %v10107_v7  ;;  %v264_v2 = vld [vmem:[#allocation2 + $0xb0] sm:$0xff]  ;;  %v9533_v7 = vcombine.low %v607_v35, %v615_v36  ;;  %v575_v15 = vld [vmem:[%s10663_s8 + $0x988] sm:$0xff] }
  0xe9   : > { %v10092_v10 = vcombine.high %v1166_v4, %v1174_v5  ;;  %6818 = vmatprep.subr.bf16.mxu0 %v9836_v9  ;;  %v10091_v17 = vcombine.low %v1166_v4, %v1174_v5  ;;  %v10913_v4 = vcombine.low %v253_v37, %v257_v38  ;;  %v261_v5 = vld [vmem:[#allocation2 + $0x98] sm:$0xff]  ;;  %v9262_v9 = vcombine.high %v335_v52, %v343_v53  ;;  %v303_v26 = vld [vmem:[%s10663_s8 + $0x108] sm:$0xff]  ;;  %v268_v37 = vld [vmem:[#allocation2 + $0xd0] sm:$0x11] }
  0xea   : > { %6819 = vmatpush2.bf16.msra.mxu0 %v9835_v16  ;;  %v10915_v12 = vcombine.high %v260_v1, %v264_v2  ;;  %v583_v16 = vld [vmem:[%s10663_s8 + $0x9c8] sm:$0xff]  ;;  %v10928_v29 = vcombine.low %v260_v1, %v264_v2  ;;  %v9245_v38 = vcombine.low %v319_v13, %v327_v14  ;;  %v10935_v35 = vcombine.high %v268_v37, %v268_v37 }
  0xeb   : > { %6889 = vmatprep.subr.bf16.mxu1 %v10092_v10  ;;  %6930 = vmatprep.subr.bf16.mxu0 %v9310_v19  ;;  %13550 = vst [vmem:[#allocation23_spill] sm:$0xff] %v10913_v4  ;;  %v9518_v10 = vcombine.high %v591_v57, %v599_v0  ;;  %v9261_v19 = vcombine.low %v335_v52, %v343_v53  ;;  %v311_v28 = vld [vmem:[%s10663_s8 + $0x148] sm:$0xff] }
  0xec   : > { %6890 = vmatpush2.bf16.msra.mxu1 %v10091_v17  ;;  %13551 = vst [vmem:[#allocation24_spill] sm:$0xff] %v10915_v12  ;;  %v10922_v17 = vcombine.high %v261_v5, %v265_v6  ;;  %v9502_v24 = vcombine.high %v575_v15, %v583_v16  ;;  %13553 = vst [vmem:[#allocation26_spill] sm:$0xff] %v10928_v29  ;;  %v559_v30 = vld [vmem:[%s10663_s8 + $0x908] sm:$0xff]  ;;  %v9230_v41 = vcombine.high %v303_v26, %v311_v28 }
  0xed   : > { %7001 = vmatprep.subr.bf16.mxu1 %v9566_v20  ;;  %6821 = vmatmul.mubr.bf16.vlgmr.msra.gmra.mxu0 %v10888_v27  ;;  %v9517_v20 = vcombine.low %v591_v57, %v599_v0  ;;  %13555 = vst [vmem:[#allocation28_spill] sm:$0xff] %v10935_v35  ;;  %v287_v36 = vld [vmem:[%s10663_s8 + $0x88] sm:$0xff]  ;;  %v9229_v52 = vcombine.low %v303_v26, %v311_v28 }
  0xee   : > { %6931 = vmatpush1.bf16.msra.mxu0 %v9309_v60  ;;  %6830 = vmatprep.mubr.bf16.mxu0 %v10895_v40  ;;  %13552 = vst [vmem:[#allocation25_spill] sm:$0xff] %v10922_v17  ;;  %v567_v60 = vld [vmem:[%s10663_s8 + $0x948] sm:$0xff] }
  0xef   : > { %6892 = vmatmul.mubr.bf16.vlgmr.msra.gmra.mxu1 %v10893_v54  ;;  %6932 = vmatprep.subr.bf16.mxu0 %v9294_v31  ;;  %v269_v31 = vld [vmem:[#allocation2 + $0xd8] sm:$0x11]  ;;  %v9486_v44 = vcombine.high %v559_v30, %v567_v60  ;;  %v9485_v53 = vcombine.low %v559_v30, %v567_v60  ;;  %v271_v1 = vld [vmem:[%s10663_s8 + $0x8] sm:$0xff] }
  0xf0   : > { %7002 = vmatpush1.bf16.msra.mxu1 %v9565_v39  ;;  %6901 = vmatprep.mubr.bf16.mxu1 %v10902_v45  ;;  %v10933_v39 = vcombine.low %v261_v5, %v265_v6  ;;  %v279_v2 = vld [vmem:[%s10663_s8 + $0x48] sm:$0xff] }
  0xf1   : > { %7003 = vmatprep.subr.bf16.mxu1 %v9550_v59  ;;  %v9501_v59 = vcombine.low %v575_v15, %v583_v16  ;;  %v527_v5 = vld [vmem:[%s10663_s8 + $0x808] sm:$0xff]  ;;  %v9198_v13 = vcombine.high %v271_v1, %v279_v2 }
  0xf2   : > { %6933 = vmatpush1.bf16.msra.mxu0 %v9293_v48  ;;  %13554 = vst [vmem:[#allocation27_spill] sm:$0xff] %v10933_v39  ;;  %v295_v48 = vld [vmem:[%s10663_s8 + $0xc8] sm:$0xff] }
  0xf3   : > { %6934 = vmatprep.subr.bf16.mxu0 %v9278_v50  ;;  %v551_v50 = vld [vmem:[%s10663_s8 + $0x8c8] sm:$0xff]  ;;  %v9214_v57 = vcombine.high %v287_v36, %v295_v48 }
  0xf4   : > { %7004 = vmatpush1.bf16.msra.mxu1 %v9549_v49  ;;  %v543_v49 = vld [vmem:[%s10663_s8 + $0x888] sm:$0xff] }
  0xf5   : > { %7005 = vmatprep.subr.bf16.mxu1 %v9534_v51  ;;  %6831 = vmatmul.mubr.bf16.gmra.mxu0 %v10909_v61  ;;  %v10942_v51 = vcombine.high %v269_v31, %v269_v31  ;;  %v9470_v0 = vcombine.high %v543_v49, %v551_v50  ;;  %v535_v6 = vld [vmem:[%s10663_s8 + $0x848] sm:$0xff] }
  0xf6   : > { %6935 = vmatpush1.bf16.msra.mxu0 %v9277_v3  ;;  %6840 = vmatprep.mubr.bf16.mxu0 %v10915_v12  ;;  %v10948_v3 = vcombine.low %v268_v37, %v268_v37  ;;  %v9454_v14 = vcombine.high %v527_v5, %v535_v6  ;;  %v511_v15 = vld [vmem:[%s10663_s8 + $0x788] sm:$0xff] }
  0xf7   : > { %6902 = vmatmul.mubr.bf16.gmra.mxu1 %v10913_v4  ;;  %6936 = vmatprep.subr.bf16.mxu0 %v9262_v9  ;;  %13556 = vst [vmem:[#allocation29_spill] sm:$0xff] %v10942_v51  ;;  %v10953_v9 = vcombine.low %v269_v31, %v269_v31  ;;  %v519_v16 = vld [vmem:[%s10663_s8 + $0x7c8] sm:$0xff] }
  0xf8   : > { %7006 = vmatpush1.bf16.msra.mxu1 %v9533_v7  ;;  %6911 = vmatprep.mubr.bf16.mxu1 %v10922_v17  ;;  %13557 = vst [vmem:[#allocation30_spill] sm:$0xff] %v10948_v3  ;;  %v9213_v7 = vcombine.low %v287_v36, %v295_v48  ;;  %v9438_v26 = vcombine.high %v511_v15, %v519_v16  ;;  %v495_v30 = vld [vmem:[%s10663_s8 + $0x708] sm:$0xff] }
  0xf9   : > { %7007 = vmatprep.subr.bf16.mxu1 %v9518_v10  ;;  %13558 = vst [vmem:[#allocation31_spill] sm:$0xff] %v10953_v9  ;;  %v9469_v10 = vcombine.low %v543_v49, %v551_v50  ;;  %v503_v60 = vld [vmem:[%s10663_s8 + $0x748] sm:$0xff]  ;;  %v9437_v31 = vcombine.low %v511_v15, %v519_v16 }
  0xfa   : > { %6937 = vmatpush1.bf16.msra.mxu0 %v9261_v19  ;;  %v767_v19 = vld [vmem:[%s10663_s8 + $0xf88] sm:$0xff] }
  0xfb   : > { %6938 = vmatprep.subr.bf16.mxu0 %v9246_v23  ;;  %v9197_v23 = vcombine.low %v271_v1, %v279_v2  ;;  %v751_v37 = vld [vmem:[%s10663_s8 + $0xf08] sm:$0xff] }
  0xfc   : > { %7008 = vmatpush1.bf16.msra.mxu1 %v9517_v20  ;;  %v775_v20 = vld [vmem:[%s10663_s8 + $0xfc8] sm:$0xff] }
  0xfd   : > { %7009 = vmatprep.subr.bf16.mxu1 %v9502_v24  ;;  %6841 = vmatmul.mubr.bf16.gmra.mxu0 %v10928_v29  ;;  %v9453_v24 = vcombine.low %v527_v5, %v535_v6  ;;  %v9694_v28 = vcombine.high %v767_v19, %v775_v20  ;;  %v479_v36 = vld [vmem:[%s10663_s8 + $0x688] sm:$0xff] }
  0xfe   : > { %6939 = vmatpush1.bf16.msra.mxu0 %v9245_v38  ;;  %6850 = vmatprep.mubr.bf16.mxu0 %v10935_v35  ;;  %v759_v38 = vld [vmem:[%s10663_s8 + $0xf48] sm:$0xff] }
  0xff   : > { %6912 = vmatmul.mubr.bf16.gmra.mxu1 %v10933_v39  ;;  %6940 = vmatprep.subr.bf16.mxu0 %v9230_v41  ;;  %v9422_v41 = vcombine.high %v495_v30, %v503_v60  ;;  %v487_v48 = vld [vmem:[%s10663_s8 + $0x6c8] sm:$0xff] }
 0x100   : > { %7010 = vmatpush1.bf16.msra.mxu1 %v9501_v59  ;;  %6921 = vmatprep.mubr.bf16.mxu1 %v10942_v51  ;;  %v9693_v59 = vcombine.low %v767_v19, %v775_v20  ;;  %v735_v49 = vld [vmem:[%s10663_s8 + $0xe88] sm:$0xff] }
 0x101   : > { %7011 = vmatprep.subr.bf16.mxu1 %v9486_v44  ;;  %v9678_v44 = vcombine.high %v751_v37, %v759_v38  ;;  %v743_v50 = vld [vmem:[%s10663_s8 + $0xec8] sm:$0xff] }
 0x102   : > { %6941 = vmatpush1.bf16.msra.mxu0 %v9229_v52  ;;  %v9421_v52 = vcombine.low %v495_v30, %v503_v60  ;;  %v463_v1 = vld [vmem:[%s10663_s8 + $0x608] sm:$0xff] }
 0x103   : > { %6942 = vmatprep.subr.bf16.mxu0 %v9214_v57  ;;  %v9406_v57 = vcombine.high %v479_v36, %v487_v48  ;;  %v471_v2 = vld [vmem:[%s10663_s8 + $0x648] sm:$0xff] }
 0x104   : > { %7012 = vmatpush1.bf16.msra.mxu1 %v9485_v53  ;;  %v9677_v53 = vcombine.low %v751_v37, %v759_v38  ;;  %v719_v5 = vld [vmem:[%s10663_s8 + $0xe08] sm:$0xff] }
 0x105   : > { %7013 = vmatprep.subr.bf16.mxu1 %v9470_v0  ;;  %6851 = vmatmul.mubr.bf16.gmra.mxu0 %v10948_v3  ;;  %v9662_v0 = vcombine.high %v735_v49, %v743_v50  ;;  %v727_v6 = vld [vmem:[%s10663_s8 + $0xe48] sm:$0xff] }
 0x106   : > { %6943 = vmatpush1.bf16.msra.mxu0 %v9213_v7  ;;  %6962 = vmatprep.mubr.bf16.mxu0 %v10705_v58  ;;  %v9405_v7 = vcombine.low %v479_v36, %v487_v48  ;;  %v447_v15 = vld [vmem:[%s10663_s8 + $0x588] sm:$0xff] }
 0x107   : > { %6922 = vmatmul.mubr.bf16.gmra.mxu1 %v10953_v9  ;;  %6944 = vmatprep.subr.bf16.mxu0 %v9198_v13  ;;  %v9390_v13 = vcombine.high %v463_v1, %v471_v2  ;;  %v455_v16 = vld [vmem:[%s10663_s8 + $0x5c8] sm:$0xff] }
 0x108   : > { %7014 = vmatpush1.bf16.msra.mxu1 %v9469_v10  ;;  %7033 = vmatprep.mubr.bf16.mxu1 %v10715_v63  ;;  %v9661_v10 = vcombine.low %v735_v49, %v743_v50  ;;  %v703_v19 = vld [vmem:[%s10663_s8 + $0xd88] sm:$0xff] }
 0x109   : > { %7015 = vmatprep.subr.bf16.mxu1 %v9454_v14  ;;  %v9646_v14 = vcombine.high %v719_v5, %v727_v6  ;;  %v711_v20 = vld [vmem:[%s10663_s8 + $0xdc8] sm:$0xff] }
 0x10a   : > { %6945 = vmatpush1.bf16.msra.mxu0 %v9197_v23  ;;  %v9389_v23 = vcombine.low %v463_v1, %v471_v2  ;;  %v431_v30 = vld [vmem:[%s10663_s8 + $0x508] sm:$0xff] }
 0x10b   : > { %6946 = vmatprep.subr.bf16.mxu0 %v9438_v26  ;;  %v9374_v26 = vcombine.high %v447_v15, %v455_v16  ;;  %v439_v60 = vld [vmem:[%s10663_s8 + $0x548] sm:$0xff] }
 0x10c   : > { %7016 = vmatpush1.bf16.msra.mxu1 %v9453_v24  ;;  %v9645_v24 = vcombine.low %v719_v5, %v727_v6  ;;  %v687_v37 = vld [vmem:[%s10663_s8 + $0xd08] sm:$0xff] }
 0x10d   : > { %7017 = vmatprep.subr.bf16.mxu1 %v9694_v28  ;;  %v9630_v28 = vcombine.high %v703_v19, %v711_v20  ;;  %v695_v38 = vld [vmem:[%s10663_s8 + $0xd48] sm:$0xff] }
 0x10e   : > { %6947 = vmatpush2.bf16.msra.mxu0 %v9437_v31  ;;  %v9373_v31 = vcombine.low %v447_v15, %v455_v16  ;;  %v415_v36 = vld [vmem:[%s10663_s8 + $0x488] sm:$0xff] }
 0x10f   : > { %6948 = vmatprep.subr.bf16.mxu0 %v9422_v41  ;;  %v9358_v41 = vcombine.high %v431_v30, %v439_v60  ;;  %v423_v48 = vld [vmem:[%s10663_s8 + $0x4c8] sm:$0xff] }
 0x110   : > { %7018 = vmatpush2.bf16.msra.mxu1 %v9693_v59  ;;  %v9629_v59 = vcombine.low %v703_v19, %v711_v20  ;;  %v671_v49 = vld [vmem:[%s10663_s8 + $0xc88] sm:$0xff] }
 0x111   : > { %7019 = vmatprep.subr.bf16.mxu1 %v9678_v44  ;;  %v9614_v44 = vcombine.high %v687_v37, %v695_v38  ;;  %v679_v50 = vld [vmem:[%s10663_s8 + $0xcc8] sm:$0xff] }
 0x112   : > { %6949 = vmatpush2.bf16.msra.mxu0 %v9421_v52  ;;  %v9357_v52 = vcombine.low %v431_v30, %v439_v60  ;;  %v399_v1 = vld [vmem:[%s10663_s8 + $0x408] sm:$0xff] }
 0x113   : > { %6950 = vmatprep.subr.bf16.mxu0 %v9406_v57  ;;  %v9342_v57 = vcombine.high %v415_v36, %v423_v48  ;;  %v407_v2 = vld [vmem:[%s10663_s8 + $0x448] sm:$0xff] }
 0x114   : > { %7020 = vmatpush2.bf16.msra.mxu1 %v9677_v53  ;;  %v9613_v53 = vcombine.low %v687_v37, %v695_v38  ;;  %v655_v5 = vld [vmem:[%s10663_s8 + $0xc08] sm:$0xff] }
 0x115   : > { %7021 = vmatprep.subr.bf16.mxu1 %v9662_v0  ;;  %v9598_v0 = vcombine.high %v671_v49, %v679_v50  ;;  %v663_v6 = vld [vmem:[%s10663_s8 + $0xc48] sm:$0xff] }
 0x116   : > { %6951 = vmatpush2.bf16.msra.mxu0 %v9405_v7  ;;  %v9341_v7 = vcombine.low %v415_v36, %v423_v48  ;;  %v895_v15 = vld [vmem:[%s10663_s8 + $0x1388] sm:$0xff] }
 0x117   : > { %6952 = vmatprep.subr.bf16.mxu0 %v9390_v13  ;;  %v9326_v13 = vcombine.high %v399_v1, %v407_v2  ;;  %v903_v16 = vld [vmem:[%s10663_s8 + $0x13c8] sm:$0xff] }
 0x118   : > { %7022 = vmatpush2.bf16.msra.mxu1 %v9661_v10  ;;  %v9597_v10 = vcombine.low %v671_v49, %v679_v50  ;;  %v1151_v19 = vld [vmem:[%s10663_s8 + $0x1b88] sm:$0xff] }
 0x119   : > { %7023 = vmatprep.subr.bf16.mxu1 %v9646_v14  ;;  %v9582_v14 = vcombine.high %v655_v5, %v663_v6  ;;  %v1159_v20 = vld [vmem:[%s10663_s8 + $0x1bc8] sm:$0xff] }
 0x11a   : > { %6953 = vmatpush2.bf16.msra.mxu0 %v9389_v23  ;;  %v9325_v23 = vcombine.low %v399_v1, %v407_v2  ;;  %v879_v30 = vld [vmem:[%s10663_s8 + $0x1308] sm:$0xff] }
 0x11b   : > { %6954 = vmatprep.subr.bf16.mxu0 %v9374_v26  ;;  %v9822_v26 = vcombine.high %v895_v15, %v903_v16  ;;  %v887_v60 = vld [vmem:[%s10663_s8 + $0x1348] sm:$0xff] }
 0x11c   : > { %7024 = vmatpush2.bf16.msra.mxu1 %v9645_v24  ;;  %v9581_v24 = vcombine.low %v655_v5, %v663_v6  ;;  %v1135_v37 = vld [vmem:[%s10663_s8 + $0x1b08] sm:$0xff] }
 0x11d   : > { %7025 = vmatprep.subr.bf16.mxu1 %v9630_v28  ;;  %v10078_v28 = vcombine.high %v1151_v19, %v1159_v20  ;;  %v1143_v38 = vld [vmem:[%s10663_s8 + $0x1b48] sm:$0xff] }
 0x11e   : > { %6955 = vmatpush2.bf16.msra.mxu0 %v9373_v31  ;;  %v9821_v31 = vcombine.low %v895_v15, %v903_v16  ;;  %v863_v36 = vld [vmem:[%s10663_s8 + $0x1288] sm:$0xff] }
 0x11f   : > { %6956 = vmatprep.subr.bf16.mxu0 %v9358_v41  ;;  %v9806_v41 = vcombine.high %v879_v30, %v887_v60  ;;  %v871_v48 = vld [vmem:[%s10663_s8 + $0x12c8] sm:$0xff] }
 0x120   : > { %7026 = vmatpush2.bf16.msra.mxu1 %v9629_v59  ;;  %v10077_v59 = vcombine.low %v1151_v19, %v1159_v20  ;;  %v1119_v49 = vld [vmem:[%s10663_s8 + $0x1a88] sm:$0xff] }
 0x121   : > { %7027 = vmatprep.subr.bf16.mxu1 %v9614_v44  ;;  %v10062_v44 = vcombine.high %v1135_v37, %v1143_v38  ;;  %v1127_v50 = vld [vmem:[%s10663_s8 + $0x1ac8] sm:$0xff] }
 0x122   : > { %6957 = vmatpush2.bf16.msra.mxu0 %v9357_v52  ;;  %v9805_v52 = vcombine.low %v879_v30, %v887_v60  ;;  %v847_v1 = vld [vmem:[%s10663_s8 + $0x1208] sm:$0xff] }
 0x123   : > { %6958 = vmatprep.subr.bf16.mxu0 %v9342_v57  ;;  %v9790_v57 = vcombine.high %v863_v36, %v871_v48  ;;  %v855_v2 = vld [vmem:[%s10663_s8 + $0x1248] sm:$0xff] }
 0x124   : > { %7028 = vmatpush2.bf16.msra.mxu1 %v9613_v53  ;;  %v10061_v53 = vcombine.low %v1135_v37, %v1143_v38  ;;  %v1103_v5 = vld [vmem:[%s10663_s8 + $0x1a08] sm:$0xff] }
 0x125   : > { %7029 = vmatprep.subr.bf16.mxu1 %v9598_v0  ;;  %v10046_v0 = vcombine.high %v1119_v49, %v1127_v50  ;;  %v1111_v6 = vld [vmem:[%s10663_s8 + $0x1a48] sm:$0xff] }
 0x126   : > { %6959 = vmatpush2.bf16.msra.mxu0 %v9341_v7  ;;  %v9789_v7 = vcombine.low %v863_v36, %v871_v48  ;;  %v831_v15 = vld [vmem:[%s10663_s8 + $0x1188] sm:$0xff] }
 0x127   : > { %6960 = vmatprep.subr.bf16.mxu0 %v9326_v13  ;;  %v9774_v13 = vcombine.high %v847_v1, %v855_v2  ;;  %v839_v16 = vld [vmem:[%s10663_s8 + $0x11c8] sm:$0xff] }
 0x128   : > { %7030 = vmatpush2.bf16.msra.mxu1 %v9597_v10  ;;  %v10045_v10 = vcombine.low %v1119_v49, %v1127_v50  ;;  %v1087_v19 = vld [vmem:[%s10663_s8 + $0x1988] sm:$0xff] }
 0x129   : > { %7031 = vmatprep.subr.bf16.mxu1 %v9582_v14  ;;  %v10030_v14 = vcombine.high %v1103_v5, %v1111_v6  ;;  %v1095_v20 = vld [vmem:[%s10663_s8 + $0x19c8] sm:$0xff] }
 0x12a   : > { %6961 = vmatpush2.bf16.msra.mxu0 %v9325_v23  ;;  %v9773_v23 = vcombine.low %v847_v1, %v855_v2  ;;  %v815_v30 = vld [vmem:[%s10663_s8 + $0x1108] sm:$0xff] }
 0x12b   : > { %7072 = vmatprep.subr.bf16.mxu0 %v9822_v26  ;;  %v9758_v26 = vcombine.high %v831_v15, %v839_v16  ;;  %v823_v60 = vld [vmem:[%s10663_s8 + $0x1148] sm:$0xff] }
 0x12c   : > { %7032 = vmatpush2.bf16.msra.mxu1 %v9581_v24  ;;  %v10029_v24 = vcombine.low %v1103_v5, %v1111_v6  ;;  %v1071_v37 = vld [vmem:[%s10663_s8 + $0x1908] sm:$0xff] }
 0x12d   : > { %7143 = vmatprep.subr.bf16.mxu1 %v10078_v28  ;;  %6963 = vmatmul.mubr.bf16.vlgmr.msra.gmra.mxu0 %v10760_v21  ;;  %v10014_v28 = vcombine.high %v1087_v19, %v1095_v20  ;;  %v1079_v38 = vld [vmem:[%s10663_s8 + $0x1948] sm:$0xff] }
 0x12e   : > { %7073 = vmatpush1.bf16.msra.mxu0 %v9821_v31  ;;  %6972 = vmatprep.mubr.bf16.mxu0 %v10769_v32  ;;  %v9757_v31 = vcombine.low %v831_v15, %v839_v16  ;;  %v799_v36 = vld [vmem:[%s10663_s8 + $0x1088] sm:$0xff] }
 0x12f   : > { %7034 = vmatmul.mubr.bf16.vlgmr.msra.gmra.mxu1 %v10765_v25  ;;  %7074 = vmatprep.subr.bf16.mxu0 %v9806_v41  ;;  %v9742_v41 = vcombine.high %v815_v30, %v823_v60  ;;  %v807_v48 = vld [vmem:[%s10663_s8 + $0x10c8] sm:$0xff] }
 0x130   : > { %7144 = vmatpush1.bf16.msra.mxu1 %v10077_v59  ;;  %7043 = vmatprep.mubr.bf16.mxu1 %v10774_v33  ;;  %v10013_v59 = vcombine.low %v1087_v19, %v1095_v20  ;;  %v1055_v49 = vld [vmem:[%s10663_s8 + $0x1888] sm:$0xff] }
 0x131   : > { %7145 = vmatprep.subr.bf16.mxu1 %v10062_v44  ;;  %v9998_v44 = vcombine.high %v1071_v37, %v1079_v38  ;;  %v1063_v50 = vld [vmem:[%s10663_s8 + $0x18c8] sm:$0xff] }
 0x132   : > { %7075 = vmatpush1.bf16.msra.mxu0 %v9805_v52  ;;  %v9741_v52 = vcombine.low %v815_v30, %v823_v60  ;;  %v783_v1 = vld [vmem:[%s10663_s8 + $0x1008] sm:$0xff] }
 0x133   : > { %7076 = vmatprep.subr.bf16.mxu0 %v9790_v57  ;;  %v9726_v57 = vcombine.high %v799_v36, %v807_v48  ;;  %v791_v2 = vld [vmem:[%s10663_s8 + $0x1048] sm:$0xff] }
 0x134   : > { %7146 = vmatpush1.bf16.msra.mxu1 %v10061_v53  ;;  %v9997_v53 = vcombine.low %v1071_v37, %v1079_v38  ;;  %v1039_v5 = vld [vmem:[%s10663_s8 + $0x1808] sm:$0xff] }
 0x135   : > { %7147 = vmatprep.subr.bf16.mxu1 %v10046_v0  ;;  %6973 = vmatmul.mubr.bf16.gmra.mxu0 %v10782_v42  ;;  %v9982_v0 = vcombine.high %v1055_v49, %v1063_v50  ;;  %v1047_v6 = vld [vmem:[%s10663_s8 + $0x1848] sm:$0xff] }
 0x136   : > { %7077 = vmatpush1.bf16.msra.mxu0 %v9789_v7  ;;  %6982 = vmatprep.mubr.bf16.mxu0 %v10789_v56  ;;  %v9725_v7 = vcombine.low %v799_v36, %v807_v48  ;;  %v1023_v15 = vld [vmem:[%s10663_s8 + $0x1788] sm:$0xff] }
 0x137   : > { %7044 = vmatmul.mubr.bf16.gmra.mxu1 %v10785_v46  ;;  %7078 = vmatprep.subr.bf16.mxu0 %v9774_v13  ;;  %v9710_v13 = vcombine.high %v783_v1, %v791_v2  ;;  %v1031_v16 = vld [vmem:[%s10663_s8 + $0x17c8] sm:$0xff] }
 0x138   : > { %7148 = vmatpush1.bf16.msra.mxu1 %v10045_v10  ;;  %7053 = vmatprep.mubr.bf16.mxu1 %v10794_v62  ;;  %v9981_v10 = vcombine.low %v1055_v49, %v1063_v50  ;;  %v1279_v19 = vld [vmem:[%s10663_s8 + $0x1f88] sm:$0xff] }
 0x139   : > { %7149 = vmatprep.subr.bf16.mxu1 %v10030_v14  ;;  %v9966_v14 = vcombine.high %v1039_v5, %v1047_v6  ;;  %v1287_v20 = vld [vmem:[%s10663_s8 + $0x1fc8] sm:$0xff] }
 0x13a   : > { %7079 = vmatpush1.bf16.msra.mxu0 %v9773_v23  ;;  %v9709_v23 = vcombine.low %v783_v1, %v791_v2  ;;  %v1007_v30 = vld [vmem:[%s10663_s8 + $0x1708] sm:$0xff] }
 0x13b   : > { %7080 = vmatprep.subr.bf16.mxu0 %v9758_v26  ;;  %v9950_v26 = vcombine.high %v1023_v15, %v1031_v16  ;;  %v1015_v60 = vld [vmem:[%s10663_s8 + $0x1748] sm:$0xff] }
 0x13c   : > { %7150 = vmatpush1.bf16.msra.mxu1 %v10029_v24  ;;  %v9965_v24 = vcombine.low %v1039_v5, %v1047_v6  ;;  %v1263_v37 = vld [vmem:[%s10663_s8 + $0x1f08] sm:$0xff] }
 0x13d   : > { %7151 = vmatprep.subr.bf16.mxu1 %v10014_v28  ;;  %6983 = vmatmul.mubr.bf16.gmra.mxu0 %v10802_v8  ;;  %v10206_v28 = vcombine.high %v1279_v19, %v1287_v20  ;;  %v1271_v38 = vld [vmem:[%s10663_s8 + $0x1f48] sm:$0xff] }
 0x13e   : > { %7081 = vmatpush1.bf16.msra.mxu0 %v9757_v31  ;;  %6992 = vmatprep.mubr.bf16.mxu0 %v10809_v18  ;;  %v9949_v31 = vcombine.low %v1023_v15, %v1031_v16  ;;  %v991_v36 = vld [vmem:[%s10663_s8 + $0x1688] sm:$0xff] }
 0x13f   : > { %7054 = vmatmul.mubr.bf16.gmra.mxu1 %v10805_v11  ;;  %7082 = vmatprep.subr.bf16.mxu0 %v9742_v41  ;;  %v9934_v41 = vcombine.high %v1007_v30, %v1015_v60  ;;  %v999_v48 = vld [vmem:[%s10663_s8 + $0x16c8] sm:$0xff] }
 0x140   : > { %7152 = vmatpush1.bf16.msra.mxu1 %v10013_v59  ;;  %7063 = vmatprep.mubr.bf16.mxu1 %v10814_v22  ;;  %v10205_v59 = vcombine.low %v1279_v19, %v1287_v20  ;;  %v1247_v49 = vld [vmem:[%s10663_s8 + $0x1e88] sm:$0xff] }
 0x141   : > { %7153 = vmatprep.subr.bf16.mxu1 %v9998_v44  ;;  %v10190_v44 = vcombine.high %v1263_v37, %v1271_v38  ;;  %v1255_v50 = vld [vmem:[%s10663_s8 + $0x1ec8] sm:$0xff] }
 0x142   : > { %7083 = vmatpush1.bf16.msra.mxu0 %v9741_v52  ;;  %v9933_v52 = vcombine.low %v1007_v30, %v1015_v60  ;;  %v975_v1 = vld [vmem:[%s10663_s8 + $0x1608] sm:$0xff] }
 0x143   : > { %7084 = vmatprep.subr.bf16.mxu0 %v9726_v57  ;;  %v9918_v57 = vcombine.high %v991_v36, %v999_v48  ;;  %v983_v2 = vld [vmem:[%s10663_s8 + $0x1648] sm:$0xff] }
 0x144   : > { %7154 = vmatpush1.bf16.msra.mxu1 %v9997_v53  ;;  %v10189_v53 = vcombine.low %v1263_v37, %v1271_v38  ;;  %v1231_v5 = vld [vmem:[%s10663_s8 + $0x1e08] sm:$0xff] }
 0x145   : > { %7155 = vmatprep.subr.bf16.mxu1 %v9982_v0  ;;  %6993 = vmatmul.mubr.bf16.gmra.mxu0 %v10822_v55  ;;  %v10174_v0 = vcombine.high %v1247_v49, %v1255_v50  ;;  %v1239_v6 = vld [vmem:[%s10663_s8 + $0x1e48] sm:$0xff]  ;;  %v1136_v55 = vld [vmem:[%s10663_s8 + $0x1b10] sm:$0xff] }
 0x146   : > { %7085 = vmatpush1.bf16.msra.mxu0 %v9725_v7  ;;  %7104 = vmatprep.mubr.bf16.mxu0 %v10839_v43  ;;  %v9917_v7 = vcombine.low %v991_v36, %v999_v48  ;;  %v959_v15 = vld [vmem:[%s10663_s8 + $0x1588] sm:$0xff]  ;;  %v488_v43 = vld [vmem:[%s10663_s8 + $0x6d0] sm:$0xff] }
 0x147   : > { %7064 = vmatmul.mubr.bf16.gmra.mxu1 %v10829_v34  ;;  %7086 = vmatprep.subr.bf16.mxu0 %v9710_v13  ;;  %v9902_v13 = vcombine.high %v975_v1, %v983_v2  ;;  %v967_v16 = vld [vmem:[%s10663_s8 + $0x15c8] sm:$0xff]  ;;  %v736_v34 = vld [vmem:[%s10663_s8 + $0xe90] sm:$0xff] }
 0x148   : > { %7156 = vmatpush1.bf16.msra.mxu1 %v9981_v10  ;;  %7175 = vmatprep.mubr.bf16.mxu1 %v10846_v47  ;;  %v10173_v10 = vcombine.low %v1247_v49, %v1255_v50  ;;  %v1215_v19 = vld [vmem:[%s10663_s8 + $0x1d88] sm:$0xff] }
 0x149   : > { %7157 = vmatprep.subr.bf16.mxu1 %v9966_v14  ;;  %v10158_v14 = vcombine.high %v1231_v5, %v1239_v6  ;;  %v1223_v20 = vld [vmem:[%s10663_s8 + $0x1dc8] sm:$0xff] }
 0x14a   : > { %7087 = vmatpush1.bf16.msra.mxu0 %v9709_v23  ;;  %v9901_v23 = vcombine.low %v975_v1, %v983_v2  ;;  %v943_v30 = vld [vmem:[%s10663_s8 + $0x1508] sm:$0xff] }
 0x14b   : > { %7088 = vmatprep.subr.bf16.mxu0 %v9950_v26  ;;  %v9886_v26 = vcombine.high %v959_v15, %v967_v16  ;;  %v951_v60 = vld [vmem:[%s10663_s8 + $0x1548] sm:$0xff] }
 0x14c   : > { %7158 = vmatpush1.bf16.msra.mxu1 %v9965_v24  ;;  %v10157_v24 = vcombine.low %v1231_v5, %v1239_v6  ;;  %v1199_v37 = vld [vmem:[%s10663_s8 + $0x1d08] sm:$0xff] }
 0x14d   : > { %7159 = vmatprep.subr.bf16.mxu1 %v10206_v28  ;;  %v10142_v28 = vcombine.high %v1215_v19, %v1223_v20  ;;  %v1207_v38 = vld [vmem:[%s10663_s8 + $0x1d48] sm:$0xff] }
 0x14e   : > { %7089 = vmatpush2.bf16.msra.mxu0 %v9949_v31  ;;  %v9885_v31 = vcombine.low %v959_v15, %v967_v16  ;;  %v927_v36 = vld [vmem:[%s10663_s8 + $0x1488] sm:$0xff]  ;;  %v384_v15 = vld [vmem:[%s10663_s8 + $0x390] sm:$0xff] }
 0x14f   : > { %7090 = vmatprep.subr.bf16.mxu0 %v9934_v41  ;;  %v9870_v41 = vcombine.high %v943_v30, %v951_v60  ;;  %v935_v48 = vld [vmem:[%s10663_s8 + $0x14c8] sm:$0xff]  ;;  %v392_v16 = vld [vmem:[%s10663_s8 + $0x3d0] sm:$0xff] }
 0x150   : > { %7160 = vmatpush2.bf16.msra.mxu1 %v10205_v59  ;;  %v10141_v59 = vcombine.low %v1215_v19, %v1223_v20  ;;  %v1183_v49 = vld [vmem:[%s10663_s8 + $0x1c88] sm:$0xff]  ;;  %v640_v19 = vld [vmem:[%s10663_s8 + $0xb90] sm:$0xff] }
 0x151   : > { %7161 = vmatprep.subr.bf16.mxu1 %v10190_v44  ;;  %v10126_v44 = vcombine.high %v1199_v37, %v1207_v38  ;;  %v1191_v50 = vld [vmem:[%s10663_s8 + $0x1cc8] sm:$0xff]  ;;  %v648_v20 = vld [vmem:[%s10663_s8 + $0xbd0] sm:$0xff] }
 0x152   : > { %7091 = vmatpush2.bf16.msra.mxu0 %v9933_v52  ;;  %v9869_v52 = vcombine.low %v943_v30, %v951_v60  ;;  %v911_v1 = vld [vmem:[%s10663_s8 + $0x1408] sm:$0xff]  ;;  %v368_v30 = vld [vmem:[%s10663_s8 + $0x310] sm:$0xff] }
 0x153   : > { %7092 = vmatprep.subr.bf16.mxu0 %v9918_v57  ;;  %v9854_v57 = vcombine.high %v927_v36, %v935_v48  ;;  %v919_v2 = vld [vmem:[%s10663_s8 + $0x1448] sm:$0xff]  ;;  %v376_v60 = vld [vmem:[%s10663_s8 + $0x350] sm:$0xff] }
 0x154   : > { %7162 = vmatpush2.bf16.msra.mxu1 %v10189_v53  ;;  %v10125_v53 = vcombine.low %v1199_v37, %v1207_v38  ;;  %v1167_v5 = vld [vmem:[%s10663_s8 + $0x1c08] sm:$0xff]  ;;  %v624_v37 = vld [vmem:[%s10663_s8 + $0xb10] sm:$0xff] }
 0x155   : > { %7163 = vmatprep.subr.bf16.mxu1 %v10174_v0  ;;  %v10110_v0 = vcombine.high %v1183_v49, %v1191_v50  ;;  %v1175_v6 = vld [vmem:[%s10663_s8 + $0x1c48] sm:$0xff]  ;;  %v632_v38 = vld [vmem:[%s10663_s8 + $0xb50] sm:$0xff] }
 0x156   : > { %7093 = vmatpush2.bf16.msra.mxu0 %v9917_v7  ;;  %v9853_v7 = vcombine.low %v927_v36, %v935_v48  ;;  %v352_v36 = vld [vmem:[%s10663_s8 + $0x290] sm:$0xff] }
 0x157   : > { %7094 = vmatprep.subr.bf16.mxu0 %v9902_v13  ;;  %v9838_v13 = vcombine.high %v911_v1, %v919_v2  ;;  %v360_v48 = vld [vmem:[%s10663_s8 + $0x2d0] sm:$0xff] }
 0x158   : > { %7164 = vmatpush2.bf16.msra.mxu1 %v10173_v10  ;;  %v10109_v10 = vcombine.low %v1183_v49, %v1191_v50  ;;  %v608_v50 = vld [vmem:[%s10663_s8 + $0xa90] sm:$0xff] }
 0x159   : > { %7165 = vmatprep.subr.bf16.mxu1 %v10158_v14  ;;  %v10094_v14 = vcombine.high %v1167_v5, %v1175_v6 }
 0x15a   : > { %7095 = vmatpush2.bf16.msra.mxu0 %v9901_v23  ;;  %v9837_v23 = vcombine.low %v911_v1, %v919_v2  ;;  %v9551_v1 = vcombine.low %v624_v37, %v632_v38  ;;  %v9280_v2 = vcombine.high %v352_v36, %v360_v48 }
 0x15b   : > { %7096 = vmatprep.subr.bf16.mxu0 %v9886_v26  ;;  %v9312_v26 = vcombine.high %v384_v15, %v392_v16 }
 0x15c   : > { %7166 = vmatpush2.bf16.msra.mxu1 %v10157_v24  ;;  %v10093_v24 = vcombine.low %v1167_v5, %v1175_v6 }
 0x15d   : > { %7167 = vmatprep.subr.bf16.mxu1 %v10142_v28  ;;  %v9568_v28 = vcombine.high %v640_v19, %v648_v20 }
 0x15e   : > { %7097 = vmatpush2.bf16.msra.mxu0 %v9885_v31  ;;  %v9311_v31 = vcombine.low %v384_v15, %v392_v16  ;;  %v600_v15 = vld [vmem:[%s10663_s8 + $0xa50] sm:$0xff] }
 0x15f   : > { %7098 = vmatprep.subr.bf16.mxu0 %v9870_v41  ;;  %v9296_v41 = vcombine.high %v368_v30, %v376_v60 }
 0x160   : > { %7168 = vmatpush2.bf16.msra.mxu1 %v10141_v59  ;;  %v9567_v59 = vcombine.low %v640_v19, %v648_v20  ;;  %v9279_v19 = vcombine.low %v352_v36, %v360_v48 }
 0x161   : > { %7169 = vmatprep.subr.bf16.mxu1 %v10126_v44  ;;  %v9552_v44 = vcombine.high %v624_v37, %v632_v38  ;;  %v576_v37 = vld [vmem:[%s10663_s8 + $0x990] sm:$0xff] }
 0x162   : > { %7099 = vmatpush2.bf16.msra.mxu0 %v9869_v52  ;;  %v616_v52 = vld [vmem:[%s10663_s8 + $0xad0] sm:$0xff] }
 0x163   : > { %7100 = vmatprep.subr.bf16.mxu0 %v9854_v57  ;;  %v9295_v57 = vcombine.low %v368_v30, %v376_v60  ;;  %v9536_v6 = vcombine.high %v608_v50, %v616_v52  ;;  %v320_v30 = vld [vmem:[%s10663_s8 + $0x190] sm:$0xff] }
 0x164   : > { %7170 = vmatpush2.bf16.msra.mxu1 %v10125_v53  ;;  %v328_v60 = vld [vmem:[%s10663_s8 + $0x1d0] sm:$0xff] }
 0x165   : > { %7171 = vmatprep.subr.bf16.mxu1 %v10110_v0  ;;  %v584_v38 = vld [vmem:[%s10663_s8 + $0x9d0] sm:$0xff]  ;;  %v9248_v36 = vcombine.high %v320_v30, %v328_v60 }
 0x166   : > { %7101 = vmatpush2.bf16.msra.mxu0 %v9853_v7  ;;  %v336_v7 = vld [vmem:[%s10663_s8 + $0x210] sm:$0xff] }
 0x167   : > { %7102 = vmatprep.subr.bf16.mxu0 %v9838_v13 }
 0x168   : > { %7172 = vmatpush2.bf16.msra.mxu1 %v10109_v10  ;;  %v11081_v49 = vpop.f32.mrf.mxu0  ;;  %v344_v10 = vld [vmem:[%s10663_s8 + $0x250] sm:$0xff] }
 0x169   : > { %7173 = vmatprep.subr.bf16.mxu1 %v10094_v14  ;;  %v592_v14 = vld [vmem:[%s10663_s8 + $0xa10] sm:$0xff] }
 0x16a   : > { %7103 = vmatpush2.bf16.msra.mxu0 %v9837_v23  ;;  %v11086_v53 = vpop.f32.mrf.mxu1  ;;  %v11089_v0 = vpop.f32.mrf.mxu0  ;;  %v9535_v23 = vcombine.low %v608_v50, %v616_v52  ;;  %v9504_v50 = vcombine.high %v576_v37, %v584_v38  ;;  %v304_v52 = vld [vmem:[%s10663_s8 + $0x110] sm:$0xff] }
 0x16b   : > { %7214 = vmatprep.subr.bf16.mxu0 %v9312_v26 }
 0x16c   : > { %7174 = vmatpush2.bf16.msra.mxu1 %v10093_v24  ;;  %v11091_v5 = vpop.f32.mrf.mxu1  ;;  %v11096_v13 = vpop.f32.mrf.mxu0  ;;  %v9264_v24 = vcombine.high %v336_v7, %v344_v10 }
 0x16d   : > { %7285 = vmatprep.subr.bf16.mxu1 %v9568_v28  ;;  %7105 = vmatmul.mubr.bf16.vlgmr.msra.gmra.mxu0 %v10888_v27  ;;  %v9520_v28 = vcombine.high %v592_v14, %v600_v15  ;;  %v504_v27 = vld [vmem:[%s10663_s8 + $0x750] sm:$0xff] }
 0x16e   : > { %7215 = vmatpush1.bf16.msra.mxu0 %v9311_v31  ;;  %7114 = vmatprep.mubr.bf16.mxu0 %v10895_v40  ;;  %v11101_v16 = vpop.f32.mrf.mxu1  ;;  %v11103_v20 = vpop.f32.mrf.mxu0 }
 0x16f   : > { %7176 = vmatmul.mubr.bf16.vlgmr.msra.gmra.mxu1 %v10893_v54  ;;  %7216 = vmatprep.subr.bf16.mxu0 %v9296_v41  ;;  %v496_v54 = vld [vmem:[%s10663_s8 + $0x710] sm:$0xff] }
 0x170   : > { %7286 = vmatpush1.bf16.msra.mxu1 %v9567_v59  ;;  %7185 = vmatprep.mubr.bf16.mxu1 %v10902_v45  ;;  %v11105_v26 = vpop.f32.mrf.mxu1  ;;  %v9263_v59 = vcombine.low %v336_v7, %v344_v10  ;;  %v9247_v10 = vcombine.low %v320_v30, %v328_v60  ;;  %v552_v30 = vld [vmem:[%s10663_s8 + $0x8d0] sm:$0xff] }
 0x171   : > { %7287 = vmatprep.subr.bf16.mxu1 %v9552_v44  ;;  %v11112_v31 = vpop.f32.mrf.mxu0  ;;  %v9519_v44 = vcombine.low %v592_v14, %v600_v15  ;;  %v9503_v15 = vcombine.low %v576_v37, %v584_v38  ;;  %v512_v45 = vld [vmem:[%s10663_s8 + $0x790] sm:$0xff] }
 0x172   : > { %7217 = vmatpush1.bf16.msra.mxu0 %v9295_v57  ;;  %v11115_v41 = vpop.f32.mrf.mxu1  ;;  %v312_v57 = vld [vmem:[%s10663_s8 + $0x150] sm:$0xff] }
 0x173   : > { %7218 = vmatprep.subr.bf16.mxu0 %v9280_v2  ;;  %v11117_v48 = vpop.f32.mrf.mxu0  ;;  %v560_v2 = vld [vmem:[%s10663_s8 + $0x910] sm:$0xff]  ;;  %v9231_v37 = vcombine.low %v304_v52, %v312_v57 }
 0x174   : > { %7288 = vmatpush1.bf16.msra.mxu1 %v9551_v1  ;;  %v11122_v1 = vpop.f32.mrf.mxu1 }
 0x175   : > { %7289 = vmatprep.subr.bf16.mxu1 %v9536_v6  ;;  %7115 = vmatmul.mubr.bf16.gmra.mxu0 %v10909_v61  ;;  %v568_v6 = vld [vmem:[%s10663_s8 + $0x950] sm:$0xff]  ;;  %v11127_v7 = vpop.f32.mrf.mxu0 }
 0x176   : > { %7219 = vmatpush1.bf16.msra.mxu0 %v9279_v19  ;;  %7124 = vmatprep.mubr.bf16.mxu0 %v10915_v12  ;;  %v11129_v14 = vpop.f32.mrf.mxu1  ;;  %v9232_v19 = vcombine.high %v304_v52, %v312_v57  ;;  %v280_v61 = vld [vmem:[%s10663_s8 + $0x50] sm:$0xff] }
 0x177   : > { %7186 = vmatmul.mubr.bf16.gmra.mxu1 %v10913_v4  ;;  %7220 = vmatprep.subr.bf16.mxu0 %v9264_v24  ;;  %v9488_v24 = vcombine.high %v560_v2, %v568_v6  ;;  %v544_v4 = vld [vmem:[%s10663_s8 + $0x890] sm:$0xff] }
 0x178   : > { %7290 = vmatpush1.bf16.msra.mxu1 %v9535_v23  ;;  %7195 = vmatprep.mubr.bf16.mxu1 %v10922_v17  ;;  %v11131_v23 = vpop.f32.mrf.mxu0  ;;  %v296_v17 = vld [vmem:[%s10663_s8 + $0xd0] sm:$0xff]  ;;  %v11135_v12 = vpop.f32.mrf.mxu1 }
 0x179   : > { %7291 = vmatprep.subr.bf16.mxu1 %v9520_v28  ;;  %v288_v28 = vld [vmem:[%s10663_s8 + $0x90] sm:$0xff] }
 0x17a   : > { %7221 = vmatpush1.bf16.msra.mxu0 %v9263_v59  ;;  %v11143_v38 = vpop.f32.mrf.mxu1  ;;  %v9487_v59 = vcombine.low %v560_v2, %v568_v6  ;;  %v528_v52 = vld [vmem:[%s10663_s8 + $0x810] sm:$0xff]  ;;  %v9215_v2 = vcombine.low %v288_v28, %v296_v17 }
 0x17b   : > { %7222 = vmatprep.subr.bf16.mxu0 %v9248_v36  ;;  %v11140_v60 = vpop.f32.mrf.mxu0  ;;  %v536_v57 = vld [vmem:[%s10663_s8 + $0x850] sm:$0xff] }
 0x17c   : > { %7292 = vmatpush1.bf16.msra.mxu1 %v9519_v44  ;;  %v9216_v44 = vcombine.high %v288_v28, %v296_v17  ;;  %v776_v17 = vld [vmem:[%s10663_s8 + $0xfd0] sm:$0xff] }
 0x17d   : > { %7293 = vmatprep.subr.bf16.mxu1 %v9504_v50  ;;  %7125 = vmatmul.mubr.bf16.gmra.mxu0 %v10928_v29  ;;  %v11145_v36 = vpop.f32.mrf.mxu0  ;;  %v9472_v50 = vcombine.high %v544_v4, %v552_v30  ;;  %v272_v29 = vld [vmem:[%s10663_s8 + $0x10] sm:$0xff] }
 0x17e   : > { %7223 = vmatpush1.bf16.msra.mxu0 %v9247_v10  ;;  %7134 = vmatprep.mubr.bf16.mxu0 %v10935_v35  ;;  %v11150_v10 = vpop.f32.mrf.mxu1 }
 0x17f   : > { %7196 = vmatmul.mubr.bf16.gmra.mxu1 %v10933_v39  ;;  %7224 = vmatprep.subr.bf16.mxu0 %v9232_v19  ;;  %v9471_v19 = vcombine.low %v544_v4, %v552_v30  ;;  %v9456_v39 = vcombine.high %v528_v52, %v536_v57  ;;  %v9199_v4 = vcombine.low %v272_v29, %v280_v61 }
 0x180   : > { %7294 = vmatpush1.bf16.msra.mxu1 %v9503_v15  ;;  %7205 = vmatprep.mubr.bf16.mxu1 %v10942_v51  ;;  %v11155_v15 = vpop.f32.mrf.mxu0  ;;  %v11157_v6 = vpop.f32.mrf.mxu1  ;;  %v520_v51 = vld [vmem:[%s10663_s8 + $0x7d0] sm:$0xff] }
 0x181   : > { %7295 = vmatprep.subr.bf16.mxu1 %v9488_v24  ;;  %v9200_v24 = vcombine.high %v272_v29, %v280_v61  ;;  %v760_v61 = vld [vmem:[%s10663_s8 + $0xf50] sm:$0xff] }
 0x182   : > { %7225 = vmatpush1.bf16.msra.mxu0 %v9231_v37  ;;  %v11159_v35 = vpop.f32.mrf.mxu0  ;;  %v11163_v40 = vpop.f32.mrf.mxu1  ;;  %v768_v37 = vld [vmem:[%s10663_s8 + $0xf90] sm:$0xff] }
 0x183   : > { %7226 = vmatprep.subr.bf16.mxu0 %v9216_v44  ;;  %v9440_v44 = vcombine.high %v512_v45, %v520_v51 }
 0x184   : > { %7296 = vmatpush1.bf16.msra.mxu1 %v9487_v59  ;;  %v11168_v28 = vpop.f32.mrf.mxu0  ;;  %v11171_v30 = vpop.f32.mrf.mxu1  ;;  %v9455_v59 = vcombine.low %v528_v52, %v536_v57  ;;  %v9439_v52 = vcombine.low %v512_v45, %v520_v51 }
 0x185   : > { %7297 = vmatprep.subr.bf16.mxu1 %v9472_v50  ;;  %7135 = vmatmul.mubr.bf16.gmra.mxu0 %v10948_v3  ;;  %v9696_v3 = vcombine.high %v768_v37, %v776_v17 }
 0x186   : > { %7227 = vmatpush1.bf16.msra.mxu0 %v9215_v2  ;;  %v11173_v50 = vpop.f32.mrf.mxu0  ;;  %v11177_v47 = vpop.f32.mrf.mxu1  ;;  %7246 = vmatprep.mubr.bf16.mxu0 %v10705_v58  ;;  %v752_v2 = vld [vmem:[%s10663_s8 + $0xf10] sm:$0xff] }
 0x187   : > { %7206 = vmatmul.mubr.bf16.gmra.mxu1 %v10953_v9  ;;  %7228 = vmatprep.subr.bf16.mxu0 %v9200_v24  ;;  %13559 = vst [vmem:[#allocation32_spill] sm:$0xff] %v11177_v47  ;;  %v9680_v58 = vcombine.high %v752_v2, %v760_v61  ;;  %v480_v9 = vld [vmem:[%s10663_s8 + $0x690] sm:$0xff]  ;;  %v9679_v45 = vcombine.low %v752_v2, %v760_v61 }
 0x188   : > { %7298 = vmatpush1.bf16.msra.mxu1 %v9471_v19  ;;  %v6714_v29 = vpop.f32.mrf.mxu0  ;;  %7317 = vmatprep.mubr.bf16.mxu1 %v10715_v63  ;;  %v6785_v57 = vpop.f32.mrf.mxu1  ;;  %v9424_v19 = vcombine.high %v496_v54, %v504_v27  ;;  %v744_v47 = vld [vmem:[%s10663_s8 + $0xed0] sm:$0xff]  ;;  %v9408_v51 = vcombine.high %v480_v9, %v488_v43 }
 0x189   : > { %7299 = vmatprep.subr.bf16.mxu1 %v9456_v39  ;;  %v9695_v39 = vcombine.low %v768_v37, %v776_v17  ;;  %v464_v37 = vld [vmem:[%s10663_s8 + $0x610] sm:$0xff]  ;;  %v9407_v57 = vcombine.low %v480_v9, %v488_v43 }
 0x18a   : > { %7229 = vmatpush1.bf16.msra.mxu0 %v9199_v4  ;;  %v6715_v24 = vpop.f32.mrf.mxu0  ;;  %v6786_v29 = vpop.f32.mrf.mxu1  ;;  %v9423_v4 = vcombine.low %v496_v54, %v504_v27  ;;  %v472_v17 = vld [vmem:[%s10663_s8 + $0x650] sm:$0xff] }
 0x18b   : > { %7230 = vmatprep.subr.bf16.mxu0 %v9440_v44  ;;  %v728_v44 = vld [vmem:[%s10663_s8 + $0xe50] sm:$0xff]  ;;  %v9392_v27 = vcombine.high %v464_v37, %v472_v17  ;;  %v1298_v24 = vlaneseq }
 0x18c   : > { %7300 = vmatpush1.bf16.msra.mxu1 %v9455_v59  ;;  %v720_v59 = vld [vmem:[%s10663_s8 + $0xe10] sm:$0xff] }
 0x18d   : > { %7301 = vmatprep.subr.bf16.mxu1 %v9696_v3  ;;  %v9664_v3 = vcombine.high %v736_v34, %v744_v47  ;;  %v9648_v54 = vcombine.high %v720_v59, %v728_v44  ;;  %v448_v2 = vld [vmem:[%s10663_s8 + $0x590] sm:$0xff]  ;;  %v9647_v43 = vcombine.low %v720_v59, %v728_v44 }
 0x18e   : > { %7231 = vmatpush2.bf16.msra.mxu0 %v9439_v52  ;;  %v9663_v52 = vcombine.low %v736_v34, %v744_v47  ;;  %v704_v61 = vld [vmem:[%s10663_s8 + $0xd90] sm:$0xff] }
 0x18f   : > { %7232 = vmatprep.subr.bf16.mxu0 %v9424_v19  ;;  %v9391_v19 = vcombine.low %v464_v37, %v472_v17  ;;  %v432_v47 = vld [vmem:[%s10663_s8 + $0x510] sm:$0xff]  ;;  %v11200_v17 = vshrl.u32 %v1298_v24, 7 }
 0x190   : > { %7302 = vmatpush2.bf16.msra.mxu1 %v9695_v39  ;;  %v712_v39 = vld [vmem:[%s10663_s8 + $0xdd0] sm:$0xff] }
 0x191   : > { %7303 = vmatprep.subr.bf16.mxu1 %v9680_v58  ;;  %v456_v58 = vld [vmem:[%s10663_s8 + $0x5d0] sm:$0xff]  ;;  %v9632_v34 = vcombine.high %v704_v61, %v712_v39 }
 0x192   : > { %7233 = vmatpush2.bf16.msra.mxu0 %v9423_v4  ;;  %v9376_v9 = vcombine.high %v448_v2, %v456_v58  ;;  %v440_v29 = vld [vmem:[%s10663_s8 + $0x550] sm:$0xff] }
 0x193   : > { %7234 = vmatprep.subr.bf16.mxu0 %v9408_v51  ;;  %v688_v4 = vld [vmem:[%s10663_s8 + $0xd10] sm:$0xff]  ;;  %v9375_v51 = vcombine.low %v448_v2, %v456_v58  ;;  %v9360_v37 = vcombine.high %v432_v47, %v440_v29 }
 0x194   : > { %7304 = vmatpush2.bf16.msra.mxu1 %v9679_v45  ;;  %v696_v45 = vld [vmem:[%s10663_s8 + $0xd50] sm:$0xff] }
 0x195   : > { %7305 = vmatprep.subr.bf16.mxu1 %v9664_v3  ;;  %v9631_v3 = vcombine.low %v704_v61, %v712_v39  ;;  %v9616_v59 = vcombine.high %v688_v4, %v696_v45  ;;  %v416_v44 = vld [vmem:[%s10663_s8 + $0x490] sm:$0xff]  ;;  %v9615_v2 = vcombine.low %v688_v4, %v696_v45  ;;  %v13517_v61 = vsub.s32 0, %v11200_v17 }
 0x196   : > { %7235 = vmatpush2.bf16.msra.mxu0 %v9407_v57  ;;  %v424_v57 = vld [vmem:[%s10663_s8 + $0x4d0] sm:$0xff] }
 0x197   : > { %7236 = vmatprep.subr.bf16.mxu0 %v9392_v27  ;;  %v680_v27 = vld [vmem:[%s10663_s8 + $0xcd0] sm:$0xff]  ;;  %v9344_v58 = vcombine.high %v416_v44, %v424_v57 }
 0x198   : > { %7306 = vmatpush2.bf16.msra.mxu1 %v9663_v52  ;;  %v672_v52 = vld [vmem:[%s10663_s8 + $0xc90] sm:$0xff] }
 0x199   : > { %7307 = vmatprep.subr.bf16.mxu1 %v9648_v54  ;;  %v9359_v54 = vcombine.low %v432_v47, %v440_v29  ;;  %v9600_v39 = vcombine.high %v672_v52, %v680_v27  ;;  %v656_v24 = vld [vmem:[%s10663_s8 + $0xc10] sm:$0xff]  ;;  %v9343_v29 = vcombine.low %v416_v44, %v424_v57  ;;  %v9599_v4 = vcombine.low %v672_v52, %v680_v27 }
 0x19a   : > { %7237 = vmatpush2.bf16.msra.mxu0 %v9391_v19  ;;  %v400_v19 = vld [vmem:[%s10663_s8 + $0x410] sm:$0xff]  ;;  %v13560_v44 = vsub.s32 1, %v11200_v17 }
 0x19b   : > { %7238 = vmatprep.subr.bf16.mxu0 %v9376_v9  ;;  %v1294_v9 = vld [vmem:[%s11209_s27] sm:$0xff] }
 0x19c   : > { %7308 = vmatpush2.bf16.msra.mxu1 %v9647_v43  ;;  %v408_v43 = vld [vmem:[%s10663_s8 + $0x450] sm:$0xff]  ;;  %v11225_v57 = vrot.slane %v1294_v9, %v13560_v44 }
 0x19d   : > { %7309 = vmatprep.subr.bf16.mxu1 %v9632_v34  ;;  %v664_v34 = vld [vmem:[%s10663_s8 + $0xc50] sm:$0xff]  ;;  %v9328_v45 = vcombine.high %v400_v19, %v408_v43  ;;  %v9327_v52 = vcombine.low %v400_v19, %v408_v43 }
 0x19e   : > { %7239 = vmatpush2.bf16.msra.mxu0 %v9375_v51  ;;  %v11217_v51 = vrot.slane %v1294_v9, %v13517_v61  ;;  %v1152_v63 = vld [vmem:[%s10663_s8 + $0x1b90] sm:$0xff]  ;;  %v9583_v27 = vcombine.low %v656_v24, %v664_v34  ;;  %v6683_v19 = vadd.f32 %v11089_v0, %v11225_v57 }
 0x19f   : > { %7240 = vmatprep.subr.bf16.mxu0 %v9360_v37  ;;  %v896_v37 = vld [vmem:[%s10663_s8 + $0x1390] sm:$0xff] }
 0x1a0   : > { %7310 = vmatpush2.bf16.msra.mxu1 %v9631_v3  ;;  %v9584_v3 = vcombine.high %v656_v24, %v664_v34  ;;  %v1160_v47 = vld [vmem:[%s10663_s8 + $0x1bd0] sm:$0xff]  ;;  %v6685_v24 = vadd.f32 %v11096_v13, %v11217_v51 }
 0x1a1   : > { %7311 = vmatprep.subr.bf16.mxu1 %v9616_v59  ;;  %v904_v59 = vld [vmem:[%s10663_s8 + $0x13d0] sm:$0xff] }
 0x1a2   : > { %7241 = vmatpush2.bf16.msra.mxu0 %v9359_v54  ;;  %v9824_v54 = vcombine.high %v896_v37, %v904_v59  ;;  %v888_v61 = vld [vmem:[%s10663_s8 + $0x1350] sm:$0xff]  ;;  %v9823_v43 = vcombine.low %v896_v37, %v904_v59 }
 0x1a3   : > { %7242 = vmatprep.subr.bf16.mxu0 %v9344_v58  ;;  %v10080_v58 = vcombine.high %v1152_v63, %v1160_v47  ;;  %v1144_v9 = vld [vmem:[%s10663_s8 + $0x1b50] sm:$0xff] }
 0x1a4   : > { %7312 = vmatpush2.bf16.msra.mxu1 %v9615_v2  ;;  %v6681_v2 = vadd.f32 %v11081_v49, %v11217_v51  ;;  %v10079_v49 = vcombine.low %v1152_v63, %v1160_v47  ;;  %v11246_v44 = vld [vmem:[%s10663_s8 + $0x1a90] sm:$0xff]  ;;  %v10063_v59 = vcombine.low %v1136_v55, %v1144_v9  ;;  %v6754_v63 = vadd.f32 %v11091_v5, %v6683_v19 }
 0x1a5   : > { %7313 = vmatprep.subr.bf16.mxu1 %v9600_v39  ;;  %v880_v39 = vld [vmem:[%s10663_s8 + $0x1310] sm:$0xff]  ;;  %v6687_v47 = vadd.f32 %v11103_v20, %v11225_v57  ;;  %v6691_v20 = vadd.f32 %v11112_v31, %v11217_v51 }
 0x1a6   : > { %7243 = vmatpush2.bf16.msra.mxu0 %v9343_v29  ;;  %v9808_v34 = vcombine.high %v880_v39, %v888_v61  ;;  %v11239_v29 = vld [vmem:[%s10663_s8 + $0x1290] sm:$0xff]  ;;  %v9807_v13 = vcombine.low %v880_v39, %v888_v61 }
 0x1a7   : > { %7244 = vmatprep.subr.bf16.mxu0 %v9328_v45  ;;  %v10064_v45 = vcombine.high %v1136_v55, %v1144_v9  ;;  %v11249_v0 = vld [vmem:[%s10663_s8 + $0x1ad0] sm:$0xff]  ;;  %v6693_v9 = vadd.f32 %v11117_v48, %v11225_v57  ;;  %v6758_v31 = vadd.f32 %v11105_v26, %v6687_v47 }
 0x1a8   : > { %7314 = vmatpush2.bf16.msra.mxu1 %v9599_v4  ;;  %v6752_v4 = vadd.f32 %v11086_v53, %v6681_v2  ;;  %v10048_v5 = vcombine.high %v11246_v44, %v11249_v0  ;;  %v11267_v39 = vld [vmem:[%s10663_s8 + $0x1250] sm:$0xff] }
 0x1a9   : > { %7315 = vmatprep.subr.bf16.mxu1 %v9584_v3  ;;  %v11243_v3 = vld [vmem:[%s10663_s8 + $0x12d0] sm:$0xff] }
 0x1aa   : > { %7245 = vmatpush2.bf16.msra.mxu0 %v9327_v52  ;;  %v9792_v55 = vcombine.high %v11239_v29, %v11243_v3  ;;  %v9791_v48 = vcombine.low %v11239_v29, %v11243_v3  ;;  %v11294_v47 = vld [vmem:[%s10663_s8 + $0x1190] sm:$0xff] }
 0x1ab   : > { %7356 = vmatprep.subr.bf16.mxu0 %v9824_v54 }
 0x1ac   : > { %7316 = vmatpush2.bf16.msra.mxu1 %v9583_v27  ;;  %v6756_v27 = vadd.f32 %v11101_v16, %v6685_v24  ;;  %v11264_v16 = vld [vmem:[%s10663_s8 + $0x1210] sm:$0xff] }
 0x1ad   : > { %7427 = vmatprep.subr.bf16.mxu1 %v10080_v58  ;;  %v6822_v37 = vpop.f32.mrf.mxu0  ;;  %7247 = vmatmul.mubr.bf16.vlgmr.msra.gmra.mxu0 %v10760_v21  ;;  %v11276_v24 = vld [vmem:[%s10663_s8 + $0x1a50] sm:$0xff] }
 0x1ae   : > { %v6823_v53 = vadd.f32 %v6822_v37, %v6752_v4  ;;  %7357 = vmatpush1.bf16.msra.mxu0 %v9823_v43  ;;  %7256 = vmatprep.mubr.bf16.mxu0 %v10769_v32  ;;  %v11273_v43 = vld [vmem:[%s10663_s8 + $0x1a10] sm:$0xff]  ;;  %v10047_v37 = vcombine.low %v11246_v44, %v11249_v0  ;;  %v6764_v0 = vadd.f32 %v11122_v1, %v6693_v9 }
 0x1af   : > { %v6893_v52 = vpop.f32.mrf.mxu1  ;;  %7318 = vmatmul.mubr.bf16.vlgmr.msra.gmra.mxu1 %v10765_v25  ;;  %v6824_v54 = vpop.f32.mrf.mxu0  ;;  %7358 = vmatprep.subr.bf16.mxu0 %v9808_v34  ;;  %v11307_v44 = vld [vmem:[%s10663_s8 + $0x19d0] sm:$0xff] }
 0x1b0   : > { %7428 = vmatpush1.bf16.msra.mxu1 %v10079_v49  ;;  %v6894_v61 = vadd.f32 %v6893_v52, %v6823_v53  ;;  %v6825_v2 = vadd.f32 %v6824_v54, %v6754_v63  ;;  %7327 = vmatprep.mubr.bf16.mxu1 %v10774_v33  ;;  %v9776_v63 = vcombine.high %v11264_v16, %v11267_v39  ;;  %v11304_v52 = vld [vmem:[%s10663_s8 + $0x1990] sm:$0xff] }
 0x1b1   : > { %v6895_v58 = vpop.f32.mrf.mxu1  ;;  %7429 = vmatprep.subr.bf16.mxu1 %v10064_v45  ;;  %v6826_v19 = vpop.f32.mrf.mxu0  ;;  %v6695_v45 = vadd.f32 %v11127_v7, %v11217_v51  ;;  %v10032_v7 = vcombine.high %v11273_v43, %v11276_v24  ;;  %v10031_v54 = vcombine.low %v11273_v43, %v11276_v24  ;;  %v11331_v43 = vld [vmem:[%s10663_s8 + $0x1150] sm:$0xff]  ;;  %v6703_v24 = vadd.f32 %v11145_v36, %v11225_v57 }
 0x1b2   : > { %8918 = vst [vmem:[%s11282_s17] sm:$0xff] %v6894_v61  ;;  %v6896_v49 = vadd.f32 %v6895_v58, %v6825_v2  ;;  %v6827_v34 = vadd.f32 %v6826_v19, %v6756_v27  ;;  %7359 = vmatpush1.bf16.msra.mxu0 %v9807_v13  ;;  %v6762_v13 = vadd.f32 %v11115_v41, %v6691_v20 }
 0x1b3   : > { %v6897_v4 = vpop.f32.mrf.mxu1  ;;  %v6828_v26 = vpop.f32.mrf.mxu0  ;;  %7360 = vmatprep.subr.bf16.mxu0 %v9792_v55  ;;  %v9775_v41 = vcombine.low %v11264_v16, %v11267_v39  ;;  %v6697_v55 = vadd.f32 %v11131_v23, %v11225_v57  ;;  %v6766_v61 = vadd.f32 %v11129_v14, %v6695_v45  ;;  %v10016_v23 = vcombine.high %v11304_v52, %v11307_v44  ;;  %v11328_v14 = vld [vmem:[%s10663_s8 + $0x1110] sm:$0xff] }
 0x1b4   : > { %7430 = vmatpush1.bf16.msra.mxu1 %v10063_v59  ;;  %8919 = vst [vmem:[%s11282_s17 + $0x8] sm:$0xff] %v6896_v49  ;;  %v6898_v29 = vadd.f32 %v6897_v4, %v6827_v34  ;;  %v6829_v3 = vadd.f32 %v6828_v26, %v6758_v31  ;;  %v11301_v59 = vld [vmem:[%s10663_s8 + $0x11d0] sm:$0xff]  ;;  %v6701_v16 = vadd.f32 %v11140_v60, %v11217_v51 }
 0x1b5   : > { %v6899_v53 = vpop.f32.mrf.mxu1  ;;  %7431 = vmatprep.subr.bf16.mxu1 %v10048_v5  ;;  %v6832_v27 = vpop.f32.mrf.mxu0  ;;  %7257 = vmatmul.mubr.bf16.gmra.mxu0 %v10782_v42  ;;  %v9760_v58 = vcombine.high %v11294_v47, %v11301_v59  ;;  %v11337_v49 = vld [vmem:[%s10663_s8 + $0x1910] sm:$0xff]  ;;  %v6768_v60 = vadd.f32 %v11135_v12, %v6697_v55  ;;  %v9759_v36 = vcombine.low %v11294_v47, %v11301_v59 }
 0x1b6   : > { %8934 = vst [vmem:[%s11282_s17 + $0x80] sm:$0xff] %v6898_v29  ;;  %v6900_v5 = vadd.f32 %v6899_v53, %v6829_v3  ;;  %v6833_v20 = vadd.f32 %v6832_v27, %v6762_v13  ;;  %7361 = vmatpush1.bf16.msra.mxu0 %v9791_v48  ;;  %7266 = vmatprep.mubr.bf16.mxu0 %v10789_v56  ;;  %v11340_v34 = vld [vmem:[%s10663_s8 + $0x1950] sm:$0xff] }
 0x1b7   : > { %v6903_v1 = vpop.f32.mrf.mxu1  ;;  %7328 = vmatmul.mubr.bf16.gmra.mxu1 %v10785_v46  ;;  %v6834_v2 = vpop.f32.mrf.mxu0  ;;  %7362 = vmatprep.subr.bf16.mxu0 %v9776_v63  ;;  %v6705_v26 = vadd.f32 %v11155_v15, %v11217_v51  ;;  %v10015_v12 = vcombine.low %v11304_v52, %v11307_v44  ;;  %v9744_v63 = vcombine.high %v11328_v14, %v11331_v43  ;;  %v11354_v13 = vld [vmem:[%s10663_s8 + $0x1090] sm:$0xff] }
 0x1b8   : > { %7432 = vmatpush1.bf16.msra.mxu1 %v10047_v37  ;;  %8935 = vst [vmem:[%s11282_s17 + $0x88] sm:$0xff] %v6900_v5  ;;  %v6835_v39 = vadd.f32 %v6834_v2, %v6764_v0  ;;  %v6904_v9 = vadd.f32 %v6903_v1, %v6833_v20  ;;  %7337 = vmatprep.mubr.bf16.mxu1 %v10794_v62  ;;  %v11364_v59 = vld [vmem:[%s10663_s8 + $0x1890] sm:$0xff] }
 0x1b9   : > { %v6905_v19 = vpop.f32.mrf.mxu1  ;;  %7433 = vmatprep.subr.bf16.mxu1 %v10032_v7  ;;  %v6836_v31 = vpop.f32.mrf.mxu0  ;;  %v6772_v29 = vadd.f32 %v11143_v38, %v6701_v16  ;;  %v10000_v15 = vcombine.high %v11337_v49, %v11340_v34  ;;  %v11361_v7 = vld [vmem:[%s10663_s8 + $0x10d0] sm:$0xff]  ;;  %v6774_v44 = vadd.f32 %v11150_v10, %v6703_v24  ;;  %v9743_v38 = vcombine.low %v11328_v14, %v11331_v43 }
 0x1ba   : > { %8950 = vst [vmem:[%s11282_s17 + $0x100] sm:$0xff] %v6904_v9  ;;  %v6837_v4 = vadd.f32 %v6836_v31, %v6766_v61  ;;  %v6906_v48 = vadd.f32 %v6905_v19, %v6835_v39  ;;  %7363 = vmatpush1.bf16.msra.mxu0 %v9775_v41  ;;  %v11367_v52 = vld [vmem:[%s10663_s8 + $0x18d0] sm:$0xff]  ;;  %v9999_v27 = vcombine.low %v11337_v49, %v11340_v34 }
 0x1bb   : > { %v6907_v45 = vpop.f32.mrf.mxu1  ;;  %v6838_v37 = vpop.f32.mrf.mxu0  ;;  %7364 = vmatprep.subr.bf16.mxu0 %v9760_v58  ;;  %v6707_v41 = vadd.f32 %v11159_v35, %v11225_v57  ;;  %v6776_v5 = vadd.f32 %v11157_v6, %v6705_v26  ;;  %v9728_v1 = vcombine.high %v11354_v13, %v11361_v7  ;;  %v9984_v35 = vcombine.high %v11364_v59, %v11367_v52  ;;  %v784_v6 = vld [vmem:[%s10663_s8 + $0x1010] sm:$0xff] }
 0x1bc   : > { %7434 = vmatpush1.bf16.msra.mxu1 %v10031_v54  ;;  %8951 = vst [vmem:[%s11282_s17 + $0x108] sm:$0xff] %v6906_v48  ;;  %v6839_v47 = vadd.f32 %v6838_v37, %v6768_v60  ;;  %v6908_v3 = vadd.f32 %v6907_v45, %v6837_v4  ;;  %v6711_v61 = vadd.f32 %v11168_v28, %v11217_v51  ;;  %v792_v16 = vld [vmem:[%s10663_s8 + $0x1050] sm:$0xff] }
 0x1bd   : > { %v6909_v53 = vpop.f32.mrf.mxu1  ;;  %7435 = vmatprep.subr.bf16.mxu1 %v10016_v23  ;;  %v6842_v0 = vpop.f32.mrf.mxu0  ;;  %7267 = vmatmul.mubr.bf16.gmra.mxu0 %v10802_v8  ;;  %v9727_v9 = vcombine.low %v11354_v13, %v11361_v7  ;;  %v1040_v19 = vld [vmem:[%s10663_s8 + $0x1810] sm:$0xff]  ;;  %v6778_v28 = vadd.f32 %v11163_v40, %v6707_v41  ;;  %v6713_v51 = vadd.f32 %v11173_v50, %v11225_v57 }
 0x1be   : > { %8966 = vst [vmem:[%s11282_s17 + $0x180] sm:$0xff] %v6908_v3  ;;  %v6843_v54 = vadd.f32 %v6842_v0, %v6772_v29  ;;  %v6910_v55 = vadd.f32 %v6909_v53, %v6839_v47  ;;  %7365 = vmatpush1.bf16.msra.mxu0 %v9759_v36  ;;  %7276 = vmatprep.mubr.bf16.mxu0 %v10809_v18  ;;  %v1048_v14 = vld [vmem:[%s10663_s8 + $0x1850] sm:$0xff]  ;;  %v13562_v29 = vld [vmem:[#allocation32_spill] sm:$0xff] }
 0x1bf   : > { %v6913_v10 = vpop.f32.mrf.mxu1  ;;  %7338 = vmatmul.mubr.bf16.gmra.mxu1 %v10805_v11  ;;  %v6844_v20 = vpop.f32.mrf.mxu0  ;;  %7366 = vmatprep.subr.bf16.mxu0 %v9744_v63  ;;  %v9983_v34 = vcombine.low %v11364_v59, %v11367_v52  ;;  %v9712_v60 = vcombine.high %v784_v6, %v792_v16  ;;  %v6782_v40 = vadd.f32 %v11171_v30, %v6711_v61  ;;  %v1024_v45 = vld [vmem:[%s10663_s8 + $0x1790] sm:$0xff] }
 0x1c0   : > { %7436 = vmatpush1.bf16.msra.mxu1 %v10015_v12  ;;  %8967 = vst [vmem:[%s11282_s17 + $0x188] sm:$0xff] %v6910_v55  ;;  %v6845_v2 = vadd.f32 %v6844_v20, %v6774_v44  ;;  %v6914_v58 = vadd.f32 %v6913_v10, %v6843_v54  ;;  %7347 = vmatprep.mubr.bf16.mxu1 %v10814_v22  ;;  %v1032_v36 = vld [vmem:[%s10663_s8 + $0x17d0] sm:$0xff]  ;;  %v13564_v55 = vld [vmem:[#allocation16_spill] sm:$0xff] }
 0x1c1   : > { %v6915_v23 = vpop.f32.mrf.mxu1  ;;  %7437 = vmatprep.subr.bf16.mxu1 %v10000_v15  ;;  %v6846_v39 = vpop.f32.mrf.mxu0  ;;  %v9968_v48 = vcombine.high %v1040_v19, %v1048_v14  ;;  %v9711_v37 = vcombine.low %v784_v6, %v792_v16  ;;  %v1280_v12 = vld [vmem:[%s10663_s8 + $0x1f90] sm:$0xff]  ;;  %v6784_v47 = vadd.f32 %v13562_v29, %v6713_v51  ;;  %v13563_v15 = vld [vmem:[#allocation15_spill] sm:$0xff]  ;;  %v9967_v59 = vcombine.low %v1040_v19, %v1048_v14 }
 0x1c2   : > { %8982 = vst [vmem:[%s11282_s17 + $0x200] sm:$0xff] %v6914_v58  ;;  %v6847_v43 = vadd.f32 %v6846_v39, %v6776_v5  ;;  %v6916_v24 = vadd.f32 %v6915_v23, %v6845_v2  ;;  %7367 = vmatpush1.bf16.msra.mxu0 %v9743_v38  ;;  %v1288_v63 = vld [vmem:[%s10663_s8 + $0x1fd0] sm:$0xff]  ;;  %v9952_v52 = vcombine.high %v1024_v45, %v1032_v36 }
 0x1c3   : > { %v6917_v31 = vpop.f32.mrf.mxu1  ;;  %v6848_v49 = vpop.f32.mrf.mxu0  ;;  %7368 = vmatprep.subr.bf16.mxu0 %v9728_v1  ;;  %v13561_v13 = vld [vmem:[#allocation14_spill] sm:$0xff]  ;;  %v13565_v1 = vld [vmem:[#allocation17_spill] sm:$0xff]  ;;  %v9951_v61 = vcombine.low %v1024_v45, %v1032_v36  ;;  %v10207_v58 = vcombine.low %v1280_v12, %v1288_v63 }
 0x1c4   : > { %7438 = vmatpush1.bf16.msra.mxu1 %v9999_v27  ;;  %8983 = vst [vmem:[%s11282_s17 + $0x208] sm:$0xff] %v6916_v24  ;;  %v6849_v50 = vadd.f32 %v6848_v49, %v6778_v28  ;;  %v6918_v57 = vadd.f32 %v6917_v31, %v6847_v43  ;;  %v10208_v27 = vcombine.high %v1280_v12, %v1288_v63  ;;  %v1008_v41 = vld [vmem:[%s10663_s8 + $0x1710] sm:$0xff] }
 0x1c5   : > { %v6919_v4 = vpop.f32.mrf.mxu1  ;;  %7439 = vmatprep.subr.bf16.mxu1 %v9984_v35  ;;  %v6852_v26 = vpop.f32.mrf.mxu0  ;;  %7277 = vmatmul.mubr.bf16.gmra.mxu0 %v13561_v13  ;;  %v1016_v54 = vld [vmem:[%s10663_s8 + $0x1750] sm:$0xff]  ;;  %v745_v13 = vld [vmem:[%s10663_s8 + $0xed8] sm:$0xff] }
 0x1c6   : > { %8998 = vst [vmem:[%s11282_s17 + $0x280] sm:$0xff] %v6918_v57  ;;  %v6853_v3 = vadd.f32 %v6852_v26, %v6782_v40  ;;  %v6920_v30 = vadd.f32 %v6919_v4, %v6849_v50  ;;  %7369 = vmatpush1.bf16.msra.mxu0 %v9727_v9  ;;  %7388 = vmatprep.mubr.bf16.mxu0 %v13564_v55  ;;  %v1264_v10 = vld [vmem:[%s10663_s8 + $0x1f10] sm:$0xff]  ;;  %v481_v55 = vld [vmem:[%s10663_s8 + $0x698] sm:$0xff] }
 0x1c7   : > { %v6923_v53 = vpop.f32.mrf.mxu1  ;;  %7348 = vmatmul.mubr.bf16.gmra.mxu1 %v13563_v15  ;;  %v6854_v7 = vpop.f32.mrf.mxu0  ;;  %7370 = vmatprep.subr.bf16.mxu0 %v9712_v60  ;;  %v1272_v5 = vld [vmem:[%s10663_s8 + $0x1f50] sm:$0xff]  ;;  %v9936_v23 = vcombine.high %v1008_v41, %v1016_v54  ;;  %v9935_v51 = vcombine.low %v1008_v41, %v1016_v54  ;;  %v489_v15 = vld [vmem:[%s10663_s8 + $0x6d8] sm:$0xff] }
 0x1c8   : > { %7440 = vmatpush1.bf16.msra.mxu1 %v9983_v34  ;;  %8999 = vst [vmem:[%s11282_s17 + $0x288] sm:$0xff] %v6920_v30  ;;  %v6855_v44 = vadd.f32 %v6854_v7, %v6784_v47  ;;  %v6924_v0 = vadd.f32 %v6923_v53, %v6853_v3  ;;  %7459 = vmatprep.mubr.bf16.mxu1 %v13565_v1  ;;  %v992_v39 = vld [vmem:[%s10663_s8 + $0x1690] sm:$0xff]  ;;  %v13581_v1 = vld [vmem:[#allocation12_spill] sm:$0xff] }
 0x1c9   : > { %v6925_v38 = vpop.f32.mrf.mxu1  ;;  %7441 = vmatprep.subr.bf16.mxu1 %v9968_v48  ;;  %v6856_v20 = vpop.f32.mrf.mxu0  ;;  %v10192_v16 = vcombine.high %v1264_v10, %v1272_v5  ;;  %v1000_v9 = vld [vmem:[%s10663_s8 + $0x16d0] sm:$0xff]  ;;  %v10191_v43 = vcombine.low %v1264_v10, %v1272_v5 }
 0x1ca   : > { %9014 = vst [vmem:[%s11282_s17 + $0x300] sm:$0x1] %v6924_v0  ;;  %v6926_v35 = vadd.f32 %v6925_v38, %v6855_v44  ;;  %7371 = vmatpush1.bf16.msra.mxu0 %v9711_v37  ;;  %v1248_v14 = vld [vmem:[%s10663_s8 + $0x1e90] sm:$0xff]  ;;  %v9920_v24 = vcombine.high %v992_v39, %v1000_v9  ;;  %v9919_v50 = vcombine.low %v992_v39, %v1000_v9 }
 0x1cb   : > { %v6927_v2 = vpop.f32.mrf.mxu1  ;;  %7372 = vmatprep.subr.bf16.mxu0 %v9952_v52  ;;  %v6857_v6 = vpop.f32.mrf.mxu0  ;;  %v1256_v28 = vld [vmem:[%s10663_s8 + $0x1ed0] sm:$0xff] }
 0x1cc   : > { %7442 = vmatpush1.bf16.msra.mxu1 %v9967_v59  ;;  %9015 = vst [vmem:[%s11282_s17 + $0x308] sm:$0x1] %v6926_v35  ;;  %v10176_v31 = vcombine.high %v1248_v14, %v1256_v28  ;;  %v976_v49 = vld [vmem:[%s10663_s8 + $0x1610] sm:$0xff]  ;;  %v10175_v57 = vcombine.low %v1248_v14, %v1256_v28  ;;  %v393_v14 = vld [vmem:[%s10663_s8 + $0x3d8] sm:$0xff] }
 0x1cd   : > { %7443 = vmatprep.subr.bf16.mxu1 %v10208_v27  ;;  %v6928_v19 = vpop.f32.mrf.mxu1  ;;  %v984_v34 = vld [vmem:[%s10663_s8 + $0x1650] sm:$0xff]  ;;  %v641_v28 = vld [vmem:[%s10663_s8 + $0xb98] sm:$0xff] }
 0x1ce   : > { %7373 = vmatpush2.bf16.msra.mxu0 %v9951_v61  ;;  %v1232_v60 = vld [vmem:[%s10663_s8 + $0x1e10] sm:$0xff]  ;;  %v9904_v4 = vcombine.high %v976_v49, %v984_v34  ;;  %v9903_v12 = vcombine.low %v976_v49, %v984_v34  ;;  %v385_v19 = vld [vmem:[%s10663_s8 + $0x398] sm:$0xff] }
 0x1cf   : > { %7374 = vmatprep.subr.bf16.mxu0 %v9936_v23  ;;  %v1240_v40 = vld [vmem:[%s10663_s8 + $0x1e50] sm:$0xff]  ;;  %v369_v34 = vld [vmem:[%s10663_s8 + $0x318] sm:$0xff] }
 0x1d0   : > { %7444 = vmatpush2.bf16.msra.mxu1 %v10207_v58  ;;  %v10160_v48 = vcombine.high %v1232_v60, %v1240_v40  ;;  %v960_v45 = vld [vmem:[%s10663_s8 + $0x1590] sm:$0xff]  ;;  %v10159_v63 = vcombine.low %v1232_v60, %v1240_v40  ;;  %v377_v60 = vld [vmem:[%s10663_s8 + $0x358] sm:$0xff] }
 0x1d1   : > { %7445 = vmatprep.subr.bf16.mxu1 %v10192_v16  ;;  %v968_v36 = vld [vmem:[%s10663_s8 + $0x15d0] sm:$0xff]  ;;  %v625_v40 = vld [vmem:[%s10663_s8 + $0xb18] sm:$0xff] }
 0x1d2   : > { %7375 = vmatpush2.bf16.msra.mxu0 %v9935_v51  ;;  %v1216_v26 = vld [vmem:[%s10663_s8 + $0x1d90] sm:$0xff]  ;;  %v9888_v29 = vcombine.high %v960_v45, %v968_v36  ;;  %v9887_v59 = vcombine.low %v960_v45, %v968_v36  ;;  %v649_v51 = vld [vmem:[%s10663_s8 + $0xbd8] sm:$0xff] }
 0x1d3   : > { %7376 = vmatprep.subr.bf16.mxu0 %v9920_v24  ;;  %v1224_v37 = vld [vmem:[%s10663_s8 + $0x1dd0] sm:$0xff]  ;;  %v9570_v49 = vcombine.high %v641_v28, %v649_v51  ;;  %v353_v36 = vld [vmem:[%s10663_s8 + $0x298] sm:$0xff] }
 0x1d4   : > { %7446 = vmatpush2.bf16.msra.mxu1 %v10191_v43  ;;  %v10144_v47 = vcombine.high %v1216_v26, %v1224_v37  ;;  %v944_v3 = vld [vmem:[%s10663_s8 + $0x1510] sm:$0xff]  ;;  %v10143_v52 = vcombine.low %v1216_v26, %v1224_v37  ;;  %v361_v26 = vld [vmem:[%s10663_s8 + $0x2d8] sm:$0xff] }
 0x1d5   : > { %7447 = vmatprep.subr.bf16.mxu1 %v10176_v31  ;;  %v952_v30 = vld [vmem:[%s10663_s8 + $0x1550] sm:$0xff]  ;;  %v9314_v31 = vcombine.high %v385_v19, %v393_v14 }
 0x1d6   : > { %7377 = vmatpush2.bf16.msra.mxu0 %v9919_v50  ;;  %v1200_v53 = vld [vmem:[%s10663_s8 + $0x1d10] sm:$0xff]  ;;  %v9872_v44 = vcombine.high %v944_v3, %v952_v30  ;;  %v9871_v10 = vcombine.low %v944_v3, %v952_v30  ;;  %v633_v50 = vld [vmem:[%s10663_s8 + $0xb58] sm:$0xff]  ;;  %v9297_v30 = vcombine.low %v369_v34, %v377_v60 }
 0x1d7   : > { %7378 = vmatprep.subr.bf16.mxu0 %v9904_v4  ;;  %v1208_v7 = vld [vmem:[%s10663_s8 + $0x1d50] sm:$0xff]  ;;  %v9569_v4 = vcombine.low %v641_v28, %v649_v51  ;;  %v9554_v45 = vcombine.high %v625_v40, %v633_v50  ;;  %v13567_v3 = vld [vmem:[#allocation19_spill] sm:$0xff] }
 0x1d8   : > { %7448 = vmatpush2.bf16.msra.mxu1 %v10175_v57  ;;  %v10128_v0 = vcombine.high %v1200_v53, %v1208_v7  ;;  %v928_v38 = vld [vmem:[%s10663_s8 + $0x1490] sm:$0xff]  ;;  %v10127_v5 = vcombine.low %v1200_v53, %v1208_v7  ;;  %v9313_v57 = vcombine.low %v385_v19, %v393_v14  ;;  %v9553_v7 = vcombine.low %v625_v40, %v633_v50  ;;  %v577_v19 = vld [vmem:[%s10663_s8 + $0x998] sm:$0xff] }
 0x1d9   : > { %7449 = vmatprep.subr.bf16.mxu1 %v10160_v48  ;;  %v936_v27 = vld [vmem:[%s10663_s8 + $0x14d0] sm:$0xff]  ;;  %v9298_v48 = vcombine.high %v369_v34, %v377_v60  ;;  %v585_v14 = vld [vmem:[%s10663_s8 + $0x9d8] sm:$0xff]  ;;  %v13572_v60 = vld [vmem:[#allocation24_spill] sm:$0xff] }
 0x1da   : > { %7379 = vmatpush2.bf16.msra.mxu0 %v9903_v12  ;;  %v1184_v41 = vld [vmem:[%s10663_s8 + $0x1c90] sm:$0xff]  ;;  %v9856_v20 = vcombine.high %v928_v38, %v936_v27  ;;  %v9855_v6 = vcombine.low %v928_v38, %v936_v27  ;;  %v337_v38 = vld [vmem:[%s10663_s8 + $0x218] sm:$0xff]  ;;  %v9506_v40 = vcombine.high %v577_v19, %v585_v14 }
 0x1db   : > { %7380 = vmatprep.subr.bf16.mxu0 %v9888_v29  ;;  %v1192_v54 = vld [vmem:[%s10663_s8 + $0x1cd0] sm:$0xff]  ;;  %v617_v29 = vld [vmem:[%s10663_s8 + $0xad8] sm:$0xff] }
 0x1dc   : > { %7450 = vmatpush2.bf16.msra.mxu1 %v10159_v63  ;;  %v10112_v35 = vcombine.high %v1184_v41, %v1192_v54  ;;  %v912_v61 = vld [vmem:[%s10663_s8 + $0x1410] sm:$0xff]  ;;  %v10111_v16 = vcombine.low %v1184_v41, %v1192_v54  ;;  %v609_v63 = vld [vmem:[%s10663_s8 + $0xa98] sm:$0xff]  ;;  %v13569_v54 = vld [vmem:[#allocation21_spill] sm:$0xff] }
 0x1dd   : > { %7451 = vmatprep.subr.bf16.mxu1 %v10144_v47  ;;  %v920_v2 = vld [vmem:[%s10663_s8 + $0x1450] sm:$0xff]  ;;  %v345_v27 = vld [vmem:[%s10663_s8 + $0x258] sm:$0xff] }
 0x1de   : > { %7381 = vmatpush2.bf16.msra.mxu0 %v9887_v59  ;;  %v1168_v58 = vld [vmem:[%s10663_s8 + $0x1c10] sm:$0xff]  ;;  %v9840_v39 = vcombine.high %v912_v61, %v920_v2  ;;  %v9839_v43 = vcombine.low %v912_v61, %v920_v2  ;;  %v9282_v59 = vcombine.high %v353_v36, %v361_v26  ;;  %v9537_v2 = vcombine.low %v609_v63, %v617_v29  ;;  %v13571_v51 = vld [vmem:[#allocation23_spill] sm:$0xff] }
 0x1df   : > { %7382 = vmatprep.subr.bf16.mxu0 %v9872_v44  ;;  %v1176_v23 = vld [vmem:[%s10663_s8 + $0x1c50] sm:$0xff]  ;;  %v13568_v44 = vld [vmem:[#allocation20_spill] sm:$0xff]  ;;  %v305_v50 = vld [vmem:[%s10663_s8 + $0x118] sm:$0xff] }
 0x1e0   : > { %7452 = vmatpush2.bf16.msra.mxu1 %v10143_v52  ;;  %v10096_v9 = vcombine.high %v1168_v58, %v1176_v23  ;;  %v10095_v24 = vcombine.low %v1168_v58, %v1176_v23  ;;  %v13566_v12 = vld [vmem:[#allocation18_spill] sm:$0xff]  ;;  %v9266_v58 = vcombine.high %v337_v38, %v345_v27 }
 0x1e1   : > { %7453 = vmatprep.subr.bf16.mxu1 %v10128_v0  ;;  %v9538_v0 = vcombine.high %v609_v63, %v617_v29 }
 0x1e2   : > { %7383 = vmatpush2.bf16.msra.mxu0 %v9871_v10  ;;  %v593_v10 = vld [vmem:[%s10663_s8 + $0xa18] sm:$0xff] }
 0x1e3   : > { %7384 = vmatprep.subr.bf16.mxu0 %v9856_v20 }
 0x1e4   : > { %7454 = vmatpush2.bf16.msra.mxu1 %v10127_v5  ;;  %v601_v5 = vld [vmem:[%s10663_s8 + $0xa58] sm:$0xff] }
 0x1e5   : > { %7455 = vmatprep.subr.bf16.mxu1 %v10112_v35  ;;  %v9281_v35 = vcombine.low %v353_v36, %v361_v26  ;;  %v569_v36 = vld [vmem:[%s10663_s8 + $0x958] sm:$0xff] }
 0x1e6   : > { %7385 = vmatpush2.bf16.msra.mxu0 %v9855_v6  ;;  %v9522_v6 = vcombine.high %v593_v10, %v601_v5 }
 0x1e7   : > { %7386 = vmatprep.subr.bf16.mxu0 %v9840_v39  ;;  %v329_v39 = vld [vmem:[%s10663_s8 + $0x1d8] sm:$0xff] }
 0x1e8   : > { %7456 = vmatpush2.bf16.msra.mxu1 %v10111_v16  ;;  %v321_v16 = vld [vmem:[%s10663_s8 + $0x198] sm:$0xff] }
 0x1e9   : > { %7457 = vmatprep.subr.bf16.mxu1 %v10096_v9  ;;  %v13570_v9 = vld [vmem:[#allocation22_spill] sm:$0xff]  ;;  %v9249_v63 = vcombine.low %v321_v16, %v329_v39 }
 0x1ea   : > { %7387 = vmatpush2.bf16.msra.mxu0 %v9839_v43  ;;  %v9265_v43 = vcombine.low %v337_v38, %v345_v27  ;;  %v289_v38 = vld [vmem:[%s10663_s8 + $0x98] sm:$0xff] }
 0x1eb   : > { %7498 = vmatprep.subr.bf16.mxu0 %v9314_v31  ;;  %v9521_v31 = vcombine.low %v593_v10, %v601_v5  ;;  %v297_v27 = vld [vmem:[%s10663_s8 + $0xd8] sm:$0xff]  ;;  %v13574_v5 = vld [vmem:[#allocation26_spill] sm:$0xff] }
 0x1ec   : > { %7458 = vmatpush2.bf16.msra.mxu1 %v10095_v24 }
 0x1ed   : > { %7569 = vmatprep.subr.bf16.mxu1 %v9570_v49  ;;  %v11454_v37 = vpop.f32.mrf.mxu0  ;;  %7389 = vmatmul.mubr.bf16.vlgmr.msra.gmra.mxu0 %v13566_v12  ;;  %v9250_v49 = vcombine.high %v321_v16, %v329_v39 }
 0x1ee   : > { %7499 = vmatpush1.bf16.msra.mxu0 %v9313_v57  ;;  %7398 = vmatprep.mubr.bf16.mxu0 %v13568_v44  ;;  %v313_v57 = vld [vmem:[%s10663_s8 + $0x158] sm:$0xff] }
 0x1ef   : > { %v11459_v47 = vpop.f32.mrf.mxu1  ;;  %7460 = vmatmul.mubr.bf16.vlgmr.msra.gmra.mxu1 %v13567_v3  ;;  %v11462_v53 = vpop.f32.mrf.mxu0  ;;  %7500 = vmatprep.subr.bf16.mxu0 %v9298_v48  ;;  %v13573_v48 = vld [vmem:[#allocation25_spill] sm:$0xff]  ;;  %v9233_v16 = vcombine.low %v305_v50, %v313_v57  ;;  %v497_v44 = vld [vmem:[%s10663_s8 + $0x718] sm:$0xff] }
 0x1f0   : > { %7570 = vmatpush1.bf16.msra.mxu1 %v9569_v4  ;;  %7469 = vmatprep.mubr.bf16.mxu1 %v13569_v54  ;;  %v505_v3 = vld [vmem:[%s10663_s8 + $0x758] sm:$0xff] }
 0x1f1   : > { %v11464_v52 = vpop.f32.mrf.mxu1  ;;  %7571 = vmatprep.subr.bf16.mxu1 %v9554_v45  ;;  %v11469_v41 = vpop.f32.mrf.mxu0  ;;  %v561_v45 = vld [vmem:[%s10663_s8 + $0x918] sm:$0xff] }
 0x1f2   : > { %7501 = vmatpush1.bf16.msra.mxu0 %v9297_v30  ;;  %v9505_v30 = vcombine.low %v577_v19, %v585_v14  ;;  %v9489_v19 = vcombine.low %v561_v45, %v569_v36  ;;  %v9218_v14 = vcombine.high %v289_v38, %v297_v27 }
 0x1f3   : > { %v11474_v20 = vpop.f32.mrf.mxu1  ;;  %v11476_v61 = vpop.f32.mrf.mxu0  ;;  %7502 = vmatprep.subr.bf16.mxu0 %v9282_v59 }
 0x1f4   : > { %7572 = vmatpush1.bf16.msra.mxu1 %v9553_v7  ;;  %v9234_v7 = vcombine.high %v305_v50, %v313_v57  ;;  %v529_v50 = vld [vmem:[%s10663_s8 + $0x818] sm:$0xff] }
 0x1f5   : > { %v11478_v23 = vpop.f32.mrf.mxu1  ;;  %7573 = vmatprep.subr.bf16.mxu1 %v9538_v0  ;;  %7399 = vmatmul.mubr.bf16.gmra.mxu0 %v13570_v9  ;;  %v11485_v28 = vpop.f32.mrf.mxu0  ;;  %v9490_v0 = vcombine.high %v561_v45, %v569_v36  ;;  %v537_v57 = vld [vmem:[%s10663_s8 + $0x858] sm:$0xff]  ;;  %v9217_v45 = vcombine.low %v289_v38, %v297_v27  ;;  %v13578_v9 = vld [vmem:[#allocation30_spill] sm:$0xff] }
 0x1f6   : > { %7503 = vmatpush1.bf16.msra.mxu0 %v9281_v35  ;;  %7408 = vmatprep.mubr.bf16.mxu0 %v13572_v60  ;;  %v545_v35 = vld [vmem:[%s10663_s8 + $0x898] sm:$0xff] }
 0x1f7   : > { %7470 = vmatmul.mubr.bf16.gmra.mxu1 %v13571_v51  ;;  %v11488_v24 = vpop.f32.mrf.mxu1  ;;  %7504 = vmatprep.subr.bf16.mxu0 %v9266_v58  ;;  %v11490_v34 = vpop.f32.mrf.mxu0  ;;  %v513_v60 = vld [vmem:[%s10663_s8 + $0x798] sm:$0xff] }
 0x1f8   : > { %7574 = vmatpush1.bf16.msra.mxu1 %v9537_v2  ;;  %7479 = vmatprep.mubr.bf16.mxu1 %v13573_v48  ;;  %v553_v2 = vld [vmem:[%s10663_s8 + $0x8d8] sm:$0xff]  ;;  %v9458_v48 = vcombine.high %v529_v50, %v537_v57 }
 0x1f9   : > { %7575 = vmatprep.subr.bf16.mxu1 %v9522_v6  ;;  %v11495_v4 = vpop.f32.mrf.mxu1  ;;  %v11500_v26 = vpop.f32.mrf.mxu0  ;;  %v13575_v6 = vld [vmem:[#allocation27_spill] sm:$0xff] }
 0x1fa   : > { %7505 = vmatpush1.bf16.msra.mxu0 %v9265_v43  ;;  %v777_v38 = vld [vmem:[%s10663_s8 + $0xfd8] sm:$0xff] }
 0x1fb   : > { %v11502_v29 = vpop.f32.mrf.mxu1  ;;  %7506 = vmatprep.subr.bf16.mxu0 %v9250_v49  ;;  %v11504_v59 = vpop.f32.mrf.mxu0  ;;  %v9474_v49 = vcombine.high %v545_v35, %v553_v2 }
 0x1fc   : > { %7576 = vmatpush1.bf16.msra.mxu1 %v9521_v31  ;;  %v13576_v31 = vld [vmem:[#allocation28_spill] sm:$0xff] }
 0x1fd   : > { %7577 = vmatprep.subr.bf16.mxu1 %v9506_v40  ;;  %v11508_v10 = vpop.f32.mrf.mxu1  ;;  %7409 = vmatmul.mubr.bf16.gmra.mxu0 %v13574_v5  ;;  %v11513_v58 = vpop.f32.mrf.mxu0  ;;  %v273_v40 = vld [vmem:[%s10663_s8 + $0x18] sm:$0xff] }
 0x1fe   : > { %7507 = vmatpush1.bf16.msra.mxu0 %v9249_v63  ;;  %7418 = vmatprep.mubr.bf16.mxu0 %v13576_v31  ;;  %v281_v5 = vld [vmem:[%s10663_s8 + $0x58] sm:$0xff] }
 0x1ff   : > { %7480 = vmatmul.mubr.bf16.gmra.mxu1 %v13575_v6  ;;  %v11516_v39 = vpop.f32.mrf.mxu1  ;;  %7508 = vmatprep.subr.bf16.mxu0 %v9234_v7  ;;  %v11518_v43 = vpop.f32.mrf.mxu0  ;;  %v13577_v6 = vld [vmem:[#allocation29_spill] sm:$0xff]  ;;  %v9473_v7 = vcombine.low %v545_v35, %v553_v2  ;;  %v13579_v35 = vld [vmem:[#allocation31_spill] sm:$0xff]  ;;  %v9201_v2 = vcombine.low %v273_v40, %v281_v5 }
 0x200   : > { %7578 = vmatpush1.bf16.msra.mxu1 %v9505_v30  ;;  %7489 = vmatprep.mubr.bf16.mxu1 %v13577_v6  ;;  %v521_v6 = vld [vmem:[%s10663_s8 + $0x7d8] sm:$0xff] }
 0x201   : > { %7579 = vmatprep.subr.bf16.mxu1 %v9490_v0  ;;  %v11523_v63 = vpop.f32.mrf.mxu1  ;;  %v11528_v30 = vpop.f32.mrf.mxu0  ;;  %v9202_v0 = vcombine.high %v273_v40, %v281_v5  ;;  %v761_v5 = vld [vmem:[%s10663_s8 + $0xf58] sm:$0xff] }
 0x202   : > { %7509 = vmatpush1.bf16.msra.mxu0 %v9233_v16  ;;  %v769_v16 = vld [vmem:[%s10663_s8 + $0xf98] sm:$0xff] }
 0x203   : > { %v11530_v36 = vpop.f32.mrf.mxu1  ;;  %7510 = vmatprep.subr.bf16.mxu0 %v9218_v14  ;;  %v11532_v31 = vpop.f32.mrf.mxu0  ;;  %v9457_v14 = vcombine.low %v529_v50, %v537_v57  ;;  %v9441_v50 = vcombine.low %v513_v60, %v521_v6 }
 0x204   : > { %7580 = vmatpush1.bf16.msra.mxu1 %v9489_v19 }
 0x205   : > { %7581 = vmatprep.subr.bf16.mxu1 %v9474_v49  ;;  %v11536_v51 = vpop.f32.mrf.mxu1  ;;  %7419 = vmatmul.mubr.bf16.gmra.mxu0 %v13578_v9  ;;  %v11541_v27 = vpop.f32.mrf.mxu0  ;;  %v9442_v49 = vcombine.high %v513_v60, %v521_v6  ;;  %v9698_v9 = vcombine.high %v769_v16, %v777_v38  ;;  %v9410_v6 = vcombine.high %v481_v55, %v489_v15 }
 0x206   : > { %7511 = vmatpush1.bf16.msra.mxu0 %v9217_v45  ;;  %7530 = vmatprep.mubr.bf16.mxu0 %v13581_v1  ;;  %v753_v45 = vld [vmem:[%s10663_s8 + $0xf18] sm:$0xff] }
 0x207   : > { %7490 = vmatmul.mubr.bf16.gmra.mxu1 %v13579_v35  ;;  %v11544_v19 = vpop.f32.mrf.mxu1  ;;  %7512 = vmatprep.subr.bf16.mxu0 %v9202_v0  ;;  %v11546_v54 = vpop.f32.mrf.mxu0  ;;  %v9426_v0 = vcombine.high %v497_v44, %v505_v3  ;;  %v9682_v1 = vcombine.high %v753_v45, %v761_v5  ;;  %v9681_v60 = vcombine.low %v753_v45, %v761_v5  ;;  %v457_v45 = vld [vmem:[%s10663_s8 + $0x5d8] sm:$0xff] }
 0x208   : > { %7582 = vmatpush1.bf16.msra.mxu1 %v9473_v7  ;;  %v13582_v7 = vld [vmem:[#allocation13_spill] sm:$0xff]  ;;  %v705_v5 = vld [vmem:[%s10663_s8 + $0xd98] sm:$0xff] }
 0x209   : > { %7583 = vmatprep.subr.bf16.mxu1 %v9458_v48  ;;  %v11550_v12 = vpop.f32.mrf.mxu1  ;;  %v6998_v40 = vpop.f32.mrf.mxu0  ;;  %7601 = vmatprep.mubr.bf16.mxu1 %v13582_v7  ;;  %v9697_v48 = vcombine.low %v769_v16, %v777_v38  ;;  %v465_v16 = vld [vmem:[%s10663_s8 + $0x618] sm:$0xff] }
 0x20a   : > { %13580 = vst [vmem:[#allocation32_spill] sm:$0xff] %v11550_v12  ;;  %7513 = vmatpush1.bf16.msra.mxu0 %v9201_v2  ;;  %v737_v12 = vld [vmem:[%s10663_s8 + $0xe98] sm:$0xff]  ;;  %v9425_v2 = vcombine.low %v497_v44, %v505_v3 }
 0x20b   : > { %v7069_v57 = vpop.f32.mrf.mxu1  ;;  %7514 = vmatprep.subr.bf16.mxu0 %v9442_v49  ;;  %v6999_v35 = vpop.f32.mrf.mxu0  ;;  %v473_v38 = vld [vmem:[%s10663_s8 + $0x658] sm:$0xff]  ;;  %v9409_v49 = vcombine.low %v481_v55, %v489_v15 }
 0x20c   : > { %7584 = vmatpush1.bf16.msra.mxu1 %v9457_v14  ;;  %v721_v35 = vld [vmem:[%s10663_s8 + $0xe18] sm:$0xff]  ;;  %v9394_v3 = vcombine.high %v465_v16, %v473_v38 }
 0x20d   : > { %7585 = vmatprep.subr.bf16.mxu1 %v9698_v9  ;;  %v7070_v40 = vpop.f32.mrf.mxu1  ;;  %v9666_v9 = vcombine.high %v737_v12, %v745_v13  ;;  %v729_v14 = vld [vmem:[%s10663_s8 + $0xe58] sm:$0xff] }
 0x20e   : > { %7515 = vmatpush2.bf16.msra.mxu0 %v9441_v50  ;;  %v9665_v50 = vcombine.low %v737_v12, %v745_v13  ;;  %v9650_v44 = vcombine.high %v721_v35, %v729_v14  ;;  %v713_v57 = vld [vmem:[%s10663_s8 + $0xdd8] sm:$0xff] }
 0x20f   : > { %7516 = vmatprep.subr.bf16.mxu0 %v9426_v0  ;;  %v9649_v0 = vcombine.low %v721_v35, %v729_v14  ;;  %v9634_v13 = vcombine.high %v705_v5, %v713_v57  ;;  %v433_v55 = vld [vmem:[%s10663_s8 + $0x518] sm:$0xff] }
 0x210   : > { %7586 = vmatpush2.bf16.msra.mxu1 %v9697_v48  ;;  %v9393_v48 = vcombine.low %v465_v16, %v473_v38  ;;  %v441_v12 = vld [vmem:[%s10663_s8 + $0x558] sm:$0xff] }
 0x211   : > { %7587 = vmatprep.subr.bf16.mxu1 %v9682_v1  ;;  %v449_v1 = vld [vmem:[%s10663_s8 + $0x598] sm:$0xff] }
 0x212   : > { %7517 = vmatpush2.bf16.msra.mxu0 %v9425_v2  ;;  %v9378_v15 = vcombine.high %v449_v1, %v457_v45  ;;  %v689_v40 = vld [vmem:[%s10663_s8 + $0xd18] sm:$0xff] }
 0x213   : > { %7518 = vmatprep.subr.bf16.mxu0 %v9410_v6  ;;  %v697_v2 = vld [vmem:[%s10663_s8 + $0xd58] sm:$0xff]  ;;  %v9633_v6 = vcombine.low %v705_v5, %v713_v57 }
 0x214   : > { %7588 = vmatpush2.bf16.msra.mxu1 %v9681_v60  ;;  %v9377_v60 = vcombine.low %v449_v1, %v457_v45  ;;  %v9618_v16 = vcombine.high %v689_v40, %v697_v2  ;;  %v417_v38 = vld [vmem:[%s10663_s8 + $0x498] sm:$0xff]  ;;  %v13520_v1 = vsub.s32 2, %v11200_v17 }
 0x215   : > { %7589 = vmatprep.subr.bf16.mxu1 %v9666_v9  ;;  %v9362_v9 = vcombine.high %v433_v55, %v441_v12  ;;  %v425_v35 = vld [vmem:[%s10663_s8 + $0x4d8] sm:$0xff] }
 0x216   : > { %7519 = vmatpush2.bf16.msra.mxu0 %v9409_v49  ;;  %v673_v14 = vld [vmem:[%s10663_s8 + $0xc98] sm:$0xff] }
 0x217   : > { %7520 = vmatprep.subr.bf16.mxu0 %v9394_v3  ;;  %v681_v49 = vld [vmem:[%s10663_s8 + $0xcd8] sm:$0xff]  ;;  %v9617_v3 = vcombine.low %v689_v40, %v697_v2  ;;  %v10305_v40 = vld [vmem:[%s11209_s27] sm:$0xff] }
 0x218   : > { %7590 = vmatpush2.bf16.msra.mxu1 %v9665_v50  ;;  %v9361_v50 = vcombine.low %v433_v55, %v441_v12  ;;  %v9602_v45 = vcombine.high %v673_v14, %v681_v49  ;;  %v401_v5 = vld [vmem:[%s10663_s8 + $0x418] sm:$0xff]  ;;  %v9601_v55 = vcombine.low %v673_v14, %v681_v49  ;;  %v11585_v2 = vrot.slane %v10305_v40, %v13520_v1 }
 0x219   : > { %7591 = vmatprep.subr.bf16.mxu1 %v9650_v44  ;;  %v9346_v44 = vcombine.high %v417_v38, %v425_v35  ;;  %v409_v57 = vld [vmem:[%s10663_s8 + $0x458] sm:$0xff] }
 0x21a   : > { %7521 = vmatpush2.bf16.msra.mxu0 %v9393_v48  ;;  %v657_v48 = vld [vmem:[%s10663_s8 + $0xc18] sm:$0xff]  ;;  %v9330_v12 = vcombine.high %v401_v5, %v409_v57 }
 0x21b   : > { %7522 = vmatprep.subr.bf16.mxu0 %v9378_v15  ;;  %v13521_v15 = vsub.s32 3, %v11200_v17  ;;  %v889_v1 = vld [vmem:[%s10663_s8 + $0x1358] sm:$0xff] }
 0x21c   : > { %7592 = vmatpush2.bf16.msra.mxu1 %v9649_v0  ;;  %v665_v0 = vld [vmem:[%s10663_s8 + $0xc58] sm:$0xff] }
 0x21d   : > { %7593 = vmatprep.subr.bf16.mxu1 %v9634_v13  ;;  %v9345_v13 = vcombine.low %v417_v38, %v425_v35  ;;  %v11593_v38 = vrot.slane %v10305_v40, %v13521_v15  ;;  %v9329_v35 = vcombine.low %v401_v5, %v409_v57  ;;  %v9585_v14 = vcombine.low %v657_v48, %v665_v0  ;;  %v1137_v7 = vld [vmem:[%s10663_s8 + $0x1b18] sm:$0xff] }
 0x21e   : > { %7523 = vmatpush2.bf16.msra.mxu0 %v9377_v60  ;;  %v9586_v60 = vcombine.high %v657_v48, %v665_v0  ;;  %v1145_v40 = vld [vmem:[%s10663_s8 + $0x1b58] sm:$0xff]  ;;  %v6969_v48 = vadd.f32 %v11469_v41, %v11585_v2 }
 0x21f   : > { %7524 = vmatprep.subr.bf16.mxu0 %v9362_v9  ;;  %v905_v9 = vld [vmem:[%s10663_s8 + $0x13d8] sm:$0xff]  ;;  %v6967_v5 = vadd.f32 %v11462_v53, %v11593_v38 }
 0x220   : > { %7594 = vmatpush2.bf16.msra.mxu1 %v9633_v6  ;;  %v897_v6 = vld [vmem:[%s10663_s8 + $0x1398] sm:$0xff] }
 0x221   : > { %7595 = vmatprep.subr.bf16.mxu1 %v9618_v16  ;;  %v1153_v16 = vld [vmem:[%s10663_s8 + $0x1b98] sm:$0xff]  ;;  %v9826_v49 = vcombine.high %v897_v6, %v905_v9  ;;  %v9825_v57 = vcombine.low %v897_v6, %v905_v9  ;;  %v10065_v9 = vcombine.low %v1137_v7, %v1145_v40 }
 0x222   : > { %7525 = vmatpush2.bf16.msra.mxu0 %v9361_v50  ;;  %v1161_v50 = vld [vmem:[%s10663_s8 + $0x1bd8] sm:$0xff] }
 0x223   : > { %7526 = vmatprep.subr.bf16.mxu0 %v9346_v44  ;;  %v10082_v44 = vcombine.high %v1153_v16, %v1161_v50  ;;  %v11613_v15 = vld [vmem:[%s10663_s8 + $0x1a98] sm:$0xff] }
 0x224   : > { %7596 = vmatpush2.bf16.msra.mxu1 %v9617_v3  ;;  %v6965_v3 = vadd.f32 %v11454_v37, %v11585_v2  ;;  %v10081_v37 = vcombine.low %v1153_v16, %v1161_v50  ;;  %v11616_v53 = vld [vmem:[%s10663_s8 + $0x1ad8] sm:$0xff]  ;;  %v7038_v16 = vadd.f32 %v11464_v52, %v6967_v5  ;;  %v6971_v50 = vadd.f32 %v11476_v61, %v11593_v38 }
 0x225   : > { %7597 = vmatprep.subr.bf16.mxu1 %v9602_v45  ;;  %v881_v45 = vld [vmem:[%s10663_s8 + $0x1318] sm:$0xff]  ;;  %v10050_v61 = vcombine.high %v11613_v15, %v11616_v53 }
 0x226   : > { %7527 = vmatpush2.bf16.msra.mxu0 %v9345_v13  ;;  %v9810_v0 = vcombine.high %v881_v45, %v889_v1  ;;  %v11606_v13 = vld [vmem:[%s10663_s8 + $0x1298] sm:$0xff]  ;;  %v9809_v41 = vcombine.low %v881_v45, %v889_v1 }
 0x227   : > { %7528 = vmatprep.subr.bf16.mxu0 %v9330_v12  ;;  %v10066_v12 = vcombine.high %v1137_v7, %v1145_v40  ;;  %v6975_v7 = vadd.f32 %v11485_v28, %v11585_v2  ;;  %v11634_v45 = vld [vmem:[%s10663_s8 + $0x1258] sm:$0xff]  ;;  %v6977_v40 = vadd.f32 %v11490_v34, %v11593_v38  ;;  %v7042_v28 = vadd.f32 %v11478_v23, %v6971_v50 }
 0x228   : > { %7598 = vmatpush2.bf16.msra.mxu1 %v9601_v55  ;;  %v7036_v55 = vadd.f32 %v11459_v47, %v6965_v3  ;;  %v10049_v23 = vcombine.low %v11613_v15, %v11616_v53  ;;  %v11657_v50 = vld [vmem:[%s10663_s8 + $0x1198] sm:$0xff] }
 0x229   : > { %7599 = vmatprep.subr.bf16.mxu1 %v9586_v60  ;;  %v11610_v60 = vld [vmem:[%s10663_s8 + $0x12d8] sm:$0xff]  ;;  %v7048_v53 = vadd.f32 %v11495_v4, %v6977_v40 }
 0x22a   : > { %7529 = vmatpush2.bf16.msra.mxu0 %v9329_v35  ;;  %v9794_v52 = vcombine.high %v11606_v13, %v11610_v60  ;;  %v9793_v34 = vcombine.low %v11606_v13, %v11610_v60  ;;  %v11670_v15 = vld [vmem:[%s10663_s8 + $0x19d8] sm:$0xff] }
 0x22b   : > { %7640 = vmatprep.subr.bf16.mxu0 %v9826_v49 }
 0x22c   : > { %7600 = vmatpush2.bf16.msra.mxu1 %v9585_v14  ;;  %v7040_v14 = vadd.f32 %v11474_v20, %v6969_v48  ;;  %v11631_v20 = vld [vmem:[%s10663_s8 + $0x1218] sm:$0xff] }
 0x22d   : > { %7711 = vmatprep.subr.bf16.mxu1 %v10082_v44  ;;  %v7106_v6 = vpop.f32.mrf.mxu0  ;;  %7531 = vmatmul.mubr.bf16.vlgmr.msra.gmra.mxu0 %v10760_v21  ;;  %v11643_v48 = vld [vmem:[%s10663_s8 + $0x1a58] sm:$0xff] }
 0x22e   : > { %v7107_v47 = vadd.f32 %v7106_v6, %v7036_v55  ;;  %7641 = vmatpush1.bf16.msra.mxu0 %v9825_v57  ;;  %7540 = vmatprep.mubr.bf16.mxu0 %v10769_v32  ;;  %v11640_v57 = vld [vmem:[%s10663_s8 + $0x1a18] sm:$0xff] }
 0x22f   : > { %v7177_v35 = vpop.f32.mrf.mxu1  ;;  %7602 = vmatmul.mubr.bf16.vlgmr.msra.gmra.mxu1 %v10765_v25  ;;  %v7108_v49 = vpop.f32.mrf.mxu0  ;;  %7642 = vmatprep.subr.bf16.mxu0 %v9810_v0 }
 0x230   : > { %7712 = vmatpush1.bf16.msra.mxu1 %v10081_v37  ;;  %v7178_v1 = vadd.f32 %v7177_v35, %v7107_v47  ;;  %v7109_v3 = vadd.f32 %v7108_v49, %v7038_v16  ;;  %7611 = vmatprep.mubr.bf16.mxu1 %v10774_v33  ;;  %v9778_v16 = vcombine.high %v11631_v20, %v11634_v45  ;;  %v11667_v35 = vld [vmem:[%s10663_s8 + $0x1998] sm:$0xff] }
 0x231   : > { %v7179_v44 = vpop.f32.mrf.mxu1  ;;  %7713 = vmatprep.subr.bf16.mxu1 %v10066_v12  ;;  %v7110_v5 = vpop.f32.mrf.mxu0  ;;  %v6979_v12 = vadd.f32 %v11500_v26, %v11585_v2  ;;  %v10034_v26 = vcombine.high %v11640_v57, %v11643_v48  ;;  %v10033_v49 = vcombine.low %v11640_v57, %v11643_v48  ;;  %v11694_v57 = vld [vmem:[%s10663_s8 + $0x1158] sm:$0xff]  ;;  %v6987_v48 = vadd.f32 %v11518_v43, %v11593_v38 }
 0x232   : > { %8920 = vst [vmem:[%s11282_s17 + $0x10] sm:$0xff] %v7178_v1  ;;  %v7180_v37 = vadd.f32 %v7179_v44, %v7109_v3  ;;  %v7111_v0 = vadd.f32 %v7110_v5, %v7040_v14  ;;  %7643 = vmatpush1.bf16.msra.mxu0 %v9809_v41  ;;  %v7046_v41 = vadd.f32 %v11488_v24, %v6975_v7 }
 0x233   : > { %v7181_v55 = vpop.f32.mrf.mxu1  ;;  %v7112_v6 = vpop.f32.mrf.mxu0  ;;  %7644 = vmatprep.subr.bf16.mxu0 %v9794_v52  ;;  %v9777_v24 = vcombine.low %v11631_v20, %v11634_v45  ;;  %v6981_v52 = vadd.f32 %v11504_v59, %v11593_v38  ;;  %v7050_v1 = vadd.f32 %v11502_v29, %v6979_v12  ;;  %v10018_v59 = vcombine.high %v11667_v35, %v11670_v15  ;;  %v11691_v29 = vld [vmem:[%s10663_s8 + $0x1118] sm:$0xff] }
 0x234   : > { %7714 = vmatpush1.bf16.msra.mxu1 %v10065_v9  ;;  %8921 = vst [vmem:[%s11282_s17 + $0x18] sm:$0xff] %v7180_v37  ;;  %v7182_v13 = vadd.f32 %v7181_v55, %v7111_v0  ;;  %v7113_v60 = vadd.f32 %v7112_v6, %v7042_v28  ;;  %v11664_v9 = vld [vmem:[%s10663_s8 + $0x11d8] sm:$0xff]  ;;  %v6985_v20 = vadd.f32 %v11513_v58, %v11585_v2 }
 0x235   : > { %v7183_v47 = vpop.f32.mrf.mxu1  ;;  %7715 = vmatprep.subr.bf16.mxu1 %v10050_v61  ;;  %v7116_v14 = vpop.f32.mrf.mxu0  ;;  %7541 = vmatmul.mubr.bf16.gmra.mxu0 %v10782_v42  ;;  %v9762_v44 = vcombine.high %v11657_v50, %v11664_v9  ;;  %v11700_v37 = vld [vmem:[%s10663_s8 + $0x1918] sm:$0xff]  ;;  %v7052_v58 = vadd.f32 %v11508_v10, %v6981_v52  ;;  %v9761_v43 = vcombine.low %v11657_v50, %v11664_v9 }
 0x236   : > { %8936 = vst [vmem:[%s11282_s17 + $0x90] sm:$0xff] %v7182_v13  ;;  %v7184_v61 = vadd.f32 %v7183_v47, %v7113_v60  ;;  %v7117_v7 = vadd.f32 %v7116_v14, %v7046_v41  ;;  %7645 = vmatpush1.bf16.msra.mxu0 %v9793_v34  ;;  %7550 = vmatprep.mubr.bf16.mxu0 %v10789_v56  ;;  %v11703_v0 = vld [vmem:[%s10663_s8 + $0x1958] sm:$0xff] }
 0x237   : > { %v7187_v4 = vpop.f32.mrf.mxu1  ;;  %7612 = vmatmul.mubr.bf16.gmra.mxu1 %v10785_v46  ;;  %v7118_v3 = vpop.f32.mrf.mxu0  ;;  %7646 = vmatprep.subr.bf16.mxu0 %v9778_v16  ;;  %v6989_v6 = vadd.f32 %v11528_v30, %v11585_v2  ;;  %v10017_v10 = vcombine.low %v11667_v35, %v11670_v15  ;;  %v9746_v16 = vcombine.high %v11691_v29, %v11694_v57  ;;  %v11717_v41 = vld [vmem:[%s10663_s8 + $0x1098] sm:$0xff] }
 0x238   : > { %7716 = vmatpush1.bf16.msra.mxu1 %v10049_v23  ;;  %8937 = vst [vmem:[%s11282_s17 + $0x98] sm:$0xff] %v7184_v61  ;;  %v7119_v45 = vadd.f32 %v7118_v3, %v7048_v53  ;;  %v7188_v40 = vadd.f32 %v7187_v4, %v7117_v7  ;;  %7621 = vmatprep.mubr.bf16.mxu1 %v10794_v62  ;;  %v11727_v9 = vld [vmem:[%s10663_s8 + $0x1898] sm:$0xff] }
 0x239   : > { %v7189_v5 = vpop.f32.mrf.mxu1  ;;  %7717 = vmatprep.subr.bf16.mxu1 %v10034_v26  ;;  %v7120_v28 = vpop.f32.mrf.mxu0  ;;  %v7056_v13 = vadd.f32 %v11516_v39, %v6985_v20  ;;  %v10002_v30 = vcombine.high %v11700_v37, %v11703_v0  ;;  %v11724_v26 = vld [vmem:[%s10663_s8 + $0x10d8] sm:$0xff]  ;;  %v7058_v15 = vadd.f32 %v11523_v63, %v6987_v48  ;;  %v9745_v39 = vcombine.low %v11691_v29, %v11694_v57 }
 0x23a   : > { %8952 = vst [vmem:[%s11282_s17 + $0x110] sm:$0xff] %v7188_v40  ;;  %v7121_v55 = vadd.f32 %v7120_v28, %v7050_v1  ;;  %v7190_v34 = vadd.f32 %v7189_v5, %v7119_v45  ;;  %7647 = vmatpush1.bf16.msra.mxu0 %v9777_v24  ;;  %v11730_v35 = vld [vmem:[%s10663_s8 + $0x18d8] sm:$0xff]  ;;  %v10001_v14 = vcombine.low %v11700_v37, %v11703_v0 }
 0x23b   : > { %v7191_v12 = vpop.f32.mrf.mxu1  ;;  %v7122_v23 = vpop.f32.mrf.mxu0  ;;  %7648 = vmatprep.subr.bf16.mxu0 %v9762_v44  ;;  %v6991_v24 = vadd.f32 %v11532_v31, %v11593_v38  ;;  %v7060_v61 = vadd.f32 %v11530_v36, %v6989_v6  ;;  %v9730_v4 = vcombine.high %v11717_v41, %v11724_v26  ;;  %v9986_v31 = vcombine.high %v11727_v9, %v11730_v35  ;;  %v785_v36 = vld [vmem:[%s10663_s8 + $0x1018] sm:$0xff] }
 0x23c   : > { %7718 = vmatpush1.bf16.msra.mxu1 %v10033_v49  ;;  %8953 = vst [vmem:[%s11282_s17 + $0x118] sm:$0xff] %v7190_v34  ;;  %v7123_v50 = vadd.f32 %v7122_v23, %v7052_v58  ;;  %v7192_v60 = vadd.f32 %v7191_v12, %v7121_v55  ;;  %v6995_v1 = vadd.f32 %v11541_v27, %v11585_v2  ;;  %v793_v20 = vld [vmem:[%s10663_s8 + $0x1058] sm:$0xff] }
 0x23d   : > { %v7193_v47 = vpop.f32.mrf.mxu1  ;;  %7719 = vmatprep.subr.bf16.mxu1 %v10018_v59  ;;  %v7126_v53 = vpop.f32.mrf.mxu0  ;;  %7551 = vmatmul.mubr.bf16.gmra.mxu0 %v10802_v8  ;;  %v9729_v40 = vcombine.low %v11717_v41, %v11724_v26  ;;  %v1041_v5 = vld [vmem:[%s10663_s8 + $0x1818] sm:$0xff]  ;;  %v7062_v27 = vadd.f32 %v11536_v51, %v6991_v24  ;;  %v6997_v2 = vadd.f32 %v11546_v54, %v11593_v38  ;;  %v13583_v41 = vld [vmem:[#allocation14_spill] sm:$0xff] }
 0x23e   : > { %8968 = vst [vmem:[%s11282_s17 + $0x190] sm:$0xff] %v7192_v60  ;;  %v7127_v49 = vadd.f32 %v7126_v53, %v7056_v13  ;;  %v7194_v52 = vadd.f32 %v7193_v47, %v7123_v50  ;;  %7649 = vmatpush1.bf16.msra.mxu0 %v9761_v43  ;;  %7560 = vmatprep.mubr.bf16.mxu0 %v10809_v18  ;;  %v1049_v29 = vld [vmem:[%s10663_s8 + $0x1858] sm:$0xff]  ;;  %v13584_v13 = vld [vmem:[#allocation32_spill] sm:$0xff] }
 0x23f   : > { %v7197_v63 = vpop.f32.mrf.mxu1  ;;  %7622 = vmatmul.mubr.bf16.gmra.mxu1 %v10805_v11  ;;  %v7128_v7 = vpop.f32.mrf.mxu0  ;;  %7650 = vmatprep.subr.bf16.mxu0 %v9746_v16  ;;  %v9985_v0 = vcombine.low %v11727_v9, %v11730_v35  ;;  %v9714_v58 = vcombine.high %v785_v36, %v793_v20  ;;  %v7066_v51 = vadd.f32 %v11544_v19, %v6995_v1  ;;  %v1025_v12 = vld [vmem:[%s10663_s8 + $0x1798] sm:$0xff] }
 0x240   : > { %7720 = vmatpush1.bf16.msra.mxu1 %v10017_v10  ;;  %8969 = vst [vmem:[%s11282_s17 + $0x198] sm:$0xff] %v7194_v52  ;;  %v7129_v3 = vadd.f32 %v7128_v7, %v7058_v15  ;;  %v7198_v44 = vadd.f32 %v7197_v63, %v7127_v49  ;;  %7631 = vmatprep.mubr.bf16.mxu1 %v10814_v22  ;;  %v1033_v43 = vld [vmem:[%s10663_s8 + $0x17d8] sm:$0xff]  ;;  %v13586_v52 = vld [vmem:[#allocation16_spill] sm:$0xff] }
 0x241   : > { %v7199_v59 = vpop.f32.mrf.mxu1  ;;  %7721 = vmatprep.subr.bf16.mxu1 %v10002_v30  ;;  %v7130_v45 = vpop.f32.mrf.mxu0  ;;  %v9970_v34 = vcombine.high %v1041_v5, %v1049_v29  ;;  %v9713_v23 = vcombine.low %v785_v36, %v793_v20  ;;  %v1281_v10 = vld [vmem:[%s10663_s8 + $0x1f98] sm:$0xff]  ;;  %v7068_v50 = vadd.f32 %v13584_v13, %v6997_v2  ;;  %v9969_v9 = vcombine.low %v1041_v5, %v1049_v29 }
 0x242   : > { %8984 = vst [vmem:[%s11282_s17 + $0x210] sm:$0xff] %v7198_v44  ;;  %v7131_v57 = vadd.f32 %v7130_v45, %v7060_v61  ;;  %v7200_v48 = vadd.f32 %v7199_v59, %v7129_v3  ;;  %7651 = vmatpush1.bf16.msra.mxu0 %v9745_v39  ;;  %v1289_v16 = vld [vmem:[%s10663_s8 + $0x1fd8] sm:$0xff]  ;;  %v9954_v35 = vcombine.high %v1025_v12, %v1033_v43 }
 0x243   : > { %v7201_v28 = vpop.f32.mrf.mxu1  ;;  %v7132_v37 = vpop.f32.mrf.mxu0  ;;  %7652 = vmatprep.subr.bf16.mxu0 %v9730_v4  ;;  %v13585_v30 = vld [vmem:[#allocation15_spill] sm:$0xff]  ;;  %v13587_v4 = vld [vmem:[#allocation17_spill] sm:$0xff]  ;;  %v9953_v1 = vcombine.low %v1025_v12, %v1033_v43  ;;  %v10209_v44 = vcombine.low %v1281_v10, %v1289_v16 }
 0x244   : > { %7722 = vmatpush1.bf16.msra.mxu1 %v10001_v14  ;;  %8985 = vst [vmem:[%s11282_s17 + $0x218] sm:$0xff] %v7200_v48  ;;  %v7133_v54 = vadd.f32 %v7132_v37, %v7062_v27  ;;  %v7202_v38 = vadd.f32 %v7201_v28, %v7131_v57  ;;  %v10210_v14 = vcombine.high %v1281_v10, %v1289_v16  ;;  %v1009_v24 = vld [vmem:[%s10663_s8 + $0x1718] sm:$0xff] }
 0x245   : > { %v7203_v55 = vpop.f32.mrf.mxu1  ;;  %7723 = vmatprep.subr.bf16.mxu1 %v9986_v31  ;;  %v7136_v6 = vpop.f32.mrf.mxu0  ;;  %7561 = vmatmul.mubr.bf16.gmra.mxu0 %v13583_v41  ;;  %v1017_v49 = vld [vmem:[%s10663_s8 + $0x1758] sm:$0xff]  ;;  %v746_v41 = vld [vmem:[%s10663_s8 + $0xee0] sm:$0xff] }
 0x246   : > { %9000 = vst [vmem:[%s11282_s17 + $0x290] sm:$0xff] %v7202_v38  ;;  %v7137_v60 = vadd.f32 %v7136_v6, %v7066_v51  ;;  %v7204_v19 = vadd.f32 %v7203_v55, %v7133_v54  ;;  %7653 = vmatpush1.bf16.msra.mxu0 %v9729_v40  ;;  %7672 = vmatprep.mubr.bf16.mxu0 %v13586_v52  ;;  %v1265_v63 = vld [vmem:[%s10663_s8 + $0x1f18] sm:$0xff]  ;;  %v482_v52 = vld [vmem:[%s10663_s8 + $0x6a0] sm:$0xff] }
 0x247   : > { %v7207_v47 = vpop.f32.mrf.mxu1  ;;  %7632 = vmatmul.mubr.bf16.gmra.mxu1 %v13585_v30  ;;  %v7138_v26 = vpop.f32.mrf.mxu0  ;;  %7654 = vmatprep.subr.bf16.mxu0 %v9714_v58  ;;  %v1273_v61 = vld [vmem:[%s10663_s8 + $0x1f58] sm:$0xff]  ;;  %v9938_v59 = vcombine.high %v1009_v24, %v1017_v49  ;;  %v9937_v2 = vcombine.low %v1009_v24, %v1017_v49  ;;  %v490_v30 = vld [vmem:[%s10663_s8 + $0x6e0] sm:$0xff] }
 0x248   : > { %7724 = vmatpush1.bf16.msra.mxu1 %v9985_v0  ;;  %9001 = vst [vmem:[%s11282_s17 + $0x298] sm:$0xff] %v7204_v19  ;;  %v7139_v15 = vadd.f32 %v7138_v26, %v7068_v50  ;;  %v7208_v53 = vadd.f32 %v7207_v47, %v7137_v60  ;;  %7743 = vmatprep.mubr.bf16.mxu1 %v13587_v4  ;;  %v993_v45 = vld [vmem:[%s10663_s8 + $0x1698] sm:$0xff]  ;;  %v13603_v4 = vld [vmem:[#allocation12_spill] sm:$0xff] }
 0x249   : > { %v7209_v39 = vpop.f32.mrf.mxu1  ;;  %7725 = vmatprep.subr.bf16.mxu1 %v9970_v34  ;;  %v7140_v7 = vpop.f32.mrf.mxu0  ;;  %v10194_v20 = vcombine.high %v1265_v63, %v1273_v61  ;;  %v1001_v40 = vld [vmem:[%s10663_s8 + $0x16d8] sm:$0xff]  ;;  %v10193_v57 = vcombine.low %v1265_v63, %v1273_v61 }
 0x24a   : > { %9016 = vst [vmem:[%s11282_s17 + $0x310] sm:$0x1] %v7208_v53  ;;  %v7210_v31 = vadd.f32 %v7209_v39, %v7139_v15  ;;  %7655 = vmatpush1.bf16.msra.mxu0 %v9713_v23  ;;  %v1249_v29 = vld [vmem:[%s10663_s8 + $0x1e98] sm:$0xff]  ;;  %v9922_v48 = vcombine.high %v993_v45, %v1001_v40  ;;  %v9921_v54 = vcombine.low %v993_v45, %v1001_v40 }
 0x24b   : > { %v7211_v3 = vpop.f32.mrf.mxu1  ;;  %7656 = vmatprep.subr.bf16.mxu0 %v9954_v35  ;;  %v7141_v36 = vpop.f32.mrf.mxu0  ;;  %v1257_v27 = vld [vmem:[%s10663_s8 + $0x1ed8] sm:$0xff] }
 0x24c   : > { %7726 = vmatpush1.bf16.msra.mxu1 %v9969_v9  ;;  %9017 = vst [vmem:[%s11282_s17 + $0x318] sm:$0x1] %v7210_v31  ;;  %v10178_v28 = vcombine.high %v1249_v29, %v1257_v27  ;;  %v977_v37 = vld [vmem:[%s10663_s8 + $0x1618] sm:$0xff]  ;;  %v10177_v38 = vcombine.low %v1249_v29, %v1257_v27  ;;  %v394_v29 = vld [vmem:[%s10663_s8 + $0x3e0] sm:$0xff] }
 0x24d   : > { %7727 = vmatprep.subr.bf16.mxu1 %v10210_v14  ;;  %v7212_v5 = vpop.f32.mrf.mxu1  ;;  %v985_v0 = vld [vmem:[%s10663_s8 + $0x1658] sm:$0xff]  ;;  %v642_v27 = vld [vmem:[%s10663_s8 + $0xba0] sm:$0xff] }
 0x24e   : > { %7657 = vmatpush2.bf16.msra.mxu0 %v9953_v1  ;;  %v1233_v58 = vld [vmem:[%s10663_s8 + $0x1e18] sm:$0xff]  ;;  %v9906_v55 = vcombine.high %v977_v37, %v985_v0  ;;  %v9905_v10 = vcombine.low %v977_v37, %v985_v0  ;;  %v386_v5 = vld [vmem:[%s10663_s8 + $0x3a0] sm:$0xff] }
 0x24f   : > { %7658 = vmatprep.subr.bf16.mxu0 %v9938_v59  ;;  %v1241_v51 = vld [vmem:[%s10663_s8 + $0x1e58] sm:$0xff]  ;;  %v370_v0 = vld [vmem:[%s10663_s8 + $0x320] sm:$0xff] }
 0x250   : > { %7728 = vmatpush2.bf16.msra.mxu1 %v10209_v44  ;;  %v10162_v34 = vcombine.high %v1233_v58, %v1241_v51  ;;  %v961_v12 = vld [vmem:[%s10663_s8 + $0x1598] sm:$0xff]  ;;  %v10161_v16 = vcombine.low %v1233_v58, %v1241_v51  ;;  %v378_v58 = vld [vmem:[%s10663_s8 + $0x360] sm:$0xff] }
 0x251   : > { %7729 = vmatprep.subr.bf16.mxu1 %v10194_v20  ;;  %v969_v43 = vld [vmem:[%s10663_s8 + $0x15d8] sm:$0xff]  ;;  %v626_v51 = vld [vmem:[%s10663_s8 + $0xb20] sm:$0xff] }
 0x252   : > { %7659 = vmatpush2.bf16.msra.mxu0 %v9937_v2  ;;  %v1217_v6 = vld [vmem:[%s10663_s8 + $0x1d98] sm:$0xff]  ;;  %v9890_v13 = vcombine.high %v961_v12, %v969_v43  ;;  %v9889_v9 = vcombine.low %v961_v12, %v969_v43  ;;  %v650_v2 = vld [vmem:[%s10663_s8 + $0xbe0] sm:$0xff] }
 0x253   : > { %7660 = vmatprep.subr.bf16.mxu0 %v9922_v48  ;;  %v1225_v23 = vld [vmem:[%s10663_s8 + $0x1dd8] sm:$0xff]  ;;  %v9572_v37 = vcombine.high %v642_v27, %v650_v2  ;;  %v354_v43 = vld [vmem:[%s10663_s8 + $0x2a0] sm:$0xff] }
 0x254   : > { %7730 = vmatpush2.bf16.msra.mxu1 %v10193_v57  ;;  %v10146_v50 = vcombine.high %v1217_v6, %v1225_v23  ;;  %v945_v60 = vld [vmem:[%s10663_s8 + $0x1518] sm:$0xff]  ;;  %v10145_v35 = vcombine.low %v1217_v6, %v1225_v23  ;;  %v362_v6 = vld [vmem:[%s10663_s8 + $0x2e0] sm:$0xff] }
 0x255   : > { %7731 = vmatprep.subr.bf16.mxu1 %v10178_v28  ;;  %v953_v19 = vld [vmem:[%s10663_s8 + $0x1558] sm:$0xff]  ;;  %v9316_v28 = vcombine.high %v386_v5, %v394_v29 }
 0x256   : > { %7661 = vmatpush2.bf16.msra.mxu0 %v9921_v54  ;;  %v1201_v47 = vld [vmem:[%s10663_s8 + $0x1d18] sm:$0xff]  ;;  %v9874_v15 = vcombine.high %v945_v60, %v953_v19  ;;  %v9873_v63 = vcombine.low %v945_v60, %v953_v19  ;;  %v634_v54 = vld [vmem:[%s10663_s8 + $0xb60] sm:$0xff]  ;;  %v9299_v19 = vcombine.low %v370_v0, %v378_v58 }
 0x257   : > { %7662 = vmatprep.subr.bf16.mxu0 %v9906_v55  ;;  %v1209_v26 = vld [vmem:[%s10663_s8 + $0x1d58] sm:$0xff]  ;;  %v9571_v55 = vcombine.low %v642_v27, %v650_v2  ;;  %v9556_v12 = vcombine.high %v626_v51, %v634_v54 }
 0x258   : > { %7732 = vmatpush2.bf16.msra.mxu1 %v10177_v38  ;;  %v10130_v53 = vcombine.high %v1201_v47, %v1209_v26  ;;  %v929_v39 = vld [vmem:[%s10663_s8 + $0x1498] sm:$0xff]  ;;  %v10129_v61 = vcombine.low %v1201_v47, %v1209_v26  ;;  %v9315_v38 = vcombine.low %v386_v5, %v394_v29  ;;  %v9555_v26 = vcombine.low %v626_v51, %v634_v54  ;;  %v578_v5 = vld [vmem:[%s10663_s8 + $0x9a0] sm:$0xff] }
 0x259   : > { %7733 = vmatprep.subr.bf16.mxu1 %v10162_v34  ;;  %v937_v14 = vld [vmem:[%s10663_s8 + $0x14d8] sm:$0xff]  ;;  %v9300_v34 = vcombine.high %v370_v0, %v378_v58  ;;  %v586_v29 = vld [vmem:[%s10663_s8 + $0x9e0] sm:$0xff] }
 0x25a   : > { %7663 = vmatpush2.bf16.msra.mxu0 %v9905_v10  ;;  %v1185_v24 = vld [vmem:[%s10663_s8 + $0x1c98] sm:$0xff]  ;;  %v9858_v7 = vcombine.high %v929_v39, %v937_v14  ;;  %v9857_v36 = vcombine.low %v929_v39, %v937_v14  ;;  %v13588_v10 = vld [vmem:[#allocation18_spill] sm:$0xff]  ;;  %v338_v39 = vld [vmem:[%s10663_s8 + $0x220] sm:$0xff]  ;;  %v9508_v51 = vcombine.high %v578_v5, %v586_v29 }
 0x25b   : > { %7664 = vmatprep.subr.bf16.mxu0 %v9890_v13  ;;  %v1193_v49 = vld [vmem:[%s10663_s8 + $0x1cd8] sm:$0xff]  ;;  %v618_v13 = vld [vmem:[%s10663_s8 + $0xae0] sm:$0xff] }
 0x25c   : > { %7734 = vmatpush2.bf16.msra.mxu1 %v10161_v16  ;;  %v10114_v31 = vcombine.high %v1185_v24, %v1193_v49  ;;  %v913_v1 = vld [vmem:[%s10663_s8 + $0x1418] sm:$0xff]  ;;  %v10113_v20 = vcombine.low %v1185_v24, %v1193_v49  ;;  %v610_v16 = vld [vmem:[%s10663_s8 + $0xaa0] sm:$0xff]  ;;  %v13591_v49 = vld [vmem:[#allocation21_spill] sm:$0xff] }
 0x25d   : > { %7735 = vmatprep.subr.bf16.mxu1 %v10146_v50  ;;  %v921_v3 = vld [vmem:[%s10663_s8 + $0x1458] sm:$0xff]  ;;  %v346_v14 = vld [vmem:[%s10663_s8 + $0x260] sm:$0xff] }
 0x25e   : > { %7665 = vmatpush2.bf16.msra.mxu0 %v9889_v9  ;;  %v1169_v44 = vld [vmem:[%s10663_s8 + $0x1c18] sm:$0xff]  ;;  %v9842_v45 = vcombine.high %v913_v1, %v921_v3  ;;  %v9841_v57 = vcombine.low %v913_v1, %v921_v3  ;;  %v9284_v9 = vcombine.high %v354_v43, %v362_v6  ;;  %v9539_v3 = vcombine.low %v610_v16, %v618_v13  ;;  %v13594_v58 = vld [vmem:[#allocation24_spill] sm:$0xff] }
 0x25f   : > { %7666 = vmatprep.subr.bf16.mxu0 %v9874_v15  ;;  %v1177_v59 = vld [vmem:[%s10663_s8 + $0x1c58] sm:$0xff]  ;;  %v13590_v15 = vld [vmem:[#allocation20_spill] sm:$0xff] }
 0x260   : > { %7736 = vmatpush2.bf16.msra.mxu1 %v10145_v35  ;;  %v10098_v40 = vcombine.high %v1169_v44, %v1177_v59  ;;  %v10097_v48 = vcombine.low %v1169_v44, %v1177_v59  ;;  %v13589_v60 = vld [vmem:[#allocation19_spill] sm:$0xff]  ;;  %v9268_v44 = vcombine.high %v338_v39, %v346_v14  ;;  %v306_v54 = vld [vmem:[%s10663_s8 + $0x120] sm:$0xff] }
 0x261   : > { %7737 = vmatprep.subr.bf16.mxu1 %v10130_v53  ;;  %v9540_v53 = vcombine.high %v610_v16, %v618_v13  ;;  %v13593_v2 = vld [vmem:[#allocation23_spill] sm:$0xff] }
 0x262   : > { %7667 = vmatpush2.bf16.msra.mxu0 %v9873_v63  ;;  %v594_v63 = vld [vmem:[%s10663_s8 + $0xa20] sm:$0xff] }
 0x263   : > { %7668 = vmatprep.subr.bf16.mxu0 %v9858_v7 }
 0x264   : > { %7738 = vmatpush2.bf16.msra.mxu1 %v10129_v61  ;;  %v602_v61 = vld [vmem:[%s10663_s8 + $0xa60] sm:$0xff] }
 0x265   : > { %7739 = vmatprep.subr.bf16.mxu1 %v10114_v31  ;;  %v9283_v31 = vcombine.low %v354_v43, %v362_v6  ;;  %v570_v43 = vld [vmem:[%s10663_s8 + $0x960] sm:$0xff] }
 0x266   : > { %7669 = vmatpush2.bf16.msra.mxu0 %v9857_v36  ;;  %v9524_v36 = vcombine.high %v594_v63, %v602_v61 }
 0x267   : > { %7670 = vmatprep.subr.bf16.mxu0 %v9842_v45  ;;  %v330_v45 = vld [vmem:[%s10663_s8 + $0x1e0] sm:$0xff] }
 0x268   : > { %7740 = vmatpush2.bf16.msra.mxu1 %v10113_v20  ;;  %v322_v20 = vld [vmem:[%s10663_s8 + $0x1a0] sm:$0xff] }
 0x269   : > { %7741 = vmatprep.subr.bf16.mxu1 %v10098_v40  ;;  %v13592_v40 = vld [vmem:[#allocation22_spill] sm:$0xff]  ;;  %v9251_v16 = vcombine.low %v322_v20, %v330_v45 }
 0x26a   : > { %7671 = vmatpush2.bf16.msra.mxu0 %v9841_v57  ;;  %v9267_v57 = vcombine.low %v338_v39, %v346_v14  ;;  %v290_v39 = vld [vmem:[%s10663_s8 + $0xa0] sm:$0xff] }
 0x26b   : > { %7782 = vmatprep.subr.bf16.mxu0 %v9316_v28  ;;  %v9523_v28 = vcombine.low %v594_v63, %v602_v61  ;;  %v298_v14 = vld [vmem:[%s10663_s8 + $0xe0] sm:$0xff]  ;;  %v13596_v61 = vld [vmem:[#allocation26_spill] sm:$0xff] }
 0x26c   : > { %7742 = vmatpush2.bf16.msra.mxu1 %v10097_v48 }
 0x26d   : > { %7853 = vmatprep.subr.bf16.mxu1 %v9572_v37  ;;  %v11817_v23 = vpop.f32.mrf.mxu0  ;;  %7673 = vmatmul.mubr.bf16.vlgmr.msra.gmra.mxu0 %v13588_v10  ;;  %v9252_v37 = vcombine.high %v322_v20, %v330_v45 }
 0x26e   : > { %7783 = vmatpush1.bf16.msra.mxu0 %v9315_v38  ;;  %7682 = vmatprep.mubr.bf16.mxu0 %v13590_v15  ;;  %v314_v38 = vld [vmem:[%s10663_s8 + $0x160] sm:$0xff] }
 0x26f   : > { %v11822_v50 = vpop.f32.mrf.mxu1  ;;  %7744 = vmatmul.mubr.bf16.vlgmr.msra.gmra.mxu1 %v13589_v60  ;;  %v11825_v47 = vpop.f32.mrf.mxu0  ;;  %7784 = vmatprep.subr.bf16.mxu0 %v9300_v34  ;;  %v13595_v34 = vld [vmem:[#allocation25_spill] sm:$0xff]  ;;  %v9235_v20 = vcombine.low %v306_v54, %v314_v38  ;;  %v498_v15 = vld [vmem:[%s10663_s8 + $0x720] sm:$0xff] }
 0x270   : > { %7854 = vmatpush1.bf16.msra.mxu1 %v9571_v55  ;;  %7753 = vmatprep.mubr.bf16.mxu1 %v13591_v49  ;;  %v506_v60 = vld [vmem:[%s10663_s8 + $0x760] sm:$0xff] }
 0x271   : > { %v11827_v35 = vpop.f32.mrf.mxu1  ;;  %7855 = vmatprep.subr.bf16.mxu1 %v9556_v12  ;;  %v11832_v24 = vpop.f32.mrf.mxu0  ;;  %v562_v12 = vld [vmem:[%s10663_s8 + $0x920] sm:$0xff] }
 0x272   : > { %7785 = vmatpush1.bf16.msra.mxu0 %v9299_v19  ;;  %v9507_v19 = vcombine.low %v578_v5, %v586_v29  ;;  %v9491_v5 = vcombine.low %v562_v12, %v570_v43  ;;  %v9220_v29 = vcombine.high %v290_v39, %v298_v14 }
 0x273   : > { %v11837_v7 = vpop.f32.mrf.mxu1  ;;  %v11839_v1 = vpop.f32.mrf.mxu0  ;;  %7786 = vmatprep.subr.bf16.mxu0 %v9284_v9 }
 0x274   : > { %7856 = vmatpush1.bf16.msra.mxu1 %v9555_v26  ;;  %v9236_v26 = vcombine.high %v306_v54, %v314_v38  ;;  %v530_v54 = vld [vmem:[%s10663_s8 + $0x820] sm:$0xff] }
 0x275   : > { %v11841_v59 = vpop.f32.mrf.mxu1  ;;  %7857 = vmatprep.subr.bf16.mxu1 %v9540_v53  ;;  %7683 = vmatmul.mubr.bf16.gmra.mxu0 %v13592_v40  ;;  %v11848_v27 = vpop.f32.mrf.mxu0  ;;  %v9492_v53 = vcombine.high %v562_v12, %v570_v43  ;;  %v538_v38 = vld [vmem:[%s10663_s8 + $0x860] sm:$0xff]  ;;  %v9219_v12 = vcombine.low %v290_v39, %v298_v14  ;;  %v13600_v40 = vld [vmem:[#allocation30_spill] sm:$0xff] }
 0x276   : > { %7787 = vmatpush1.bf16.msra.mxu0 %v9283_v31  ;;  %7692 = vmatprep.mubr.bf16.mxu0 %v13594_v58  ;;  %v546_v31 = vld [vmem:[%s10663_s8 + $0x8a0] sm:$0xff] }
 0x277   : > { %7754 = vmatmul.mubr.bf16.gmra.mxu1 %v13593_v2  ;;  %v11851_v48 = vpop.f32.mrf.mxu1  ;;  %7788 = vmatprep.subr.bf16.mxu0 %v9268_v44  ;;  %v11853_v0 = vpop.f32.mrf.mxu0  ;;  %v514_v58 = vld [vmem:[%s10663_s8 + $0x7a0] sm:$0xff] }
 0x278   : > { %7858 = vmatpush1.bf16.msra.mxu1 %v9539_v3  ;;  %7763 = vmatprep.mubr.bf16.mxu1 %v13595_v34  ;;  %v554_v3 = vld [vmem:[%s10663_s8 + $0x8e0] sm:$0xff]  ;;  %v9460_v34 = vcombine.high %v530_v54, %v538_v38 }
 0x279   : > { %7859 = vmatprep.subr.bf16.mxu1 %v9524_v36  ;;  %v11858_v55 = vpop.f32.mrf.mxu1  ;;  %v11863_v6 = vpop.f32.mrf.mxu0  ;;  %v13597_v36 = vld [vmem:[#allocation27_spill] sm:$0xff]  ;;  %v778_v39 = vld [vmem:[%s10663_s8 + $0xfe0] sm:$0xff] }
 0x27a   : > { %7789 = vmatpush1.bf16.msra.mxu0 %v9267_v57 }
 0x27b   : > { %v11865_v13 = vpop.f32.mrf.mxu1  ;;  %7790 = vmatprep.subr.bf16.mxu0 %v9252_v37  ;;  %v11867_v9 = vpop.f32.mrf.mxu0  ;;  %v9476_v37 = vcombine.high %v546_v31, %v554_v3 }
 0x27c   : > { %7860 = vmatpush1.bf16.msra.mxu1 %v9523_v28  ;;  %v13598_v28 = vld [vmem:[#allocation28_spill] sm:$0xff] }
 0x27d   : > { %7861 = vmatprep.subr.bf16.mxu1 %v9508_v51  ;;  %v11871_v63 = vpop.f32.mrf.mxu1  ;;  %7693 = vmatmul.mubr.bf16.gmra.mxu0 %v13596_v61  ;;  %v11876_v44 = vpop.f32.mrf.mxu0  ;;  %v274_v51 = vld [vmem:[%s10663_s8 + $0x20] sm:$0xff] }
 0x27e   : > { %7791 = vmatpush1.bf16.msra.mxu0 %v9251_v16  ;;  %7702 = vmatprep.mubr.bf16.mxu0 %v13598_v28  ;;  %v282_v61 = vld [vmem:[%s10663_s8 + $0x60] sm:$0xff] }
 0x27f   : > { %7764 = vmatmul.mubr.bf16.gmra.mxu1 %v13597_v36  ;;  %v11879_v45 = vpop.f32.mrf.mxu1  ;;  %7792 = vmatprep.subr.bf16.mxu0 %v9236_v26  ;;  %v11881_v57 = vpop.f32.mrf.mxu0  ;;  %v13599_v36 = vld [vmem:[#allocation29_spill] sm:$0xff]  ;;  %v9475_v26 = vcombine.low %v546_v31, %v554_v3  ;;  %v13601_v31 = vld [vmem:[#allocation31_spill] sm:$0xff]  ;;  %v9203_v3 = vcombine.low %v274_v51, %v282_v61 }
 0x280   : > { %7862 = vmatpush1.bf16.msra.mxu1 %v9507_v19  ;;  %7773 = vmatprep.mubr.bf16.mxu1 %v13599_v36  ;;  %v522_v36 = vld [vmem:[%s10663_s8 + $0x7e0] sm:$0xff] }
 0x281   : > { %7863 = vmatprep.subr.bf16.mxu1 %v9492_v53  ;;  %v11886_v16 = vpop.f32.mrf.mxu1  ;;  %v11891_v19 = vpop.f32.mrf.mxu0  ;;  %v9204_v53 = vcombine.high %v274_v51, %v282_v61  ;;  %v762_v61 = vld [vmem:[%s10663_s8 + $0xf60] sm:$0xff] }
 0x282   : > { %7793 = vmatpush1.bf16.msra.mxu0 %v9235_v20  ;;  %v770_v20 = vld [vmem:[%s10663_s8 + $0xfa0] sm:$0xff] }
 0x283   : > { %v11893_v43 = vpop.f32.mrf.mxu1  ;;  %7794 = vmatprep.subr.bf16.mxu0 %v9220_v29  ;;  %v11895_v28 = vpop.f32.mrf.mxu0  ;;  %v9459_v29 = vcombine.low %v530_v54, %v538_v38  ;;  %v9443_v54 = vcombine.low %v514_v58, %v522_v36 }
 0x284   : > { %7864 = vmatpush1.bf16.msra.mxu1 %v9491_v5 }
 0x285   : > { %7865 = vmatprep.subr.bf16.mxu1 %v9476_v37  ;;  %v11899_v2 = vpop.f32.mrf.mxu1  ;;  %7703 = vmatmul.mubr.bf16.gmra.mxu0 %v13600_v40  ;;  %v11904_v14 = vpop.f32.mrf.mxu0  ;;  %v9444_v37 = vcombine.high %v514_v58, %v522_v36  ;;  %v9700_v40 = vcombine.high %v770_v20, %v778_v39  ;;  %v9412_v36 = vcombine.high %v482_v52, %v490_v30 }
 0x286   : > { %7795 = vmatpush1.bf16.msra.mxu0 %v9219_v12  ;;  %7814 = vmatprep.mubr.bf16.mxu0 %v13603_v4  ;;  %v754_v12 = vld [vmem:[%s10663_s8 + $0xf20] sm:$0xff] }
 0x287   : > { %7774 = vmatmul.mubr.bf16.gmra.mxu1 %v13601_v31  ;;  %v11907_v5 = vpop.f32.mrf.mxu1  ;;  %7796 = vmatprep.subr.bf16.mxu0 %v9204_v53  ;;  %v11909_v49 = vpop.f32.mrf.mxu0  ;;  %v9428_v53 = vcombine.high %v498_v15, %v506_v60  ;;  %v9684_v4 = vcombine.high %v754_v12, %v762_v61  ;;  %v9683_v58 = vcombine.low %v754_v12, %v762_v61  ;;  %v458_v12 = vld [vmem:[%s10663_s8 + $0x5e0] sm:$0xff] }
 0x288   : > { %7866 = vmatpush1.bf16.msra.mxu1 %v9475_v26  ;;  %v13604_v26 = vld [vmem:[#allocation13_spill] sm:$0xff]  ;;  %v706_v61 = vld [vmem:[%s10663_s8 + $0xda0] sm:$0xff] }
 0x289   : > { %7867 = vmatprep.subr.bf16.mxu1 %v9460_v34  ;;  %v11913_v10 = vpop.f32.mrf.mxu1  ;;  %v7282_v51 = vpop.f32.mrf.mxu0  ;;  %7885 = vmatprep.mubr.bf16.mxu1 %v13604_v26  ;;  %v9699_v34 = vcombine.low %v770_v20, %v778_v39  ;;  %v466_v20 = vld [vmem:[%s10663_s8 + $0x620] sm:$0xff] }
 0x28a   : > { %13602 = vst [vmem:[#allocation32_spill] sm:$0xff] %v11913_v10  ;;  %7797 = vmatpush1.bf16.msra.mxu0 %v9203_v3  ;;  %v738_v10 = vld [vmem:[%s10663_s8 + $0xea0] sm:$0xff]  ;;  %v9427_v3 = vcombine.low %v498_v15, %v506_v60 }
 0x28b   : > { %v7353_v38 = vpop.f32.mrf.mxu1  ;;  %7798 = vmatprep.subr.bf16.mxu0 %v9444_v37  ;;  %v7283_v31 = vpop.f32.mrf.mxu0  ;;  %v474_v39 = vld [vmem:[%s10663_s8 + $0x660] sm:$0xff]  ;;  %v9411_v37 = vcombine.low %v482_v52, %v490_v30 }
 0x28c   : > { %7868 = vmatpush1.bf16.msra.mxu1 %v9459_v29  ;;  %v722_v31 = vld [vmem:[%s10663_s8 + $0xe20] sm:$0xff]  ;;  %v9396_v60 = vcombine.high %v466_v20, %v474_v39 }
 0x28d   : > { %7869 = vmatprep.subr.bf16.mxu1 %v9700_v40  ;;  %v7354_v51 = vpop.f32.mrf.mxu1  ;;  %v9668_v40 = vcombine.high %v738_v10, %v746_v41  ;;  %v730_v29 = vld [vmem:[%s10663_s8 + $0xe60] sm:$0xff] }
 0x28e   : > { %7799 = vmatpush2.bf16.msra.mxu0 %v9443_v54  ;;  %v9667_v54 = vcombine.low %v738_v10, %v746_v41  ;;  %v9652_v15 = vcombine.high %v722_v31, %v730_v29  ;;  %v714_v38 = vld [vmem:[%s10663_s8 + $0xde0] sm:$0xff] }
 0x28f   : > { %7800 = vmatprep.subr.bf16.mxu0 %v9428_v53  ;;  %v9651_v53 = vcombine.low %v722_v31, %v730_v29  ;;  %v9636_v41 = vcombine.high %v706_v61, %v714_v38  ;;  %v434_v52 = vld [vmem:[%s10663_s8 + $0x520] sm:$0xff] }
 0x290   : > { %7870 = vmatpush2.bf16.msra.mxu1 %v9699_v34  ;;  %v9395_v34 = vcombine.low %v466_v20, %v474_v39  ;;  %v442_v10 = vld [vmem:[%s10663_s8 + $0x560] sm:$0xff] }
 0x291   : > { %7871 = vmatprep.subr.bf16.mxu1 %v9684_v4  ;;  %v450_v4 = vld [vmem:[%s10663_s8 + $0x5a0] sm:$0xff] }
 0x292   : > { %7801 = vmatpush2.bf16.msra.mxu0 %v9427_v3  ;;  %v9380_v30 = vcombine.high %v450_v4, %v458_v12  ;;  %v690_v51 = vld [vmem:[%s10663_s8 + $0xd20] sm:$0xff] }
 0x293   : > { %7802 = vmatprep.subr.bf16.mxu0 %v9412_v36  ;;  %v698_v3 = vld [vmem:[%s10663_s8 + $0xd60] sm:$0xff]  ;;  %v9635_v36 = vcombine.low %v706_v61, %v714_v38 }
 0x294   : > { %7872 = vmatpush2.bf16.msra.mxu1 %v9683_v58  ;;  %v9379_v58 = vcombine.low %v450_v4, %v458_v12  ;;  %v9620_v20 = vcombine.high %v690_v51, %v698_v3  ;;  %v418_v39 = vld [vmem:[%s10663_s8 + $0x4a0] sm:$0xff]  ;;  %v13522_v4 = vsub.s32 4, %v11200_v17 }
 0x295   : > { %7873 = vmatprep.subr.bf16.mxu1 %v9668_v40  ;;  %v9364_v40 = vcombine.high %v434_v52, %v442_v10  ;;  %v426_v31 = vld [vmem:[%s10663_s8 + $0x4e0] sm:$0xff] }
 0x296   : > { %7803 = vmatpush2.bf16.msra.mxu0 %v9411_v37  ;;  %v674_v29 = vld [vmem:[%s10663_s8 + $0xca0] sm:$0xff] }
 0x297   : > { %7804 = vmatprep.subr.bf16.mxu0 %v9396_v60  ;;  %v682_v37 = vld [vmem:[%s10663_s8 + $0xce0] sm:$0xff]  ;;  %v9619_v60 = vcombine.low %v690_v51, %v698_v3 }
 0x298   : > { %7874 = vmatpush2.bf16.msra.mxu1 %v9667_v54  ;;  %v9363_v54 = vcombine.low %v434_v52, %v442_v10  ;;  %v9604_v12 = vcombine.high %v674_v29, %v682_v37  ;;  %v402_v61 = vld [vmem:[%s10663_s8 + $0x420] sm:$0xff]  ;;  %v9603_v52 = vcombine.low %v674_v29, %v682_v37 }
 0x299   : > { %7875 = vmatprep.subr.bf16.mxu1 %v9652_v15  ;;  %v9348_v15 = vcombine.high %v418_v39, %v426_v31  ;;  %v410_v38 = vld [vmem:[%s10663_s8 + $0x460] sm:$0xff] }
 0x29a   : > { %7805 = vmatpush2.bf16.msra.mxu0 %v9395_v34  ;;  %v658_v34 = vld [vmem:[%s10663_s8 + $0xc20] sm:$0xff]  ;;  %v9332_v10 = vcombine.high %v402_v61, %v410_v38 }
 0x29b   : > { %7806 = vmatprep.subr.bf16.mxu0 %v9380_v30  ;;  %v13523_v30 = vsub.s32 5, %v11200_v17  ;;  %v10306_v51 = vld [vmem:[%s11209_s27] sm:$0xff] }
 0x29c   : > { %7876 = vmatpush2.bf16.msra.mxu1 %v9651_v53  ;;  %v666_v53 = vld [vmem:[%s10663_s8 + $0xc60] sm:$0xff]  ;;  %v11948_v3 = vrot.slane %v10306_v51, %v13522_v4 }
 0x29d   : > { %7877 = vmatprep.subr.bf16.mxu1 %v9636_v41  ;;  %v9347_v41 = vcombine.low %v418_v39, %v426_v31  ;;  %v11956_v39 = vrot.slane %v10306_v51, %v13523_v30  ;;  %v9331_v31 = vcombine.low %v402_v61, %v410_v38  ;;  %v9587_v29 = vcombine.low %v658_v34, %v666_v53  ;;  %v890_v4 = vld [vmem:[%s10663_s8 + $0x1360] sm:$0xff] }
 0x29e   : > { %7807 = vmatpush2.bf16.msra.mxu0 %v9379_v58  ;;  %v9588_v58 = vcombine.high %v658_v34, %v666_v53  ;;  %v1138_v26 = vld [vmem:[%s10663_s8 + $0x1b20] sm:$0xff]  ;;  %v7253_v34 = vadd.f32 %v11832_v24, %v11948_v3 }
 0x29f   : > { %7808 = vmatprep.subr.bf16.mxu0 %v9364_v40  ;;  %v906_v40 = vld [vmem:[%s10663_s8 + $0x13e0] sm:$0xff]  ;;  %v7251_v61 = vadd.f32 %v11825_v47, %v11956_v39 }
 0x2a0   : > { %7878 = vmatpush2.bf16.msra.mxu1 %v9635_v36  ;;  %v898_v36 = vld [vmem:[%s10663_s8 + $0x13a0] sm:$0xff] }
 0x2a1   : > { %7879 = vmatprep.subr.bf16.mxu1 %v9620_v20  ;;  %v1154_v20 = vld [vmem:[%s10663_s8 + $0x1ba0] sm:$0xff]  ;;  %v9828_v37 = vcombine.high %v898_v36, %v906_v40  ;;  %v9827_v38 = vcombine.low %v898_v36, %v906_v40 }
 0x2a2   : > { %7809 = vmatpush2.bf16.msra.mxu0 %v9363_v54  ;;  %v1162_v54 = vld [vmem:[%s10663_s8 + $0x1be0] sm:$0xff] }
 0x2a3   : > { %7810 = vmatprep.subr.bf16.mxu0 %v9348_v15  ;;  %v10084_v15 = vcombine.high %v1154_v20, %v1162_v54  ;;  %v1146_v51 = vld [vmem:[%s10663_s8 + $0x1b60] sm:$0xff] }
 0x2a4   : > { %7880 = vmatpush2.bf16.msra.mxu1 %v9619_v60  ;;  %v7249_v60 = vadd.f32 %v11817_v23, %v11948_v3  ;;  %v10083_v23 = vcombine.low %v1154_v20, %v1162_v54  ;;  %v11976_v30 = vld [vmem:[%s10663_s8 + $0x1aa0] sm:$0xff]  ;;  %v10067_v40 = vcombine.low %v1138_v26, %v1146_v51  ;;  %v7322_v20 = vadd.f32 %v11827_v35, %v7251_v61 }
 0x2a5   : > { %7881 = vmatprep.subr.bf16.mxu1 %v9604_v12  ;;  %v882_v12 = vld [vmem:[%s10663_s8 + $0x1320] sm:$0xff]  ;;  %v7255_v54 = vadd.f32 %v11839_v1, %v11956_v39 }
 0x2a6   : > { %7811 = vmatpush2.bf16.msra.mxu0 %v9347_v41  ;;  %v9812_v53 = vcombine.high %v882_v12, %v890_v4  ;;  %v11969_v41 = vld [vmem:[%s10663_s8 + $0x12a0] sm:$0xff]  ;;  %v9811_v24 = vcombine.low %v882_v12, %v890_v4 }
 0x2a7   : > { %7812 = vmatprep.subr.bf16.mxu0 %v9332_v10  ;;  %v10068_v10 = vcombine.high %v1138_v26, %v1146_v51  ;;  %v11979_v47 = vld [vmem:[%s10663_s8 + $0x1ae0] sm:$0xff]  ;;  %v7259_v26 = vadd.f32 %v11848_v27, %v11948_v3  ;;  %v7261_v51 = vadd.f32 %v11853_v0, %v11956_v39  ;;  %v7326_v27 = vadd.f32 %v11841_v59, %v7255_v54 }
 0x2a8   : > { %7882 = vmatpush2.bf16.msra.mxu1 %v9603_v52  ;;  %v7320_v52 = vadd.f32 %v11822_v50, %v7249_v60  ;;  %v10052_v1 = vcombine.high %v11976_v30, %v11979_v47  ;;  %v11997_v12 = vld [vmem:[%s10663_s8 + $0x1260] sm:$0xff]  ;;  %v10051_v59 = vcombine.low %v11976_v30, %v11979_v47 }
 0x2a9   : > { %7883 = vmatprep.subr.bf16.mxu1 %v9588_v58  ;;  %v11973_v58 = vld [vmem:[%s10663_s8 + $0x12e0] sm:$0xff]  ;;  %v7332_v47 = vadd.f32 %v11858_v55, %v7261_v51 }
 0x2aa   : > { %7813 = vmatpush2.bf16.msra.mxu0 %v9331_v31  ;;  %v9796_v35 = vcombine.high %v11969_v41, %v11973_v58  ;;  %v9795_v0 = vcombine.low %v11969_v41, %v11973_v58  ;;  %v12020_v54 = vld [vmem:[%s10663_s8 + $0x11a0] sm:$0xff] }
 0x2ab   : > { %7924 = vmatprep.subr.bf16.mxu0 %v9828_v37  ;;  %v12033_v30 = vld [vmem:[%s10663_s8 + $0x19e0] sm:$0xff] }
 0x2ac   : > { %7884 = vmatpush2.bf16.msra.mxu1 %v9587_v29  ;;  %v7324_v29 = vadd.f32 %v11837_v7, %v7253_v34  ;;  %v11994_v7 = vld [vmem:[%s10663_s8 + $0x1220] sm:$0xff] }
 0x2ad   : > { %7995 = vmatprep.subr.bf16.mxu1 %v10084_v15  ;;  %v7390_v36 = vpop.f32.mrf.mxu0  ;;  %7815 = vmatmul.mubr.bf16.vlgmr.msra.gmra.mxu0 %v10760_v21  ;;  %v12006_v34 = vld [vmem:[%s10663_s8 + $0x1a60] sm:$0xff] }
 0x2ae   : > { %v7391_v50 = vadd.f32 %v7390_v36, %v7320_v52  ;;  %7925 = vmatpush1.bf16.msra.mxu0 %v9827_v38  ;;  %7824 = vmatprep.mubr.bf16.mxu0 %v10769_v32  ;;  %v12003_v38 = vld [vmem:[%s10663_s8 + $0x1a20] sm:$0xff] }
 0x2af   : > { %v7461_v31 = vpop.f32.mrf.mxu1  ;;  %7886 = vmatmul.mubr.bf16.vlgmr.msra.gmra.mxu1 %v10765_v25  ;;  %v7392_v37 = vpop.f32.mrf.mxu0  ;;  %7926 = vmatprep.subr.bf16.mxu0 %v9812_v53 }
 0x2b0   : > { %7996 = vmatpush1.bf16.msra.mxu1 %v10083_v23  ;;  %v7462_v4 = vadd.f32 %v7461_v31, %v7391_v50  ;;  %v7393_v60 = vadd.f32 %v7392_v37, %v7322_v20  ;;  %7895 = vmatprep.mubr.bf16.mxu1 %v10774_v33  ;;  %v9780_v20 = vcombine.high %v11994_v7, %v11997_v12  ;;  %v12030_v31 = vld [vmem:[%s10663_s8 + $0x19a0] sm:$0xff] }
 0x2b1   : > { %v7463_v15 = vpop.f32.mrf.mxu1  ;;  %7997 = vmatprep.subr.bf16.mxu1 %v10068_v10  ;;  %v7394_v61 = vpop.f32.mrf.mxu0  ;;  %v7263_v10 = vadd.f32 %v11863_v6, %v11948_v3  ;;  %v10036_v6 = vcombine.high %v12003_v38, %v12006_v34  ;;  %v10035_v37 = vcombine.low %v12003_v38, %v12006_v34  ;;  %v12057_v38 = vld [vmem:[%s10663_s8 + $0x1160] sm:$0xff]  ;;  %v7271_v34 = vadd.f32 %v11881_v57, %v11956_v39 }
 0x2b2   : > { %8922 = vst [vmem:[%s11282_s17 + $0x20] sm:$0xff] %v7462_v4  ;;  %v7464_v23 = vadd.f32 %v7463_v15, %v7393_v60  ;;  %v7395_v53 = vadd.f32 %v7394_v61, %v7324_v29  ;;  %7927 = vmatpush1.bf16.msra.mxu0 %v9811_v24  ;;  %v7330_v24 = vadd.f32 %v11851_v48, %v7259_v26 }
 0x2b3   : > { %v7465_v52 = vpop.f32.mrf.mxu1  ;;  %v7396_v36 = vpop.f32.mrf.mxu0  ;;  %7928 = vmatprep.subr.bf16.mxu0 %v9796_v35  ;;  %v9779_v48 = vcombine.low %v11994_v7, %v11997_v12  ;;  %v7265_v35 = vadd.f32 %v11867_v9, %v11956_v39  ;;  %v7334_v4 = vadd.f32 %v11865_v13, %v7263_v10  ;;  %v10020_v9 = vcombine.high %v12030_v31, %v12033_v30  ;;  %v12054_v13 = vld [vmem:[%s10663_s8 + $0x1120] sm:$0xff] }
 0x2b4   : > { %7998 = vmatpush1.bf16.msra.mxu1 %v10067_v40  ;;  %8923 = vst [vmem:[%s11282_s17 + $0x28] sm:$0xff] %v7464_v23  ;;  %v7466_v41 = vadd.f32 %v7465_v52, %v7395_v53  ;;  %v7397_v58 = vadd.f32 %v7396_v36, %v7326_v27  ;;  %v12027_v40 = vld [vmem:[%s10663_s8 + $0x11e0] sm:$0xff]  ;;  %v7269_v7 = vadd.f32 %v11876_v44, %v11948_v3 }
 0x2b5   : > { %v7467_v50 = vpop.f32.mrf.mxu1  ;;  %7999 = vmatprep.subr.bf16.mxu1 %v10052_v1  ;;  %v7400_v29 = vpop.f32.mrf.mxu0  ;;  %7825 = vmatmul.mubr.bf16.gmra.mxu0 %v10782_v42  ;;  %v9764_v15 = vcombine.high %v12020_v54, %v12027_v40  ;;  %v12063_v23 = vld [vmem:[%s10663_s8 + $0x1920] sm:$0xff]  ;;  %v7336_v44 = vadd.f32 %v11871_v63, %v7265_v35  ;;  %v9763_v57 = vcombine.low %v12020_v54, %v12027_v40 }
 0x2b6   : > { %8938 = vst [vmem:[%s11282_s17 + $0xa0] sm:$0xff] %v7466_v41  ;;  %v7468_v1 = vadd.f32 %v7467_v50, %v7397_v58  ;;  %v7401_v26 = vadd.f32 %v7400_v29, %v7330_v24  ;;  %7929 = vmatpush1.bf16.msra.mxu0 %v9795_v0  ;;  %7834 = vmatprep.mubr.bf16.mxu0 %v10789_v56  ;;  %v12066_v53 = vld [vmem:[%s10663_s8 + $0x1960] sm:$0xff] }
 0x2b7   : > { %v7471_v55 = vpop.f32.mrf.mxu1  ;;  %7896 = vmatmul.mubr.bf16.gmra.mxu1 %v10785_v46  ;;  %v7402_v60 = vpop.f32.mrf.mxu0  ;;  %7930 = vmatprep.subr.bf16.mxu0 %v9780_v20  ;;  %v7273_v36 = vadd.f32 %v11891_v19, %v11948_v3  ;;  %v10019_v63 = vcombine.low %v12030_v31, %v12033_v30  ;;  %v9748_v20 = vcombine.high %v12054_v13, %v12057_v38  ;;  %v12080_v24 = vld [vmem:[%s10663_s8 + $0x10a0] sm:$0xff] }
 0x2b8   : > { %8000 = vmatpush1.bf16.msra.mxu1 %v10051_v59  ;;  %8939 = vst [vmem:[%s11282_s17 + $0xa8] sm:$0xff] %v7468_v1  ;;  %v7403_v12 = vadd.f32 %v7402_v60, %v7332_v47  ;;  %v7472_v51 = vadd.f32 %v7471_v55, %v7401_v26  ;;  %7905 = vmatprep.mubr.bf16.mxu1 %v10794_v62  ;;  %v12090_v40 = vld [vmem:[%s10663_s8 + $0x18a0] sm:$0xff] }
 0x2b9   : > { %v7473_v61 = vpop.f32.mrf.mxu1  ;;  %8001 = vmatprep.subr.bf16.mxu1 %v10036_v6  ;;  %v7404_v27 = vpop.f32.mrf.mxu0  ;;  %v7340_v41 = vadd.f32 %v11879_v45, %v7269_v7  ;;  %v10004_v19 = vcombine.high %v12063_v23, %v12066_v53  ;;  %v12087_v6 = vld [vmem:[%s10663_s8 + $0x10e0] sm:$0xff]  ;;  %v7342_v30 = vadd.f32 %v11886_v16, %v7271_v34  ;;  %v9747_v45 = vcombine.low %v12054_v13, %v12057_v38 }
 0x2ba   : > { %8954 = vst [vmem:[%s11282_s17 + $0x120] sm:$0xff] %v7472_v51  ;;  %v7405_v52 = vadd.f32 %v7404_v27, %v7334_v4  ;;  %v7474_v0 = vadd.f32 %v7473_v61, %v7403_v12  ;;  %7931 = vmatpush1.bf16.msra.mxu0 %v9779_v48  ;;  %v12093_v31 = vld [vmem:[%s10663_s8 + $0x18e0] sm:$0xff]  ;;  %v10003_v29 = vcombine.low %v12063_v23, %v12066_v53 }
 0x2bb   : > { %v7475_v10 = vpop.f32.mrf.mxu1  ;;  %v7406_v59 = vpop.f32.mrf.mxu0  ;;  %7932 = vmatprep.subr.bf16.mxu0 %v9764_v15  ;;  %v7275_v48 = vadd.f32 %v11895_v28, %v11956_v39  ;;  %v7344_v1 = vadd.f32 %v11893_v43, %v7273_v36  ;;  %v9732_v55 = vcombine.high %v12080_v24, %v12087_v6  ;;  %v9988_v28 = vcombine.high %v12090_v40, %v12093_v31  ;;  %v786_v43 = vld [vmem:[%s10663_s8 + $0x1020] sm:$0xff] }
 0x2bc   : > { %8002 = vmatpush1.bf16.msra.mxu1 %v10035_v37  ;;  %8955 = vst [vmem:[%s11282_s17 + $0x128] sm:$0xff] %v7474_v0  ;;  %v7407_v54 = vadd.f32 %v7406_v59, %v7336_v44  ;;  %v7476_v58 = vadd.f32 %v7475_v10, %v7405_v52  ;;  %v7279_v4 = vadd.f32 %v11904_v14, %v11948_v3  ;;  %v794_v7 = vld [vmem:[%s10663_s8 + $0x1060] sm:$0xff] }
 0x2bd   : > { %v7477_v50 = vpop.f32.mrf.mxu1  ;;  %8003 = vmatprep.subr.bf16.mxu1 %v10020_v9  ;;  %v7410_v47 = vpop.f32.mrf.mxu0  ;;  %7835 = vmatmul.mubr.bf16.gmra.mxu0 %v10802_v8  ;;  %v9731_v51 = vcombine.low %v12080_v24, %v12087_v6  ;;  %v1042_v61 = vld [vmem:[%s10663_s8 + $0x1820] sm:$0xff]  ;;  %v7346_v14 = vadd.f32 %v11899_v2, %v7275_v48  ;;  %v7281_v3 = vadd.f32 %v11909_v49, %v11956_v39  ;;  %v13605_v24 = vld [vmem:[#allocation14_spill] sm:$0xff] }
 0x2be   : > { %8970 = vst [vmem:[%s11282_s17 + $0x1a0] sm:$0xff] %v7476_v58  ;;  %v7411_v37 = vadd.f32 %v7410_v47, %v7340_v41  ;;  %v7478_v35 = vadd.f32 %v7477_v50, %v7407_v54  ;;  %7933 = vmatpush1.bf16.msra.mxu0 %v9763_v57  ;;  %7844 = vmatprep.mubr.bf16.mxu0 %v10809_v18  ;;  %v1050_v13 = vld [vmem:[%s10663_s8 + $0x1860] sm:$0xff] }
 0x2bf   : > { %v7481_v16 = vpop.f32.mrf.mxu1  ;;  %7906 = vmatmul.mubr.bf16.gmra.mxu1 %v10805_v11  ;;  %v7412_v26 = vpop.f32.mrf.mxu0  ;;  %7934 = vmatprep.subr.bf16.mxu0 %v9748_v20  ;;  %v9987_v53 = vcombine.low %v12090_v40, %v12093_v31  ;;  %v9716_v44 = vcombine.high %v786_v43, %v794_v7  ;;  %v7350_v2 = vadd.f32 %v11907_v5, %v7279_v4  ;;  %v1026_v10 = vld [vmem:[%s10663_s8 + $0x17a0] sm:$0xff] }
 0x2c0   : > { %8004 = vmatpush1.bf16.msra.mxu1 %v10019_v63  ;;  %8971 = vst [vmem:[%s11282_s17 + $0x1a8] sm:$0xff] %v7478_v35  ;;  %v7413_v60 = vadd.f32 %v7412_v26, %v7342_v30  ;;  %v7482_v15 = vadd.f32 %v7481_v16, %v7411_v37  ;;  %7915 = vmatprep.mubr.bf16.mxu1 %v10814_v22  ;;  %v1034_v57 = vld [vmem:[%s10663_s8 + $0x17e0] sm:$0xff] }
 0x2c1   : > { %v7483_v9 = vpop.f32.mrf.mxu1  ;;  %8005 = vmatprep.subr.bf16.mxu1 %v10004_v19  ;;  %v7414_v12 = vpop.f32.mrf.mxu0  ;;  %v9972_v0 = vcombine.high %v1042_v61, %v1050_v13  ;;  %v9715_v59 = vcombine.low %v786_v43, %v794_v7  ;;  %v1282_v63 = vld [vmem:[%s10663_s8 + $0x1fa0] sm:$0xff]  ;;  %v13607_v19 = vld [vmem:[#allocation15_spill] sm:$0xff]  ;;  %v9971_v40 = vcombine.low %v1042_v61, %v1050_v13  ;;  %v9956_v31 = vcombine.high %v1026_v10, %v1034_v57 }
 0x2c2   : > { %8986 = vst [vmem:[%s11282_s17 + $0x220] sm:$0xff] %v7482_v15  ;;  %v7415_v38 = vadd.f32 %v7414_v12, %v7344_v1  ;;  %v7484_v34 = vadd.f32 %v7483_v9, %v7413_v60  ;;  %7935 = vmatpush1.bf16.msra.mxu0 %v9747_v45  ;;  %v1290_v20 = vld [vmem:[%s10663_s8 + $0x1fe0] sm:$0xff]  ;;  %v9955_v4 = vcombine.low %v1026_v10, %v1034_v57 }
 0x2c3   : > { %v7485_v27 = vpop.f32.mrf.mxu1  ;;  %v7416_v23 = vpop.f32.mrf.mxu0  ;;  %7936 = vmatprep.subr.bf16.mxu0 %v9732_v55  ;;  %v13606_v41 = vld [vmem:[#allocation32_spill] sm:$0xff]  ;;  %v13609_v55 = vld [vmem:[#allocation17_spill] sm:$0xff]  ;;  %v10211_v15 = vcombine.low %v1282_v63, %v1290_v20 }
 0x2c4   : > { %8006 = vmatpush1.bf16.msra.mxu1 %v10003_v29  ;;  %8987 = vst [vmem:[%s11282_s17 + $0x228] sm:$0xff] %v7484_v34  ;;  %v7417_v49 = vadd.f32 %v7416_v23, %v7346_v14  ;;  %v7486_v39 = vadd.f32 %v7485_v27, %v7415_v38  ;;  %v7352_v54 = vadd.f32 %v13606_v41, %v7281_v3  ;;  %v1010_v48 = vld [vmem:[%s10663_s8 + $0x1720] sm:$0xff] }
 0x2c5   : > { %v7487_v52 = vpop.f32.mrf.mxu1  ;;  %8007 = vmatprep.subr.bf16.mxu1 %v9988_v28  ;;  %v7420_v36 = vpop.f32.mrf.mxu0  ;;  %7845 = vmatmul.mubr.bf16.gmra.mxu0 %v13605_v24  ;;  %v10212_v29 = vcombine.high %v1282_v63, %v1290_v20  ;;  %v1018_v37 = vld [vmem:[%s10663_s8 + $0x1760] sm:$0xff]  ;;  %v747_v24 = vld [vmem:[%s10663_s8 + $0xee8] sm:$0xff] }
 0x2c6   : > { %9002 = vst [vmem:[%s11282_s17 + $0x2a0] sm:$0xff] %v7486_v39  ;;  %v7421_v58 = vadd.f32 %v7420_v36, %v7350_v2  ;;  %v7488_v5 = vadd.f32 %v7487_v52, %v7417_v49  ;;  %7937 = vmatpush1.bf16.msra.mxu0 %v9731_v51  ;;  %v13608_v35 = vld [vmem:[#allocation16_spill] sm:$0xff]  ;;  %v9940_v9 = vcombine.high %v1010_v48, %v1018_v37 }
 0x2c7   : > { %v7491_v50 = vpop.f32.mrf.mxu1  ;;  %7916 = vmatmul.mubr.bf16.gmra.mxu1 %v13607_v19  ;;  %v7422_v6 = vpop.f32.mrf.mxu0  ;;  %7938 = vmatprep.subr.bf16.mxu0 %v9716_v44  ;;  %v1266_v16 = vld [vmem:[%s10663_s8 + $0x1f20] sm:$0xff]  ;;  %v9939_v3 = vcombine.low %v1010_v48, %v1018_v37  ;;  %v491_v19 = vld [vmem:[%s10663_s8 + $0x6e8] sm:$0xff] }
 0x2c8   : > { %8008 = vmatpush1.bf16.msra.mxu1 %v9987_v53  ;;  %9003 = vst [vmem:[%s11282_s17 + $0x2a8] sm:$0xff] %v7488_v5  ;;  %v7423_v30 = vadd.f32 %v7422_v6, %v7352_v54  ;;  %v7492_v47 = vadd.f32 %v7491_v50, %v7421_v58  ;;  %7956 = vmatprep.mubr.bf16.mxu0 %v13608_v35  ;;  %v1274_v1 = vld [vmem:[%s10663_s8 + $0x1f60] sm:$0xff]  ;;  %v483_v35 = vld [vmem:[%s10663_s8 + $0x6a8] sm:$0xff] }
 0x2c9   : > { %v7493_v45 = vpop.f32.mrf.mxu1  ;;  %8009 = vmatprep.subr.bf16.mxu1 %v9972_v0  ;;  %v7424_v26 = vpop.f32.mrf.mxu0  ;;  %8027 = vmatprep.mubr.bf16.mxu1 %v13609_v55  ;;  %v10196_v7 = vcombine.high %v1266_v16, %v1274_v1  ;;  %v994_v12 = vld [vmem:[%s10663_s8 + $0x16a0] sm:$0xff]  ;;  %v10195_v38 = vcombine.low %v1266_v16, %v1274_v1 }
 0x2ca   : > { %9018 = vst [vmem:[%s11282_s17 + $0x320] sm:$0x1] %v7492_v47  ;;  %v7494_v28 = vadd.f32 %v7493_v45, %v7423_v30  ;;  %7939 = vmatpush1.bf16.msra.mxu0 %v9715_v59  ;;  %v1002_v51 = vld [vmem:[%s10663_s8 + $0x16e0] sm:$0xff] }
 0x2cb   : > { %v7495_v60 = vpop.f32.mrf.mxu1  ;;  %7940 = vmatprep.subr.bf16.mxu0 %v9956_v31  ;;  %v7425_v43 = vpop.f32.mrf.mxu0  ;;  %v1250_v13 = vld [vmem:[%s10663_s8 + $0x1ea0] sm:$0xff]  ;;  %v9924_v34 = vcombine.high %v994_v12, %v1002_v51  ;;  %v9923_v49 = vcombine.low %v994_v12, %v1002_v51 }
 0x2cc   : > { %8010 = vmatpush1.bf16.msra.mxu1 %v9971_v40  ;;  %9019 = vst [vmem:[%s11282_s17 + $0x328] sm:$0x1] %v7494_v28  ;;  %v1258_v14 = vld [vmem:[%s10663_s8 + $0x1ee0] sm:$0xff] }
 0x2cd   : > { %8011 = vmatprep.subr.bf16.mxu1 %v10212_v29  ;;  %v7496_v61 = vpop.f32.mrf.mxu1  ;;  %v10180_v27 = vcombine.high %v1250_v13, %v1258_v14  ;;  %v978_v23 = vld [vmem:[%s10663_s8 + $0x1620] sm:$0xff]  ;;  %v10179_v39 = vcombine.low %v1250_v13, %v1258_v14  ;;  %v395_v13 = vld [vmem:[%s10663_s8 + $0x3e8] sm:$0xff] }
 0x2ce   : > { %7941 = vmatpush2.bf16.msra.mxu0 %v9955_v4  ;;  %v986_v53 = vld [vmem:[%s10663_s8 + $0x1660] sm:$0xff]  ;;  %v387_v61 = vld [vmem:[%s10663_s8 + $0x3a8] sm:$0xff] }
 0x2cf   : > { %7942 = vmatprep.subr.bf16.mxu0 %v9940_v9  ;;  %v1234_v44 = vld [vmem:[%s10663_s8 + $0x1e20] sm:$0xff]  ;;  %v9908_v52 = vcombine.high %v978_v23, %v986_v53  ;;  %v9907_v63 = vcombine.low %v978_v23, %v986_v53  ;;  %v643_v14 = vld [vmem:[%s10663_s8 + $0xba8] sm:$0xff] }
 0x2d0   : > { %8012 = vmatpush2.bf16.msra.mxu1 %v10211_v15  ;;  %v1242_v2 = vld [vmem:[%s10663_s8 + $0x1e60] sm:$0xff]  ;;  %v371_v53 = vld [vmem:[%s10663_s8 + $0x328] sm:$0xff] }
 0x2d1   : > { %8013 = vmatprep.subr.bf16.mxu1 %v10196_v7  ;;  %v10164_v0 = vcombine.high %v1234_v44, %v1242_v2  ;;  %v962_v10 = vld [vmem:[%s10663_s8 + $0x15a0] sm:$0xff]  ;;  %v10163_v20 = vcombine.low %v1234_v44, %v1242_v2  ;;  %v379_v44 = vld [vmem:[%s10663_s8 + $0x368] sm:$0xff] }
 0x2d2   : > { %7943 = vmatpush2.bf16.msra.mxu0 %v9939_v3  ;;  %v970_v57 = vld [vmem:[%s10663_s8 + $0x15e0] sm:$0xff]  ;;  %v651_v3 = vld [vmem:[%s10663_s8 + $0xbe8] sm:$0xff] }
 0x2d3   : > { %7944 = vmatprep.subr.bf16.mxu0 %v9924_v34  ;;  %v1218_v36 = vld [vmem:[%s10663_s8 + $0x1da0] sm:$0xff]  ;;  %v9892_v41 = vcombine.high %v962_v10, %v970_v57  ;;  %v9891_v40 = vcombine.low %v962_v10, %v970_v57  ;;  %v9574_v23 = vcombine.high %v643_v14, %v651_v3  ;;  %v627_v2 = vld [vmem:[%s10663_s8 + $0xb28] sm:$0xff] }
 0x2d4   : > { %8014 = vmatpush2.bf16.msra.mxu1 %v10195_v38  ;;  %v1226_v59 = vld [vmem:[%s10663_s8 + $0x1de0] sm:$0xff]  ;;  %v355_v57 = vld [vmem:[%s10663_s8 + $0x2a8] sm:$0xff] }
 0x2d5   : > { %8015 = vmatprep.subr.bf16.mxu1 %v10180_v27  ;;  %v10148_v54 = vcombine.high %v1218_v36, %v1226_v59  ;;  %v946_v58 = vld [vmem:[%s10663_s8 + $0x1520] sm:$0xff]  ;;  %v10147_v31 = vcombine.low %v1218_v36, %v1226_v59  ;;  %v9318_v27 = vcombine.high %v387_v61, %v395_v13  ;;  %v363_v36 = vld [vmem:[%s10663_s8 + $0x2e8] sm:$0xff] }
 0x2d6   : > { %7945 = vmatpush2.bf16.msra.mxu0 %v9923_v49  ;;  %v954_v5 = vld [vmem:[%s10663_s8 + $0x1560] sm:$0xff]  ;;  %v635_v49 = vld [vmem:[%s10663_s8 + $0xb68] sm:$0xff] }
 0x2d7   : > { %7946 = vmatprep.subr.bf16.mxu0 %v9908_v52  ;;  %v1202_v50 = vld [vmem:[%s10663_s8 + $0x1d20] sm:$0xff]  ;;  %v9876_v30 = vcombine.high %v946_v58, %v954_v5  ;;  %v9875_v16 = vcombine.low %v946_v58, %v954_v5  ;;  %v9573_v52 = vcombine.low %v643_v14, %v651_v3  ;;  %v9558_v10 = vcombine.high %v627_v2, %v635_v49  ;;  %v13611_v58 = vld [vmem:[#allocation19_spill] sm:$0xff] }
 0x2d8   : > { %8016 = vmatpush2.bf16.msra.mxu1 %v10179_v39  ;;  %v1210_v6 = vld [vmem:[%s10663_s8 + $0x1d60] sm:$0xff]  ;;  %v9317_v39 = vcombine.low %v387_v61, %v395_v13  ;;  %v9301_v5 = vcombine.low %v371_v53, %v379_v44  ;;  %v579_v61 = vld [vmem:[%s10663_s8 + $0x9a8] sm:$0xff]  ;;  %v13615_v3 = vld [vmem:[#allocation23_spill] sm:$0xff] }
 0x2d9   : > { %8017 = vmatprep.subr.bf16.mxu1 %v10164_v0  ;;  %v10132_v47 = vcombine.high %v1202_v50, %v1210_v6  ;;  %v930_v45 = vld [vmem:[%s10663_s8 + $0x14a0] sm:$0xff]  ;;  %v10131_v1 = vcombine.low %v1202_v50, %v1210_v6  ;;  %v9302_v0 = vcombine.high %v371_v53, %v379_v44  ;;  %v9557_v6 = vcombine.low %v627_v2, %v635_v49  ;;  %v587_v13 = vld [vmem:[%s10663_s8 + $0x9e8] sm:$0xff] }
 0x2da   : > { %7947 = vmatpush2.bf16.msra.mxu0 %v9907_v63  ;;  %v938_v29 = vld [vmem:[%s10663_s8 + $0x14e0] sm:$0xff]  ;;  %v13610_v63 = vld [vmem:[#allocation18_spill] sm:$0xff]  ;;  %v9510_v2 = vcombine.high %v579_v61, %v587_v13  ;;  %v307_v49 = vld [vmem:[%s10663_s8 + $0x128] sm:$0xff] }
 0x2db   : > { %7948 = vmatprep.subr.bf16.mxu0 %v9892_v41  ;;  %v1186_v48 = vld [vmem:[%s10663_s8 + $0x1ca0] sm:$0xff]  ;;  %v9860_v26 = vcombine.high %v930_v45, %v938_v29  ;;  %v9859_v43 = vcombine.low %v930_v45, %v938_v29  ;;  %v619_v41 = vld [vmem:[%s10663_s8 + $0xae8] sm:$0xff] }
 0x2dc   : > { %8018 = vmatpush2.bf16.msra.mxu1 %v10163_v20  ;;  %v1194_v37 = vld [vmem:[%s10663_s8 + $0x1ce0] sm:$0xff]  ;;  %v611_v20 = vld [vmem:[%s10663_s8 + $0xaa8] sm:$0xff] }
 0x2dd   : > { %8019 = vmatprep.subr.bf16.mxu1 %v10148_v54  ;;  %v10116_v28 = vcombine.high %v1186_v48, %v1194_v37  ;;  %v914_v4 = vld [vmem:[%s10663_s8 + $0x1420] sm:$0xff]  ;;  %v10115_v7 = vcombine.low %v1186_v48, %v1194_v37  ;;  %v339_v45 = vld [vmem:[%s10663_s8 + $0x228] sm:$0xff] }
 0x2de   : > { %7949 = vmatpush2.bf16.msra.mxu0 %v9891_v40  ;;  %v922_v60 = vld [vmem:[%s10663_s8 + $0x1460] sm:$0xff]  ;;  %v9286_v40 = vcombine.high %v355_v57, %v363_v36  ;;  %v347_v29 = vld [vmem:[%s10663_s8 + $0x268] sm:$0xff] }
 0x2df   : > { %7950 = vmatprep.subr.bf16.mxu0 %v9876_v30  ;;  %v1170_v15 = vld [vmem:[%s10663_s8 + $0x1c20] sm:$0xff]  ;;  %v9844_v12 = vcombine.high %v914_v4, %v922_v60  ;;  %v9843_v38 = vcombine.low %v914_v4, %v922_v60  ;;  %v13613_v37 = vld [vmem:[#allocation21_spill] sm:$0xff]  ;;  %v9541_v60 = vcombine.low %v611_v20, %v619_v41 }
 0x2e0   : > { %8020 = vmatpush2.bf16.msra.mxu1 %v10147_v31  ;;  %v1178_v9 = vld [vmem:[%s10663_s8 + $0x1c60] sm:$0xff] }
 0x2e1   : > { %8021 = vmatprep.subr.bf16.mxu1 %v10132_v47  ;;  %v10100_v51 = vcombine.high %v1170_v15, %v1178_v9  ;;  %v10099_v34 = vcombine.low %v1170_v15, %v1178_v9  ;;  %v13612_v30 = vld [vmem:[#allocation20_spill] sm:$0xff]  ;;  %v9542_v47 = vcombine.high %v611_v20, %v619_v41  ;;  %v9270_v15 = vcombine.high %v339_v45, %v347_v29 }
 0x2e2   : > { %7951 = vmatpush2.bf16.msra.mxu0 %v9875_v16  ;;  %v595_v16 = vld [vmem:[%s10663_s8 + $0xa28] sm:$0xff]  ;;  %v13616_v44 = vld [vmem:[#allocation24_spill] sm:$0xff] }
 0x2e3   : > { %7952 = vmatprep.subr.bf16.mxu0 %v9860_v26  ;;  %v13625_v55 = vld [vmem:[#allocation12_spill] sm:$0xff] }
 0x2e4   : > { %8022 = vmatpush2.bf16.msra.mxu1 %v10131_v1  ;;  %v603_v1 = vld [vmem:[%s10663_s8 + $0xa68] sm:$0xff] }
 0x2e5   : > { %8023 = vmatprep.subr.bf16.mxu1 %v10116_v28  ;;  %v9285_v28 = vcombine.low %v355_v57, %v363_v36  ;;  %v571_v57 = vld [vmem:[%s10663_s8 + $0x968] sm:$0xff] }
 0x2e6   : > { %7953 = vmatpush2.bf16.msra.mxu0 %v9859_v43  ;;  %v9526_v43 = vcombine.high %v595_v16, %v603_v1 }
 0x2e7   : > { %7954 = vmatprep.subr.bf16.mxu0 %v9844_v12  ;;  %v331_v12 = vld [vmem:[%s10663_s8 + $0x1e8] sm:$0xff] }
 0x2e8   : > { %8024 = vmatpush2.bf16.msra.mxu1 %v10115_v7  ;;  %v323_v7 = vld [vmem:[%s10663_s8 + $0x1a8] sm:$0xff] }
 0x2e9   : > { %8025 = vmatprep.subr.bf16.mxu1 %v10100_v51  ;;  %v13614_v51 = vld [vmem:[#allocation22_spill] sm:$0xff]  ;;  %v9253_v20 = vcombine.low %v323_v7, %v331_v12 }
 0x2ea   : > { %7955 = vmatpush2.bf16.msra.mxu0 %v9843_v38  ;;  %v9269_v38 = vcombine.low %v339_v45, %v347_v29  ;;  %v291_v45 = vld [vmem:[%s10663_s8 + $0xa8] sm:$0xff] }
 0x2eb   : > { %8066 = vmatprep.subr.bf16.mxu0 %v9318_v27  ;;  %v9525_v27 = vcombine.low %v595_v16, %v603_v1  ;;  %v299_v29 = vld [vmem:[%s10663_s8 + $0xe8] sm:$0xff]  ;;  %v13618_v1 = vld [vmem:[#allocation26_spill] sm:$0xff] }
 0x2ec   : > { %8026 = vmatpush2.bf16.msra.mxu1 %v10099_v34 }
 0x2ed   : > { %8137 = vmatprep.subr.bf16.mxu1 %v9574_v23  ;;  %v12180_v59 = vpop.f32.mrf.mxu0  ;;  %7957 = vmatmul.mubr.bf16.vlgmr.msra.gmra.mxu0 %v13610_v63  ;;  %v9254_v23 = vcombine.high %v323_v7, %v331_v12 }
 0x2ee   : > { %8067 = vmatpush1.bf16.msra.mxu0 %v9317_v39  ;;  %7966 = vmatprep.mubr.bf16.mxu0 %v13612_v30  ;;  %v315_v39 = vld [vmem:[%s10663_s8 + $0x168] sm:$0xff] }
 0x2ef   : > { %v12185_v54 = vpop.f32.mrf.mxu1  ;;  %8028 = vmatmul.mubr.bf16.vlgmr.msra.gmra.mxu1 %v13611_v58  ;;  %v12188_v50 = vpop.f32.mrf.mxu0  ;;  %8068 = vmatprep.subr.bf16.mxu0 %v9302_v0  ;;  %v13617_v0 = vld [vmem:[#allocation25_spill] sm:$0xff]  ;;  %v9237_v7 = vcombine.low %v307_v49, %v315_v39 }
 0x2f0   : > { %8138 = vmatpush1.bf16.msra.mxu1 %v9573_v52  ;;  %8037 = vmatprep.mubr.bf16.mxu1 %v13613_v37  ;;  %v499_v30 = vld [vmem:[%s10663_s8 + $0x728] sm:$0xff] }
 0x2f1   : > { %v12190_v31 = vpop.f32.mrf.mxu1  ;;  %8139 = vmatprep.subr.bf16.mxu1 %v9558_v10  ;;  %v12195_v48 = vpop.f32.mrf.mxu0  ;;  %v563_v10 = vld [vmem:[%s10663_s8 + $0x928] sm:$0xff] }
 0x2f2   : > { %8069 = vmatpush1.bf16.msra.mxu0 %v9301_v5  ;;  %v9509_v5 = vcombine.low %v579_v61, %v587_v13  ;;  %v9493_v61 = vcombine.low %v563_v10, %v571_v57  ;;  %v9222_v13 = vcombine.high %v291_v45, %v299_v29  ;;  %v507_v58 = vld [vmem:[%s10663_s8 + $0x768] sm:$0xff] }
 0x2f3   : > { %v12200_v26 = vpop.f32.mrf.mxu1  ;;  %v12202_v4 = vpop.f32.mrf.mxu0  ;;  %8070 = vmatprep.subr.bf16.mxu0 %v9286_v40 }
 0x2f4   : > { %8140 = vmatpush1.bf16.msra.mxu1 %v9557_v6  ;;  %v9238_v6 = vcombine.high %v307_v49, %v315_v39  ;;  %v531_v49 = vld [vmem:[%s10663_s8 + $0x828] sm:$0xff] }
 0x2f5   : > { %v12204_v9 = vpop.f32.mrf.mxu1  ;;  %8141 = vmatprep.subr.bf16.mxu1 %v9542_v47  ;;  %7967 = vmatmul.mubr.bf16.gmra.mxu0 %v13614_v51  ;;  %v12211_v14 = vpop.f32.mrf.mxu0  ;;  %v9494_v47 = vcombine.high %v563_v10, %v571_v57  ;;  %v539_v39 = vld [vmem:[%s10663_s8 + $0x868] sm:$0xff]  ;;  %v9221_v10 = vcombine.low %v291_v45, %v299_v29  ;;  %v13622_v51 = vld [vmem:[#allocation30_spill] sm:$0xff] }
 0x2f6   : > { %8071 = vmatpush1.bf16.msra.mxu0 %v9285_v28  ;;  %7976 = vmatprep.mubr.bf16.mxu0 %v13616_v44  ;;  %v547_v28 = vld [vmem:[%s10663_s8 + $0x8a8] sm:$0xff] }
 0x2f7   : > { %8038 = vmatmul.mubr.bf16.gmra.mxu1 %v13615_v3  ;;  %v12214_v34 = vpop.f32.mrf.mxu1  ;;  %8072 = vmatprep.subr.bf16.mxu0 %v9270_v15  ;;  %v12216_v53 = vpop.f32.mrf.mxu0  ;;  %v515_v44 = vld [vmem:[%s10663_s8 + $0x7a8] sm:$0xff] }
 0x2f8   : > { %8142 = vmatpush1.bf16.msra.mxu1 %v9541_v60  ;;  %8047 = vmatprep.mubr.bf16.mxu1 %v13617_v0  ;;  %v555_v60 = vld [vmem:[%s10663_s8 + $0x8e8] sm:$0xff]  ;;  %v9462_v0 = vcombine.high %v531_v49, %v539_v39 }
 0x2f9   : > { %8143 = vmatprep.subr.bf16.mxu1 %v9526_v43  ;;  %v12221_v52 = vpop.f32.mrf.mxu1  ;;  %v12226_v36 = vpop.f32.mrf.mxu0  ;;  %v13619_v43 = vld [vmem:[#allocation27_spill] sm:$0xff]  ;;  %v779_v45 = vld [vmem:[%s10663_s8 + $0xfe8] sm:$0xff] }
 0x2fa   : > { %8073 = vmatpush1.bf16.msra.mxu0 %v9269_v38 }
 0x2fb   : > { %v12228_v41 = vpop.f32.mrf.mxu1  ;;  %8074 = vmatprep.subr.bf16.mxu0 %v9254_v23  ;;  %v12230_v40 = vpop.f32.mrf.mxu0  ;;  %v9478_v23 = vcombine.high %v547_v28, %v555_v60 }
 0x2fc   : > { %8144 = vmatpush1.bf16.msra.mxu1 %v9525_v27  ;;  %v13620_v27 = vld [vmem:[#allocation28_spill] sm:$0xff] }
 0x2fd   : > { %8145 = vmatprep.subr.bf16.mxu1 %v9510_v2  ;;  %v12234_v16 = vpop.f32.mrf.mxu1  ;;  %7977 = vmatmul.mubr.bf16.gmra.mxu0 %v13618_v1  ;;  %v12239_v15 = vpop.f32.mrf.mxu0  ;;  %v275_v2 = vld [vmem:[%s10663_s8 + $0x28] sm:$0xff] }
 0x2fe   : > { %8075 = vmatpush1.bf16.msra.mxu0 %v9253_v20  ;;  %7986 = vmatprep.mubr.bf16.mxu0 %v13620_v27  ;;  %v283_v1 = vld [vmem:[%s10663_s8 + $0x68] sm:$0xff] }
 0x2ff   : > { %8048 = vmatmul.mubr.bf16.gmra.mxu1 %v13619_v43  ;;  %v12242_v12 = vpop.f32.mrf.mxu1  ;;  %8076 = vmatprep.subr.bf16.mxu0 %v9238_v6  ;;  %v12244_v38 = vpop.f32.mrf.mxu0  ;;  %v13621_v43 = vld [vmem:[#allocation29_spill] sm:$0xff]  ;;  %v9477_v6 = vcombine.low %v547_v28, %v555_v60  ;;  %v13623_v28 = vld [vmem:[#allocation31_spill] sm:$0xff]  ;;  %v9205_v60 = vcombine.low %v275_v2, %v283_v1 }
 0x300   : > { %8146 = vmatpush1.bf16.msra.mxu1 %v9509_v5  ;;  %8057 = vmatprep.mubr.bf16.mxu1 %v13621_v43  ;;  %v523_v43 = vld [vmem:[%s10663_s8 + $0x7e8] sm:$0xff] }
 0x301   : > { %8147 = vmatprep.subr.bf16.mxu1 %v9494_v47  ;;  %v12249_v20 = vpop.f32.mrf.mxu1  ;;  %v12254_v5 = vpop.f32.mrf.mxu0  ;;  %v9206_v47 = vcombine.high %v275_v2, %v283_v1  ;;  %v763_v1 = vld [vmem:[%s10663_s8 + $0xf68] sm:$0xff] }
 0x302   : > { %8077 = vmatpush1.bf16.msra.mxu0 %v9237_v7  ;;  %v771_v7 = vld [vmem:[%s10663_s8 + $0xfa8] sm:$0xff] }
 0x303   : > { %v12256_v57 = vpop.f32.mrf.mxu1  ;;  %8078 = vmatprep.subr.bf16.mxu0 %v9222_v13  ;;  %v12258_v27 = vpop.f32.mrf.mxu0  ;;  %v9461_v13 = vcombine.low %v531_v49, %v539_v39  ;;  %v9445_v49 = vcombine.low %v515_v44, %v523_v43 }
 0x304   : > { %8148 = vmatpush1.bf16.msra.mxu1 %v9493_v61 }
 0x305   : > { %8149 = vmatprep.subr.bf16.mxu1 %v9478_v23  ;;  %v12262_v3 = vpop.f32.mrf.mxu1  ;;  %7987 = vmatmul.mubr.bf16.gmra.mxu0 %v13622_v51  ;;  %v12267_v29 = vpop.f32.mrf.mxu0  ;;  %v9446_v23 = vcombine.high %v515_v44, %v523_v43  ;;  %v9702_v51 = vcombine.high %v771_v7, %v779_v45  ;;  %v9414_v43 = vcombine.high %v483_v35, %v491_v19 }
 0x306   : > { %8079 = vmatpush1.bf16.msra.mxu0 %v9221_v10  ;;  %8098 = vmatprep.mubr.bf16.mxu0 %v13625_v55  ;;  %v755_v10 = vld [vmem:[%s10663_s8 + $0xf28] sm:$0xff] }
 0x307   : > { %8058 = vmatmul.mubr.bf16.gmra.mxu1 %v13623_v28  ;;  %v12270_v61 = vpop.f32.mrf.mxu1  ;;  %8080 = vmatprep.subr.bf16.mxu0 %v9206_v47  ;;  %v12272_v37 = vpop.f32.mrf.mxu0  ;;  %v9430_v47 = vcombine.high %v499_v30, %v507_v58  ;;  %v9686_v55 = vcombine.high %v755_v10, %v763_v1  ;;  %v9685_v44 = vcombine.low %v755_v10, %v763_v1  ;;  %v459_v10 = vld [vmem:[%s10663_s8 + $0x5e8] sm:$0xff] }
 0x308   : > { %8150 = vmatpush1.bf16.msra.mxu1 %v9477_v6  ;;  %v13626_v6 = vld [vmem:[#allocation13_spill] sm:$0xff] }
 0x309   : > { %8151 = vmatprep.subr.bf16.mxu1 %v9462_v0  ;;  %v12276_v63 = vpop.f32.mrf.mxu1  ;;  %v7566_v2 = vpop.f32.mrf.mxu0  ;;  %8169 = vmatprep.mubr.bf16.mxu1 %v13626_v6  ;;  %v9701_v0 = vcombine.low %v771_v7, %v779_v45  ;;  %v467_v7 = vld [vmem:[%s10663_s8 + $0x628] sm:$0xff] }
 0x30a   : > { %13624 = vst [vmem:[#allocation32_spill] sm:$0xff] %v12276_v63  ;;  %8081 = vmatpush1.bf16.msra.mxu0 %v9205_v60  ;;  %v739_v63 = vld [vmem:[%s10663_s8 + $0xea8] sm:$0xff]  ;;  %v9429_v60 = vcombine.low %v499_v30, %v507_v58 }
 0x30b   : > { %v7637_v39 = vpop.f32.mrf.mxu1  ;;  %8082 = vmatprep.subr.bf16.mxu0 %v9446_v23  ;;  %v7567_v28 = vpop.f32.mrf.mxu0  ;;  %v475_v45 = vld [vmem:[%s10663_s8 + $0x668] sm:$0xff]  ;;  %v9413_v23 = vcombine.low %v483_v35, %v491_v19 }
 0x30c   : > { %8152 = vmatpush1.bf16.msra.mxu1 %v9461_v13  ;;  %v723_v28 = vld [vmem:[%s10663_s8 + $0xe28] sm:$0xff]  ;;  %v9398_v58 = vcombine.high %v467_v7, %v475_v45 }
 0x30d   : > { %8153 = vmatprep.subr.bf16.mxu1 %v9702_v51  ;;  %v7638_v2 = vpop.f32.mrf.mxu1  ;;  %v9670_v51 = vcombine.high %v739_v63, %v747_v24  ;;  %v731_v13 = vld [vmem:[%s10663_s8 + $0xe68] sm:$0xff] }
 0x30e   : > { %8083 = vmatpush2.bf16.msra.mxu0 %v9445_v49  ;;  %v9669_v49 = vcombine.low %v739_v63, %v747_v24  ;;  %v9654_v30 = vcombine.high %v723_v28, %v731_v13  ;;  %v707_v1 = vld [vmem:[%s10663_s8 + $0xda8] sm:$0xff] }
 0x30f   : > { %8084 = vmatprep.subr.bf16.mxu0 %v9430_v47  ;;  %v715_v39 = vld [vmem:[%s10663_s8 + $0xde8] sm:$0xff]  ;;  %v9653_v47 = vcombine.low %v723_v28, %v731_v13 }
 0x310   : > { %8154 = vmatpush2.bf16.msra.mxu1 %v9701_v0  ;;  %v9397_v0 = vcombine.low %v467_v7, %v475_v45  ;;  %v9638_v24 = vcombine.high %v707_v1, %v715_v39  ;;  %v435_v35 = vld [vmem:[%s10663_s8 + $0x528] sm:$0xff] }
 0x311   : > { %8155 = vmatprep.subr.bf16.mxu1 %v9686_v55  ;;  %v451_v55 = vld [vmem:[%s10663_s8 + $0x5a8] sm:$0xff] }
 0x312   : > { %8085 = vmatpush2.bf16.msra.mxu0 %v9429_v60  ;;  %v9382_v19 = vcombine.high %v451_v55, %v459_v10  ;;  %v443_v63 = vld [vmem:[%s10663_s8 + $0x568] sm:$0xff] }
 0x313   : > { %8086 = vmatprep.subr.bf16.mxu0 %v9414_v43  ;;  %v691_v2 = vld [vmem:[%s10663_s8 + $0xd28] sm:$0xff]  ;;  %v9637_v43 = vcombine.low %v707_v1, %v715_v39 }
 0x314   : > { %8156 = vmatpush2.bf16.msra.mxu1 %v9685_v44  ;;  %v699_v60 = vld [vmem:[%s10663_s8 + $0xd68] sm:$0xff]  ;;  %v9381_v44 = vcombine.low %v451_v55, %v459_v10  ;;  %v13524_v55 = vsub.s32 6, %v11200_v17 }
 0x315   : > { %8157 = vmatprep.subr.bf16.mxu1 %v9670_v51  ;;  %v9366_v51 = vcombine.high %v435_v35, %v443_v63  ;;  %v9622_v7 = vcombine.high %v691_v2, %v699_v60  ;;  %v419_v45 = vld [vmem:[%s10663_s8 + $0x4a8] sm:$0xff] }
 0x316   : > { %8087 = vmatpush2.bf16.msra.mxu0 %v9413_v23  ;;  %v427_v28 = vld [vmem:[%s10663_s8 + $0x4e8] sm:$0xff] }
 0x317   : > { %8088 = vmatprep.subr.bf16.mxu0 %v9398_v58  ;;  %v675_v13 = vld [vmem:[%s10663_s8 + $0xca8] sm:$0xff]  ;;  %v9621_v58 = vcombine.low %v691_v2, %v699_v60  ;;  %v10307_v2 = vld [vmem:[%s11209_s27] sm:$0xff] }
 0x318   : > { %8158 = vmatpush2.bf16.msra.mxu1 %v9669_v49  ;;  %v683_v23 = vld [vmem:[%s10663_s8 + $0xce8] sm:$0xff]  ;;  %v9365_v49 = vcombine.low %v435_v35, %v443_v63  ;;  %v12311_v60 = vrot.slane %v10307_v2, %v13524_v55 }
 0x319   : > { %8159 = vmatprep.subr.bf16.mxu1 %v9654_v30  ;;  %v9350_v30 = vcombine.high %v419_v45, %v427_v28  ;;  %v9606_v10 = vcombine.high %v675_v13, %v683_v23  ;;  %v403_v1 = vld [vmem:[%s10663_s8 + $0x428] sm:$0xff]  ;;  %v9605_v35 = vcombine.low %v675_v13, %v683_v23 }
 0x31a   : > { %8089 = vmatpush2.bf16.msra.mxu0 %v9397_v0  ;;  %v411_v39 = vld [vmem:[%s10663_s8 + $0x468] sm:$0xff] }
 0x31b   : > { %8090 = vmatprep.subr.bf16.mxu0 %v9382_v19  ;;  %v659_v0 = vld [vmem:[%s10663_s8 + $0xc28] sm:$0xff]  ;;  %v13525_v19 = vsub.s32 7, %v11200_v17  ;;  %v9334_v63 = vcombine.high %v403_v1, %v411_v39 }
 0x31c   : > { %8160 = vmatpush2.bf16.msra.mxu1 %v9653_v47  ;;  %v667_v47 = vld [vmem:[%s10663_s8 + $0xc68] sm:$0xff] }
 0x31d   : > { %8161 = vmatprep.subr.bf16.mxu1 %v9638_v24  ;;  %v9349_v24 = vcombine.low %v419_v45, %v427_v28  ;;  %v12319_v45 = vrot.slane %v10307_v2, %v13525_v19  ;;  %v9333_v28 = vcombine.low %v403_v1, %v411_v39  ;;  %v9589_v13 = vcombine.low %v659_v0, %v667_v47  ;;  %v891_v55 = vld [vmem:[%s10663_s8 + $0x1368] sm:$0xff] }
 0x31e   : > { %8091 = vmatpush2.bf16.msra.mxu0 %v9381_v44  ;;  %v9590_v44 = vcombine.high %v659_v0, %v667_v47  ;;  %v1139_v6 = vld [vmem:[%s10663_s8 + $0x1b28] sm:$0xff]  ;;  %v7537_v0 = vadd.f32 %v12195_v48, %v12311_v60 }
 0x31f   : > { %8092 = vmatprep.subr.bf16.mxu0 %v9366_v51  ;;  %v907_v51 = vld [vmem:[%s10663_s8 + $0x13e8] sm:$0xff]  ;;  %v7535_v1 = vadd.f32 %v12188_v50, %v12319_v45 }
 0x320   : > { %8162 = vmatpush2.bf16.msra.mxu1 %v9637_v43  ;;  %v899_v43 = vld [vmem:[%s10663_s8 + $0x13a8] sm:$0xff] }
 0x321   : > { %8163 = vmatprep.subr.bf16.mxu1 %v9622_v7  ;;  %v1155_v7 = vld [vmem:[%s10663_s8 + $0x1ba8] sm:$0xff]  ;;  %v9830_v23 = vcombine.high %v899_v43, %v907_v51  ;;  %v9829_v39 = vcombine.low %v899_v43, %v907_v51 }
 0x322   : > { %8093 = vmatpush2.bf16.msra.mxu0 %v9365_v49  ;;  %v1163_v49 = vld [vmem:[%s10663_s8 + $0x1be8] sm:$0xff] }
 0x323   : > { %8094 = vmatprep.subr.bf16.mxu0 %v9350_v30  ;;  %v10086_v30 = vcombine.high %v1155_v7, %v1163_v49  ;;  %v1147_v2 = vld [vmem:[%s10663_s8 + $0x1b68] sm:$0xff] }
 0x324   : > { %8164 = vmatpush2.bf16.msra.mxu1 %v9621_v58  ;;  %v7533_v58 = vadd.f32 %v12180_v59, %v12311_v60  ;;  %v10085_v59 = vcombine.low %v1155_v7, %v1163_v49  ;;  %v12339_v19 = vld [vmem:[%s10663_s8 + $0x1aa8] sm:$0xff]  ;;  %v10069_v51 = vcombine.low %v1139_v6, %v1147_v2  ;;  %v7606_v7 = vadd.f32 %v12190_v31, %v7535_v1 }
 0x325   : > { %8165 = vmatprep.subr.bf16.mxu1 %v9606_v10  ;;  %v883_v10 = vld [vmem:[%s10663_s8 + $0x1328] sm:$0xff]  ;;  %v7539_v49 = vadd.f32 %v12202_v4, %v12319_v45 }
 0x326   : > { %8095 = vmatpush2.bf16.msra.mxu0 %v9349_v24  ;;  %v9814_v47 = vcombine.high %v883_v10, %v891_v55  ;;  %v12332_v24 = vld [vmem:[%s10663_s8 + $0x12a8] sm:$0xff]  ;;  %v9813_v48 = vcombine.low %v883_v10, %v891_v55 }
 0x327   : > { %8096 = vmatprep.subr.bf16.mxu0 %v9334_v63  ;;  %v10070_v63 = vcombine.high %v1139_v6, %v1147_v2  ;;  %v12342_v50 = vld [vmem:[%s10663_s8 + $0x1ae8] sm:$0xff]  ;;  %v7543_v6 = vadd.f32 %v12211_v14, %v12311_v60  ;;  %v7545_v2 = vadd.f32 %v12216_v53, %v12319_v45  ;;  %v7610_v14 = vadd.f32 %v12204_v9, %v7539_v49 }
 0x328   : > { %8166 = vmatpush2.bf16.msra.mxu1 %v9605_v35  ;;  %v7604_v35 = vadd.f32 %v12185_v54, %v7533_v58  ;;  %v10054_v4 = vcombine.high %v12339_v19, %v12342_v50  ;;  %v12360_v10 = vld [vmem:[%s10663_s8 + $0x1268] sm:$0xff]  ;;  %v10053_v9 = vcombine.low %v12339_v19, %v12342_v50 }
 0x329   : > { %8167 = vmatprep.subr.bf16.mxu1 %v9590_v44  ;;  %v12336_v44 = vld [vmem:[%s10663_s8 + $0x12e8] sm:$0xff]  ;;  %v7616_v50 = vadd.f32 %v12221_v52, %v7545_v2 }
 0x32a   : > { %8097 = vmatpush2.bf16.msra.mxu0 %v9333_v28  ;;  %v9798_v31 = vcombine.high %v12332_v24, %v12336_v44  ;;  %v9797_v53 = vcombine.low %v12332_v24, %v12336_v44  ;;  %v12383_v49 = vld [vmem:[%s10663_s8 + $0x11a8] sm:$0xff] }
 0x32b   : > { %8208 = vmatprep.subr.bf16.mxu0 %v9830_v23  ;;  %v12396_v19 = vld [vmem:[%s10663_s8 + $0x19e8] sm:$0xff] }
 0x32c   : > { %8168 = vmatpush2.bf16.msra.mxu1 %v9589_v13  ;;  %v7608_v13 = vadd.f32 %v12200_v26, %v7537_v0  ;;  %v12357_v26 = vld [vmem:[%s10663_s8 + $0x1228] sm:$0xff] }
 0x32d   : > { %8279 = vmatprep.subr.bf16.mxu1 %v10086_v30  ;;  %v7674_v43 = vpop.f32.mrf.mxu0  ;;  %8099 = vmatmul.mubr.bf16.vlgmr.msra.gmra.mxu0 %v10760_v21  ;;  %v12369_v0 = vld [vmem:[%s10663_s8 + $0x1a68] sm:$0xff] }
 0x32e   : > { %v7675_v54 = vadd.f32 %v7674_v43, %v7604_v35  ;;  %8209 = vmatpush1.bf16.msra.mxu0 %v9829_v39  ;;  %8108 = vmatprep.mubr.bf16.mxu0 %v10769_v32  ;;  %v12366_v39 = vld [vmem:[%s10663_s8 + $0x1a28] sm:$0xff] }
 0x32f   : > { %v7745_v28 = vpop.f32.mrf.mxu1  ;;  %8170 = vmatmul.mubr.bf16.vlgmr.msra.gmra.mxu1 %v10765_v25  ;;  %v7676_v23 = vpop.f32.mrf.mxu0  ;;  %8210 = vmatprep.subr.bf16.mxu0 %v9814_v47 }
 0x330   : > { %8280 = vmatpush1.bf16.msra.mxu1 %v10085_v59  ;;  %v7746_v55 = vadd.f32 %v7745_v28, %v7675_v54  ;;  %v7677_v58 = vadd.f32 %v7676_v23, %v7606_v7  ;;  %8179 = vmatprep.mubr.bf16.mxu1 %v10774_v33  ;;  %v9782_v7 = vcombine.high %v12357_v26, %v12360_v10  ;;  %v12393_v28 = vld [vmem:[%s10663_s8 + $0x19a8] sm:$0xff] }
 0x331   : > { %v7747_v30 = vpop.f32.mrf.mxu1  ;;  %8281 = vmatprep.subr.bf16.mxu1 %v10070_v63  ;;  %v7678_v1 = vpop.f32.mrf.mxu0  ;;  %v7547_v63 = vadd.f32 %v12226_v36, %v12311_v60  ;;  %v10038_v36 = vcombine.high %v12366_v39, %v12369_v0  ;;  %v10037_v23 = vcombine.low %v12366_v39, %v12369_v0  ;;  %v12420_v39 = vld [vmem:[%s10663_s8 + $0x1168] sm:$0xff]  ;;  %v7555_v0 = vadd.f32 %v12244_v38, %v12319_v45 }
 0x332   : > { %8924 = vst [vmem:[%s11282_s17 + $0x30] sm:$0xff] %v7746_v55  ;;  %v7748_v59 = vadd.f32 %v7747_v30, %v7677_v58  ;;  %v7679_v47 = vadd.f32 %v7678_v1, %v7608_v13  ;;  %8211 = vmatpush1.bf16.msra.mxu0 %v9813_v48  ;;  %v7614_v48 = vadd.f32 %v12214_v34, %v7543_v6 }
 0x333   : > { %v7749_v35 = vpop.f32.mrf.mxu1  ;;  %v7680_v43 = vpop.f32.mrf.mxu0  ;;  %8212 = vmatprep.subr.bf16.mxu0 %v9798_v31  ;;  %v9781_v34 = vcombine.low %v12357_v26, %v12360_v10  ;;  %v7549_v31 = vadd.f32 %v12230_v40, %v12319_v45  ;;  %v7618_v55 = vadd.f32 %v12228_v41, %v7547_v63  ;;  %v10022_v40 = vcombine.high %v12393_v28, %v12396_v19  ;;  %v12417_v41 = vld [vmem:[%s10663_s8 + $0x1128] sm:$0xff] }
 0x334   : > { %8282 = vmatpush1.bf16.msra.mxu1 %v10069_v51  ;;  %8925 = vst [vmem:[%s11282_s17 + $0x38] sm:$0xff] %v7748_v59  ;;  %v7750_v24 = vadd.f32 %v7749_v35, %v7679_v47  ;;  %v7681_v44 = vadd.f32 %v7680_v43, %v7610_v14  ;;  %v12390_v51 = vld [vmem:[%s10663_s8 + $0x11e8] sm:$0xff]  ;;  %v7553_v26 = vadd.f32 %v12239_v15, %v12311_v60 }
 0x335   : > { %v7751_v54 = vpop.f32.mrf.mxu1  ;;  %8283 = vmatprep.subr.bf16.mxu1 %v10054_v4  ;;  %v7684_v13 = vpop.f32.mrf.mxu0  ;;  %8109 = vmatmul.mubr.bf16.gmra.mxu0 %v10782_v42  ;;  %v9766_v30 = vcombine.high %v12383_v49, %v12390_v51  ;;  %v12426_v59 = vld [vmem:[%s10663_s8 + $0x1928] sm:$0xff]  ;;  %v7620_v15 = vadd.f32 %v12234_v16, %v7549_v31  ;;  %v9765_v38 = vcombine.low %v12383_v49, %v12390_v51 }
 0x336   : > { %8940 = vst [vmem:[%s11282_s17 + $0xb0] sm:$0xff] %v7750_v24  ;;  %v7752_v4 = vadd.f32 %v7751_v54, %v7681_v44  ;;  %v7685_v6 = vadd.f32 %v7684_v13, %v7614_v48  ;;  %8213 = vmatpush1.bf16.msra.mxu0 %v9797_v53  ;;  %8118 = vmatprep.mubr.bf16.mxu0 %v10789_v56  ;;  %v12429_v47 = vld [vmem:[%s10663_s8 + $0x1968] sm:$0xff] }
 0x337   : > { %v7755_v52 = vpop.f32.mrf.mxu1  ;;  %8180 = vmatmul.mubr.bf16.gmra.mxu1 %v10785_v46  ;;  %v7686_v58 = vpop.f32.mrf.mxu0  ;;  %8214 = vmatprep.subr.bf16.mxu0 %v9782_v7  ;;  %v7557_v43 = vadd.f32 %v12254_v5, %v12311_v60  ;;  %v10021_v16 = vcombine.low %v12393_v28, %v12396_v19  ;;  %v9750_v7 = vcombine.high %v12417_v41, %v12420_v39  ;;  %v12443_v48 = vld [vmem:[%s10663_s8 + $0x10a8] sm:$0xff] }
 0x338   : > { %8284 = vmatpush1.bf16.msra.mxu1 %v10053_v9  ;;  %8941 = vst [vmem:[%s11282_s17 + $0xb8] sm:$0xff] %v7752_v4  ;;  %v7687_v10 = vadd.f32 %v7686_v58, %v7616_v50  ;;  %v7756_v2 = vadd.f32 %v7755_v52, %v7685_v6  ;;  %8189 = vmatprep.mubr.bf16.mxu1 %v10794_v62  ;;  %v12453_v51 = vld [vmem:[%s10663_s8 + $0x18a8] sm:$0xff] }
 0x339   : > { %v7757_v1 = vpop.f32.mrf.mxu1  ;;  %8285 = vmatprep.subr.bf16.mxu1 %v10038_v36  ;;  %v7688_v14 = vpop.f32.mrf.mxu0  ;;  %v7624_v24 = vadd.f32 %v12242_v12, %v7553_v26  ;;  %v10006_v5 = vcombine.high %v12426_v59, %v12429_v47  ;;  %v12450_v36 = vld [vmem:[%s10663_s8 + $0x10e8] sm:$0xff]  ;;  %v7626_v19 = vadd.f32 %v12249_v20, %v7555_v0  ;;  %v9749_v12 = vcombine.low %v12417_v41, %v12420_v39 }
 0x33a   : > { %8956 = vst [vmem:[%s11282_s17 + $0x130] sm:$0xff] %v7756_v2  ;;  %v7689_v35 = vadd.f32 %v7688_v14, %v7618_v55  ;;  %v7758_v53 = vadd.f32 %v7757_v1, %v7687_v10  ;;  %8215 = vmatpush1.bf16.msra.mxu0 %v9781_v34  ;;  %v12456_v28 = vld [vmem:[%s10663_s8 + $0x18e8] sm:$0xff]  ;;  %v10005_v13 = vcombine.low %v12426_v59, %v12429_v47 }
 0x33b   : > { %v7759_v63 = vpop.f32.mrf.mxu1  ;;  %v7690_v9 = vpop.f32.mrf.mxu0  ;;  %8216 = vmatprep.subr.bf16.mxu0 %v9766_v30  ;;  %v7559_v34 = vadd.f32 %v12258_v27, %v12319_v45  ;;  %v7628_v4 = vadd.f32 %v12256_v57, %v7557_v43  ;;  %v9734_v52 = vcombine.high %v12443_v48, %v12450_v36  ;;  %v9990_v27 = vcombine.high %v12453_v51, %v12456_v28  ;;  %v787_v57 = vld [vmem:[%s10663_s8 + $0x1028] sm:$0xff] }
 0x33c   : > { %8286 = vmatpush1.bf16.msra.mxu1 %v10037_v23  ;;  %8957 = vst [vmem:[%s11282_s17 + $0x138] sm:$0xff] %v7758_v53  ;;  %v7691_v49 = vadd.f32 %v7690_v9, %v7620_v15  ;;  %v7760_v44 = vadd.f32 %v7759_v63, %v7689_v35  ;;  %v7563_v55 = vadd.f32 %v12267_v29, %v12311_v60  ;;  %v795_v26 = vld [vmem:[%s10663_s8 + $0x1068] sm:$0xff] }
 0x33d   : > { %v7761_v54 = vpop.f32.mrf.mxu1  ;;  %8287 = vmatprep.subr.bf16.mxu1 %v10022_v40  ;;  %v7694_v50 = vpop.f32.mrf.mxu0  ;;  %8119 = vmatmul.mubr.bf16.gmra.mxu0 %v10802_v8  ;;  %v9733_v2 = vcombine.low %v12443_v48, %v12450_v36  ;;  %v1043_v1 = vld [vmem:[%s10663_s8 + $0x1828] sm:$0xff]  ;;  %v7630_v29 = vadd.f32 %v12262_v3, %v7559_v34  ;;  %v7565_v60 = vadd.f32 %v12272_v37, %v12319_v45  ;;  %v13627_v48 = vld [vmem:[#allocation14_spill] sm:$0xff] }
 0x33e   : > { %8972 = vst [vmem:[%s11282_s17 + $0x1b0] sm:$0xff] %v7760_v44  ;;  %v7695_v23 = vadd.f32 %v7694_v50, %v7624_v24  ;;  %v7762_v31 = vadd.f32 %v7761_v54, %v7691_v49  ;;  %8217 = vmatpush1.bf16.msra.mxu0 %v9765_v38  ;;  %8128 = vmatprep.mubr.bf16.mxu0 %v10809_v18  ;;  %v1051_v41 = vld [vmem:[%s10663_s8 + $0x1868] sm:$0xff]  ;;  %v13628_v24 = vld [vmem:[#allocation32_spill] sm:$0xff] }
 0x33f   : > { %v7765_v20 = vpop.f32.mrf.mxu1  ;;  %8190 = vmatmul.mubr.bf16.gmra.mxu1 %v10805_v11  ;;  %v7696_v6 = vpop.f32.mrf.mxu0  ;;  %8218 = vmatprep.subr.bf16.mxu0 %v9750_v7  ;;  %v9989_v47 = vcombine.low %v12453_v51, %v12456_v28  ;;  %v9718_v15 = vcombine.high %v787_v57, %v795_v26  ;;  %v7634_v3 = vadd.f32 %v12270_v61, %v7563_v55  ;;  %v1027_v63 = vld [vmem:[%s10663_s8 + $0x17a8] sm:$0xff] }
 0x340   : > { %8288 = vmatpush1.bf16.msra.mxu1 %v10021_v16  ;;  %8973 = vst [vmem:[%s11282_s17 + $0x1b8] sm:$0xff] %v7762_v31  ;;  %v7697_v58 = vadd.f32 %v7696_v6, %v7626_v19  ;;  %v7766_v30 = vadd.f32 %v7765_v20, %v7695_v23  ;;  %8199 = vmatprep.mubr.bf16.mxu1 %v10814_v22  ;;  %v1035_v38 = vld [vmem:[%s10663_s8 + $0x17e8] sm:$0xff]  ;;  %v13630_v31 = vld [vmem:[#allocation16_spill] sm:$0xff] }
 0x341   : > { %v7767_v40 = vpop.f32.mrf.mxu1  ;;  %8289 = vmatprep.subr.bf16.mxu1 %v10006_v5  ;;  %v7698_v10 = vpop.f32.mrf.mxu0  ;;  %v9974_v53 = vcombine.high %v1043_v1, %v1051_v41  ;;  %v9717_v9 = vcombine.low %v787_v57, %v795_v26  ;;  %v1283_v16 = vld [vmem:[%s10663_s8 + $0x1fa8] sm:$0xff]  ;;  %v7636_v49 = vadd.f32 %v13628_v24, %v7565_v60  ;;  %v13629_v5 = vld [vmem:[#allocation15_spill] sm:$0xff]  ;;  %v9973_v51 = vcombine.low %v1043_v1, %v1051_v41 }
 0x342   : > { %8988 = vst [vmem:[%s11282_s17 + $0x230] sm:$0xff] %v7766_v30  ;;  %v7699_v39 = vadd.f32 %v7698_v10, %v7628_v4  ;;  %v7768_v0 = vadd.f32 %v7767_v40, %v7697_v58  ;;  %8219 = vmatpush1.bf16.msra.mxu0 %v9749_v12  ;;  %v1291_v7 = vld [vmem:[%s10663_s8 + $0x1fe8] sm:$0xff]  ;;  %v9958_v28 = vcombine.high %v1027_v63, %v1035_v38 }
 0x343   : > { %v7769_v14 = vpop.f32.mrf.mxu1  ;;  %v7700_v59 = vpop.f32.mrf.mxu0  ;;  %8220 = vmatprep.subr.bf16.mxu0 %v9734_v52  ;;  %v1011_v34 = vld [vmem:[%s10663_s8 + $0x1728] sm:$0xff]  ;;  %v9957_v55 = vcombine.low %v1027_v63, %v1035_v38  ;;  %v10213_v30 = vcombine.low %v1283_v16, %v1291_v7 }
 0x344   : > { %8290 = vmatpush1.bf16.msra.mxu1 %v10005_v13  ;;  %8989 = vst [vmem:[%s11282_s17 + $0x238] sm:$0xff] %v7768_v0  ;;  %v7701_v37 = vadd.f32 %v7700_v59, %v7630_v29  ;;  %v7770_v45 = vadd.f32 %v7769_v14, %v7699_v39  ;;  %v10214_v13 = vcombine.high %v1283_v16, %v1291_v7  ;;  %v1019_v23 = vld [vmem:[%s10663_s8 + $0x1768] sm:$0xff] }
 0x345   : > { %v7771_v35 = vpop.f32.mrf.mxu1  ;;  %8291 = vmatprep.subr.bf16.mxu1 %v9990_v27  ;;  %v7704_v43 = vpop.f32.mrf.mxu0  ;;  %8129 = vmatmul.mubr.bf16.gmra.mxu0 %v13627_v48  ;;  %v1267_v20 = vld [vmem:[%s10663_s8 + $0x1f28] sm:$0xff]  ;;  %v9942_v40 = vcombine.high %v1011_v34, %v1019_v23  ;;  %v9941_v60 = vcombine.low %v1011_v34, %v1019_v23  ;;  %v748_v48 = vld [vmem:[%s10663_s8 + $0xef0] sm:$0xff] }
 0x346   : > { %9004 = vst [vmem:[%s11282_s17 + $0x2b0] sm:$0xff] %v7770_v45  ;;  %v7705_v44 = vadd.f32 %v7704_v43, %v7634_v3  ;;  %v7772_v61 = vadd.f32 %v7771_v35, %v7701_v37  ;;  %8221 = vmatpush1.bf16.msra.mxu0 %v9733_v2  ;;  %8240 = vmatprep.mubr.bf16.mxu0 %v13630_v31  ;;  %v1275_v4 = vld [vmem:[%s10663_s8 + $0x1f68] sm:$0xff]  ;;  %v484_v31 = vld [vmem:[%s10663_s8 + $0x6b0] sm:$0xff] }
 0x347   : > { %v7775_v54 = vpop.f32.mrf.mxu1  ;;  %8200 = vmatmul.mubr.bf16.gmra.mxu1 %v13629_v5  ;;  %v7706_v36 = vpop.f32.mrf.mxu0  ;;  %8222 = vmatprep.subr.bf16.mxu0 %v9718_v15  ;;  %v13631_v52 = vld [vmem:[#allocation17_spill] sm:$0xff]  ;;  %v10198_v26 = vcombine.high %v1267_v20, %v1275_v4  ;;  %v10197_v39 = vcombine.low %v1267_v20, %v1275_v4  ;;  %v492_v5 = vld [vmem:[%s10663_s8 + $0x6f0] sm:$0xff] }
 0x348   : > { %8292 = vmatpush1.bf16.msra.mxu1 %v9989_v47  ;;  %9005 = vst [vmem:[%s11282_s17 + $0x2b8] sm:$0xff] %v7772_v61  ;;  %v7707_v19 = vadd.f32 %v7706_v36, %v7636_v49  ;;  %v7776_v50 = vadd.f32 %v7775_v54, %v7705_v44  ;;  %8311 = vmatprep.mubr.bf16.mxu1 %v13631_v52  ;;  %v995_v10 = vld [vmem:[%s10663_s8 + $0x16a8] sm:$0xff]  ;;  %v13647_v52 = vld [vmem:[#allocation12_spill] sm:$0xff] }
 0x349   : > { %v7777_v12 = vpop.f32.mrf.mxu1  ;;  %8293 = vmatprep.subr.bf16.mxu1 %v9974_v53  ;;  %v7708_v6 = vpop.f32.mrf.mxu0  ;;  %v1003_v2 = vld [vmem:[%s10663_s8 + $0x16e8] sm:$0xff] }
 0x34a   : > { %9020 = vst [vmem:[%s11282_s17 + $0x330] sm:$0x1] %v7776_v50  ;;  %v7778_v27 = vadd.f32 %v7777_v12, %v7707_v19  ;;  %8223 = vmatpush1.bf16.msra.mxu0 %v9717_v9  ;;  %v1251_v41 = vld [vmem:[%s10663_s8 + $0x1ea8] sm:$0xff]  ;;  %v9926_v0 = vcombine.high %v995_v10, %v1003_v2  ;;  %v9925_v37 = vcombine.low %v995_v10, %v1003_v2 }
 0x34b   : > { %v7779_v58 = vpop.f32.mrf.mxu1  ;;  %8224 = vmatprep.subr.bf16.mxu0 %v9958_v28  ;;  %v7709_v57 = vpop.f32.mrf.mxu0  ;;  %v1259_v29 = vld [vmem:[%s10663_s8 + $0x1ee8] sm:$0xff] }
 0x34c   : > { %8294 = vmatpush1.bf16.msra.mxu1 %v9973_v51  ;;  %9021 = vst [vmem:[%s11282_s17 + $0x338] sm:$0x1] %v7778_v27  ;;  %v10182_v14 = vcombine.high %v1251_v41, %v1259_v29  ;;  %v979_v59 = vld [vmem:[%s10663_s8 + $0x1628] sm:$0xff]  ;;  %v10181_v45 = vcombine.low %v1251_v41, %v1259_v29  ;;  %v396_v41 = vld [vmem:[%s10663_s8 + $0x3f0] sm:$0xff] }
 0x34d   : > { %8295 = vmatprep.subr.bf16.mxu1 %v10214_v13  ;;  %v7780_v1 = vpop.f32.mrf.mxu1  ;;  %v987_v47 = vld [vmem:[%s10663_s8 + $0x1668] sm:$0xff]  ;;  %v644_v29 = vld [vmem:[%s10663_s8 + $0xbb0] sm:$0xff] }
 0x34e   : > { %8225 = vmatpush2.bf16.msra.mxu0 %v9957_v55  ;;  %v1235_v15 = vld [vmem:[%s10663_s8 + $0x1e28] sm:$0xff]  ;;  %v9910_v35 = vcombine.high %v979_v59, %v987_v47  ;;  %v9909_v16 = vcombine.low %v979_v59, %v987_v47  ;;  %v388_v1 = vld [vmem:[%s10663_s8 + $0x3b0] sm:$0xff] }
 0x34f   : > { %8226 = vmatprep.subr.bf16.mxu0 %v9942_v40  ;;  %v1243_v3 = vld [vmem:[%s10663_s8 + $0x1e68] sm:$0xff]  ;;  %v372_v47 = vld [vmem:[%s10663_s8 + $0x330] sm:$0xff] }
 0x350   : > { %8296 = vmatpush2.bf16.msra.mxu1 %v10213_v30  ;;  %v10166_v53 = vcombine.high %v1235_v15, %v1243_v3  ;;  %v963_v63 = vld [vmem:[%s10663_s8 + $0x15a8] sm:$0xff]  ;;  %v10165_v7 = vcombine.low %v1235_v15, %v1243_v3  ;;  %v380_v15 = vld [vmem:[%s10663_s8 + $0x370] sm:$0xff] }
 0x351   : > { %8297 = vmatprep.subr.bf16.mxu1 %v10198_v26  ;;  %v971_v38 = vld [vmem:[%s10663_s8 + $0x15e8] sm:$0xff]  ;;  %v628_v3 = vld [vmem:[%s10663_s8 + $0xb30] sm:$0xff] }
 0x352   : > { %8227 = vmatpush2.bf16.msra.mxu0 %v9941_v60  ;;  %v1219_v43 = vld [vmem:[%s10663_s8 + $0x1da8] sm:$0xff]  ;;  %v9894_v24 = vcombine.high %v963_v63, %v971_v38  ;;  %v9893_v51 = vcombine.low %v963_v63, %v971_v38  ;;  %v652_v60 = vld [vmem:[%s10663_s8 + $0xbf0] sm:$0xff] }
 0x353   : > { %8228 = vmatprep.subr.bf16.mxu0 %v9926_v0  ;;  %v1227_v9 = vld [vmem:[%s10663_s8 + $0x1de8] sm:$0xff]  ;;  %v9576_v59 = vcombine.high %v644_v29, %v652_v60  ;;  %v356_v38 = vld [vmem:[%s10663_s8 + $0x2b0] sm:$0xff] }
 0x354   : > { %8298 = vmatpush2.bf16.msra.mxu1 %v10197_v39  ;;  %v10150_v49 = vcombine.high %v1219_v43, %v1227_v9  ;;  %v947_v44 = vld [vmem:[%s10663_s8 + $0x1528] sm:$0xff]  ;;  %v10149_v28 = vcombine.low %v1219_v43, %v1227_v9  ;;  %v364_v43 = vld [vmem:[%s10663_s8 + $0x2f0] sm:$0xff] }
 0x355   : > { %8299 = vmatprep.subr.bf16.mxu1 %v10182_v14  ;;  %v955_v61 = vld [vmem:[%s10663_s8 + $0x1568] sm:$0xff]  ;;  %v9320_v14 = vcombine.high %v388_v1, %v396_v41 }
 0x356   : > { %8229 = vmatpush2.bf16.msra.mxu0 %v9925_v37  ;;  %v1203_v54 = vld [vmem:[%s10663_s8 + $0x1d28] sm:$0xff]  ;;  %v9878_v19 = vcombine.high %v947_v44, %v955_v61  ;;  %v9877_v20 = vcombine.low %v947_v44, %v955_v61  ;;  %v636_v37 = vld [vmem:[%s10663_s8 + $0xb70] sm:$0xff]  ;;  %v13633_v44 = vld [vmem:[#allocation19_spill] sm:$0xff]  ;;  %v9303_v61 = vcombine.low %v372_v47, %v380_v15 }
 0x357   : > { %8230 = vmatprep.subr.bf16.mxu0 %v9910_v35  ;;  %v1211_v36 = vld [vmem:[%s10663_s8 + $0x1d68] sm:$0xff]  ;;  %v9575_v35 = vcombine.low %v644_v29, %v652_v60  ;;  %v9560_v63 = vcombine.high %v628_v3, %v636_v37  ;;  %v13637_v60 = vld [vmem:[#allocation23_spill] sm:$0xff] }
 0x358   : > { %8300 = vmatpush2.bf16.msra.mxu1 %v10181_v45  ;;  %v10134_v50 = vcombine.high %v1203_v54, %v1211_v36  ;;  %v931_v12 = vld [vmem:[%s10663_s8 + $0x14a8] sm:$0xff]  ;;  %v10133_v4 = vcombine.low %v1203_v54, %v1211_v36  ;;  %v9319_v45 = vcombine.low %v388_v1, %v396_v41  ;;  %v9559_v36 = vcombine.low %v628_v3, %v636_v37  ;;  %v580_v1 = vld [vmem:[%s10663_s8 + $0x9b0] sm:$0xff] }
 0x359   : > { %8301 = vmatprep.subr.bf16.mxu1 %v10166_v53  ;;  %v939_v13 = vld [vmem:[%s10663_s8 + $0x14e8] sm:$0xff]  ;;  %v9304_v53 = vcombine.high %v372_v47, %v380_v15  ;;  %v588_v41 = vld [vmem:[%s10663_s8 + $0x9f0] sm:$0xff]  ;;  %v13638_v15 = vld [vmem:[#allocation24_spill] sm:$0xff] }
 0x35a   : > { %8231 = vmatpush2.bf16.msra.mxu0 %v9909_v16  ;;  %v1187_v34 = vld [vmem:[%s10663_s8 + $0x1ca8] sm:$0xff]  ;;  %v9862_v6 = vcombine.high %v931_v12, %v939_v13  ;;  %v9861_v57 = vcombine.low %v931_v12, %v939_v13  ;;  %v13632_v16 = vld [vmem:[#allocation18_spill] sm:$0xff]  ;;  %v9512_v3 = vcombine.high %v580_v1, %v588_v41 }
 0x35b   : > { %8232 = vmatprep.subr.bf16.mxu0 %v9894_v24  ;;  %v1195_v23 = vld [vmem:[%s10663_s8 + $0x1ce8] sm:$0xff]  ;;  %v620_v24 = vld [vmem:[%s10663_s8 + $0xaf0] sm:$0xff] }
 0x35c   : > { %8302 = vmatpush2.bf16.msra.mxu1 %v10165_v7  ;;  %v10118_v27 = vcombine.high %v1187_v34, %v1195_v23  ;;  %v915_v55 = vld [vmem:[%s10663_s8 + $0x1428] sm:$0xff]  ;;  %v10117_v26 = vcombine.low %v1187_v34, %v1195_v23  ;;  %v612_v7 = vld [vmem:[%s10663_s8 + $0xab0] sm:$0xff] }
 0x35d   : > { %8303 = vmatprep.subr.bf16.mxu1 %v10150_v49  ;;  %v923_v58 = vld [vmem:[%s10663_s8 + $0x1468] sm:$0xff]  ;;  %v340_v12 = vld [vmem:[%s10663_s8 + $0x230] sm:$0xff] }
 0x35e   : > { %8233 = vmatpush2.bf16.msra.mxu0 %v9893_v51  ;;  %v1171_v30 = vld [vmem:[%s10663_s8 + $0x1c28] sm:$0xff]  ;;  %v9846_v10 = vcombine.high %v915_v55, %v923_v58  ;;  %v9845_v39 = vcombine.low %v915_v55, %v923_v58  ;;  %v9288_v51 = vcombine.high %v356_v38, %v364_v43  ;;  %v348_v13 = vld [vmem:[%s10663_s8 + $0x270] sm:$0xff]  ;;  %v9543_v58 = vcombine.low %v612_v7, %v620_v24 }
 0x35f   : > { %8234 = vmatprep.subr.bf16.mxu0 %v9878_v19  ;;  %v1179_v40 = vld [vmem:[%s10663_s8 + $0x1c68] sm:$0xff]  ;;  %v13634_v19 = vld [vmem:[#allocation20_spill] sm:$0xff]  ;;  %v308_v37 = vld [vmem:[%s10663_s8 + $0x130] sm:$0xff] }
 0x360   : > { %8304 = vmatpush2.bf16.msra.mxu1 %v10149_v28  ;;  %v10102_v2 = vcombine.high %v1171_v30, %v1179_v40  ;;  %v10101_v0 = vcombine.low %v1171_v30, %v1179_v40  ;;  %v13635_v23 = vld [vmem:[#allocation21_spill] sm:$0xff]  ;;  %v9272_v30 = vcombine.high %v340_v12, %v348_v13 }
 0x361   : > { %8305 = vmatprep.subr.bf16.mxu1 %v10134_v50  ;;  %v9544_v50 = vcombine.high %v612_v7, %v620_v24 }
 0x362   : > { %8235 = vmatpush2.bf16.msra.mxu0 %v9877_v20  ;;  %v596_v20 = vld [vmem:[%s10663_s8 + $0xa30] sm:$0xff] }
 0x363   : > { %8236 = vmatprep.subr.bf16.mxu0 %v9862_v6 }
 0x364   : > { %8306 = vmatpush2.bf16.msra.mxu1 %v10133_v4  ;;  %v604_v4 = vld [vmem:[%s10663_s8 + $0xa70] sm:$0xff] }
 0x365   : > { %8307 = vmatprep.subr.bf16.mxu1 %v10118_v27  ;;  %v9287_v27 = vcombine.low %v356_v38, %v364_v43  ;;  %v572_v38 = vld [vmem:[%s10663_s8 + $0x970] sm:$0xff] }
 0x366   : > { %8237 = vmatpush2.bf16.msra.mxu0 %v9861_v57  ;;  %v9528_v57 = vcombine.high %v596_v20, %v604_v4 }
 0x367   : > { %8238 = vmatprep.subr.bf16.mxu0 %v9846_v10  ;;  %v332_v10 = vld [vmem:[%s10663_s8 + $0x1f0] sm:$0xff] }
 0x368   : > { %8308 = vmatpush2.bf16.msra.mxu1 %v10117_v26  ;;  %v324_v26 = vld [vmem:[%s10663_s8 + $0x1b0] sm:$0xff] }
 0x369   : > { %8309 = vmatprep.subr.bf16.mxu1 %v10102_v2  ;;  %v13636_v2 = vld [vmem:[#allocation22_spill] sm:$0xff]  ;;  %v9255_v7 = vcombine.low %v324_v26, %v332_v10 }
 0x36a   : > { %8239 = vmatpush2.bf16.msra.mxu0 %v9845_v39  ;;  %v9271_v39 = vcombine.low %v340_v12, %v348_v13  ;;  %v292_v12 = vld [vmem:[%s10663_s8 + $0xb0] sm:$0xff] }
 0x36b   : > { %8350 = vmatprep.subr.bf16.mxu0 %v9320_v14  ;;  %v9527_v14 = vcombine.low %v596_v20, %v604_v4  ;;  %v300_v13 = vld [vmem:[%s10663_s8 + $0xf0] sm:$0xff] }
 0x36c   : > { %8310 = vmatpush2.bf16.msra.mxu1 %v10101_v0  ;;  %v13640_v4 = vld [vmem:[#allocation26_spill] sm:$0xff] }
 0x36d   : > { %8421 = vmatprep.subr.bf16.mxu1 %v9576_v59  ;;  %v12543_v9 = vpop.f32.mrf.mxu0  ;;  %8241 = vmatmul.mubr.bf16.vlgmr.msra.gmra.mxu0 %v13632_v16  ;;  %v9256_v59 = vcombine.high %v324_v26, %v332_v10 }
 0x36e   : > { %8351 = vmatpush1.bf16.msra.mxu0 %v9319_v45  ;;  %8250 = vmatprep.mubr.bf16.mxu0 %v13634_v19  ;;  %v316_v45 = vld [vmem:[%s10663_s8 + $0x170] sm:$0xff] }
 0x36f   : > { %v12548_v49 = vpop.f32.mrf.mxu1  ;;  %8312 = vmatmul.mubr.bf16.vlgmr.msra.gmra.mxu1 %v13633_v44  ;;  %v12551_v54 = vpop.f32.mrf.mxu0  ;;  %8352 = vmatprep.subr.bf16.mxu0 %v9304_v53  ;;  %v13639_v53 = vld [vmem:[#allocation25_spill] sm:$0xff]  ;;  %v9239_v26 = vcombine.low %v308_v37, %v316_v45  ;;  %v500_v19 = vld [vmem:[%s10663_s8 + $0x730] sm:$0xff] }
 0x370   : > { %8422 = vmatpush1.bf16.msra.mxu1 %v9575_v35  ;;  %8321 = vmatprep.mubr.bf16.mxu1 %v13635_v23  ;;  %v508_v44 = vld [vmem:[%s10663_s8 + $0x770] sm:$0xff] }
 0x371   : > { %v12553_v28 = vpop.f32.mrf.mxu1  ;;  %8423 = vmatprep.subr.bf16.mxu1 %v9560_v63  ;;  %v12558_v34 = vpop.f32.mrf.mxu0  ;;  %v564_v63 = vld [vmem:[%s10663_s8 + $0x930] sm:$0xff] }
 0x372   : > { %8353 = vmatpush1.bf16.msra.mxu0 %v9303_v61  ;;  %v9511_v61 = vcombine.low %v580_v1, %v588_v41  ;;  %v9495_v1 = vcombine.low %v564_v63, %v572_v38  ;;  %v9224_v41 = vcombine.high %v292_v12, %v300_v13 }
 0x373   : > { %v12563_v6 = vpop.f32.mrf.mxu1  ;;  %v12565_v55 = vpop.f32.mrf.mxu0  ;;  %8354 = vmatprep.subr.bf16.mxu0 %v9288_v51 }
 0x374   : > { %8424 = vmatpush1.bf16.msra.mxu1 %v9559_v36  ;;  %v9240_v36 = vcombine.high %v308_v37, %v316_v45  ;;  %v532_v37 = vld [vmem:[%s10663_s8 + $0x830] sm:$0xff] }
 0x375   : > { %v12567_v40 = vpop.f32.mrf.mxu1  ;;  %8425 = vmatprep.subr.bf16.mxu1 %v9544_v50  ;;  %8251 = vmatmul.mubr.bf16.gmra.mxu0 %v13636_v2  ;;  %v12574_v29 = vpop.f32.mrf.mxu0  ;;  %v9496_v50 = vcombine.high %v564_v63, %v572_v38  ;;  %v540_v45 = vld [vmem:[%s10663_s8 + $0x870] sm:$0xff]  ;;  %v9223_v63 = vcombine.low %v292_v12, %v300_v13 }
 0x376   : > { %8355 = vmatpush1.bf16.msra.mxu0 %v9287_v27  ;;  %8260 = vmatprep.mubr.bf16.mxu0 %v13638_v15  ;;  %v548_v27 = vld [vmem:[%s10663_s8 + $0x8b0] sm:$0xff] }
 0x377   : > { %8322 = vmatmul.mubr.bf16.gmra.mxu1 %v13637_v60  ;;  %v12577_v0 = vpop.f32.mrf.mxu1  ;;  %8356 = vmatprep.subr.bf16.mxu0 %v9272_v30  ;;  %v12579_v47 = vpop.f32.mrf.mxu0  ;;  %v516_v15 = vld [vmem:[%s10663_s8 + $0x7b0] sm:$0xff] }
 0x378   : > { %8426 = vmatpush1.bf16.msra.mxu1 %v9543_v58  ;;  %8331 = vmatprep.mubr.bf16.mxu1 %v13639_v53  ;;  %v556_v58 = vld [vmem:[%s10663_s8 + $0x8f0] sm:$0xff]  ;;  %v9464_v53 = vcombine.high %v532_v37, %v540_v45 }
 0x379   : > { %8427 = vmatprep.subr.bf16.mxu1 %v9528_v57  ;;  %v12584_v35 = vpop.f32.mrf.mxu1  ;;  %v12589_v43 = vpop.f32.mrf.mxu0  ;;  %v13641_v57 = vld [vmem:[#allocation27_spill] sm:$0xff]  ;;  %v13644_v2 = vld [vmem:[#allocation30_spill] sm:$0xff] }
 0x37a   : > { %8357 = vmatpush1.bf16.msra.mxu0 %v9271_v39  ;;  %v780_v12 = vld [vmem:[%s10663_s8 + $0xff0] sm:$0xff] }
 0x37b   : > { %v12591_v24 = vpop.f32.mrf.mxu1  ;;  %8358 = vmatprep.subr.bf16.mxu0 %v9256_v59  ;;  %v12593_v51 = vpop.f32.mrf.mxu0  ;;  %v9480_v59 = vcombine.high %v548_v27, %v556_v58 }
 0x37c   : > { %8428 = vmatpush1.bf16.msra.mxu1 %v9527_v14  ;;  %v13642_v14 = vld [vmem:[#allocation28_spill] sm:$0xff] }
 0x37d   : > { %8429 = vmatprep.subr.bf16.mxu1 %v9512_v3  ;;  %v12597_v20 = vpop.f32.mrf.mxu1  ;;  %8261 = vmatmul.mubr.bf16.gmra.mxu0 %v13640_v4  ;;  %v12602_v30 = vpop.f32.mrf.mxu0  ;;  %v276_v3 = vld [vmem:[%s10663_s8 + $0x30] sm:$0xff] }
 0x37e   : > { %8359 = vmatpush1.bf16.msra.mxu0 %v9255_v7  ;;  %8270 = vmatprep.mubr.bf16.mxu0 %v13642_v14  ;;  %v284_v4 = vld [vmem:[%s10663_s8 + $0x70] sm:$0xff] }
 0x37f   : > { %8332 = vmatmul.mubr.bf16.gmra.mxu1 %v13641_v57  ;;  %v12605_v10 = vpop.f32.mrf.mxu1  ;;  %8360 = vmatprep.subr.bf16.mxu0 %v9240_v36  ;;  %v12607_v39 = vpop.f32.mrf.mxu0  ;;  %v13643_v57 = vld [vmem:[#allocation29_spill] sm:$0xff]  ;;  %v9479_v36 = vcombine.low %v548_v27, %v556_v58  ;;  %v13645_v27 = vld [vmem:[#allocation31_spill] sm:$0xff]  ;;  %v9207_v58 = vcombine.low %v276_v3, %v284_v4 }
 0x380   : > { %8430 = vmatpush1.bf16.msra.mxu1 %v9511_v61  ;;  %8341 = vmatprep.mubr.bf16.mxu1 %v13643_v57  ;;  %v524_v57 = vld [vmem:[%s10663_s8 + $0x7f0] sm:$0xff] }
 0x381   : > { %8431 = vmatprep.subr.bf16.mxu1 %v9496_v50  ;;  %v12612_v7 = vpop.f32.mrf.mxu1  ;;  %v12617_v61 = vpop.f32.mrf.mxu0  ;;  %v9208_v50 = vcombine.high %v276_v3, %v284_v4  ;;  %v764_v4 = vld [vmem:[%s10663_s8 + $0xf70] sm:$0xff] }
 0x382   : > { %8361 = vmatpush1.bf16.msra.mxu0 %v9239_v26  ;;  %v772_v26 = vld [vmem:[%s10663_s8 + $0xfb0] sm:$0xff] }
 0x383   : > { %v12619_v38 = vpop.f32.mrf.mxu1  ;;  %8362 = vmatprep.subr.bf16.mxu0 %v9224_v41  ;;  %v12621_v14 = vpop.f32.mrf.mxu0  ;;  %v9463_v41 = vcombine.low %v532_v37, %v540_v45  ;;  %v9447_v37 = vcombine.low %v516_v15, %v524_v57 }
 0x384   : > { %8432 = vmatpush1.bf16.msra.mxu1 %v9495_v1 }
 0x385   : > { %8433 = vmatprep.subr.bf16.mxu1 %v9480_v59  ;;  %v12625_v60 = vpop.f32.mrf.mxu1  ;;  %8271 = vmatmul.mubr.bf16.gmra.mxu0 %v13644_v2  ;;  %v12630_v13 = vpop.f32.mrf.mxu0  ;;  %v9448_v59 = vcombine.high %v516_v15, %v524_v57  ;;  %v9704_v2 = vcombine.high %v772_v26, %v780_v12  ;;  %v9416_v57 = vcombine.high %v484_v31, %v492_v5 }
 0x386   : > { %8363 = vmatpush1.bf16.msra.mxu0 %v9223_v63  ;;  %8382 = vmatprep.mubr.bf16.mxu0 %v13647_v52  ;;  %v756_v63 = vld [vmem:[%s10663_s8 + $0xf30] sm:$0xff] }
 0x387   : > { %8342 = vmatmul.mubr.bf16.gmra.mxu1 %v13645_v27  ;;  %v12633_v1 = vpop.f32.mrf.mxu1  ;;  %8364 = vmatprep.subr.bf16.mxu0 %v9208_v50  ;;  %v12635_v23 = vpop.f32.mrf.mxu0  ;;  %v9432_v50 = vcombine.high %v500_v19, %v508_v44  ;;  %v9688_v52 = vcombine.high %v756_v63, %v764_v4  ;;  %v9687_v15 = vcombine.low %v756_v63, %v764_v4  ;;  %v460_v63 = vld [vmem:[%s10663_s8 + $0x5f0] sm:$0xff] }
 0x388   : > { %8434 = vmatpush1.bf16.msra.mxu1 %v9479_v36  ;;  %v13648_v36 = vld [vmem:[#allocation13_spill] sm:$0xff]  ;;  %v708_v4 = vld [vmem:[%s10663_s8 + $0xdb0] sm:$0xff] }
 0x389   : > { %8435 = vmatprep.subr.bf16.mxu1 %v9464_v53  ;;  %v12639_v16 = vpop.f32.mrf.mxu1  ;;  %v7850_v3 = vpop.f32.mrf.mxu0  ;;  %8453 = vmatprep.mubr.bf16.mxu1 %v13648_v36  ;;  %v9703_v53 = vcombine.low %v772_v26, %v780_v12  ;;  %v468_v26 = vld [vmem:[%s10663_s8 + $0x630] sm:$0xff] }
 0x38a   : > { %13646 = vst [vmem:[#allocation32_spill] sm:$0xff] %v12639_v16  ;;  %8365 = vmatpush1.bf16.msra.mxu0 %v9207_v58  ;;  %v740_v16 = vld [vmem:[%s10663_s8 + $0xeb0] sm:$0xff]  ;;  %v9431_v58 = vcombine.low %v500_v19, %v508_v44 }
 0x38b   : > { %v7921_v45 = vpop.f32.mrf.mxu1  ;;  %8366 = vmatprep.subr.bf16.mxu0 %v9448_v59  ;;  %v7851_v27 = vpop.f32.mrf.mxu0  ;;  %v476_v12 = vld [vmem:[%s10663_s8 + $0x670] sm:$0xff]  ;;  %v9415_v59 = vcombine.low %v484_v31, %v492_v5 }
 0x38c   : > { %8436 = vmatpush1.bf16.msra.mxu1 %v9463_v41  ;;  %v724_v27 = vld [vmem:[%s10663_s8 + $0xe30] sm:$0xff]  ;;  %v9400_v44 = vcombine.high %v468_v26, %v476_v12 }
 0x38d   : > { %8437 = vmatprep.subr.bf16.mxu1 %v9704_v2  ;;  %v7922_v3 = vpop.f32.mrf.mxu1  ;;  %v9672_v2 = vcombine.high %v740_v16, %v748_v48  ;;  %v732_v41 = vld [vmem:[%s10663_s8 + $0xe70] sm:$0xff] }
 0x38e   : > { %8367 = vmatpush2.bf16.msra.mxu0 %v9447_v37  ;;  %v9671_v37 = vcombine.low %v740_v16, %v748_v48  ;;  %v9656_v19 = vcombine.high %v724_v27, %v732_v41  ;;  %v716_v45 = vld [vmem:[%s10663_s8 + $0xdf0] sm:$0xff] }
 0x38f   : > { %8368 = vmatprep.subr.bf16.mxu0 %v9432_v50  ;;  %v9655_v50 = vcombine.low %v724_v27, %v732_v41  ;;  %v9640_v48 = vcombine.high %v708_v4, %v716_v45  ;;  %v436_v31 = vld [vmem:[%s10663_s8 + $0x530] sm:$0xff] }
 0x390   : > { %8438 = vmatpush2.bf16.msra.mxu1 %v9703_v53  ;;  %v9399_v53 = vcombine.low %v468_v26, %v476_v12  ;;  %v444_v16 = vld [vmem:[%s10663_s8 + $0x570] sm:$0xff] }
 0x391   : > { %8439 = vmatprep.subr.bf16.mxu1 %v9688_v52  ;;  %v452_v52 = vld [vmem:[%s10663_s8 + $0x5b0] sm:$0xff] }
 0x392   : > { %8369 = vmatpush2.bf16.msra.mxu0 %v9431_v58  ;;  %v9384_v5 = vcombine.high %v452_v52, %v460_v63  ;;  %v692_v3 = vld [vmem:[%s10663_s8 + $0xd30] sm:$0xff] }
 0x393   : > { %8370 = vmatprep.subr.bf16.mxu0 %v9416_v57  ;;  %v700_v58 = vld [vmem:[%s10663_s8 + $0xd70] sm:$0xff]  ;;  %v9639_v57 = vcombine.low %v708_v4, %v716_v45  ;;  %v1295_v45 = vld [vmem:[%s11209_s27 + $0x8] sm:$0xff] }
 0x394   : > { %8440 = vmatpush2.bf16.msra.mxu1 %v9687_v15  ;;  %v9383_v15 = vcombine.low %v452_v52, %v460_v63  ;;  %v9624_v26 = vcombine.high %v692_v3, %v700_v58  ;;  %v420_v12 = vld [vmem:[%s10663_s8 + $0x4b0] sm:$0xff] }
 0x395   : > { %8441 = vmatprep.subr.bf16.mxu1 %v9672_v2  ;;  %v9368_v2 = vcombine.high %v436_v31, %v444_v16  ;;  %v428_v27 = vld [vmem:[%s10663_s8 + $0x4f0] sm:$0xff] }
 0x396   : > { %8371 = vmatpush2.bf16.msra.mxu0 %v9415_v59  ;;  %v676_v41 = vld [vmem:[%s10663_s8 + $0xcb0] sm:$0xff] }
 0x397   : > { %8372 = vmatprep.subr.bf16.mxu0 %v9400_v44  ;;  %v684_v59 = vld [vmem:[%s10663_s8 + $0xcf0] sm:$0xff]  ;;  %v9623_v44 = vcombine.low %v692_v3, %v700_v58 }
 0x398   : > { %8442 = vmatpush2.bf16.msra.mxu1 %v9671_v37  ;;  %v9367_v37 = vcombine.low %v436_v31, %v444_v16  ;;  %v9608_v52 = vcombine.high %v676_v41, %v684_v59  ;;  %v404_v63 = vld [vmem:[%s10663_s8 + $0x430] sm:$0xff]  ;;  %v13649_v16 = vsub.s32 0, %v11200_v17 }
 0x399   : > { %8443 = vmatprep.subr.bf16.mxu1 %v9656_v19  ;;  %v9352_v19 = vcombine.high %v420_v12, %v428_v27  ;;  %v412_v4 = vld [vmem:[%s10663_s8 + $0x470] sm:$0xff] }
 0x39a   : > { %8373 = vmatpush2.bf16.msra.mxu0 %v9399_v53  ;;  %v660_v53 = vld [vmem:[%s10663_s8 + $0xc30] sm:$0xff]  ;;  %v9336_v31 = vcombine.high %v404_v63, %v412_v4  ;;  %v12672_v3 = vrot.slane %v1295_v45, %v13649_v16 }
 0x39b   : > { %8374 = vmatprep.subr.bf16.mxu0 %v9384_v5  ;;  %v9351_v5 = vcombine.low %v420_v12, %v428_v27  ;;  %v13650_v12 = vsub.s32 1, %v11200_v17  ;;  %v892_v16 = vld [vmem:[%s10663_s8 + $0x1370] sm:$0xff] }
 0x39c   : > { %8444 = vmatpush2.bf16.msra.mxu1 %v9655_v50  ;;  %v668_v50 = vld [vmem:[%s10663_s8 + $0xc70] sm:$0xff] }
 0x39d   : > { %8445 = vmatprep.subr.bf16.mxu1 %v9640_v48  ;;  %v9607_v48 = vcombine.low %v676_v41, %v684_v59  ;;  %v9592_v58 = vcombine.high %v660_v53, %v668_v50  ;;  %v12680_v27 = vrot.slane %v1295_v45, %v13650_v12  ;;  %v9335_v41 = vcombine.low %v404_v63, %v412_v4  ;;  %v1140_v36 = vld [vmem:[%s10663_s8 + $0x1b30] sm:$0xff] }
 0x39e   : > { %8375 = vmatpush2.bf16.msra.mxu0 %v9383_v15  ;;  %v900_v15 = vld [vmem:[%s10663_s8 + $0x13b0] sm:$0xff]  ;;  %v9591_v59 = vcombine.low %v660_v53, %v668_v50  ;;  %v7821_v53 = vadd.f32 %v12558_v34, %v12672_v3 }
 0x39f   : > { %8376 = vmatprep.subr.bf16.mxu0 %v9368_v2  ;;  %v1156_v2 = vld [vmem:[%s10663_s8 + $0x1bb0] sm:$0xff]  ;;  %v7819_v63 = vadd.f32 %v12551_v54, %v12680_v27 }
 0x3a0   : > { %8446 = vmatpush2.bf16.msra.mxu1 %v9639_v57  ;;  %v908_v57 = vld [vmem:[%s10663_s8 + $0x13f0] sm:$0xff] }
 0x3a1   : > { %8447 = vmatprep.subr.bf16.mxu1 %v9624_v26  ;;  %v1164_v26 = vld [vmem:[%s10663_s8 + $0x1bf0] sm:$0xff]  ;;  %v9831_v4 = vcombine.low %v900_v15, %v908_v57 }
 0x3a2   : > { %8377 = vmatpush2.bf16.msra.mxu0 %v9367_v37  ;;  %v9832_v37 = vcombine.high %v900_v15, %v908_v57  ;;  %v1148_v45 = vld [vmem:[%s10663_s8 + $0x1b70] sm:$0xff] }
 0x3a3   : > { %8378 = vmatprep.subr.bf16.mxu0 %v9352_v19  ;;  %v10088_v19 = vcombine.high %v1156_v2, %v1164_v26  ;;  %v12700_v12 = vld [vmem:[%s10663_s8 + $0x1ab0] sm:$0xff]  ;;  %v10071_v57 = vcombine.low %v1140_v36, %v1148_v45 }
 0x3a4   : > { %8448 = vmatpush2.bf16.msra.mxu1 %v9623_v44  ;;  %v7817_v44 = vadd.f32 %v12543_v9, %v12672_v3  ;;  %v10087_v9 = vcombine.low %v1156_v2, %v1164_v26  ;;  %v12703_v54 = vld [vmem:[%s10663_s8 + $0x1af0] sm:$0xff]  ;;  %v7890_v2 = vadd.f32 %v12553_v28, %v7819_v63  ;;  %v7823_v26 = vadd.f32 %v12565_v55, %v12680_v27 }
 0x3a5   : > { %8449 = vmatprep.subr.bf16.mxu1 %v9608_v52  ;;  %v884_v52 = vld [vmem:[%s10663_s8 + $0x1330] sm:$0xff]  ;;  %v10056_v55 = vcombine.high %v12700_v12, %v12703_v54 }
 0x3a6   : > { %8379 = vmatpush2.bf16.msra.mxu0 %v9351_v5  ;;  %v9816_v50 = vcombine.high %v884_v52, %v892_v16  ;;  %v12693_v5 = vld [vmem:[%s10663_s8 + $0x12b0] sm:$0xff]  ;;  %v9815_v34 = vcombine.low %v884_v52, %v892_v16 }
 0x3a7   : > { %8380 = vmatprep.subr.bf16.mxu0 %v9336_v31  ;;  %v10072_v31 = vcombine.high %v1140_v36, %v1148_v45  ;;  %v7827_v36 = vadd.f32 %v12574_v29, %v12672_v3  ;;  %v12721_v16 = vld [vmem:[%s10663_s8 + $0x1270] sm:$0xff]  ;;  %v7829_v45 = vadd.f32 %v12579_v47, %v12680_v27  ;;  %v7894_v29 = vadd.f32 %v12567_v40, %v7823_v26 }
 0x3a8   : > { %8450 = vmatpush2.bf16.msra.mxu1 %v9607_v48  ;;  %v7888_v48 = vadd.f32 %v12548_v49, %v7817_v44  ;;  %v10055_v40 = vcombine.low %v12700_v12, %v12703_v54  ;;  %v12744_v26 = vld [vmem:[%s10663_s8 + $0x11b0] sm:$0xff] }
 0x3a9   : > { %8451 = vmatprep.subr.bf16.mxu1 %v9592_v58  ;;  %v12697_v58 = vld [vmem:[%s10663_s8 + $0x12f0] sm:$0xff]  ;;  %v7900_v54 = vadd.f32 %v12584_v35, %v7829_v45 }
 0x3aa   : > { %8381 = vmatpush2.bf16.msra.mxu0 %v9335_v41  ;;  %v9800_v28 = vcombine.high %v12693_v5, %v12697_v58  ;;  %v9799_v47 = vcombine.low %v12693_v5, %v12697_v58  ;;  %v12757_v12 = vld [vmem:[%s10663_s8 + $0x19f0] sm:$0xff] }
 0x3ab   : > { %8492 = vmatprep.subr.bf16.mxu0 %v9832_v37 }
 0x3ac   : > { %8452 = vmatpush2.bf16.msra.mxu1 %v9591_v59  ;;  %v7892_v59 = vadd.f32 %v12563_v6, %v7821_v53  ;;  %v12718_v6 = vld [vmem:[%s10663_s8 + $0x1230] sm:$0xff] }
 0x3ad   : > { %8563 = vmatprep.subr.bf16.mxu1 %v10088_v19  ;;  %v7958_v15 = vpop.f32.mrf.mxu0  ;;  %8383 = vmatmul.mubr.bf16.vlgmr.msra.gmra.mxu0 %v10760_v21  ;;  %v12730_v53 = vld [vmem:[%s10663_s8 + $0x1a70] sm:$0xff] }
 0x3ae   : > { %v7959_v49 = vadd.f32 %v7958_v15, %v7888_v48  ;;  %8493 = vmatpush1.bf16.msra.mxu0 %v9831_v4  ;;  %8392 = vmatprep.mubr.bf16.mxu0 %v10769_v32  ;;  %v12727_v4 = vld [vmem:[%s10663_s8 + $0x1a30] sm:$0xff] }
 0x3af   : > { %v8029_v41 = vpop.f32.mrf.mxu1  ;;  %8454 = vmatmul.mubr.bf16.vlgmr.msra.gmra.mxu1 %v10765_v25  ;;  %v7960_v37 = vpop.f32.mrf.mxu0  ;;  %8494 = vmatprep.subr.bf16.mxu0 %v9816_v50 }
 0x3b0   : > { %8564 = vmatpush1.bf16.msra.mxu1 %v10087_v9  ;;  %v8030_v44 = vadd.f32 %v8029_v41, %v7959_v49  ;;  %v7961_v19 = vadd.f32 %v7960_v37, %v7890_v2  ;;  %8463 = vmatprep.mubr.bf16.mxu1 %v10774_v33  ;;  %v9784_v2 = vcombine.high %v12718_v6, %v12721_v16  ;;  %v12754_v41 = vld [vmem:[%s10663_s8 + $0x19b0] sm:$0xff] }
 0x3b1   : > { %v8031_v52 = vpop.f32.mrf.mxu1  ;;  %8565 = vmatprep.subr.bf16.mxu1 %v10072_v31  ;;  %v7962_v63 = vpop.f32.mrf.mxu0  ;;  %v7831_v31 = vadd.f32 %v12589_v43, %v12672_v3  ;;  %v10040_v43 = vcombine.high %v12727_v4, %v12730_v53  ;;  %v10039_v37 = vcombine.low %v12727_v4, %v12730_v53  ;;  %v12781_v4 = vld [vmem:[%s10663_s8 + $0x1170] sm:$0xff]  ;;  %v7839_v53 = vadd.f32 %v12607_v39, %v12680_v27 }
 0x3b2   : > { %8926 = vst [vmem:[%s11282_s17 + $0x40] sm:$0xff] %v8030_v44  ;;  %v8032_v9 = vadd.f32 %v8031_v52, %v7961_v19  ;;  %v7963_v50 = vadd.f32 %v7962_v63, %v7892_v59  ;;  %8495 = vmatpush1.bf16.msra.mxu0 %v9815_v34  ;;  %v7898_v34 = vadd.f32 %v12577_v0, %v7827_v36 }
 0x3b3   : > { %v8033_v48 = vpop.f32.mrf.mxu1  ;;  %v7964_v15 = vpop.f32.mrf.mxu0  ;;  %8496 = vmatprep.subr.bf16.mxu0 %v9800_v28  ;;  %v9783_v0 = vcombine.low %v12718_v6, %v12721_v16  ;;  %v7833_v28 = vadd.f32 %v12593_v51, %v12680_v27  ;;  %v7902_v44 = vadd.f32 %v12591_v24, %v7831_v31  ;;  %v10024_v51 = vcombine.high %v12754_v41, %v12757_v12  ;;  %v12778_v24 = vld [vmem:[%s10663_s8 + $0x1130] sm:$0xff] }
 0x3b4   : > { %8566 = vmatpush1.bf16.msra.mxu1 %v10071_v57  ;;  %8927 = vst [vmem:[%s11282_s17 + $0x48] sm:$0xff] %v8032_v9  ;;  %v8034_v5 = vadd.f32 %v8033_v48, %v7963_v50  ;;  %v7965_v58 = vadd.f32 %v7964_v15, %v7894_v29  ;;  %v12751_v57 = vld [vmem:[%s10663_s8 + $0x11f0] sm:$0xff]  ;;  %v7837_v6 = vadd.f32 %v12602_v30, %v12672_v3 }
 0x3b5   : > { %v8035_v49 = vpop.f32.mrf.mxu1  ;;  %8567 = vmatprep.subr.bf16.mxu1 %v10056_v55  ;;  %v7968_v59 = vpop.f32.mrf.mxu0  ;;  %8393 = vmatmul.mubr.bf16.gmra.mxu0 %v10782_v42  ;;  %v9768_v52 = vcombine.high %v12744_v26, %v12751_v57  ;;  %v12787_v9 = vld [vmem:[%s10663_s8 + $0x1930] sm:$0xff]  ;;  %v7904_v30 = vadd.f32 %v12597_v20, %v7833_v28  ;;  %v9767_v39 = vcombine.low %v12744_v26, %v12751_v57 }
 0x3b6   : > { %8942 = vst [vmem:[%s11282_s17 + $0xc0] sm:$0xff] %v8034_v5  ;;  %v8036_v55 = vadd.f32 %v8035_v49, %v7965_v58  ;;  %v7969_v36 = vadd.f32 %v7968_v59, %v7898_v34  ;;  %8497 = vmatpush1.bf16.msra.mxu0 %v9799_v47  ;;  %8402 = vmatprep.mubr.bf16.mxu0 %v10789_v56  ;;  %v12790_v50 = vld [vmem:[%s10663_s8 + $0x1970] sm:$0xff] }
 0x3b7   : > { %v8039_v35 = vpop.f32.mrf.mxu1  ;;  %8464 = vmatmul.mubr.bf16.gmra.mxu1 %v10785_v46  ;;  %v7970_v19 = vpop.f32.mrf.mxu0  ;;  %8498 = vmatprep.subr.bf16.mxu0 %v9784_v2  ;;  %v7841_v15 = vadd.f32 %v12617_v61, %v12672_v3  ;;  %v10023_v20 = vcombine.low %v12754_v41, %v12757_v12  ;;  %v9752_v2 = vcombine.high %v12778_v24, %v12781_v4  ;;  %v12804_v34 = vld [vmem:[%s10663_s8 + $0x10b0] sm:$0xff] }
 0x3b8   : > { %8568 = vmatpush1.bf16.msra.mxu1 %v10055_v40  ;;  %8943 = vst [vmem:[%s11282_s17 + $0xc8] sm:$0xff] %v8036_v55  ;;  %v7971_v16 = vadd.f32 %v7970_v19, %v7900_v54  ;;  %v8040_v45 = vadd.f32 %v8039_v35, %v7969_v36  ;;  %8473 = vmatprep.mubr.bf16.mxu1 %v10794_v62  ;;  %v12814_v57 = vld [vmem:[%s10663_s8 + $0x18b0] sm:$0xff] }
 0x3b9   : > { %v8041_v63 = vpop.f32.mrf.mxu1  ;;  %8569 = vmatprep.subr.bf16.mxu1 %v10040_v43  ;;  %v7972_v29 = vpop.f32.mrf.mxu0  ;;  %v7908_v5 = vadd.f32 %v12605_v10, %v7837_v6  ;;  %v10008_v61 = vcombine.high %v12787_v9, %v12790_v50  ;;  %v12811_v43 = vld [vmem:[%s10663_s8 + $0x10f0] sm:$0xff]  ;;  %v7910_v12 = vadd.f32 %v12612_v7, %v7839_v53  ;;  %v9751_v10 = vcombine.low %v12778_v24, %v12781_v4 }
 0x3ba   : > { %8958 = vst [vmem:[%s11282_s17 + $0x140] sm:$0xff] %v8040_v45  ;;  %v7973_v48 = vadd.f32 %v7972_v29, %v7902_v44  ;;  %v8042_v47 = vadd.f32 %v8041_v63, %v7971_v16  ;;  %8499 = vmatpush1.bf16.msra.mxu0 %v9783_v0  ;;  %v12817_v41 = vld [vmem:[%s10663_s8 + $0x18f0] sm:$0xff]  ;;  %v10007_v59 = vcombine.low %v12787_v9, %v12790_v50 }
 0x3bb   : > { %v8043_v31 = vpop.f32.mrf.mxu1  ;;  %v7974_v40 = vpop.f32.mrf.mxu0  ;;  %8500 = vmatprep.subr.bf16.mxu0 %v9768_v52  ;;  %v7843_v0 = vadd.f32 %v12621_v14, %v12680_v27  ;;  %v7912_v55 = vadd.f32 %v12619_v38, %v7841_v15  ;;  %v9736_v35 = vcombine.high %v12804_v34, %v12811_v43  ;;  %v9992_v14 = vcombine.high %v12814_v57, %v12817_v41  ;;  %v788_v38 = vld [vmem:[%s10663_s8 + $0x1030] sm:$0xff] }
 0x3bc   : > { %8570 = vmatpush1.bf16.msra.mxu1 %v10039_v37  ;;  %8959 = vst [vmem:[%s11282_s17 + $0x148] sm:$0xff] %v8042_v47  ;;  %v7975_v26 = vadd.f32 %v7974_v40, %v7904_v30  ;;  %v8044_v58 = vadd.f32 %v8043_v31, %v7973_v48  ;;  %v7847_v44 = vadd.f32 %v12630_v13, %v12672_v3  ;;  %v796_v6 = vld [vmem:[%s10663_s8 + $0x1070] sm:$0xff] }
 0x3bd   : > { %v8045_v49 = vpop.f32.mrf.mxu1  ;;  %8571 = vmatprep.subr.bf16.mxu1 %v10024_v51  ;;  %v7978_v54 = vpop.f32.mrf.mxu0  ;;  %8403 = vmatmul.mubr.bf16.gmra.mxu0 %v10802_v8  ;;  %v9735_v45 = vcombine.low %v12804_v34, %v12811_v43  ;;  %v1044_v63 = vld [vmem:[%s10663_s8 + $0x1830] sm:$0xff]  ;;  %v7914_v13 = vadd.f32 %v12625_v60, %v7843_v0  ;;  %v7849_v3 = vadd.f32 %v12635_v23, %v12680_v27 }
 0x3be   : > { %8974 = vst [vmem:[%s11282_s17 + $0x1c0] sm:$0xff] %v8044_v58  ;;  %v7979_v37 = vadd.f32 %v7978_v54, %v7908_v5  ;;  %v8046_v28 = vadd.f32 %v8045_v49, %v7975_v26  ;;  %8501 = vmatpush1.bf16.msra.mxu0 %v9767_v39  ;;  %8412 = vmatprep.mubr.bf16.mxu0 %v10809_v18  ;;  %v1052_v24 = vld [vmem:[%s10663_s8 + $0x1870] sm:$0xff]  ;;  %v13652_v5 = vld [vmem:[#allocation32_spill] sm:$0xff] }
 0x3bf   : > { %v8049_v7 = vpop.f32.mrf.mxu1  ;;  %8474 = vmatmul.mubr.bf16.gmra.mxu1 %v10805_v11  ;;  %v7980_v36 = vpop.f32.mrf.mxu0  ;;  %8502 = vmatprep.subr.bf16.mxu0 %v9752_v2  ;;  %v9991_v50 = vcombine.low %v12814_v57, %v12817_v41  ;;  %v9720_v30 = vcombine.high %v788_v38, %v796_v6  ;;  %v7918_v60 = vadd.f32 %v12633_v1, %v7847_v44  ;;  %v1028_v31 = vld [vmem:[%s10663_s8 + $0x17b0] sm:$0xff] }
 0x3c0   : > { %8572 = vmatpush1.bf16.msra.mxu1 %v10023_v20  ;;  %8975 = vst [vmem:[%s11282_s17 + $0x1c8] sm:$0xff] %v8046_v28  ;;  %v7981_v19 = vadd.f32 %v7980_v36, %v7910_v12  ;;  %v8050_v52 = vadd.f32 %v8049_v7, %v7979_v37  ;;  %8483 = vmatprep.mubr.bf16.mxu1 %v10814_v22  ;;  %v1036_v39 = vld [vmem:[%s10663_s8 + $0x17f0] sm:$0xff]  ;;  %v13654_v28 = vld [vmem:[#allocation16_spill] sm:$0xff] }
 0x3c1   : > { %v8051_v51 = vpop.f32.mrf.mxu1  ;;  %8573 = vmatprep.subr.bf16.mxu1 %v10008_v61  ;;  %v7982_v16 = vpop.f32.mrf.mxu0  ;;  %v9976_v47 = vcombine.high %v1044_v63, %v1052_v24  ;;  %v9719_v40 = vcombine.low %v788_v38, %v796_v6  ;;  %v1284_v20 = vld [vmem:[%s10663_s8 + $0x1fb0] sm:$0xff]  ;;  %v7920_v26 = vadd.f32 %v13652_v5, %v7849_v3  ;;  %v13653_v61 = vld [vmem:[#allocation15_spill] sm:$0xff]  ;;  %v9975_v57 = vcombine.low %v1044_v63, %v1052_v24 }
 0x3c2   : > { %8990 = vst [vmem:[%s11282_s17 + $0x240] sm:$0xff] %v8050_v52  ;;  %v7983_v4 = vadd.f32 %v7982_v16, %v7912_v55  ;;  %v8052_v53 = vadd.f32 %v8051_v51, %v7981_v19  ;;  %8503 = vmatpush1.bf16.msra.mxu0 %v9751_v10  ;;  %v1292_v2 = vld [vmem:[%s10663_s8 + $0x1ff0] sm:$0xff]  ;;  %v9960_v41 = vcombine.high %v1028_v31, %v1036_v39 }
 0x3c3   : > { %v8053_v29 = vpop.f32.mrf.mxu1  ;;  %v7984_v9 = vpop.f32.mrf.mxu0  ;;  %8504 = vmatprep.subr.bf16.mxu0 %v9736_v35  ;;  %v13651_v34 = vld [vmem:[#allocation14_spill] sm:$0xff]  ;;  %v13655_v35 = vld [vmem:[#allocation17_spill] sm:$0xff]  ;;  %v9959_v44 = vcombine.low %v1028_v31, %v1036_v39  ;;  %v10215_v52 = vcombine.low %v1284_v20, %v1292_v2 }
 0x3c4   : > { %8574 = vmatpush1.bf16.msra.mxu1 %v10007_v59  ;;  %8991 = vst [vmem:[%s11282_s17 + $0x248] sm:$0xff] %v8052_v53  ;;  %v7985_v23 = vadd.f32 %v7984_v9, %v7914_v13  ;;  %v8054_v27 = vadd.f32 %v8053_v29, %v7983_v4  ;;  %v10216_v59 = vcombine.high %v1284_v20, %v1292_v2  ;;  %v1012_v0 = vld [vmem:[%s10663_s8 + $0x1730] sm:$0xff] }
 0x3c5   : > { %v8055_v48 = vpop.f32.mrf.mxu1  ;;  %8575 = vmatprep.subr.bf16.mxu1 %v9992_v14  ;;  %v7988_v15 = vpop.f32.mrf.mxu0  ;;  %8413 = vmatmul.mubr.bf16.gmra.mxu0 %v13651_v34  ;;  %v1020_v37 = vld [vmem:[%s10663_s8 + $0x1770] sm:$0xff]  ;;  %v749_v34 = vld [vmem:[%s10663_s8 + $0xef8] sm:$0xff] }
 0x3c6   : > { %9006 = vst [vmem:[%s11282_s17 + $0x2c0] sm:$0xff] %v8054_v27  ;;  %v7989_v58 = vadd.f32 %v7988_v15, %v7918_v60  ;;  %v8056_v1 = vadd.f32 %v8055_v48, %v7985_v23  ;;  %8505 = vmatpush1.bf16.msra.mxu0 %v9735_v45  ;;  %8524 = vmatprep.mubr.bf16.mxu0 %v13654_v28  ;;  %v1268_v7 = vld [vmem:[%s10663_s8 + $0x1f30] sm:$0xff]  ;;  %v485_v28 = vld [vmem:[%s10663_s8 + $0x6b8] sm:$0xff] }
 0x3c7   : > { %v8059_v49 = vpop.f32.mrf.mxu1  ;;  %8484 = vmatmul.mubr.bf16.gmra.mxu1 %v13653_v61  ;;  %v7990_v43 = vpop.f32.mrf.mxu0  ;;  %8506 = vmatprep.subr.bf16.mxu0 %v9720_v30  ;;  %v1276_v55 = vld [vmem:[%s10663_s8 + $0x1f70] sm:$0xff]  ;;  %v9944_v51 = vcombine.high %v1012_v0, %v1020_v37  ;;  %v9943_v3 = vcombine.low %v1012_v0, %v1020_v37  ;;  %v493_v61 = vld [vmem:[%s10663_s8 + $0x6f8] sm:$0xff] }
 0x3c8   : > { %8576 = vmatpush1.bf16.msra.mxu1 %v9991_v50  ;;  %9007 = vst [vmem:[%s11282_s17 + $0x2c8] sm:$0xff] %v8056_v1  ;;  %v7991_v12 = vadd.f32 %v7990_v43, %v7920_v26  ;;  %v8060_v54 = vadd.f32 %v8059_v49, %v7989_v58  ;;  %8595 = vmatprep.mubr.bf16.mxu1 %v13655_v35  ;;  %v996_v16 = vld [vmem:[%s10663_s8 + $0x16b0] sm:$0xff]  ;;  %v13671_v35 = vld [vmem:[#allocation12_spill] sm:$0xff] }
 0x3c9   : > { %v8061_v10 = vpop.f32.mrf.mxu1  ;;  %8577 = vmatprep.subr.bf16.mxu1 %v9976_v47  ;;  %v7992_v36 = vpop.f32.mrf.mxu0  ;;  %v10200_v6 = vcombine.high %v1268_v7, %v1276_v55  ;;  %v1004_v45 = vld [vmem:[%s10663_s8 + $0x16f0] sm:$0xff]  ;;  %v10199_v4 = vcombine.low %v1268_v7, %v1276_v55 }
 0x3ca   : > { %9022 = vst [vmem:[%s11282_s17 + $0x340] sm:$0x1] %v8060_v54  ;;  %v8062_v14 = vadd.f32 %v8061_v10, %v7991_v12  ;;  %8507 = vmatpush1.bf16.msra.mxu0 %v9719_v40  ;;  %v1252_v24 = vld [vmem:[%s10663_s8 + $0x1eb0] sm:$0xff]  ;;  %v9928_v53 = vcombine.high %v996_v16, %v1004_v45  ;;  %v9927_v23 = vcombine.low %v996_v16, %v1004_v45 }
 0x3cb   : > { %v8063_v19 = vpop.f32.mrf.mxu1  ;;  %8508 = vmatprep.subr.bf16.mxu0 %v9960_v41  ;;  %v7993_v38 = vpop.f32.mrf.mxu0  ;;  %v1260_v13 = vld [vmem:[%s10663_s8 + $0x1ef0] sm:$0xff] }
 0x3cc   : > { %8578 = vmatpush1.bf16.msra.mxu1 %v9975_v57  ;;  %9023 = vst [vmem:[%s11282_s17 + $0x348] sm:$0x1] %v8062_v14  ;;  %v10184_v29 = vcombine.high %v1252_v24, %v1260_v13  ;;  %v980_v9 = vld [vmem:[%s10663_s8 + $0x1630] sm:$0xff]  ;;  %v10183_v27 = vcombine.low %v1252_v24, %v1260_v13  ;;  %v397_v24 = vld [vmem:[%s10663_s8 + $0x3f8] sm:$0xff] }
 0x3cd   : > { %8579 = vmatprep.subr.bf16.mxu1 %v10216_v59  ;;  %v8064_v63 = vpop.f32.mrf.mxu1  ;;  %v988_v50 = vld [vmem:[%s10663_s8 + $0x1670] sm:$0xff]  ;;  %v645_v13 = vld [vmem:[%s10663_s8 + $0xbb8] sm:$0xff] }
 0x3ce   : > { %8509 = vmatpush2.bf16.msra.mxu0 %v9959_v44  ;;  %v1236_v30 = vld [vmem:[%s10663_s8 + $0x1e30] sm:$0xff]  ;;  %v9912_v48 = vcombine.high %v980_v9, %v988_v50  ;;  %v9911_v20 = vcombine.low %v980_v9, %v988_v50  ;;  %v389_v63 = vld [vmem:[%s10663_s8 + $0x3b8] sm:$0xff] }
 0x3cf   : > { %8510 = vmatprep.subr.bf16.mxu0 %v9944_v51  ;;  %v1244_v60 = vld [vmem:[%s10663_s8 + $0x1e70] sm:$0xff]  ;;  %v373_v50 = vld [vmem:[%s10663_s8 + $0x338] sm:$0xff] }
 0x3d0   : > { %8580 = vmatpush2.bf16.msra.mxu1 %v10215_v52  ;;  %v10168_v47 = vcombine.high %v1236_v30, %v1244_v60  ;;  %v964_v31 = vld [vmem:[%s10663_s8 + $0x15b0] sm:$0xff]  ;;  %v10167_v2 = vcombine.low %v1236_v30, %v1244_v60  ;;  %v381_v30 = vld [vmem:[%s10663_s8 + $0x378] sm:$0xff] }
 0x3d1   : > { %8581 = vmatprep.subr.bf16.mxu1 %v10200_v6  ;;  %v972_v39 = vld [vmem:[%s10663_s8 + $0x15f0] sm:$0xff]  ;;  %v629_v60 = vld [vmem:[%s10663_s8 + $0xb38] sm:$0xff] }
 0x3d2   : > { %8511 = vmatpush2.bf16.msra.mxu0 %v9943_v3  ;;  %v1220_v15 = vld [vmem:[%s10663_s8 + $0x1db0] sm:$0xff]  ;;  %v9896_v5 = vcombine.high %v964_v31, %v972_v39  ;;  %v9895_v57 = vcombine.low %v964_v31, %v972_v39  ;;  %v653_v3 = vld [vmem:[%s10663_s8 + $0xbf8] sm:$0xff] }
 0x3d3   : > { %8512 = vmatprep.subr.bf16.mxu0 %v9928_v53  ;;  %v1228_v40 = vld [vmem:[%s10663_s8 + $0x1df0] sm:$0xff]  ;;  %v9578_v9 = vcombine.high %v645_v13, %v653_v3  ;;  %v357_v39 = vld [vmem:[%s10663_s8 + $0x2b8] sm:$0xff] }
 0x3d4   : > { %8582 = vmatpush2.bf16.msra.mxu1 %v10199_v4  ;;  %v10152_v26 = vcombine.high %v1220_v15, %v1228_v40  ;;  %v948_v58 = vld [vmem:[%s10663_s8 + $0x1530] sm:$0xff]  ;;  %v10151_v41 = vcombine.low %v1220_v15, %v1228_v40  ;;  %v365_v15 = vld [vmem:[%s10663_s8 + $0x2f8] sm:$0xff] }
 0x3d5   : > { %8583 = vmatprep.subr.bf16.mxu1 %v10184_v29  ;;  %v956_v1 = vld [vmem:[%s10663_s8 + $0x1570] sm:$0xff]  ;;  %v9322_v29 = vcombine.high %v389_v63, %v397_v24 }
 0x3d6   : > { %8513 = vmatpush2.bf16.msra.mxu0 %v9927_v23  ;;  %v1204_v49 = vld [vmem:[%s10663_s8 + $0x1d30] sm:$0xff]  ;;  %v9880_v12 = vcombine.high %v948_v58, %v956_v1  ;;  %v9879_v7 = vcombine.low %v948_v58, %v956_v1  ;;  %v637_v23 = vld [vmem:[%s10663_s8 + $0xb78] sm:$0xff]  ;;  %v9305_v1 = vcombine.low %v373_v50, %v381_v30 }
 0x3d7   : > { %8514 = vmatprep.subr.bf16.mxu0 %v9912_v48  ;;  %v1212_v43 = vld [vmem:[%s10663_s8 + $0x1d70] sm:$0xff]  ;;  %v9577_v48 = vcombine.low %v645_v13, %v653_v3  ;;  %v9562_v31 = vcombine.high %v629_v60, %v637_v23  ;;  %v13657_v58 = vld [vmem:[#allocation19_spill] sm:$0xff] }
 0x3d8   : > { %8584 = vmatpush2.bf16.msra.mxu1 %v10183_v27  ;;  %v10136_v54 = vcombine.high %v1204_v49, %v1212_v43  ;;  %v932_v10 = vld [vmem:[%s10663_s8 + $0x14b0] sm:$0xff]  ;;  %v10135_v55 = vcombine.low %v1204_v49, %v1212_v43  ;;  %v9321_v27 = vcombine.low %v389_v63, %v397_v24  ;;  %v9561_v43 = vcombine.low %v629_v60, %v637_v23  ;;  %v581_v63 = vld [vmem:[%s10663_s8 + $0x9b8] sm:$0xff] }
 0x3d9   : > { %8585 = vmatprep.subr.bf16.mxu1 %v10168_v47  ;;  %v940_v59 = vld [vmem:[%s10663_s8 + $0x14f0] sm:$0xff]  ;;  %v9306_v47 = vcombine.high %v373_v50, %v381_v30  ;;  %v589_v24 = vld [vmem:[%s10663_s8 + $0x9f8] sm:$0xff]  ;;  %v13662_v30 = vld [vmem:[#allocation24_spill] sm:$0xff] }
 0x3da   : > { %8515 = vmatpush2.bf16.msra.mxu0 %v9911_v20  ;;  %v1188_v0 = vld [vmem:[%s10663_s8 + $0x1cb0] sm:$0xff]  ;;  %v9864_v36 = vcombine.high %v932_v10, %v940_v59  ;;  %v9863_v38 = vcombine.low %v932_v10, %v940_v59  ;;  %v341_v10 = vld [vmem:[%s10663_s8 + $0x238] sm:$0xff]  ;;  %v9514_v60 = vcombine.high %v581_v63, %v589_v24 }
 0x3db   : > { %8516 = vmatprep.subr.bf16.mxu0 %v9896_v5  ;;  %v1196_v37 = vld [vmem:[%s10663_s8 + $0x1cf0] sm:$0xff]  ;;  %v621_v5 = vld [vmem:[%s10663_s8 + $0xaf8] sm:$0xff] }
 0x3dc   : > { %8586 = vmatpush2.bf16.msra.mxu1 %v10167_v2  ;;  %v10120_v14 = vcombine.high %v1188_v0, %v1196_v37  ;;  %v916_v44 = vld [vmem:[%s10663_s8 + $0x1430] sm:$0xff]  ;;  %v10119_v6 = vcombine.low %v1188_v0, %v1196_v37  ;;  %v613_v2 = vld [vmem:[%s10663_s8 + $0xab8] sm:$0xff]  ;;  %v13659_v37 = vld [vmem:[#allocation21_spill] sm:$0xff] }
 0x3dd   : > { %8587 = vmatprep.subr.bf16.mxu1 %v10152_v26  ;;  %v924_v19 = vld [vmem:[%s10663_s8 + $0x1470] sm:$0xff]  ;;  %v349_v59 = vld [vmem:[%s10663_s8 + $0x278] sm:$0xff] }
 0x3de   : > { %8517 = vmatpush2.bf16.msra.mxu0 %v9895_v57  ;;  %v1172_v52 = vld [vmem:[%s10663_s8 + $0x1c30] sm:$0xff]  ;;  %v9848_v16 = vcombine.high %v916_v44, %v924_v19  ;;  %v9847_v4 = vcombine.low %v916_v44, %v924_v19  ;;  %v9290_v57 = vcombine.high %v357_v39, %v365_v15  ;;  %v9545_v19 = vcombine.low %v613_v2, %v621_v5  ;;  %v13661_v3 = vld [vmem:[#allocation23_spill] sm:$0xff] }
 0x3df   : > { %8518 = vmatprep.subr.bf16.mxu0 %v9880_v12  ;;  %v1180_v51 = vld [vmem:[%s10663_s8 + $0x1c70] sm:$0xff]  ;;  %v13658_v12 = vld [vmem:[#allocation20_spill] sm:$0xff]  ;;  %v309_v23 = vld [vmem:[%s10663_s8 + $0x138] sm:$0xff] }
 0x3e0   : > { %8588 = vmatpush2.bf16.msra.mxu1 %v10151_v41  ;;  %v10104_v45 = vcombine.high %v1172_v52, %v1180_v51  ;;  %v10103_v53 = vcombine.low %v1172_v52, %v1180_v51  ;;  %v13656_v20 = vld [vmem:[#allocation18_spill] sm:$0xff]  ;;  %v9274_v52 = vcombine.high %v341_v10, %v349_v59 }
 0x3e1   : > { %8589 = vmatprep.subr.bf16.mxu1 %v10136_v54  ;;  %v9546_v54 = vcombine.high %v613_v2, %v621_v5 }
 0x3e2   : > { %8519 = vmatpush2.bf16.msra.mxu0 %v9879_v7  ;;  %v597_v7 = vld [vmem:[%s10663_s8 + $0xa38] sm:$0xff] }
 0x3e3   : > { %8520 = vmatprep.subr.bf16.mxu0 %v9864_v36 }
 0x3e4   : > { %8590 = vmatpush2.bf16.msra.mxu1 %v10135_v55  ;;  %v605_v55 = vld [vmem:[%s10663_s8 + $0xa78] sm:$0xff] }
 0x3e5   : > { %8591 = vmatprep.subr.bf16.mxu1 %v10120_v14  ;;  %v9289_v14 = vcombine.low %v357_v39, %v365_v15  ;;  %v573_v39 = vld [vmem:[%s10663_s8 + $0x978] sm:$0xff] }
 0x3e6   : > { %8521 = vmatpush2.bf16.msra.mxu0 %v9863_v38  ;;  %v9530_v38 = vcombine.high %v597_v7, %v605_v55 }
 0x3e7   : > { %8522 = vmatprep.subr.bf16.mxu0 %v9848_v16  ;;  %v333_v16 = vld [vmem:[%s10663_s8 + $0x1f8] sm:$0xff] }
 0x3e8   : > { %8592 = vmatpush2.bf16.msra.mxu1 %v10119_v6  ;;  %v325_v6 = vld [vmem:[%s10663_s8 + $0x1b8] sm:$0xff] }
 0x3e9   : > { %8593 = vmatprep.subr.bf16.mxu1 %v10104_v45  ;;  %v13660_v45 = vld [vmem:[#allocation22_spill] sm:$0xff]  ;;  %v9257_v2 = vcombine.low %v325_v6, %v333_v16 }
 0x3ea   : > { %8523 = vmatpush2.bf16.msra.mxu0 %v9847_v4  ;;  %v9273_v4 = vcombine.low %v341_v10, %v349_v59  ;;  %v293_v10 = vld [vmem:[%s10663_s8 + $0xb8] sm:$0xff] }
 0x3eb   : > { %8634 = vmatprep.subr.bf16.mxu0 %v9322_v29  ;;  %v9529_v29 = vcombine.low %v597_v7, %v605_v55  ;;  %v301_v59 = vld [vmem:[%s10663_s8 + $0xf8] sm:$0xff]  ;;  %v13664_v55 = vld [vmem:[#allocation26_spill] sm:$0xff] }
 0x3ec   : > { %8594 = vmatpush2.bf16.msra.mxu1 %v10103_v53 }
 0x3ed   : > { %8705 = vmatprep.subr.bf16.mxu1 %v9578_v9  ;;  %v12904_v40 = vpop.f32.mrf.mxu0  ;;  %8525 = vmatmul.mubr.bf16.vlgmr.msra.gmra.mxu0 %v13656_v20  ;;  %v9258_v9 = vcombine.high %v325_v6, %v333_v16 }
 0x3ee   : > { %8635 = vmatpush1.bf16.msra.mxu0 %v9321_v27  ;;  %8534 = vmatprep.mubr.bf16.mxu0 %v13658_v12  ;;  %v317_v27 = vld [vmem:[%s10663_s8 + $0x178] sm:$0xff] }
 0x3ef   : > { %v12909_v26 = vpop.f32.mrf.mxu1  ;;  %8596 = vmatmul.mubr.bf16.vlgmr.msra.gmra.mxu1 %v13657_v58  ;;  %v12912_v49 = vpop.f32.mrf.mxu0  ;;  %8636 = vmatprep.subr.bf16.mxu0 %v9306_v47  ;;  %v13663_v47 = vld [vmem:[#allocation25_spill] sm:$0xff]  ;;  %v9241_v6 = vcombine.low %v309_v23, %v317_v27  ;;  %v501_v12 = vld [vmem:[%s10663_s8 + $0x738] sm:$0xff] }
 0x3f0   : > { %8706 = vmatpush1.bf16.msra.mxu1 %v9577_v48  ;;  %8605 = vmatprep.mubr.bf16.mxu1 %v13659_v37  ;;  %v509_v58 = vld [vmem:[%s10663_s8 + $0x778] sm:$0xff] }
 0x3f1   : > { %v12914_v41 = vpop.f32.mrf.mxu1  ;;  %8707 = vmatprep.subr.bf16.mxu1 %v9562_v31  ;;  %v12919_v0 = vpop.f32.mrf.mxu0  ;;  %v565_v31 = vld [vmem:[%s10663_s8 + $0x938] sm:$0xff] }
 0x3f2   : > { %8637 = vmatpush1.bf16.msra.mxu0 %v9305_v1  ;;  %v9513_v1 = vcombine.low %v581_v63, %v589_v24  ;;  %v9497_v63 = vcombine.low %v565_v31, %v573_v39  ;;  %v9226_v24 = vcombine.high %v293_v10, %v301_v59 }
 0x3f3   : > { %v12924_v36 = vpop.f32.mrf.mxu1  ;;  %v12926_v44 = vpop.f32.mrf.mxu0  ;;  %8638 = vmatprep.subr.bf16.mxu0 %v9290_v57 }
 0x3f4   : > { %8708 = vmatpush1.bf16.msra.mxu1 %v9561_v43  ;;  %v9242_v43 = vcombine.high %v309_v23, %v317_v27  ;;  %v533_v23 = vld [vmem:[%s10663_s8 + $0x838] sm:$0xff] }
 0x3f5   : > { %v12928_v51 = vpop.f32.mrf.mxu1  ;;  %8709 = vmatprep.subr.bf16.mxu1 %v9546_v54  ;;  %8535 = vmatmul.mubr.bf16.gmra.mxu0 %v13660_v45  ;;  %v12935_v13 = vpop.f32.mrf.mxu0  ;;  %v9498_v54 = vcombine.high %v565_v31, %v573_v39  ;;  %v541_v27 = vld [vmem:[%s10663_s8 + $0x878] sm:$0xff]  ;;  %v9225_v31 = vcombine.low %v293_v10, %v301_v59  ;;  %v13668_v45 = vld [vmem:[#allocation30_spill] sm:$0xff] }
 0x3f6   : > { %8639 = vmatpush1.bf16.msra.mxu0 %v9289_v14  ;;  %8544 = vmatprep.mubr.bf16.mxu0 %v13662_v30  ;;  %v549_v14 = vld [vmem:[%s10663_s8 + $0x8b8] sm:$0xff] }
 0x3f7   : > { %8606 = vmatmul.mubr.bf16.gmra.mxu1 %v13661_v3  ;;  %v12938_v53 = vpop.f32.mrf.mxu1  ;;  %8640 = vmatprep.subr.bf16.mxu0 %v9274_v52  ;;  %v12940_v50 = vpop.f32.mrf.mxu0  ;;  %v517_v30 = vld [vmem:[%s10663_s8 + $0x7b8] sm:$0xff] }
 0x3f8   : > { %8710 = vmatpush1.bf16.msra.mxu1 %v9545_v19  ;;  %8615 = vmatprep.mubr.bf16.mxu1 %v13663_v47  ;;  %v557_v19 = vld [vmem:[%s10663_s8 + $0x8f8] sm:$0xff]  ;;  %v9466_v47 = vcombine.high %v533_v23, %v541_v27 }
 0x3f9   : > { %8711 = vmatprep.subr.bf16.mxu1 %v9530_v38  ;;  %v12945_v48 = vpop.f32.mrf.mxu1  ;;  %v12950_v15 = vpop.f32.mrf.mxu0  ;;  %v13665_v38 = vld [vmem:[#allocation27_spill] sm:$0xff] }
 0x3fa   : > { %8641 = vmatpush1.bf16.msra.mxu0 %v9273_v4  ;;  %v781_v10 = vld [vmem:[%s10663_s8 + $0xff8] sm:$0xff] }
 0x3fb   : > { %v12952_v5 = vpop.f32.mrf.mxu1  ;;  %8642 = vmatprep.subr.bf16.mxu0 %v9258_v9  ;;  %v12954_v57 = vpop.f32.mrf.mxu0  ;;  %v9482_v9 = vcombine.high %v549_v14, %v557_v19 }
 0x3fc   : > { %8712 = vmatpush1.bf16.msra.mxu1 %v9529_v29  ;;  %v13666_v29 = vld [vmem:[#allocation28_spill] sm:$0xff] }
 0x3fd   : > { %8713 = vmatprep.subr.bf16.mxu1 %v9514_v60  ;;  %v12958_v7 = vpop.f32.mrf.mxu1  ;;  %8545 = vmatmul.mubr.bf16.gmra.mxu0 %v13664_v55  ;;  %v12963_v52 = vpop.f32.mrf.mxu0  ;;  %v277_v60 = vld [vmem:[%s10663_s8 + $0x38] sm:$0xff] }
 0x3fe   : > { %8643 = vmatpush1.bf16.msra.mxu0 %v9257_v2  ;;  %8554 = vmatprep.mubr.bf16.mxu0 %v13666_v29  ;;  %v285_v55 = vld [vmem:[%s10663_s8 + $0x78] sm:$0xff] }
 0x3ff   : > { %8616 = vmatmul.mubr.bf16.gmra.mxu1 %v13665_v38  ;;  %v12966_v16 = vpop.f32.mrf.mxu1  ;;  %8644 = vmatprep.subr.bf16.mxu0 %v9242_v43  ;;  %v12968_v4 = vpop.f32.mrf.mxu0  ;;  %v13667_v38 = vld [vmem:[#allocation29_spill] sm:$0xff]  ;;  %v9481_v43 = vcombine.low %v549_v14, %v557_v19  ;;  %v13669_v14 = vld [vmem:[#allocation31_spill] sm:$0xff]  ;;  %v9209_v19 = vcombine.low %v277_v60, %v285_v55 }
 0x400   : > { %8714 = vmatpush1.bf16.msra.mxu1 %v9513_v1  ;;  %8625 = vmatprep.mubr.bf16.mxu1 %v13667_v38  ;;  %v525_v38 = vld [vmem:[%s10663_s8 + $0x7f8] sm:$0xff] }
 0x401   : > { %8715 = vmatprep.subr.bf16.mxu1 %v9498_v54  ;;  %v12973_v2 = vpop.f32.mrf.mxu1  ;;  %v12978_v1 = vpop.f32.mrf.mxu0  ;;  %v9210_v54 = vcombine.high %v277_v60, %v285_v55  ;;  %v765_v55 = vld [vmem:[%s10663_s8 + $0xf78] sm:$0xff] }
 0x402   : > { %8645 = vmatpush1.bf16.msra.mxu0 %v9241_v6  ;;  %v773_v6 = vld [vmem:[%s10663_s8 + $0xfb8] sm:$0xff] }
 0x403   : > { %v12980_v39 = vpop.f32.mrf.mxu1  ;;  %8646 = vmatprep.subr.bf16.mxu0 %v9226_v24  ;;  %v12982_v29 = vpop.f32.mrf.mxu0  ;;  %v9465_v24 = vcombine.low %v533_v23, %v541_v27  ;;  %v9449_v23 = vcombine.low %v517_v30, %v525_v38 }
 0x404   : > { %8716 = vmatpush1.bf16.msra.mxu1 %v9497_v63 }
 0x405   : > { %8717 = vmatprep.subr.bf16.mxu1 %v9482_v9  ;;  %v12986_v3 = vpop.f32.mrf.mxu1  ;;  %8555 = vmatmul.mubr.bf16.gmra.mxu0 %v13668_v45  ;;  %v12991_v59 = vpop.f32.mrf.mxu0  ;;  %v9450_v9 = vcombine.high %v517_v30, %v525_v38  ;;  %v9706_v45 = vcombine.high %v773_v6, %v781_v10  ;;  %v9418_v38 = vcombine.high %v485_v28, %v493_v61 }
 0x406   : > { %8647 = vmatpush1.bf16.msra.mxu0 %v9225_v31  ;;  %8666 = vmatprep.mubr.bf16.mxu0 %v13671_v35  ;;  %v757_v31 = vld [vmem:[%s10663_s8 + $0xf38] sm:$0xff] }
 0x407   : > { %8626 = vmatmul.mubr.bf16.gmra.mxu1 %v13669_v14  ;;  %v12994_v63 = vpop.f32.mrf.mxu1  ;;  %8648 = vmatprep.subr.bf16.mxu0 %v9210_v54  ;;  %v12996_v37 = vpop.f32.mrf.mxu0  ;;  %v9434_v54 = vcombine.high %v501_v12, %v509_v58  ;;  %v9690_v35 = vcombine.high %v757_v31, %v765_v55  ;;  %v9689_v30 = vcombine.low %v757_v31, %v765_v55  ;;  %v453_v31 = vld [vmem:[%s10663_s8 + $0x5b8] sm:$0xff] }
 0x408   : > { %8718 = vmatpush1.bf16.msra.mxu1 %v9481_v43  ;;  %v13672_v43 = vld [vmem:[#allocation13_spill] sm:$0xff]  ;;  %v461_v55 = vld [vmem:[%s10663_s8 + $0x5f8] sm:$0xff] }
 0x409   : > { %8719 = vmatprep.subr.bf16.mxu1 %v9466_v47  ;;  %v13000_v20 = vpop.f32.mrf.mxu1  ;;  %v8134_v60 = vpop.f32.mrf.mxu0  ;;  %8737 = vmatprep.mubr.bf16.mxu1 %v13672_v43  ;;  %v9705_v47 = vcombine.low %v773_v6, %v781_v10  ;;  %v469_v6 = vld [vmem:[%s10663_s8 + $0x638] sm:$0xff] }
 0x40a   : > { %13670 = vst [vmem:[#allocation32_spill] sm:$0xff] %v13000_v20  ;;  %8649 = vmatpush1.bf16.msra.mxu0 %v9209_v19  ;;  %v741_v20 = vld [vmem:[%s10663_s8 + $0xeb8] sm:$0xff]  ;;  %v9433_v19 = vcombine.low %v501_v12, %v509_v58 }
 0x40b   : > { %v8205_v27 = vpop.f32.mrf.mxu1  ;;  %8650 = vmatprep.subr.bf16.mxu0 %v9450_v9  ;;  %v8135_v14 = vpop.f32.mrf.mxu0  ;;  %v477_v10 = vld [vmem:[%s10663_s8 + $0x678] sm:$0xff]  ;;  %v9417_v9 = vcombine.low %v485_v28, %v493_v61  ;;  %v9673_v43 = vcombine.low %v741_v20, %v749_v34  ;;  %v9386_v61 = vcombine.high %v453_v31, %v461_v55 }
 0x40c   : > { %8720 = vmatpush1.bf16.msra.mxu1 %v9465_v24  ;;  %v725_v14 = vld [vmem:[%s10663_s8 + $0xe38] sm:$0xff]  ;;  %v9402_v58 = vcombine.high %v469_v6, %v477_v10 }
 0x40d   : > { %8721 = vmatprep.subr.bf16.mxu1 %v9706_v45  ;;  %v8206_v60 = vpop.f32.mrf.mxu1  ;;  %v9674_v45 = vcombine.high %v741_v20, %v749_v34  ;;  %v733_v24 = vld [vmem:[%s10663_s8 + $0xe78] sm:$0xff] }
 0x40e   : > { %8651 = vmatpush2.bf16.msra.mxu0 %v9449_v23  ;;  %v9658_v12 = vcombine.high %v725_v14, %v733_v24  ;;  %v709_v23 = vld [vmem:[%s10663_s8 + $0xdb8] sm:$0xff] }
 0x40f   : > { %8652 = vmatprep.subr.bf16.mxu0 %v9434_v54  ;;  %v717_v27 = vld [vmem:[%s10663_s8 + $0xdf8] sm:$0xff]  ;;  %v9657_v54 = vcombine.low %v725_v14, %v733_v24 }
 0x410   : > { %8722 = vmatpush2.bf16.msra.mxu1 %v9705_v47  ;;  %v9401_v47 = vcombine.low %v469_v6, %v477_v10  ;;  %v9642_v34 = vcombine.high %v709_v23, %v717_v27  ;;  %v437_v28 = vld [vmem:[%s10663_s8 + $0x538] sm:$0xff] }
 0x411   : > { %8723 = vmatprep.subr.bf16.mxu1 %v9690_v35  ;;  %v445_v20 = vld [vmem:[%s10663_s8 + $0x578] sm:$0xff] }
 0x412   : > { %8653 = vmatpush2.bf16.msra.mxu0 %v9433_v19  ;;  %v693_v35 = vld [vmem:[%s10663_s8 + $0xd38] sm:$0xff]  ;;  %v9385_v19 = vcombine.low %v453_v31, %v461_v55 }
 0x413   : > { %8654 = vmatprep.subr.bf16.mxu0 %v9418_v38  ;;  %v701_v60 = vld [vmem:[%s10663_s8 + $0xd78] sm:$0xff]  ;;  %v9370_v38 = vcombine.high %v437_v28, %v445_v20 }
 0x414   : > { %8724 = vmatpush2.bf16.msra.mxu1 %v9689_v30  ;;  %v9641_v30 = vcombine.low %v709_v23, %v717_v27  ;;  %v421_v6 = vld [vmem:[%s10663_s8 + $0x4b8] sm:$0xff] }
 0x415   : > { %8725 = vmatprep.subr.bf16.mxu1 %v9674_v45  ;;  %v9626_v45 = vcombine.high %v693_v35, %v701_v60  ;;  %v429_v10 = vld [vmem:[%s10663_s8 + $0x4f8] sm:$0xff] }
 0x416   : > { %8655 = vmatpush2.bf16.msra.mxu0 %v9417_v9  ;;  %v677_v14 = vld [vmem:[%s10663_s8 + $0xcb8] sm:$0xff]  ;;  %v9369_v9 = vcombine.low %v437_v28, %v445_v20  ;;  %v13674_v28 = vsub.s32 2, %v11200_v17 }
 0x417   : > { %8656 = vmatprep.subr.bf16.mxu0 %v9402_v58  ;;  %v685_v24 = vld [vmem:[%s10663_s8 + $0xcf8] sm:$0xff]  ;;  %v9354_v58 = vcombine.high %v421_v6, %v429_v10 }
 0x418   : > { %8726 = vmatpush2.bf16.msra.mxu1 %v9673_v43  ;;  %v9625_v43 = vcombine.low %v693_v35, %v701_v60  ;;  %v405_v31 = vld [vmem:[%s10663_s8 + $0x438] sm:$0xff] }
 0x419   : > { %8727 = vmatprep.subr.bf16.mxu1 %v9658_v12  ;;  %v9610_v12 = vcombine.high %v677_v14, %v685_v24  ;;  %v413_v55 = vld [vmem:[%s10663_s8 + $0x478] sm:$0xff] }
 0x41a   : > { %8657 = vmatpush2.bf16.msra.mxu0 %v9401_v47  ;;  %v661_v23 = vld [vmem:[%s10663_s8 + $0xc38] sm:$0xff]  ;;  %v9353_v47 = vcombine.low %v421_v6, %v429_v10  ;;  %v9337_v10 = vcombine.low %v405_v31, %v413_v55 }
 0x41b   : > { %8658 = vmatprep.subr.bf16.mxu0 %v9386_v61  ;;  %v669_v27 = vld [vmem:[%s10663_s8 + $0xc78] sm:$0xff]  ;;  %v9338_v61 = vcombine.high %v405_v31, %v413_v55 }
 0x41c   : > { %8728 = vmatpush2.bf16.msra.mxu1 %v9657_v54  ;;  %v9609_v54 = vcombine.low %v677_v14, %v685_v24  ;;  %v9594_v35 = vcombine.high %v661_v23, %v669_v27  ;;  %v901_v60 = vld [vmem:[%s10663_s8 + $0x13b8] sm:$0xff]  ;;  %v9593_v14 = vcombine.low %v661_v23, %v669_v27 }
 0x41d   : > { %8729 = vmatprep.subr.bf16.mxu1 %v9642_v34  ;;  %v13031_v34 = vld [vmem:[%s11209_s27 + $0x8] sm:$0xff] }
 0x41e   : > { %8659 = vmatpush2.bf16.msra.mxu0 %v9385_v19  ;;  %13673 = vst [vmem:[#allocation12_spill] sm:$0xff] %v13031_v34  ;;  %v13036_v20 = vrot.slane %v13031_v34, %v13674_v28  ;;  %v909_v19 = vld [vmem:[%s10663_s8 + $0x13f8] sm:$0xff] }
 0x41f   : > { %8660 = vmatprep.subr.bf16.mxu0 %v9370_v38  ;;  %v1165_v38 = vld [vmem:[%s10663_s8 + $0x1bf8] sm:$0xff]  ;;  %v9834_v24 = vcombine.high %v901_v60, %v909_v19  ;;  %v9833_v55 = vcombine.low %v901_v60, %v909_v19 }
 0x420   : > { %8730 = vmatpush2.bf16.msra.mxu1 %v9641_v30  ;;  %v1157_v30 = vld [vmem:[%s10663_s8 + $0x1bb8] sm:$0xff]  ;;  %v8105_v23 = vadd.f32 %v12919_v0, %v13036_v20 }
 0x421   : > { %8731 = vmatprep.subr.bf16.mxu1 %v9626_v45  ;;  %v13675_v45 = vsub.s32 3, %v11200_v17  ;;  %v1141_v28 = vld [vmem:[%s10663_s8 + $0x1b38] sm:$0xff] }
 0x422   : > { %8661 = vmatpush2.bf16.msra.mxu0 %v9369_v9  ;;  %v8101_v9 = vadd.f32 %v12904_v40, %v13036_v20  ;;  %v10089_v40 = vcombine.low %v1157_v30, %v1165_v38 }
 0x423   : > { %8662 = vmatprep.subr.bf16.mxu0 %v9354_v58  ;;  %v13045_v6 = vrot.slane %v13031_v34, %v13675_v45  ;;  %v885_v58 = vld [vmem:[%s10663_s8 + $0x1338] sm:$0xff] }
 0x424   : > { %8732 = vmatpush2.bf16.msra.mxu1 %v9625_v43  ;;  %v10090_v43 = vcombine.high %v1157_v30, %v1165_v38  ;;  %v1149_v45 = vld [vmem:[%s10663_s8 + $0x1b78] sm:$0xff] }
 0x425   : > { %8733 = vmatprep.subr.bf16.mxu1 %v9610_v12  ;;  %v893_v12 = vld [vmem:[%s10663_s8 + $0x1378] sm:$0xff]  ;;  %v8103_v31 = vadd.f32 %v12912_v49, %v13045_v6  ;;  %v10073_v19 = vcombine.low %v1141_v28, %v1149_v45  ;;  %v8107_v38 = vadd.f32 %v12926_v44, %v13045_v6 }
 0x426   : > { %8663 = vmatpush2.bf16.msra.mxu0 %v9353_v47  ;;  %v9818_v27 = vcombine.high %v885_v58, %v893_v12  ;;  %v13058_v47 = vld [vmem:[%s10663_s8 + $0x12b8] sm:$0xff]  ;;  %v9817_v0 = vcombine.low %v885_v58, %v893_v12  ;;  %v8113_v12 = vadd.f32 %v12940_v50, %v13045_v6  ;;  %v8115_v50 = vadd.f32 %v12950_v15, %v13036_v20 }
 0x427   : > { %8664 = vmatprep.subr.bf16.mxu0 %v9338_v61  ;;  %v10074_v61 = vcombine.high %v1141_v28, %v1149_v45  ;;  %v13065_v34 = vld [vmem:[%s10663_s8 + $0x1ab8] sm:$0xff]  ;;  %v8174_v30 = vadd.f32 %v12914_v41, %v8103_v31 }
 0x428   : > { %8734 = vmatpush2.bf16.msra.mxu1 %v9609_v54  ;;  %v8172_v54 = vadd.f32 %v12909_v26, %v8101_v9  ;;  %v13068_v49 = vld [vmem:[%s10663_s8 + $0x1af8] sm:$0xff] }
 0x429   : > { %8735 = vmatprep.subr.bf16.mxu1 %v9594_v35  ;;  %v13062_v35 = vld [vmem:[%s10663_s8 + $0x12f8] sm:$0xff]  ;;  %v10058_v44 = vcombine.high %v13065_v34, %v13068_v49 }
 0x42a   : > { %8665 = vmatpush2.bf16.msra.mxu0 %v9337_v10  ;;  %v9802_v41 = vcombine.high %v13058_v47, %v13062_v35  ;;  %v13086_v58 = vld [vmem:[%s10663_s8 + $0x1278] sm:$0xff] }
 0x42b   : > { %8776 = vmatprep.subr.bf16.mxu0 %v9834_v24  ;;  %v8111_v24 = vadd.f32 %v12935_v13, %v13036_v20  ;;  %v13092_v45 = vld [vmem:[%s10663_s8 + $0x1a38] sm:$0xff]  ;;  %v8178_v13 = vadd.f32 %v12928_v51, %v8107_v38 }
 0x42c   : > { %8736 = vmatpush2.bf16.msra.mxu1 %v9593_v14  ;;  %v8176_v14 = vadd.f32 %v12924_v36, %v8105_v23  ;;  %v13083_v36 = vld [vmem:[%s10663_s8 + $0x1238] sm:$0xff] }
 0x42d   : > { %8847 = vmatprep.subr.bf16.mxu1 %v10090_v43  ;;  %v8242_v60 = vpop.f32.mrf.mxu0  ;;  %8667 = vmatmul.mubr.bf16.vlgmr.msra.gmra.mxu0 %v10760_v21  ;;  %v13095_v31 = vld [vmem:[%s10663_s8 + $0x1a78] sm:$0xff]  ;;  %v9786_v51 = vcombine.high %v13083_v36, %v13086_v58 }
 0x42e   : > { %v8243_v26 = vadd.f32 %v8242_v60, %v8172_v54  ;;  %8777 = vmatpush1.bf16.msra.mxu0 %v9833_v55  ;;  %8676 = vmatprep.mubr.bf16.mxu0 %v10769_v32  ;;  %v9801_v32 = vcombine.low %v13058_v47, %v13062_v35  ;;  %v13109_v54 = vld [vmem:[%s10663_s8 + $0x11b8] sm:$0xff]  ;;  %v10042_v15 = vcombine.high %v13092_v45, %v13095_v31 }
 0x42f   : > { %v8313_v10 = vpop.f32.mrf.mxu1  ;;  %8738 = vmatmul.mubr.bf16.vlgmr.msra.gmra.mxu1 %v10765_v25  ;;  %v8244_v21 = vpop.f32.mrf.mxu0  ;;  %8778 = vmatprep.subr.bf16.mxu0 %v9818_v27  ;;  %v10041_v38 = vcombine.low %v13092_v45, %v13095_v31 }
 0x430   : > { %8848 = vmatpush1.bf16.msra.mxu1 %v10089_v40  ;;  %v8314_v9 = vadd.f32 %v8313_v10, %v8243_v26  ;;  %v8245_v25 = vadd.f32 %v8244_v21, %v8174_v30  ;;  %8747 = vmatprep.mubr.bf16.mxu1 %v10774_v33  ;;  %v10057_v33 = vcombine.low %v13065_v34, %v13068_v49  ;;  %v13122_v34 = vld [vmem:[%s10663_s8 + $0x19f8] sm:$0xff] }
 0x431   : > { %v8315_v43 = vpop.f32.mrf.mxu1  ;;  %8849 = vmatprep.subr.bf16.mxu1 %v10074_v61  ;;  %v8246_v28 = vpop.f32.mrf.mxu0  ;;  %v8182_v61 = vadd.f32 %v12938_v53, %v8111_v24  ;;  %v8184_v49 = vadd.f32 %v12945_v48, %v8113_v12  ;;  %v9785_v53 = vcombine.low %v13083_v36, %v13086_v58  ;;  %v8117_v26 = vadd.f32 %v12954_v57, %v13045_v6  ;;  %v13152_v58 = vld [vmem:[%s10663_s8 + $0x1938] sm:$0xff] }
 0x432   : > { %8928 = vst [vmem:[%s11282_s17 + $0x50] sm:$0xff] %v8314_v9  ;;  %v8316_v55 = vadd.f32 %v8315_v43, %v8245_v25  ;;  %v8247_v23 = vadd.f32 %v8246_v28, %v8176_v14  ;;  %8779 = vmatpush1.bf16.msra.mxu0 %v9817_v0  ;;  %v13116_v0 = vld [vmem:[%s10663_s8 + $0x11f8] sm:$0xff]  ;;  %v8186_v21 = vadd.f32 %v12952_v5, %v8115_v50 }
 0x433   : > { %v8317_v40 = vpop.f32.mrf.mxu1  ;;  %v8248_v27 = vpop.f32.mrf.mxu0  ;;  %8780 = vmatprep.subr.bf16.mxu0 %v9802_v41  ;;  %v13143_v5 = vld [vmem:[%s10663_s8 + $0x1138] sm:$0xff]  ;;  %v8123_v43 = vadd.f32 %v12968_v4, %v13045_v6  ;;  %v8125_v4 = vadd.f32 %v12978_v1, %v13036_v20 }
 0x434   : > { %8850 = vmatpush1.bf16.msra.mxu1 %v10073_v19  ;;  %8929 = vst [vmem:[%s11282_s17 + $0x58] sm:$0xff] %v8316_v55  ;;  %v8318_v47 = vadd.f32 %v8317_v40, %v8247_v23  ;;  %v8249_v35 = vadd.f32 %v8248_v27, %v8178_v13  ;;  %v13119_v19 = vld [vmem:[%s10663_s8 + $0x19b8] sm:$0xff] }
 0x435   : > { %v8319_v60 = vpop.f32.mrf.mxu1  ;;  %8851 = vmatprep.subr.bf16.mxu1 %v10058_v44  ;;  %v8252_v30 = vpop.f32.mrf.mxu0  ;;  %8677 = vmatmul.mubr.bf16.gmra.mxu0 %v10782_v42  ;;  %v9770_v42 = vcombine.high %v13109_v54, %v13116_v0  ;;  %v10026_v57 = vcombine.high %v13119_v19, %v13122_v34  ;;  %v8121_v44 = vadd.f32 %v12963_v52, %v13036_v20  ;;  %v13146_v25 = vld [vmem:[%s10663_s8 + $0x1178] sm:$0xff] }
 0x436   : > { %8944 = vst [vmem:[%s11282_s17 + $0xd0] sm:$0xff] %v8318_v47  ;;  %v8320_v10 = vadd.f32 %v8319_v60, %v8249_v35  ;;  %v8253_v14 = vadd.f32 %v8252_v30, %v8182_v61  ;;  %8781 = vmatpush1.bf16.msra.mxu0 %v9801_v32  ;;  %8686 = vmatprep.mubr.bf16.mxu0 %v10789_v56  ;;  %v13155_v12 = vld [vmem:[%s10663_s8 + $0x1978] sm:$0xff] }
 0x437   : > { %v8323_v48 = vpop.f32.mrf.mxu1  ;;  %8748 = vmatmul.mubr.bf16.gmra.mxu1 %v10785_v46  ;;  %v8254_v41 = vpop.f32.mrf.mxu0  ;;  %8782 = vmatprep.subr.bf16.mxu0 %v9786_v51  ;;  %v8188_v52 = vadd.f32 %v12958_v7, %v8117_v26  ;;  %v9769_v56 = vcombine.low %v13109_v54, %v13116_v0  ;;  %v9754_v7 = vcombine.high %v13143_v5, %v13146_v25  ;;  %v13169_v55 = vld [vmem:[%s10663_s8 + $0x10b8] sm:$0xff] }
 0x438   : > { %8852 = vmatpush1.bf16.msra.mxu1 %v10057_v33  ;;  %8945 = vst [vmem:[%s11282_s17 + $0xd8] sm:$0xff] %v8320_v10  ;;  %v8255_v24 = vadd.f32 %v8254_v41, %v8184_v49  ;;  %v8324_v46 = vadd.f32 %v8323_v48, %v8253_v14  ;;  %8757 = vmatprep.mubr.bf16.mxu1 %v10794_v62  ;;  %v13176_v27 = vld [vmem:[%s10663_s8 + $0x10f8] sm:$0xff] }
 0x439   : > { %v8325_v9 = vpop.f32.mrf.mxu1  ;;  %8853 = vmatprep.subr.bf16.mxu1 %v10042_v15  ;;  %v8256_v36 = vpop.f32.mrf.mxu0  ;;  %v10025_v62 = vcombine.low %v13119_v19, %v13122_v34  ;;  %v8192_v23 = vadd.f32 %v12966_v16, %v8121_v44  ;;  %v10010_v1 = vcombine.high %v13152_v58, %v13155_v12  ;;  %v13179_v33 = vld [vmem:[%s10663_s8 + $0x18b8] sm:$0xff]  ;;  %v8194_v54 = vadd.f32 %v12973_v2, %v8123_v43 }
 0x43a   : > { %8960 = vst [vmem:[%s11282_s17 + $0x150] sm:$0xff] %v8324_v46  ;;  %v8257_v28 = vadd.f32 %v8256_v36, %v8186_v21  ;;  %v8326_v45 = vadd.f32 %v8325_v9, %v8255_v24  ;;  %8783 = vmatpush1.bf16.msra.mxu0 %v9785_v53  ;;  %v13182_v51 = vld [vmem:[%s10663_s8 + $0x18f8] sm:$0xff]  ;;  %v9753_v16 = vcombine.low %v13143_v5, %v13146_v25  ;;  %v13676_v36 = vld [vmem:[#allocation14_spill] sm:$0xff] }
 0x43b   : > { %v8327_v31 = vpop.f32.mrf.mxu1  ;;  %v8258_v13 = vpop.f32.mrf.mxu0  ;;  %8784 = vmatprep.subr.bf16.mxu0 %v9770_v42  ;;  %v10009_v47 = vcombine.low %v13152_v58, %v13155_v12  ;;  %v8127_v35 = vadd.f32 %v12982_v29, %v13045_v6  ;;  %v8196_v0 = vadd.f32 %v12980_v39, %v8125_v4  ;;  %v9994_v29 = vcombine.high %v13179_v33, %v13182_v51  ;;  %v789_v39 = vld [vmem:[%s10663_s8 + $0x1038] sm:$0xff]  ;;  %v13677_v58 = vld [vmem:[#allocation32_spill] sm:$0xff] }
 0x43c   : > { %8854 = vmatpush1.bf16.msra.mxu1 %v10041_v38  ;;  %8961 = vst [vmem:[%s11282_s17 + $0x158] sm:$0xff] %v8326_v45  ;;  %v8259_v40 = vadd.f32 %v8258_v13, %v8188_v52  ;;  %v8328_v32 = vadd.f32 %v8327_v31, %v8257_v28  ;;  %v8131_v34 = vadd.f32 %v12991_v59, %v13036_v20  ;;  %v797_v53 = vld [vmem:[%s10663_s8 + $0x1078] sm:$0xff] }
 0x43d   : > { %v8329_v50 = vpop.f32.mrf.mxu1  ;;  %8855 = vmatprep.subr.bf16.mxu1 %v10026_v57  ;;  %v8262_v61 = vpop.f32.mrf.mxu0  ;;  %8687 = vmatmul.mubr.bf16.gmra.mxu0 %v10802_v8  ;;  %v9738_v8 = vcombine.high %v13169_v55, %v13176_v27  ;;  %v9737_v26 = vcombine.low %v13169_v55, %v13176_v27  ;;  %v1045_v10 = vld [vmem:[%s10663_s8 + $0x1838] sm:$0xff]  ;;  %v8198_v59 = vadd.f32 %v12986_v3, %v8127_v35 }
 0x43e   : > { %8976 = vst [vmem:[%s11282_s17 + $0x1d0] sm:$0xff] %v8328_v32  ;;  %v8263_v60 = vadd.f32 %v8262_v61, %v8192_v23  ;;  %v8330_v15 = vadd.f32 %v8329_v50, %v8259_v40  ;;  %8785 = vmatpush1.bf16.msra.mxu0 %v9769_v56  ;;  %8696 = vmatprep.mubr.bf16.mxu0 %v10809_v18  ;;  %v1053_v14 = vld [vmem:[%s10663_s8 + $0x1878] sm:$0xff]  ;;  %v13679_v32 = vld [vmem:[#allocation16_spill] sm:$0xff] }
 0x43f   : > { %v8333_v2 = vpop.f32.mrf.mxu1  ;;  %8758 = vmatmul.mubr.bf16.gmra.mxu1 %v10805_v11  ;;  %v8264_v19 = vpop.f32.mrf.mxu0  ;;  %8786 = vmatprep.subr.bf16.mxu0 %v9754_v7  ;;  %v8133_v20 = vadd.f32 %v12996_v37, %v13045_v6  ;;  %v9722_v42 = vcombine.high %v789_v39, %v797_v53  ;;  %v8202_v3 = vadd.f32 %v12994_v63, %v8131_v34  ;;  %v1029_v24 = vld [vmem:[%s10663_s8 + $0x17b8] sm:$0xff] }
 0x440   : > { %8856 = vmatpush1.bf16.msra.mxu1 %v10025_v62  ;;  %8977 = vst [vmem:[%s11282_s17 + $0x1d8] sm:$0xff] %v8330_v15  ;;  %v8265_v49 = vadd.f32 %v8264_v19, %v8194_v54  ;;  %v8334_v11 = vadd.f32 %v8333_v2, %v8263_v60  ;;  %8767 = vmatprep.mubr.bf16.mxu1 %v10814_v22  ;;  %v1037_v46 = vld [vmem:[%s10663_s8 + $0x17f8] sm:$0xff] }
 0x441   : > { %v8335_v30 = vpop.f32.mrf.mxu1  ;;  %8857 = vmatprep.subr.bf16.mxu1 %v10010_v1  ;;  %v8266_v38 = vpop.f32.mrf.mxu0  ;;  %v9993_v22 = vcombine.low %v13179_v33, %v13182_v51  ;;  %v9978_v44 = vcombine.high %v1045_v10, %v1053_v14  ;;  %v9721_v5 = vcombine.low %v789_v39, %v797_v53  ;;  %v1285_v25 = vld [vmem:[%s10663_s8 + $0x1fb8] sm:$0xff]  ;;  %v8204_v12 = vadd.f32 %v13677_v58, %v8133_v20  ;;  %v13680_v33 = vld [vmem:[#allocation17_spill] sm:$0xff] }
 0x442   : > { %8992 = vst [vmem:[%s11282_s17 + $0x250] sm:$0xff] %v8334_v11  ;;  %v8267_v48 = vadd.f32 %v8266_v38, %v8196_v0  ;;  %v8336_v21 = vadd.f32 %v8335_v30, %v8265_v49  ;;  %8787 = vmatpush1.bf16.msra.mxu0 %v9753_v16  ;;  %v1293_v43 = vld [vmem:[%s10663_s8 + $0x1ff8] sm:$0xff]  ;;  %v9977_v56 = vcombine.low %v1045_v10, %v1053_v14 }
 0x443   : > { %v8337_v18 = vpop.f32.mrf.mxu1  ;;  %v8268_v41 = vpop.f32.mrf.mxu0  ;;  %8788 = vmatprep.subr.bf16.mxu0 %v9738_v8  ;;  %v13678_v45 = vld [vmem:[#allocation15_spill] sm:$0xff]  ;;  %v9962_v4 = vcombine.high %v1029_v24, %v1037_v46  ;;  %v10218_v55 = vcombine.high %v1285_v25, %v1293_v43  ;;  %v9961_v54 = vcombine.low %v1029_v24, %v1037_v46  ;;  %v10217_v16 = vcombine.low %v1285_v25, %v1293_v43 }
 0x444   : > { %8858 = vmatpush1.bf16.msra.mxu1 %v10009_v47  ;;  %8993 = vst [vmem:[%s11282_s17 + $0x258] sm:$0xff] %v8336_v21  ;;  %v8269_v37 = vadd.f32 %v8268_v41, %v8198_v59  ;;  %v8338_v6 = vadd.f32 %v8337_v18, %v8267_v48  ;;  %v1013_v23 = vld [vmem:[%s10663_s8 + $0x1738] sm:$0xff] }
 0x445   : > { %v8339_v57 = vpop.f32.mrf.mxu1  ;;  %8859 = vmatprep.subr.bf16.mxu1 %v9994_v29  ;;  %v8272_v9 = vpop.f32.mrf.mxu0  ;;  %8697 = vmatmul.mubr.bf16.gmra.mxu0 %v13676_v36  ;;  %v1021_v40 = vld [vmem:[%s10663_s8 + $0x1778] sm:$0xff] }
 0x446   : > { %9008 = vst [vmem:[%s11282_s17 + $0x2d0] sm:$0xff] %v8338_v6  ;;  %v8273_v52 = vadd.f32 %v8272_v9, %v8202_v3  ;;  %v8340_v63 = vadd.f32 %v8339_v57, %v8269_v37  ;;  %8789 = vmatpush1.bf16.msra.mxu0 %v9737_v26  ;;  %8808 = vmatprep.mubr.bf16.mxu0 %v13679_v32  ;;  %v1269_v50 = vld [vmem:[%s10663_s8 + $0x1f38] sm:$0xff] }
 0x447   : > { %v8343_v28 = vpop.f32.mrf.mxu1  ;;  %8768 = vmatmul.mubr.bf16.gmra.mxu1 %v13678_v45  ;;  %v8274_v31 = vpop.f32.mrf.mxu0  ;;  %8790 = vmatprep.subr.bf16.mxu0 %v9722_v42  ;;  %v1277_v1 = vld [vmem:[%s10663_s8 + $0x1f78] sm:$0xff]  ;;  %v9946_v47 = vcombine.high %v1013_v23, %v1021_v40  ;;  %v9945_v29 = vcombine.low %v1013_v23, %v1021_v40 }
 0x448   : > { %8860 = vmatpush1.bf16.msra.mxu1 %v9993_v22  ;;  %9009 = vst [vmem:[%s11282_s17 + $0x2d8] sm:$0xff] %v8340_v63  ;;  %v8275_v13 = vadd.f32 %v8274_v31, %v8204_v12  ;;  %v8344_v62 = vadd.f32 %v8343_v28, %v8273_v52  ;;  %8879 = vmatprep.mubr.bf16.mxu1 %v13680_v33  ;;  %v997_v15 = vld [vmem:[%s10663_s8 + $0x16b8] sm:$0xff]  ;;  %v13683_v33 = vld [vmem:[#allocation20_spill] sm:$0xff] }
 0x449   : > { %v8345_v7 = vpop.f32.mrf.mxu1  ;;  %8861 = vmatprep.subr.bf16.mxu1 %v9978_v44  ;;  %v8276_v27 = vpop.f32.mrf.mxu0  ;;  %v10202_v60 = vcombine.high %v1269_v50, %v1277_v1  ;;  %v1005_v2 = vld [vmem:[%s10663_s8 + $0x16f8] sm:$0xff]  ;;  %v10201_v34 = vcombine.low %v1269_v50, %v1277_v1  ;;  %v13681_v50 = vld [vmem:[#allocation18_spill] sm:$0xff] }
 0x44a   : > { %9024 = vst [vmem:[%s11282_s17 + $0x350] sm:$0x1] %v8344_v62  ;;  %v8346_v51 = vadd.f32 %v8345_v7, %v8275_v13  ;;  %8791 = vmatpush1.bf16.msra.mxu0 %v9721_v5  ;;  %v1253_v19 = vld [vmem:[%s10663_s8 + $0x1eb8] sm:$0xff]  ;;  %v9930_v49 = vcombine.high %v997_v15, %v1005_v2  ;;  %v9929_v26 = vcombine.low %v997_v15, %v1005_v2  ;;  %v13685_v15 = vld [vmem:[#allocation22_spill] sm:$0xff] }
 0x44b   : > { %v8347_v61 = vpop.f32.mrf.mxu1  ;;  %8792 = vmatprep.subr.bf16.mxu0 %v9962_v4  ;;  %v8277_v35 = vpop.f32.mrf.mxu0  ;;  %v1261_v8 = vld [vmem:[%s10663_s8 + $0x1ef8] sm:$0xff] }
 0x44c   : > { %8862 = vmatpush1.bf16.msra.mxu1 %v9977_v56  ;;  %9025 = vst [vmem:[%s11282_s17 + $0x358] sm:$0x1] %v8346_v51  ;;  %v10186_v11 = vcombine.high %v1253_v19, %v1261_v8  ;;  %v981_v30 = vld [vmem:[%s10663_s8 + $0x1638] sm:$0xff]  ;;  %v10185_v10 = vcombine.low %v1253_v19, %v1261_v8  ;;  %v13687_v19 = vld [vmem:[#allocation24_spill] sm:$0xff] }
 0x44d   : > { %8863 = vmatprep.subr.bf16.mxu1 %v10218_v55  ;;  %v8348_v0 = vpop.f32.mrf.mxu1  ;;  %v989_v39 = vld [vmem:[%s10663_s8 + $0x1678] sm:$0xff] }
 0x44e   : > { %8793 = vmatpush2.bf16.msra.mxu0 %v9961_v54  ;;  %v1237_v53 = vld [vmem:[%s10663_s8 + $0x1e38] sm:$0xff]  ;;  %v9914_v14 = vcombine.high %v981_v30, %v989_v39  ;;  %v9913_v41 = vcombine.low %v981_v30, %v989_v39  ;;  %v13684_v54 = vld [vmem:[#allocation21_spill] sm:$0xff] }
 0x44f   : > { %8794 = vmatprep.subr.bf16.mxu0 %v9946_v47  ;;  %v1245_v38 = vld [vmem:[%s10663_s8 + $0x1e78] sm:$0xff] }
 0x450   : > { %8864 = vmatpush2.bf16.msra.mxu1 %v10217_v16  ;;  %v10170_v59 = vcombine.high %v1237_v53, %v1245_v38  ;;  %v965_v20 = vld [vmem:[%s10663_s8 + $0x15b8] sm:$0xff]  ;;  %v10169_v22 = vcombine.low %v1237_v53, %v1245_v38  ;;  %v13689_v38 = vld [vmem:[#allocation26_spill] sm:$0xff] }
 0x451   : > { %8865 = vmatprep.subr.bf16.mxu1 %v10202_v60  ;;  %v973_v48 = vld [vmem:[%s10663_s8 + $0x15f8] sm:$0xff] }
 0x452   : > { %8795 = vmatpush2.bf16.msra.mxu0 %v9945_v29  ;;  %v1221_v21 = vld [vmem:[%s10663_s8 + $0x1db8] sm:$0xff]  ;;  %v9898_v42 = vcombine.high %v965_v20, %v973_v48  ;;  %v9897_v24 = vcombine.low %v965_v20, %v973_v48  ;;  %v13688_v29 = vld [vmem:[#allocation25_spill] sm:$0xff] }
 0x453   : > { %8796 = vmatprep.subr.bf16.mxu0 %v9930_v49  ;;  %v1229_v18 = vld [vmem:[%s10663_s8 + $0x1df8] sm:$0xff]  ;;  %v13692_v20 = vld [vmem:[#allocation29_spill] sm:$0xff] }
 0x454   : > { %8866 = vmatpush2.bf16.msra.mxu1 %v10201_v34  ;;  %v10154_v3 = vcombine.high %v1221_v21, %v1229_v18  ;;  %v949_v37 = vld [vmem:[%s10663_s8 + $0x1538] sm:$0xff]  ;;  %v10153_v46 = vcombine.low %v1221_v21, %v1229_v18 }
 0x455   : > { %8867 = vmatprep.subr.bf16.mxu1 %v10186_v11  ;;  %v957_v6 = vld [vmem:[%s10663_s8 + $0x1578] sm:$0xff] }
 0x456   : > { %8797 = vmatpush2.bf16.msra.mxu0 %v9929_v26  ;;  %v1205_v57 = vld [vmem:[%s10663_s8 + $0x1d38] sm:$0xff]  ;;  %v9882_v9 = vcombine.high %v949_v37, %v957_v6  ;;  %v9881_v12 = vcombine.low %v949_v37, %v957_v6 }
 0x457   : > { %8798 = vmatprep.subr.bf16.mxu0 %v9914_v14  ;;  %v1213_v44 = vld [vmem:[%s10663_s8 + $0x1d78] sm:$0xff]  ;;  %v13691_v14 = vld [vmem:[#allocation28_spill] sm:$0xff] }
 0x458   : > { %8868 = vmatpush2.bf16.msra.mxu1 %v10185_v10  ;;  %v10138_v5 = vcombine.high %v1205_v57, %v1213_v44  ;;  %v933_v25 = vld [vmem:[%s10663_s8 + $0x14b8] sm:$0xff]  ;;  %v10137_v52 = vcombine.low %v1205_v57, %v1213_v44 }
 0x459   : > { %8869 = vmatprep.subr.bf16.mxu1 %v10170_v59  ;;  %v941_v43 = vld [vmem:[%s10663_s8 + $0x14f8] sm:$0xff] }
 0x45a   : > { %8799 = vmatpush2.bf16.msra.mxu0 %v9913_v41  ;;  %v1189_v36 = vld [vmem:[%s10663_s8 + $0x1cb8] sm:$0xff]  ;;  %v9866_v63 = vcombine.high %v933_v25, %v941_v43  ;;  %v9865_v13 = vcombine.low %v933_v25, %v941_v43  ;;  %v13695_v43 = vsub.s32 4, %v11200_v17 }
 0x45b   : > { %8800 = vmatprep.subr.bf16.mxu0 %v9898_v42  ;;  %v1197_v58 = vld [vmem:[%s10663_s8 + $0x1cf8] sm:$0xff] }
 0x45c   : > { %8870 = vmatpush2.bf16.msra.mxu1 %v10169_v22  ;;  %v10122_v28 = vcombine.high %v1189_v36, %v1197_v58  ;;  %v917_v45 = vld [vmem:[%s10663_s8 + $0x1438] sm:$0xff]  ;;  %v10121_v62 = vcombine.low %v1189_v36, %v1197_v58  ;;  %v13696_v36 = vld [vmem:[#allocation12_spill] sm:$0xff] }
 0x45d   : > { %8871 = vmatprep.subr.bf16.mxu1 %v10154_v3  ;;  %v925_v31 = vld [vmem:[%s10663_s8 + $0x1478] sm:$0xff]  ;;  %v13693_v3 = vld [vmem:[#allocation30_spill] sm:$0xff]  ;;  %v13302_v58 = vrot.slane %v13696_v36, %v13695_v43 }
 0x45e   : > { %8801 = vmatpush2.bf16.msra.mxu0 %v9897_v24  ;;  %v1173_v56 = vld [vmem:[%s10663_s8 + $0x1c38] sm:$0xff]  ;;  %v9850_v7 = vcombine.high %v917_v45, %v925_v31  ;;  %v9849_v23 = vcombine.low %v917_v45, %v925_v31 }
 0x45f   : > { %8802 = vmatprep.subr.bf16.mxu0 %v9882_v9  ;;  %v1181_v4 = vld [vmem:[%s10663_s8 + $0x1c78] sm:$0xff] }
 0x460   : > { %8872 = vmatpush2.bf16.msra.mxu1 %v10153_v46  ;;  %v10106_v55 = vcombine.high %v1173_v56, %v1181_v4  ;;  %v10105_v40 = vcombine.low %v1173_v56, %v1181_v4  ;;  %v13682_v27 = vld [vmem:[#allocation19_spill] sm:$0xff] }
 0x461   : > { %8873 = vmatprep.subr.bf16.mxu1 %v10138_v5  ;;  %v13686_v0 = vld [vmem:[#allocation23_spill] sm:$0xff] }
 0x462   : > { %8803 = vmatpush2.bf16.msra.mxu0 %v9881_v12  ;;  %v13690_v10 = vld [vmem:[#allocation27_spill] sm:$0xff]  ;;  %v13697_v12 = vsub.s32 5, %v11200_v17 }
 0x463   : > { %8804 = vmatprep.subr.bf16.mxu0 %v9866_v63  ;;  %v13694_v6 = vld [vmem:[#allocation31_spill] sm:$0xff] }
 0x464   : > { %8874 = vmatpush2.bf16.msra.mxu1 %v10137_v52  ;;  %v13307_v52 = vrot.slane %v13696_v36, %v13697_v12 }
 0x465   : > { %8875 = vmatprep.subr.bf16.mxu1 %v10122_v28 }
 0x466   : > { %8805 = vmatpush2.bf16.msra.mxu0 %v9865_v13 }
 0x467   : > { %8806 = vmatprep.subr.bf16.mxu0 %v9850_v7 }
 0x468   : > { %8876 = vmatpush2.bf16.msra.mxu1 %v10121_v62 }
 0x469   : > { %8877 = vmatprep.subr.bf16.mxu1 %v10106_v55 }
 0x46a   : > { %8807 = vmatpush2.bf16.msra.mxu0 %v9849_v23 }
 0x46c   : > { %8878 = vmatpush2.bf16.msra.mxu1 %v10105_v40 }
 0x46d   : > { %v8384_v32 = vpop.f32.mrf.mxu0  ;;  %8809 = vmatmul.mubr.bf16.vlgmr.msra.gmra.mxu0 %v13681_v50 }
 0x46e   : > { %8818 = vmatprep.mubr.bf16.mxu0 %v13683_v33  ;;  %v8385_v63 = vadd.f32 %v8384_v32, %v13302_v58 }
 0x46f   : > { %v8455_v1 = vpop.f32.mrf.mxu1  ;;  %8880 = vmatmul.mubr.bf16.vlgmr.msra.gmra.mxu1 %v13682_v27  ;;  %v8386_v51 = vpop.f32.mrf.mxu0 }
 0x470   : > { %8889 = vmatprep.mubr.bf16.mxu1 %v13684_v54  ;;  %v8387_v28 = vadd.f32 %v8386_v51, %v13307_v52  ;;  %v8456_v45 = vadd.f32 %v8455_v1, %v8385_v63 }
 0x471   : > { %v8457_v61 = vpop.f32.mrf.mxu1  ;;  %v8388_v16 = vpop.f32.mrf.mxu0 }
 0x472   : > { %v8389_v31 = vadd.f32 %v8388_v16, %v13302_v58  ;;  %v8458_v4 = vadd.f32 %v8457_v61, %v8387_v28 }
 0x473   : > { %v8459_v47 = vpop.f32.mrf.mxu1  ;;  %v8390_v35 = vpop.f32.mrf.mxu0 }
 0x474   : > { %v8391_v13 = vadd.f32 %v8390_v35, %v13307_v52  ;;  %v8460_v23 = vadd.f32 %v8459_v47, %v8389_v31 }
 0x475   : > { %v8461_v60 = vpop.f32.mrf.mxu1  ;;  %8819 = vmatmul.mubr.bf16.gmra.mxu0 %v13685_v15  ;;  %v8394_v2 = vpop.f32.mrf.mxu0 }
 0x476   : > { %8828 = vmatprep.mubr.bf16.mxu0 %v13687_v19  ;;  %v8395_v40 = vadd.f32 %v8394_v2, %v13302_v58  ;;  %v8462_v51 = vadd.f32 %v8461_v60, %v8391_v13 }
 0x477   : > { %8890 = vmatmul.mubr.bf16.gmra.mxu1 %v13686_v0  ;;  %v8465_v8 = vpop.f32.mrf.mxu1  ;;  %v8396_v34 = vpop.f32.mrf.mxu0 }
 0x478   : > { %8899 = vmatprep.mubr.bf16.mxu1 %v13688_v29  ;;  %v8397_v1 = vadd.f32 %v8396_v34, %v13307_v52  ;;  %v8466_v15 = vadd.f32 %v8465_v8, %v8395_v40 }
 0x479   : > { %v8467_v49 = vpop.f32.mrf.mxu1  ;;  %v8398_v11 = vpop.f32.mrf.mxu0 }
 0x47a   : > { %v8399_v0 = vadd.f32 %v8398_v11, %v13302_v58 }
 0x47b   : > { %v13267_v30 = vpop.f32.mrf.mxu1  ;;  %v8400_v39 = vpop.f32.mrf.mxu0 }
 0x47c   : > { %v8401_v60 = vadd.f32 %v8400_v39, %v13307_v52 }
 0x47d   : > { %v13269_v53 = vpop.f32.mrf.mxu1  ;;  %8829 = vmatmul.mubr.bf16.gmra.mxu0 %v13689_v38  ;;  %v8404_v26 = vpop.f32.mrf.mxu0  ;;  %v8468_v38 = vadd.f32 %v8467_v49, %v8397_v1 }
 0x47e   : > { %8838 = vmatprep.mubr.bf16.mxu0 %v13691_v14  ;;  %v8405_v8 = vadd.f32 %v8404_v26, %v13302_v58  ;;  %v8472_v49 = vadd.f32 %v13269_v53, %v8401_v60 }
 0x47f   : > { %8900 = vmatmul.mubr.bf16.gmra.mxu1 %v13690_v10  ;;  %v13274_v59 = vpop.f32.mrf.mxu1  ;;  %v13277_v48 = vpop.f32.mrf.mxu0 }
 0x480   : > { %8909 = vmatprep.mubr.bf16.mxu1 %v13692_v20  ;;  %v8407_v39 = vadd.f32 %v13277_v48, %v13307_v52 }
 0x481   : > { %v13279_v21 = vpop.f32.mrf.mxu1  ;;  %v13281_v18 = vpop.f32.mrf.mxu0 }
 0x482   : > { %v8409_v26 = vadd.f32 %v13281_v18, %v13302_v58  ;;  %v8478_v31 = vadd.f32 %v13279_v21, %v8407_v39 }
 0x483   : > { %v13283_v41 = vpop.f32.mrf.mxu1  ;;  %v13285_v22 = vpop.f32.mrf.mxu0 }
 0x484   : > { %v8411_v48 = vadd.f32 %v13285_v22, %v13307_v52 }
 0x485   : > { %v13287_v42 = vpop.f32.mrf.mxu1  ;;  %8839 = vmatmul.mubr.bf16.gmra.mxu0 %v13693_v3  ;;  %v13290_v37 = vpop.f32.mrf.mxu0  ;;  %v8470_v3 = vadd.f32 %v13267_v30, %v8399_v0  ;;  %v8476_v30 = vadd.f32 %v13274_v59, %v8405_v8 }
 0x486   : > { %v8415_v18 = vadd.f32 %v13290_v37, %v13302_v58  ;;  %v8482_v40 = vadd.f32 %v13287_v42, %v8411_v48 }
 0x487   : > { %8910 = vmatmul.mubr.bf16.gmra.mxu1 %v13694_v6  ;;  %v13293_v57 = vpop.f32.mrf.mxu1  ;;  %v13295_v44 = vpop.f32.mrf.mxu0 }
 0x488   : > { %v8417_v22 = vadd.f32 %v13295_v44, %v13307_v52 }
 0x489   : > { %v13297_v24 = vpop.f32.mrf.mxu1  ;;  %v8418_v46 = vpop.f32.mrf.mxu0 }
 0x48a   : > { %v8488_v42 = vadd.f32 %v13297_v24, %v8417_v22 }
 0x48b   : > { %v8489_v9 = vpop.f32.mrf.mxu1  ;;  %v8419_v5 = vpop.f32.mrf.mxu0 }
 0x48d   : > { %v8490_v25 = vpop.f32.mrf.mxu1 }
 0x4ad   : > { %v8526_v56 = vpop.f32.mrf.mxu0 }
 0x4ae   : > { %v8527_v62 = vadd.f32 %v8526_v56, %v8456_v45 }
 0x4af   : > { %v8597_v7 = vpop.f32.mrf.mxu1  ;;  %v8528_v55 = vpop.f32.mrf.mxu0 }
 0x4b0   : > { %v8598_v50 = vadd.f32 %v8597_v7, %v8527_v62  ;;  %v8529_v27 = vadd.f32 %v8528_v55, %v8458_v4  ;;  %v8480_v62 = vadd.f32 %v13283_v41, %v8409_v26 }
 0x4b1   : > { %v8599_v32 = vpop.f32.mrf.mxu1  ;;  %v8530_v33 = vpop.f32.mrf.mxu0 }
 0x4b2   : > { %8930 = vst [vmem:[%s11282_s17 + $0x60] sm:$0xff] %v8598_v50  ;;  %v8600_v54 = vadd.f32 %v8599_v32, %v8529_v27  ;;  %v8531_v61 = vadd.f32 %v8530_v33, %v8460_v23  ;;  %v8486_v33 = vadd.f32 %v13293_v57, %v8415_v18 }
 0x4b3   : > { %v8601_v16 = vpop.f32.mrf.mxu1  ;;  %v8532_v35 = vpop.f32.mrf.mxu0 }
 0x4b4   : > { %8931 = vst [vmem:[%s11282_s17 + $0x68] sm:$0xff] %v8600_v54  ;;  %v8602_v47 = vadd.f32 %v8601_v16, %v8531_v61  ;;  %v8533_v2 = vadd.f32 %v8532_v35, %v8462_v51 }
 0x4b5   : > { %v8603_v19 = vpop.f32.mrf.mxu1  ;;  %v8536_v29 = vpop.f32.mrf.mxu0 }
 0x4b6   : > { %8946 = vst [vmem:[%s11282_s17 + $0xe0] sm:$0xff] %v8602_v47  ;;  %v8604_v34 = vadd.f32 %v8603_v19, %v8533_v2  ;;  %v8537_v10 = vadd.f32 %v8536_v29, %v8466_v15 }
 0x4b7   : > { %v8607_v14 = vpop.f32.mrf.mxu1  ;;  %v8538_v20 = vpop.f32.mrf.mxu0 }
 0x4b8   : > { %8947 = vst [vmem:[%s11282_s17 + $0xe8] sm:$0xff] %v8604_v34  ;;  %v8539_v11 = vadd.f32 %v8538_v20, %v8468_v38  ;;  %v8608_v6 = vadd.f32 %v8607_v14, %v8537_v10 }
 0x4b9   : > { %v8609_v46 = vpop.f32.mrf.mxu1  ;;  %v8540_v9 = vpop.f32.mrf.mxu0 }
 0x4ba   : > { %8962 = vst [vmem:[%s11282_s17 + $0x160] sm:$0xff] %v8608_v6  ;;  %v8541_v5 = vadd.f32 %v8540_v9, %v8470_v3  ;;  %v8610_v25 = vadd.f32 %v8609_v46, %v8539_v11 }
 0x4bb   : > { %v8611_v43 = vpop.f32.mrf.mxu1  ;;  %v8542_v12 = vpop.f32.mrf.mxu0 }
 0x4bc   : > { %8963 = vst [vmem:[%s11282_s17 + $0x168] sm:$0xff] %v8610_v25  ;;  %v8543_v63 = vadd.f32 %v8542_v12, %v8472_v49  ;;  %v8612_v28 = vadd.f32 %v8611_v43, %v8541_v5 }
 0x4bd   : > { %v8613_v45 = vpop.f32.mrf.mxu1  ;;  %v8546_v53 = vpop.f32.mrf.mxu0 }
 0x4be   : > { %8978 = vst [vmem:[%s11282_s17 + $0x1e0] sm:$0xff] %v8612_v28  ;;  %v8547_v56 = vadd.f32 %v8546_v53, %v8476_v30  ;;  %v8614_v4 = vadd.f32 %v8613_v45, %v8543_v63 }
 0x4bf   : > { %v8617_v13 = vpop.f32.mrf.mxu1  ;;  %v8548_v59 = vpop.f32.mrf.mxu0 }
 0x4c0   : > { %8979 = vst [vmem:[%s11282_s17 + $0x1e8] sm:$0xff] %v8614_v4  ;;  %v8549_v7 = vadd.f32 %v8548_v59, %v8478_v31  ;;  %v8618_v55 = vadd.f32 %v8617_v13, %v8547_v56 }
 0x4c1   : > { %v8619_v23 = vpop.f32.mrf.mxu1  ;;  %v8550_v21 = vpop.f32.mrf.mxu0 }
 0x4c2   : > { %8994 = vst [vmem:[%s11282_s17 + $0x260] sm:$0xff] %v8618_v55  ;;  %v8551_v50 = vadd.f32 %v8550_v21, %v8480_v62  ;;  %v8620_v27 = vadd.f32 %v8619_v23, %v8549_v7  ;;  %v13698_v62 = vsub.s32 6, %v11200_v17  ;;  %v13699_v7 = vsub.s32 7, %v11200_v17 }
 0x4c3   : > { %v8621_v32 = vpop.f32.mrf.mxu1  ;;  %v8552_v41 = vpop.f32.mrf.mxu0 }
 0x4c4   : > { %8995 = vst [vmem:[%s11282_s17 + $0x268] sm:$0xff] %v8620_v27  ;;  %v8553_v37 = vadd.f32 %v8552_v41, %v8482_v40  ;;  %v8622_v58 = vadd.f32 %v8621_v32, %v8551_v50  ;;  %v13375_v18 = vrot.slane %v13696_v36, %v13698_v62  ;;  %v13380_v55 = vrot.slane %v13696_v36, %v13699_v7 }
 0x4c5   : > { %v8623_v51 = vpop.f32.mrf.mxu1  ;;  %v8556_v1 = vpop.f32.mrf.mxu0 }
 0x4c6   : > { %9010 = vst [vmem:[%s11282_s17 + $0x2e0] sm:$0xff] %v8622_v58  ;;  %v8557_v54 = vadd.f32 %v8556_v1, %v8486_v33  ;;  %v8624_v44 = vadd.f32 %v8623_v51, %v8553_v37 }
 0x4c7   : > { %v8627_v52 = vpop.f32.mrf.mxu1  ;;  %v8558_v61 = vpop.f32.mrf.mxu0 }
 0x4c8   : > { %9011 = vst [vmem:[%s11282_s17 + $0x2e8] sm:$0xff] %v8624_v44  ;;  %v8559_v16 = vadd.f32 %v8558_v61, %v8488_v42  ;;  %v8628_v35 = vadd.f32 %v8627_v52, %v8557_v54 }
 0x4c9   : > { %v8629_v15 = vpop.f32.mrf.mxu1  ;;  %v8560_v0 = vpop.f32.mrf.mxu0 }
 0x4ca   : > { %9026 = vst [vmem:[%s11282_s17 + $0x360] sm:$0x1] %v8628_v35  ;;  %v8630_v57 = vadd.f32 %v8629_v15, %v8559_v16 }
 0x4cb   : > { %v8631_v47 = vpop.f32.mrf.mxu1  ;;  %v8561_v2 = vpop.f32.mrf.mxu0 }
 0x4cc   : > { %9027 = vst [vmem:[%s11282_s17 + $0x368] sm:$0x1] %v8630_v57 }
 0x4cd   : > { %v8632_v19 = vpop.f32.mrf.mxu1 }
 0x4ed   : > { %v8668_v29 = vpop.f32.mrf.mxu0 }
 0x4ee   : > { %v8669_v23 = vadd.f32 %v8668_v29, %v13375_v18 }
 0x4ef   : > { %v8739_v38 = vpop.f32.mrf.mxu1  ;;  %v8670_v60 = vpop.f32.mrf.mxu0 }
 0x4f0   : > { %v8671_v21 = vadd.f32 %v8670_v60, %v13380_v55  ;;  %v8740_v40 = vadd.f32 %v8739_v38, %v8669_v23 }
 0x4f1   : > { %v8741_v24 = vpop.f32.mrf.mxu1  ;;  %v8672_v34 = vpop.f32.mrf.mxu0 }
 0x4f2   : > { %v8673_v22 = vadd.f32 %v8672_v34, %v13375_v18  ;;  %v8742_v27 = vadd.f32 %v8741_v24, %v8671_v21 }
 0x4f3   : > { %v8743_v10 = vpop.f32.mrf.mxu1  ;;  %v8674_v14 = vpop.f32.mrf.mxu0 }
 0x4f4   : > { %v8675_v32 = vadd.f32 %v8674_v14, %v13380_v55  ;;  %v8744_v17 = vadd.f32 %v8743_v10, %v8673_v22 }
 0x4f5   : > { %v8745_v20 = vpop.f32.mrf.mxu1  ;;  %v8678_v3 = vpop.f32.mrf.mxu0 }
 0x4f6   : > { %v8679_v36 = vadd.f32 %v8678_v3, %v13375_v18  ;;  %v8746_v54 = vadd.f32 %v8745_v20, %v8675_v32 }
 0x4f7   : > { %v8749_v8 = vpop.f32.mrf.mxu1  ;;  %v8680_v11 = vpop.f32.mrf.mxu0 }
 0x4f8   : > { %v8681_v44 = vadd.f32 %v8680_v11, %v13380_v55  ;;  %v8750_v15 = vadd.f32 %v8749_v8, %v8679_v36 }
 0x4f9   : > { %v8751_v6 = vpop.f32.mrf.mxu1  ;;  %v8682_v46 = vpop.f32.mrf.mxu0 }
 0x4fa   : > { %v8683_v0 = vadd.f32 %v8682_v46, %v13375_v18  ;;  %v8752_v29 = vadd.f32 %v8751_v6, %v8681_v44 }
 0x4fb   : > { %v8753_v9 = vpop.f32.mrf.mxu1  ;;  %v8684_v49 = vpop.f32.mrf.mxu0 }
 0x4fc   : > { %v8685_v38 = vadd.f32 %v8684_v49, %v13380_v55  ;;  %v8754_v14 = vadd.f32 %v8753_v9, %v8683_v0 }
 0x4fd   : > { %v13350_v39 = vpop.f32.mrf.mxu1  ;;  %v8688_v5 = vpop.f32.mrf.mxu0 }
 0x4fe   : > { %v8689_v20 = vadd.f32 %v8688_v5, %v13375_v18 }
 0x4ff   : > { %v13352_v25 = vpop.f32.mrf.mxu1  ;;  %v8690_v43 = vpop.f32.mrf.mxu0 }
 0x500   : > { %v8691_v6 = vadd.f32 %v8690_v43, %v13380_v55  ;;  %v8760_v9 = vadd.f32 %v13352_v25, %v8689_v20 }
 0x501   : > { %v13354_v12 = vpop.f32.mrf.mxu1  ;;  %v13356_v30 = vpop.f32.mrf.mxu0 }
 0x502   : > { %v8693_v5 = vadd.f32 %v13356_v30, %v13375_v18 }
 0x503   : > { %v13358_v26 = vpop.f32.mrf.mxu1  ;;  %v13360_v63 = vpop.f32.mrf.mxu0 }
 0x504   : > { %v8695_v43 = vadd.f32 %v13360_v63, %v13380_v55 }
 0x505   : > { %v13362_v28 = vpop.f32.mrf.mxu1  ;;  %v13364_v45 = vpop.f32.mrf.mxu0 }
 0x506   : > { %v8699_v30 = vadd.f32 %v13364_v45, %v13375_v18  ;;  %v8766_v63 = vadd.f32 %v13362_v28, %v8695_v43 }
 0x507   : > { %v13366_v53 = vpop.f32.mrf.mxu1  ;;  %v13368_v31 = vpop.f32.mrf.mxu0 }
 0x508   : > { %v8770_v45 = vadd.f32 %v13366_v53, %v8699_v30 }
 0x509   : > { %v13370_v48 = vpop.f32.mrf.mxu1  ;;  %v8702_v56 = vpop.f32.mrf.mxu0 }
 0x50a   : > { %v8756_v56 = vadd.f32 %v13350_v39, %v8685_v38  ;;  %v8762_v39 = vadd.f32 %v13354_v12, %v8691_v6 }
 0x50b   : > { %v8773_v4 = vpop.f32.mrf.mxu1  ;;  %v8703_v13 = vpop.f32.mrf.mxu0 }
 0x50d   : > { %v8774_v59 = vpop.f32.mrf.mxu1 }
 0x52d   : > { %v8810_v50 = vpop.f32.mrf.mxu0 }
 0x52e   : > { %v8811_v41 = vadd.f32 %v8810_v50, %v8740_v40 }
 0x52f   : > { %v8881_v33 = vpop.f32.mrf.mxu1  ;;  %v8812_v37 = vpop.f32.mrf.mxu0 }
 0x530   : > { %v8882_v58 = vadd.f32 %v8881_v33, %v8811_v41  ;;  %v8813_v51 = vadd.f32 %v8812_v37, %v8742_v27  ;;  %v8764_v27 = vadd.f32 %v13358_v26, %v8693_v5  ;;  %v8701_v37 = vadd.f32 %v13368_v31, %v13380_v55 }
 0x531   : > { %v8883_v1 = vpop.f32.mrf.mxu1  ;;  %v8814_v42 = vpop.f32.mrf.mxu0 }
 0x532   : > { %8932 = vst [vmem:[%s11282_s17 + $0x70] sm:$0xff] %v8882_v58  ;;  %v8884_v52 = vadd.f32 %v8883_v1, %v8813_v51  ;;  %v8815_v61 = vadd.f32 %v8814_v42, %v8744_v17  ;;  %v8772_v28 = vadd.f32 %v13370_v48, %v8701_v37 }
 0x533   : > { %v8885_v16 = vpop.f32.mrf.mxu1  ;;  %v8816_v35 = vpop.f32.mrf.mxu0 }
 0x534   : > { %8933 = vst [vmem:[%s11282_s17 + $0x78] sm:$0xff] %v8884_v52  ;;  %v8886_v57 = vadd.f32 %v8885_v16, %v8815_v61  ;;  %v8817_v47 = vadd.f32 %v8816_v35, %v8746_v54 }
 0x535   : > { %v8887_v2 = vpop.f32.mrf.mxu1  ;;  %v8820_v19 = vpop.f32.mrf.mxu0 }
 0x536   : > { %8948 = vst [vmem:[%s11282_s17 + $0xf0] sm:$0xff] %v8886_v57  ;;  %v8888_v60 = vadd.f32 %v8887_v2, %v8817_v47  ;;  %v8821_v24 = vadd.f32 %v8820_v19, %v8750_v15 }
 0x537   : > { %v8891_v34 = vpop.f32.mrf.mxu1  ;;  %v8822_v10 = vpop.f32.mrf.mxu0 }
 0x538   : > { %8949 = vst [vmem:[%s11282_s17 + $0xf8] sm:$0xff] %v8888_v60  ;;  %v8892_v3 = vadd.f32 %v8891_v34, %v8821_v24  ;;  %v8823_v8 = vadd.f32 %v8822_v10, %v8752_v29 }
 0x539   : > { %v8893_v11 = vpop.f32.mrf.mxu1  ;;  %v8824_v46 = vpop.f32.mrf.mxu0 }
 0x53a   : > { %8964 = vst [vmem:[%s11282_s17 + $0x170] sm:$0xff] %v8892_v3  ;;  %v8894_v49 = vadd.f32 %v8893_v11, %v8823_v8  ;;  %v8825_v4 = vadd.f32 %v8824_v46, %v8754_v14 }
 0x53b   : > { %v8895_v13 = vpop.f32.mrf.mxu1  ;;  %v8826_v59 = vpop.f32.mrf.mxu0 }
 0x53c   : > { %8965 = vst [vmem:[%s11282_s17 + $0x178] sm:$0xff] %v8894_v49  ;;  %v8896_v62 = vadd.f32 %v8895_v13, %v8825_v4  ;;  %v8827_v7 = vadd.f32 %v8826_v59, %v8756_v56 }
 0x53d   : > { %v8897_v23 = vpop.f32.mrf.mxu1  ;;  %v8830_v21 = vpop.f32.mrf.mxu0 }
 0x53e   : > { %8980 = vst [vmem:[%s11282_s17 + $0x1f0] sm:$0xff] %v8896_v62  ;;  %v8898_v40 = vadd.f32 %v8897_v23, %v8827_v7  ;;  %v8831_v22 = vadd.f32 %v8830_v21, %v8760_v9 }
 0x53f   : > { %v8901_v50 = vpop.f32.mrf.mxu1  ;;  %v8832_v25 = vpop.f32.mrf.mxu0 }
 0x540   : > { %8981 = vst [vmem:[%s11282_s17 + $0x1f8] sm:$0xff] %v8898_v40  ;;  %v8902_v32 = vadd.f32 %v8901_v50, %v8831_v22  ;;  %v8833_v41 = vadd.f32 %v8832_v25, %v8762_v39 }
 0x541   : > { %v8903_v12 = vpop.f32.mrf.mxu1  ;;  %v8834_v33 = vpop.f32.mrf.mxu0 }
 0x542   : > { %8996 = vst [vmem:[%s11282_s17 + $0x270] sm:$0xff] %v8902_v32  ;;  %v8904_v17 = vadd.f32 %v8903_v12, %v8833_v41  ;;  %v8835_v36 = vadd.f32 %v8834_v33, %v8764_v27 }
 0x543   : > { %v8905_v26 = vpop.f32.mrf.mxu1  ;;  %v8836_v58 = vpop.f32.mrf.mxu0 }
 0x544   : > { %8997 = vst [vmem:[%s11282_s17 + $0x278] sm:$0xff] %v8904_v17  ;;  %v8906_v18 = vadd.f32 %v8905_v26, %v8835_v36  ;;  %v8837_v51 = vadd.f32 %v8836_v58, %v8766_v63 }
 0x545   : > { %v8907_v1 = vpop.f32.mrf.mxu1  ;;  %v8840_v42 = vpop.f32.mrf.mxu0 }
 0x546   : > { %9012 = vst [vmem:[%s11282_s17 + $0x2f0] sm:$0xff] %v8906_v18  ;;  %v8908_v31 = vadd.f32 %v8907_v1, %v8837_v51  ;;  %v8841_v55 = vadd.f32 %v8840_v42, %v8770_v45 }
 0x547   : > { %v8911_v54 = vpop.f32.mrf.mxu1  ;;  %v8842_v44 = vpop.f32.mrf.mxu0 }
 0x548   : > { %9013 = vst [vmem:[%s11282_s17 + $0x2f8] sm:$0xff] %v8908_v31  ;;  %v8912_v53 = vadd.f32 %v8911_v54, %v8841_v55  ;;  %v8843_v52 = vadd.f32 %v8842_v44, %v8772_v28 }
 0x549   : > { %v8913_v61 = vpop.f32.mrf.mxu1  ;;  %v8844_v16 = vpop.f32.mrf.mxu0 }
 0x54a   : > { %9028 = vst [vmem:[%s11282_s17 + $0x370] sm:$0x1] %v8912_v53  ;;  %v8914_v48 = vadd.f32 %v8913_v61, %v8843_v52 }
 0x54b   : > { %v8915_v35 = vpop.f32.mrf.mxu1  ;;  %v8845_v15 = vpop.f32.mrf.mxu0 }
 0x54c   : > { %9029 = vst [vmem:[%s11282_s17 + $0x378] sm:$0x1] %v8914_v48 }
 0x54d   : > { %v8916_v0 = vpop.f32.mrf.mxu1 }
 0x54e   : > { %10404 = shalt.err (!%p10401_p3)
}
 0x54f   : > { %s10405_s25 = scalar_lea.hbm %s13424_s22, 14336  ;;  %s10409_s8 = scalar_lea.hbm %s13474_s3, 28672 }
 0x550   : > { %p10406_p12 = scmp.ne.s32.totalorder %s13424_s22, %s10405_s25  ;;  %p10410_p7 = scmp.lt.s32.totalorder %s13424_s22, %s13474_s3 }
 0x551   : > { %p10411_p10 = scmp.lt.s32.totalorder %s10409_s8, %s10405_s25 }
 0x552   : > { %p10407_p13 = pnand %p10406_p12, %p13700_p4 }
 0x553   : > { %p10412_p6 = por %p10411_p10, %p10410_p7 }
 0x554   : > { %p10408_p8 = pneg %p10407_p13 }
 0x556   : > { %p10413_p2 = pnand %p10412_p6, %p10408_p8 }
 0x558   : > { %10416 = shalt.err (!%p10413_p2)
}
 0x559   : > { %s10470_s4 = smov 2048   ;;  %s10471_s17 = smov 4096  }
 0x55a   : > { %s10472_s20 = smov 128  }
 0x55b   : > { %10235 = dma.vmem_to_hbm [thread:$0]  (%p13700_p4), %s13426_s10, 14336, %s13424_s22, %s9031_s24, %s10470_s4, %s10471_s17, %s10472_s20  }
 0x55c PF: > { %s9059_s11 = sand.u32 1, %s10447_s12   ;;  %p13701_p5 = scmp.ne.s32.totalorder %s13531_s28, 0 }
 0x55d   : > { %p13702_p9 = scmp.ge.s32.totalorder %s10459_s15, 2  ;;  %s9060_s18 = scalar_lea.sflag [#allocation4], %s9059_s11 }
 0x55f   : > { %p10249_p1 = pnand %p13702_p9, %p13701_p5 }
 0x561   : > { %p10250_p11 = pneg %p10249_p1 }
 0x563   : > { %10442 = dma.done.wait (%p10250_p11), %s9060_s18, 14336  }
 0x564   : > { %10444 = vsyncadd (%p10250_p11), %s9060_s18, 4294952960  ;;  %p17_p0 = scmp.ge.s32.totalorder %s10514_s16, 4   ;;  %s13703_s12 = smov %s10451_s13 }
 0x565   : > { %s13704_s13 = smov %s10455_s14  ;;  %s13705_s14 = smov %s10525_s19 }
 0x566   : > { %s13706_s15 = smov %s10514_s16  ;;  %19 = sbr.rel (!%p17_p0) target bundleno = 6 (0x6), region = 93 }
 0x56b   :  { %9065 = vsyncpa [#allocation3], 1 }
 0x56c   :  { %9067 = vsyncpa [#allocation3 + $0x1], 1 }
 0x56d   :  { %9068 = vsyncpa [#allocation6], 1 }
 0x56e   :  { %9070 = vsyncpa [#allocation6 + $0x1], 1 }
 0x56f   :  { %9071 = vsyncpa [#allocation4], 1 }
 0x570   :  { %9073 = vsyncpa [#allocation4 + $0x1], 1 }

</bundles_post_ra>
